<compile_context>
chip_gen: v5e
topology: v5e:2x2
jax: 0.10.0
libtpu: 0.0.40
codegen_flags: <defaults>
</compile_context>

<pallas_src>
import functools
import math

import jax
import jax.numpy as jnp
import numpy as np
from jax.experimental import pallas as pl
from jax.experimental.pallas import tpu as pltpu


# ----------------------------------------------------------------------------- kernel


def _decoder_kernel(x_ref,
                    w1, p1, w2, p2, avg,
                    wr1, pr1, wr2, pr2, w_traj, b_traj,
                    wc1, pc1, wc2, pc2, wc3, bc3,
                    o_cls, o_traj):
    """Mode batching is folded into block-diagonal weights offline, so the kernel
    is a straight chain of (TN, 128)-wide matmuls with zero relayouts."""

    def lin_ln_relu(h, w_ref, p_ref):
        # Full-width LayerNorm (projection MLP).  p rows: 0=bias, 1=gamma, 2=beta.
        p = p_ref[...]
        y = jnp.dot(h, w_ref[...], preferred_element_type=jnp.float32) + p[0:1, :]
        mu = jnp.mean(y, axis=-1, keepdims=True)
        d = y - mu
        var = jnp.mean(d * d, axis=-1, keepdims=True)
        return jnp.maximum(d * jax.lax.rsqrt(var + 1e-5) * p[1:2, :] + p[2:3, :], 0.0)

    A = avg[...]  # (M*H, M*H) block-diag averaging matrix (each HxH block = 1/H)

    def lin_gln_relu(h, w_ref, p_ref):
        # Per-mode (grouped) LayerNorm: group mean / var computed on the MXU via A,
        # keeping modes on the lane axis (no cross-lane shuffles, no XLU reduce).
        p = p_ref[...]
        y = jnp.dot(h, w_ref[...], preferred_element_type=jnp.float32) + p[0:1, :]
        mu = jnp.dot(y, A, preferred_element_type=jnp.float32)
        d = y - mu
        var = jnp.dot(d * d, A, preferred_element_type=jnp.float32)
        return jnp.maximum(d * jax.lax.rsqrt(var + 1e-5) * p[1:2, :] + p[2:3, :], 0.0)

    x = x_ref[...]                                        # (TN, H)

    # multihead projection: (TN,H) -> (TN,dim_inter) -> (TN,M*H)
    # mode m occupies lanes [m*H:(m+1)*H] (== torch .view(-1, M, H) column order)
    h = lin_ln_relu(x, w1, p1)
    h = lin_ln_relu(h, w2, p2)

    # regression head (block-diag over modes) + folded [rx|ry|vx|vy] basis matmul
    r = lin_gln_relu(h, wr1, pr1)
    r = lin_gln_relu(r, wr2, pr2)
    o_traj[...] = jnp.dot(r, w_traj[...], preferred_element_type=jnp.float32) + b_traj[...]

    # classification head + softmax over modes
    c = lin_gln_relu(h, wc1, pc1)
    c = lin_gln_relu(c, wc2, pc2)
    logits = jnp.dot(c, wc3[...], preferred_element_type=jnp.float32) + bc3[...]  # (TN, M)
    lmax = jnp.max(logits, axis=-1, keepdims=True)
    e = jnp.exp(logits - lmax)
    o_cls[...] = e * pl.reciprocal(jnp.sum(e, axis=-1, keepdims=True), approx=True)


# ----------------------------------------------------------------------------- params


class Config:
    def __init__(self):
        self.d_embed = 32
        self.g_pred_len = 8
        self.g_num_modes = 4
        self.param_out = "monomial"
        self.param_order = 5


def init_params(key, cfg):
    H, M, F = cfg.d_embed, cfg.g_num_modes, cfg.g_pred_len
    K1 = cfg.param_order + 1
    dim_mm = H * M
    dim_inter = dim_mm // 2

    def linear(k, fin, fout):
        kw, kb = jax.random.split(k)
        bound = 1.0 / math.sqrt(fin)
        W = jax.random.uniform(kw, (fin, fout), jnp.float32, -bound, bound)
        b = jax.random.uniform(kb, (1, fout), jnp.float32, -bound, bound)
        return W, b

    def ln(d):
        return jnp.ones((1, d), jnp.float32), jnp.zeros((1, d), jnp.float32)

    keys = jax.random.split(key, 8)
    W1, b1 = linear(keys[0], H, dim_inter); g1, be1 = ln(dim_inter)
    W2, b2 = linear(keys[1], dim_inter, dim_mm); g2, be2 = ln(dim_mm)
    Wr1, br1 = linear(keys[2], H, H); gr1, ber1 = ln(H)
    Wr2, br2 = linear(keys[3], H, H); gr2, ber2 = ln(H)
    Wr3, br3 = linear(keys[4], H, K1 * 2)
    Wc1, bc1 = linear(keys[5], H, H); gc1, bec1 = ln(H)
    Wc2, bc2 = linear(keys[6], H, H); gc2, bec2 = ln(H)
    Wc3, bc3 = linear(keys[7], H, 1)

    # monomial basis, identical to _get_T_matrix_monomial / _get_Tp_matrix_monomial
    ts = np.linspace(0.0, 1.0, F, endpoint=True)
    mat_T = jnp.asarray(np.stack([ts ** i for i in range(K1)], axis=1).astype(np.float32))              # (F, K+1)
    mat_Tp = jnp.asarray(np.stack([(i + 1) * ts ** i for i in range(K1 - 1)], axis=1).astype(np.float32))  # (F, K)

    # ---- kernel-friendly repacking (pure JAX, done once offline) ----
    # 1) de-interleave the final reg linear into x / y columns and fold the basis
    #    matmuls + velocity scaling directly into one per-mode (H, 4F) projection.
    inv_dt = 1.0 / (F * 0.1)
    mTt, mTpt = mat_T.T, mat_Tp.T                      # (K+1, F), (K, F)
    Wr3x, Wr3y = Wr3[:, 0::2], Wr3[:, 1::2]
    br3x, br3y = br3[:, 0::2], br3[:, 1::2]
    W_traj = jnp.concatenate(
        [Wr3x @ mTt, Wr3y @ mTt, (Wr3x[:, 1:] @ mTpt) * inv_dt, (Wr3y[:, 1:] @ mTpt) * inv_dt],
        axis=1)                                        # (H, 4F)
    b_traj = jnp.concatenate(
        [br3x @ mTt, br3y @ mTt, (br3x[:, 1:] @ mTpt) * inv_dt, (br3y[:, 1:] @ mTpt) * inv_dt],
        axis=1)                                        # (1, 4F)

    # 2) block-diagonalize the mode-shared head weights so modes ride the lane axis
    eyeM = jnp.eye(M, dtype=jnp.float32)

    def bd(W):                                         # block_diag of M copies
        return jnp.kron(eyeM, W)

    def tile_lane(v):                                  # tile a (1, d) row M times on lanes
        return jnp.tile(v, (1, M))

    def pack(b, g, be):                                # (3, d): bias / gamma / beta
        return jnp.concatenate([b, g, be], axis=0)

    A = jnp.kron(eyeM, jnp.full((H, H), 1.0 / H, jnp.float32))   # grouped-LN averaging

    flat = [
        W1, pack(b1, g1, be1),
        W2, pack(b2, g2, be2),
        A,
        bd(Wr1), pack(tile_lane(br1), tile_lane(gr1), tile_lane(ber1)),
        bd(Wr2), pack(tile_lane(br2), tile_lane(gr2), tile_lane(ber2)),
        bd(W_traj), tile_lane(b_traj),
        bd(Wc1), pack(tile_lane(bc1), tile_lane(gc1), tile_lane(bec1)),
        bd(Wc2), pack(tile_lane(bc2), tile_lane(gc2), tile_lane(bec2)),
        bd(Wc3), tile_lane(bc3),
    ]

    full = dict(W1=W1, b1=b1, g1=g1, be1=be1, W2=W2, b2=b2, g2=g2, be2=be2,
                Wr1=Wr1, br1=br1, gr1=gr1, ber1=ber1, Wr2=Wr2, br2=br2, gr2=gr2, ber2=ber2,
                Wr3=Wr3, br3=br3,
                Wc1=Wc1, bc1=bc1, gc1=gc1, bec1=bec1, Wc2=Wc2, bc2=bc2, gc2=gc2, bec2=bec2,
                Wc3=Wc3, bc3=bc3, mat_T=mat_T, mat_Tp=mat_Tp)
    return {"flat": flat, "full": full}


# ----------------------------------------------------------------------------- wrapper


def run_decoder_kernel(embed, params, cfg, tile_n=256):
    N, H = embed.shape
    M, F = cfg.g_num_modes, cfg.g_pred_len
    flat = params["flat"]

    # pad actor count to a multiple of the tile (padded rows are harmless & sliced off)
    n_pad = ((N + tile_n - 1) // tile_n) * tile_n
    if n_pad != N:
        embed = jnp.pad(embed, ((0, n_pad - N), (0, 0)))

    x_spec = pl.BlockSpec((tile_n, H), lambda i: (i, 0))
    # constant index_map -> weights stay resident in VMEM across the actor grid
    w_specs = [pl.BlockSpec(p.shape, lambda i, nd=p.ndim: (0,) * nd) for p in flat]
    out_specs = [
        pl.BlockSpec((tile_n, M), lambda i: (i, 0)),
        pl.BlockSpec((tile_n, M * 4 * F), lambda i: (i, 0)),
    ]
    out_shape = [
        jax.ShapeDtypeStruct((n_pad, M), jnp.float32),
        jax.ShapeDtypeStruct((n_pad, M * 4 * F), jnp.float32),
    ]
    cls, traj = pl.pallas_call(
        _decoder_kernel,
        out_shape=out_shape,
        grid_spec=pltpu.PrefetchScalarGridSpec(
            num_scalar_prefetch=0,
            grid=(n_pad // tile_n,),
            in_specs=[x_spec] + w_specs,
            out_specs=out_specs,
        ),
        compiler_params=pltpu.CompilerParams(dimension_semantics=("parallel",)),
    )(embed, *flat)

    # unpack the lane-dense (N, M*4F) slab -> reg / vel, matching the torch layout
    traj = traj[:N].reshape(N, M, 4, F)
    cls = cls[:N]
    reg = jnp.stack([traj[:, :, 0, :], traj[:, :, 1, :]], axis=-1)   # (N, M, F, 2)
    vel = jnp.stack([traj[:, :, 2, :], traj[:, :, 3, :]], axis=-1)   # (N, M, F, 2)
    return cls, reg, vel


def mlp_decoder_forward(embed, actor_idcs, params, cfg):
    cls, reg, _vel = run_decoder_kernel(embed, params, cfg)
    # TODO(synk): `vel` is computed in the torch forward but never returned (res_aux == []).
    res_cls, res_reg, res_aux = [], [], []
    for idcs in actor_idcs:
        res_cls.append(cls[idcs])
        res_reg.append(reg[idcs])
    return res_cls, res_reg, res_aux


# ----------------------------------------------------------------------------- reference


def _layernorm(x, gamma, beta, eps=1e-5):
    mu = jnp.mean(x, axis=-1, keepdims=True)
    var = jnp.mean((x - mu) ** 2, axis=-1, keepdims=True)
    return (x - mu) * jax.lax.rsqrt(var + eps) * gamma + beta


def reference_forward(embed, params, cfg):
    # pure-JAX mirror of the torch forward (correctness check only)
    p = params["full"]
    H, M, F = cfg.d_embed, cfg.g_num_modes, cfg.g_pred_len
    K1 = cfg.param_order + 1
    N = embed.shape[0]

    def lin_ln_relu(x, W, b, g, be):
        return jax.nn.relu(_layernorm(x @ W + b, g, be))

    h = lin_ln_relu(embed, p["W1"], p["b1"], p["g1"], p["be1"])
    h = lin_ln_relu(h, p["W2"], p["b2"], p["g2"], p["be2"])
    e = h.reshape(N, M, H).transpose(1, 0, 2)                 # (M, N, H)

    c = lin_ln_relu(e, p["Wc1"], p["bc1"], p["gc1"], p["bec1"])
    c = lin_ln_relu(c, p["Wc2"], p["bc2"], p["gc2"], p["bec2"])
    cls = (c @ p["Wc3"] + p["bc3"]).reshape(M, N).T
    cls = jax.nn.softmax(cls, axis=1)

    r = lin_ln_relu(e, p["Wr1"], p["br1"], p["gr1"], p["ber1"])
    r = lin_ln_relu(r, p["Wr2"], p["br2"], p["gr2"], p["ber2"])
    param = (r @ p["Wr3"] + p["br3"]).reshape(M, N, K1, 2).transpose(1, 0, 2, 3)
    reg = jnp.einsum("fk,nmkc->nmfc", p["mat_T"], param)
    vel = jnp.einsum("fk,nmkc->nmfc", p["mat_Tp"], param[:, :, 1:, :]) / (F * 0.1)
    return cls, reg, vel


# ----------------------------------------------------------------------------- main


if __name__ == "__main__":
    cfg = Config()
    key = jax.random.PRNGKey(0)
    kp, kx = jax.random.split(key)
    params = init_params(kp, cfg)

    N = 512                                 # 2 grid steps at tile_n=256 (keeps both v7x TCs busy)
    embed = jax.random.normal(kx, (N, cfg.d_embed), jnp.float32)
    actor_idcs = [jnp.arange(0, 300), jnp.arange(300, N)]

    cls, reg, vel = run_decoder_kernel(embed, params, cfg)
    jax.block_until_ready((cls, reg, vel))

    res_cls, res_reg, res_aux = mlp_decoder_forward(embed, actor_idcs, params, cfg)
    jax.block_until_ready(res_cls)
    jax.block_until_ready(res_reg)

    ref_cls, ref_reg, ref_vel = reference_forward(embed, params, cfg)
    assert cls.shape == (N, cfg.g_num_modes)
    assert reg.shape == (N, cfg.g_num_modes, cfg.g_pred_len, 2)
    assert res_cls[0].shape == (300, cfg.g_num_modes)
    assert res_reg[1].shape == (N - 300, cfg.g_num_modes, cfg.g_pred_len, 2)
    assert res_aux == []
    assert jnp.allclose(cls, ref_cls, rtol=1e-2, atol=1e-2), "cls mismatch"
    assert jnp.allclose(reg, ref_reg, rtol=1e-2, atol=1e-2), "reg mismatch"
    assert jnp.allclose(vel, ref_vel, rtol=1e-2, atol=1e-2), "vel mismatch"

    print("KERNEL_OK")
</pallas_src>

<mosaic_0001>
module attributes {stable_mosaic.version = 11 : i64} {
  func.func @_decoder_kernel(%arg0: i32, %arg1: memref<256x32xf32, #tpu.memory_space<vmem>>, %arg2: memref<32x64xf32, #tpu.memory_space<vmem>>, %arg3: memref<3x64xf32, #tpu.memory_space<vmem>>, %arg4: memref<64x128xf32, #tpu.memory_space<vmem>>, %arg5: memref<3x128xf32, #tpu.memory_space<vmem>>, %arg6: memref<128x128xf32, #tpu.memory_space<vmem>>, %arg7: memref<128x128xf32, #tpu.memory_space<vmem>>, %arg8: memref<3x128xf32, #tpu.memory_space<vmem>>, %arg9: memref<128x128xf32, #tpu.memory_space<vmem>>, %arg10: memref<3x128xf32, #tpu.memory_space<vmem>>, %arg11: memref<128x128xf32, #tpu.memory_space<vmem>>, %arg12: memref<1x128xf32, #tpu.memory_space<vmem>>, %arg13: memref<128x128xf32, #tpu.memory_space<vmem>>, %arg14: memref<3x128xf32, #tpu.memory_space<vmem>>, %arg15: memref<128x128xf32, #tpu.memory_space<vmem>>, %arg16: memref<3x128xf32, #tpu.memory_space<vmem>>, %arg17: memref<128x4xf32, #tpu.memory_space<vmem>>, %arg18: memref<1x4xf32, #tpu.memory_space<vmem>>, %arg19: memref<256x4xf32, #tpu.memory_space<vmem>>, %arg20: memref<256x128xf32, #tpu.memory_space<vmem>>) attributes {dimension_semantics = [#tpu.dimension_semantics<parallel>], iteration_bounds = array<i64: 2>, scalar_prefetch = 0 : i64, scratch_operands = 0 : i64, tpu.core_type = #tpu.core_type<tc>, window_params = [{transform_indices = @transform_0, window_bounds = array<i64: 256, 32>}, {pipeline_mode = #tpu.pipeline_mode<synchronous>, transform_indices = @transform_1, window_bounds = array<i64: 32, 64>}, {pipeline_mode = #tpu.pipeline_mode<synchronous>, transform_indices = @transform_2, window_bounds = array<i64: 3, 64>}, {pipeline_mode = #tpu.pipeline_mode<synchronous>, transform_indices = @transform_3, window_bounds = array<i64: 64, 128>}, {pipeline_mode = #tpu.pipeline_mode<synchronous>, transform_indices = @transform_4, window_bounds = array<i64: 3, 128>}, {pipeline_mode = #tpu.pipeline_mode<synchronous>, transform_indices = @transform_5, window_bounds = array<i64: 128, 128>}, {pipeline_mode = #tpu.pipeline_mode<synchronous>, transform_indices = @transform_6, window_bounds = array<i64: 128, 128>}, {pipeline_mode = #tpu.pipeline_mode<synchronous>, transform_indices = @transform_7, window_bounds = array<i64: 3, 128>}, {pipeline_mode = #tpu.pipeline_mode<synchronous>, transform_indices = @transform_8, window_bounds = array<i64: 128, 128>}, {pipeline_mode = #tpu.pipeline_mode<synchronous>, transform_indices = @transform_9, window_bounds = array<i64: 3, 128>}, {pipeline_mode = #tpu.pipeline_mode<synchronous>, transform_indices = @transform_10, window_bounds = array<i64: 128, 128>}, {pipeline_mode = #tpu.pipeline_mode<synchronous>, transform_indices = @transform_11, window_bounds = array<i64: 1, 128>}, {pipeline_mode = #tpu.pipeline_mode<synchronous>, transform_indices = @transform_12, window_bounds = array<i64: 128, 128>}, {pipeline_mode = #tpu.pipeline_mode<synchronous>, transform_indices = @transform_13, window_bounds = array<i64: 3, 128>}, {pipeline_mode = #tpu.pipeline_mode<synchronous>, transform_indices = @transform_14, window_bounds = array<i64: 128, 128>}, {pipeline_mode = #tpu.pipeline_mode<synchronous>, transform_indices = @transform_15, window_bounds = array<i64: 3, 128>}, {pipeline_mode = #tpu.pipeline_mode<synchronous>, transform_indices = @transform_16, window_bounds = array<i64: 128, 4>}, {pipeline_mode = #tpu.pipeline_mode<synchronous>, transform_indices = @transform_17, window_bounds = array<i64: 1, 4>}, {transform_indices = @transform_18, window_bounds = array<i64: 256, 4>}, {transform_indices = @transform_19, window_bounds = array<i64: 256, 128>}]} {
    %c0 = arith.constant 0 : index
    %c0_0 = arith.constant 0 : index
    %0 = vector.load %arg6[%c0, %c0_0] : memref<128x128xf32, #tpu.memory_space<vmem>>, vector<128x128xf32>
    %c0_1 = arith.constant 0 : index
    %c0_2 = arith.constant 0 : index
    %1 = vector.load %arg1[%c0_1, %c0_2] : memref<256x32xf32, #tpu.memory_space<vmem>>, vector<256x32xf32>
    %c0_3 = arith.constant 0 : index
    %c0_4 = arith.constant 0 : index
    %2 = vector.load %arg3[%c0_3, %c0_4] : memref<3x64xf32, #tpu.memory_space<vmem>>, vector<3x64xf32>
    %c0_5 = arith.constant 0 : index
    %c0_6 = arith.constant 0 : index
    %3 = vector.load %arg2[%c0_5, %c0_6] : memref<32x64xf32, #tpu.memory_space<vmem>>, vector<32x64xf32>
    %cst = arith.constant dense<0.000000e+00> : vector<256x64xf32>
    %4 = tpu.matmul %1, %3, %cst {dimension_numbers = #tpu.dot_dimension_numbers<[1], [0], [0], [1], [0, 0, 1, 1], [], []>} : vector<256x32xf32>, vector<32x64xf32>, vector<256x64xf32> -> vector<256x64xf32>
    %5 = vector.extract_strided_slice %2 {offsets = [0, 0], sizes = [1, 64], strides = [1, 1]} : vector<3x64xf32> to vector<1x64xf32>
    %6 = vector.broadcast %5 : vector<1x64xf32> to vector<256x64xf32>
    %7 = arith.addf %4, %6 : vector<256x64xf32>
    %cst_7 = arith.constant dense<0.000000e+00> : vector<256xf32>
    %8 = vector.multi_reduction <add>, %7, %cst_7 [1] : vector<256x64xf32> to vector<256xf32>
    %9 = vector.shape_cast %8 : vector<256xf32> to vector<256x1xf32>
    %cst_8 = arith.constant 6.400000e+01 : f32
    %10 = vector.broadcast %cst_8 : f32 to vector<256x1xf32>
    %11 = arith.divf %9, %10 : vector<256x1xf32>
    %12 = vector.broadcast %11 : vector<256x1xf32> to vector<256x64xf32>
    %13 = arith.subf %7, %12 : vector<256x64xf32>
    %14 = arith.mulf %13, %13 : vector<256x64xf32>
    %cst_9 = arith.constant dense<0.000000e+00> : vector<256xf32>
    %15 = vector.multi_reduction <add>, %14, %cst_9 [1] : vector<256x64xf32> to vector<256xf32>
    %16 = vector.shape_cast %15 : vector<256xf32> to vector<256x1xf32>
    %cst_10 = arith.constant 6.400000e+01 : f32
    %17 = vector.broadcast %cst_10 : f32 to vector<256x1xf32>
    %18 = arith.divf %16, %17 : vector<256x1xf32>
    %cst_11 = arith.constant 9.99999974E-6 : f32
    %19 = vector.broadcast %cst_11 : f32 to vector<256x1xf32>
    %20 = arith.addf %18, %19 : vector<256x1xf32>
    %21 = math.rsqrt %20 : vector<256x1xf32>
    %22 = vector.broadcast %21 : vector<256x1xf32> to vector<256x64xf32>
    %23 = arith.mulf %13, %22 : vector<256x64xf32>
    %24 = vector.extract_strided_slice %2 {offsets = [1, 0], sizes = [1, 64], strides = [1, 1]} : vector<3x64xf32> to vector<1x64xf32>
    %25 = vector.broadcast %24 : vector<1x64xf32> to vector<256x64xf32>
    %26 = arith.mulf %23, %25 : vector<256x64xf32>
    %27 = vector.extract_strided_slice %2 {offsets = [2, 0], sizes = [1, 64], strides = [1, 1]} : vector<3x64xf32> to vector<1x64xf32>
    %28 = vector.broadcast %27 : vector<1x64xf32> to vector<256x64xf32>
    %29 = arith.addf %26, %28 : vector<256x64xf32>
    %cst_12 = arith.constant 0.000000e+00 : f32
    %30 = vector.broadcast %cst_12 : f32 to vector<256x64xf32>
    %31 = arith.maximumf %29, %30 : vector<256x64xf32>
    %c0_13 = arith.constant 0 : index
    %c0_14 = arith.constant 0 : index
    %32 = vector.load %arg5[%c0_13, %c0_14] : memref<3x128xf32, #tpu.memory_space<vmem>>, vector<3x128xf32>
    %c0_15 = arith.constant 0 : index
    %c0_16 = arith.constant 0 : index
    %33 = vector.load %arg4[%c0_15, %c0_16] : memref<64x128xf32, #tpu.memory_space<vmem>>, vector<64x128xf32>
    %cst_17 = arith.constant dense<0.000000e+00> : vector<256x128xf32>
    %34 = tpu.matmul %31, %33, %cst_17 {dimension_numbers = #tpu.dot_dimension_numbers<[1], [0], [0], [1], [0, 0, 1, 1], [], []>} : vector<256x64xf32>, vector<64x128xf32>, vector<256x128xf32> -> vector<256x128xf32>
    %35 = vector.extract_strided_slice %32 {offsets = [0, 0], sizes = [1, 128], strides = [1, 1]} : vector<3x128xf32> to vector<1x128xf32>
    %36 = vector.broadcast %35 : vector<1x128xf32> to vector<256x128xf32>
    %37 = arith.addf %34, %36 : vector<256x128xf32>
    %cst_18 = arith.constant dense<0.000000e+00> : vector<256xf32>
    %38 = vector.multi_reduction <add>, %37, %cst_18 [1] : vector<256x128xf32> to vector<256xf32>
    %39 = vector.shape_cast %38 : vector<256xf32> to vector<256x1xf32>
    %cst_19 = arith.constant 1.280000e+02 : f32
    %40 = vector.broadcast %cst_19 : f32 to vector<256x1xf32>
    %41 = arith.divf %39, %40 : vector<256x1xf32>
    %42 = vector.broadcast %41 : vector<256x1xf32> to vector<256x128xf32>
    %43 = arith.subf %37, %42 : vector<256x128xf32>
    %44 = arith.mulf %43, %43 : vector<256x128xf32>
    %cst_20 = arith.constant dense<0.000000e+00> : vector<256xf32>
    %45 = vector.multi_reduction <add>, %44, %cst_20 [1] : vector<256x128xf32> to vector<256xf32>
    %46 = vector.shape_cast %45 : vector<256xf32> to vector<256x1xf32>
    %cst_21 = arith.constant 1.280000e+02 : f32
    %47 = vector.broadcast %cst_21 : f32 to vector<256x1xf32>
    %48 = arith.divf %46, %47 : vector<256x1xf32>
    %cst_22 = arith.constant 9.99999974E-6 : f32
    %49 = vector.broadcast %cst_22 : f32 to vector<256x1xf32>
    %50 = arith.addf %48, %49 : vector<256x1xf32>
    %51 = math.rsqrt %50 : vector<256x1xf32>
    %52 = vector.broadcast %51 : vector<256x1xf32> to vector<256x128xf32>
    %53 = arith.mulf %43, %52 : vector<256x128xf32>
    %54 = vector.extract_strided_slice %32 {offsets = [1, 0], sizes = [1, 128], strides = [1, 1]} : vector<3x128xf32> to vector<1x128xf32>
    %55 = vector.broadcast %54 : vector<1x128xf32> to vector<256x128xf32>
    %56 = arith.mulf %53, %55 : vector<256x128xf32>
    %57 = vector.extract_strided_slice %32 {offsets = [2, 0], sizes = [1, 128], strides = [1, 1]} : vector<3x128xf32> to vector<1x128xf32>
    %58 = vector.broadcast %57 : vector<1x128xf32> to vector<256x128xf32>
    %59 = arith.addf %56, %58 : vector<256x128xf32>
    %cst_23 = arith.constant 0.000000e+00 : f32
    %60 = vector.broadcast %cst_23 : f32 to vector<256x128xf32>
    %61 = arith.maximumf %59, %60 : vector<256x128xf32>
    %c0_24 = arith.constant 0 : index
    %c0_25 = arith.constant 0 : index
    %62 = vector.load %arg8[%c0_24, %c0_25] : memref<3x128xf32, #tpu.memory_space<vmem>>, vector<3x128xf32>
    %c0_26 = arith.constant 0 : index
    %c0_27 = arith.constant 0 : index
    %63 = vector.load %arg7[%c0_26, %c0_27] : memref<128x128xf32, #tpu.memory_space<vmem>>, vector<128x128xf32>
    %cst_28 = arith.constant dense<0.000000e+00> : vector<256x128xf32>
    %64 = tpu.matmul %61, %63, %cst_28 {dimension_numbers = #tpu.dot_dimension_numbers<[1], [0], [0], [1], [0, 0, 1, 1], [], []>} : vector<256x128xf32>, vector<128x128xf32>, vector<256x128xf32> -> vector<256x128xf32>
    %65 = vector.extract_strided_slice %62 {offsets = [0, 0], sizes = [1, 128], strides = [1, 1]} : vector<3x128xf32> to vector<1x128xf32>
    %66 = vector.broadcast %65 : vector<1x128xf32> to vector<256x128xf32>
    %67 = arith.addf %64, %66 : vector<256x128xf32>
    %cst_29 = arith.constant dense<0.000000e+00> : vector<256x128xf32>
    %68 = tpu.matmul %67, %0, %cst_29 {dimension_numbers = #tpu.dot_dimension_numbers<[1], [0], [0], [1], [0, 0, 1, 1], [], []>} : vector<256x128xf32>, vector<128x128xf32>, vector<256x128xf32> -> vector<256x128xf32>
    %69 = arith.subf %67, %68 : vector<256x128xf32>
    %70 = arith.mulf %69, %69 : vector<256x128xf32>
    %cst_30 = arith.constant dense<0.000000e+00> : vector<256x128xf32>
    %71 = tpu.matmul %70, %0, %cst_30 {dimension_numbers = #tpu.dot_dimension_numbers<[1], [0], [0], [1], [0, 0, 1, 1], [], []>} : vector<256x128xf32>, vector<128x128xf32>, vector<256x128xf32> -> vector<256x128xf32>
    %cst_31 = arith.constant 9.99999974E-6 : f32
    %72 = vector.broadcast %cst_31 : f32 to vector<256x128xf32>
    %73 = arith.addf %71, %72 : vector<256x128xf32>
    %74 = math.rsqrt %73 : vector<256x128xf32>
    %75 = arith.mulf %69, %74 : vector<256x128xf32>
    %76 = vector.extract_strided_slice %62 {offsets = [1, 0], sizes = [1, 128], strides = [1, 1]} : vector<3x128xf32> to vector<1x128xf32>
    %77 = vector.broadcast %76 : vector<1x128xf32> to vector<256x128xf32>
    %78 = arith.mulf %75, %77 : vector<256x128xf32>
    %79 = vector.extract_strided_slice %62 {offsets = [2, 0], sizes = [1, 128], strides = [1, 1]} : vector<3x128xf32> to vector<1x128xf32>
    %80 = vector.broadcast %79 : vector<1x128xf32> to vector<256x128xf32>
    %81 = arith.addf %78, %80 : vector<256x128xf32>
    %cst_32 = arith.constant 0.000000e+00 : f32
    %82 = vector.broadcast %cst_32 : f32 to vector<256x128xf32>
    %83 = arith.maximumf %81, %82 : vector<256x128xf32>
    %c0_33 = arith.constant 0 : index
    %c0_34 = arith.constant 0 : index
    %84 = vector.load %arg10[%c0_33, %c0_34] : memref<3x128xf32, #tpu.memory_space<vmem>>, vector<3x128xf32>
    %c0_35 = arith.constant 0 : index
    %c0_36 = arith.constant 0 : index
    %85 = vector.load %arg9[%c0_35, %c0_36] : memref<128x128xf32, #tpu.memory_space<vmem>>, vector<128x128xf32>
    %cst_37 = arith.constant dense<0.000000e+00> : vector<256x128xf32>
    %86 = tpu.matmul %83, %85, %cst_37 {dimension_numbers = #tpu.dot_dimension_numbers<[1], [0], [0], [1], [0, 0, 1, 1], [], []>} : vector<256x128xf32>, vector<128x128xf32>, vector<256x128xf32> -> vector<256x128xf32>
    %87 = vector.extract_strided_slice %84 {offsets = [0, 0], sizes = [1, 128], strides = [1, 1]} : vector<3x128xf32> to vector<1x128xf32>
    %88 = vector.broadcast %87 : vector<1x128xf32> to vector<256x128xf32>
    %89 = arith.addf %86, %88 : vector<256x128xf32>
    %cst_38 = arith.constant dense<0.000000e+00> : vector<256x128xf32>
    %90 = tpu.matmul %89, %0, %cst_38 {dimension_numbers = #tpu.dot_dimension_numbers<[1], [0], [0], [1], [0, 0, 1, 1], [], []>} : vector<256x128xf32>, vector<128x128xf32>, vector<256x128xf32> -> vector<256x128xf32>
    %91 = arith.subf %89, %90 : vector<256x128xf32>
    %92 = arith.mulf %91, %91 : vector<256x128xf32>
    %cst_39 = arith.constant dense<0.000000e+00> : vector<256x128xf32>
    %93 = tpu.matmul %92, %0, %cst_39 {dimension_numbers = #tpu.dot_dimension_numbers<[1], [0], [0], [1], [0, 0, 1, 1], [], []>} : vector<256x128xf32>, vector<128x128xf32>, vector<256x128xf32> -> vector<256x128xf32>
    %cst_40 = arith.constant 9.99999974E-6 : f32
    %94 = vector.broadcast %cst_40 : f32 to vector<256x128xf32>
    %95 = arith.addf %93, %94 : vector<256x128xf32>
    %96 = math.rsqrt %95 : vector<256x128xf32>
    %97 = arith.mulf %91, %96 : vector<256x128xf32>
    %98 = vector.extract_strided_slice %84 {offsets = [1, 0], sizes = [1, 128], strides = [1, 1]} : vector<3x128xf32> to vector<1x128xf32>
    %99 = vector.broadcast %98 : vector<1x128xf32> to vector<256x128xf32>
    %100 = arith.mulf %97, %99 : vector<256x128xf32>
    %101 = vector.extract_strided_slice %84 {offsets = [2, 0], sizes = [1, 128], strides = [1, 1]} : vector<3x128xf32> to vector<1x128xf32>
    %102 = vector.broadcast %101 : vector<1x128xf32> to vector<256x128xf32>
    %103 = arith.addf %100, %102 : vector<256x128xf32>
    %cst_41 = arith.constant 0.000000e+00 : f32
    %104 = vector.broadcast %cst_41 : f32 to vector<256x128xf32>
    %105 = arith.maximumf %103, %104 : vector<256x128xf32>
    %c0_42 = arith.constant 0 : index
    %c0_43 = arith.constant 0 : index
    %106 = vector.load %arg11[%c0_42, %c0_43] : memref<128x128xf32, #tpu.memory_space<vmem>>, vector<128x128xf32>
    %cst_44 = arith.constant dense<0.000000e+00> : vector<256x128xf32>
    %107 = tpu.matmul %105, %106, %cst_44 {dimension_numbers = #tpu.dot_dimension_numbers<[1], [0], [0], [1], [0, 0, 1, 1], [], []>} : vector<256x128xf32>, vector<128x128xf32>, vector<256x128xf32> -> vector<256x128xf32>
    %c0_45 = arith.constant 0 : index
    %c0_46 = arith.constant 0 : index
    %108 = vector.load %arg12[%c0_45, %c0_46] : memref<1x128xf32, #tpu.memory_space<vmem>>, vector<1x128xf32>
    %109 = vector.broadcast %108 : vector<1x128xf32> to vector<256x128xf32>
    %110 = arith.addf %107, %109 : vector<256x128xf32>
    %c0_47 = arith.constant 0 : index
    %c0_48 = arith.constant 0 : index
    %111 = vector.load %arg20[%c0_47, %c0_48] : memref<256x128xf32, #tpu.memory_space<vmem>>, vector<256x128xf32>
    tpu.vector_store %arg20[%c0_47, %c0_48], %110 {strides = array<i32>} : memref<256x128xf32, #tpu.memory_space<vmem>>, vector<256x128xf32>,
    %c0_49 = arith.constant 0 : index
    %c0_50 = arith.constant 0 : index
    %112 = vector.load %arg14[%c0_49, %c0_50] : memref<3x128xf32, #tpu.memory_space<vmem>>, vector<3x128xf32>
    %c0_51 = arith.constant 0 : index
    %c0_52 = arith.constant 0 : index
    %113 = vector.load %arg13[%c0_51, %c0_52] : memref<128x128xf32, #tpu.memory_space<vmem>>, vector<128x128xf32>
    %cst_53 = arith.constant dense<0.000000e+00> : vector<256x128xf32>
    %114 = tpu.matmul %61, %113, %cst_53 {dimension_numbers = #tpu.dot_dimension_numbers<[1], [0], [0], [1], [0, 0, 1, 1], [], []>} : vector<256x128xf32>, vector<128x128xf32>, vector<256x128xf32> -> vector<256x128xf32>
    %115 = vector.extract_strided_slice %112 {offsets = [0, 0], sizes = [1, 128], strides = [1, 1]} : vector<3x128xf32> to vector<1x128xf32>
    %116 = vector.broadcast %115 : vector<1x128xf32> to vector<256x128xf32>
    %117 = arith.addf %114, %116 : vector<256x128xf32>
    %cst_54 = arith.constant dense<0.000000e+00> : vector<256x128xf32>
    %118 = tpu.matmul %117, %0, %cst_54 {dimension_numbers = #tpu.dot_dimension_numbers<[1], [0], [0], [1], [0, 0, 1, 1], [], []>} : vector<256x128xf32>, vector<128x128xf32>, vector<256x128xf32> -> vector<256x128xf32>
    %119 = arith.subf %117, %118 : vector<256x128xf32>
    %120 = arith.mulf %119, %119 : vector<256x128xf32>
    %cst_55 = arith.constant dense<0.000000e+00> : vector<256x128xf32>
    %121 = tpu.matmul %120, %0, %cst_55 {dimension_numbers = #tpu.dot_dimension_numbers<[1], [0], [0], [1], [0, 0, 1, 1], [], []>} : vector<256x128xf32>, vector<128x128xf32>, vector<256x128xf32> -> vector<256x128xf32>
    %cst_56 = arith.constant 9.99999974E-6 : f32
    %122 = vector.broadcast %cst_56 : f32 to vector<256x128xf32>
    %123 = arith.addf %121, %122 : vector<256x128xf32>
    %124 = math.rsqrt %123 : vector<256x128xf32>
    %125 = arith.mulf %119, %124 : vector<256x128xf32>
    %126 = vector.extract_strided_slice %112 {offsets = [1, 0], sizes = [1, 128], strides = [1, 1]} : vector<3x128xf32> to vector<1x128xf32>
    %127 = vector.broadcast %126 : vector<1x128xf32> to vector<256x128xf32>
    %128 = arith.mulf %125, %127 : vector<256x128xf32>
    %129 = vector.extract_strided_slice %112 {offsets = [2, 0], sizes = [1, 128], strides = [1, 1]} : vector<3x128xf32> to vector<1x128xf32>
    %130 = vector.broadcast %129 : vector<1x128xf32> to vector<256x128xf32>
    %131 = arith.addf %128, %130 : vector<256x128xf32>
    %cst_57 = arith.constant 0.000000e+00 : f32
    %132 = vector.broadcast %cst_57 : f32 to vector<256x128xf32>
    %133 = arith.maximumf %131, %132 : vector<256x128xf32>
    %c0_58 = arith.constant 0 : index
    %c0_59 = arith.constant 0 : index
    %134 = vector.load %arg16[%c0_58, %c0_59] : memref<3x128xf32, #tpu.memory_space<vmem>>, vector<3x128xf32>
    %c0_60 = arith.constant 0 : index
    %c0_61 = arith.constant 0 : index
    %135 = vector.load %arg15[%c0_60, %c0_61] : memref<128x128xf32, #tpu.memory_space<vmem>>, vector<128x128xf32>
    %cst_62 = arith.constant dense<0.000000e+00> : vector<256x128xf32>
    %136 = tpu.matmul %133, %135, %cst_62 {dimension_numbers = #tpu.dot_dimension_numbers<[1], [0], [0], [1], [0, 0, 1, 1], [], []>} : vector<256x128xf32>, vector<128x128xf32>, vector<256x128xf32> -> vector<256x128xf32>
    %137 = vector.extract_strided_slice %134 {offsets = [0, 0], sizes = [1, 128], strides = [1, 1]} : vector<3x128xf32> to vector<1x128xf32>
    %138 = vector.broadcast %137 : vector<1x128xf32> to vector<256x128xf32>
    %139 = arith.addf %136, %138 : vector<256x128xf32>
    %cst_63 = arith.constant dense<0.000000e+00> : vector<256x128xf32>
    %140 = tpu.matmul %139, %0, %cst_63 {dimension_numbers = #tpu.dot_dimension_numbers<[1], [0], [0], [1], [0, 0, 1, 1], [], []>} : vector<256x128xf32>, vector<128x128xf32>, vector<256x128xf32> -> vector<256x128xf32>
    %141 = arith.subf %139, %140 : vector<256x128xf32>
    %142 = arith.mulf %141, %141 : vector<256x128xf32>
    %cst_64 = arith.constant dense<0.000000e+00> : vector<256x128xf32>
    %143 = tpu.matmul %142, %0, %cst_64 {dimension_numbers = #tpu.dot_dimension_numbers<[1], [0], [0], [1], [0, 0, 1, 1], [], []>} : vector<256x128xf32>, vector<128x128xf32>, vector<256x128xf32> -> vector<256x128xf32>
    %cst_65 = arith.constant 9.99999974E-6 : f32
    %144 = vector.broadcast %cst_65 : f32 to vector<256x128xf32>
    %145 = arith.addf %143, %144 : vector<256x128xf32>
    %146 = math.rsqrt %145 : vector<256x128xf32>
    %147 = arith.mulf %141, %146 : vector<256x128xf32>
    %148 = vector.extract_strided_slice %134 {offsets = [1, 0], sizes = [1, 128], strides = [1, 1]} : vector<3x128xf32> to vector<1x128xf32>
    %149 = vector.broadcast %148 : vector<1x128xf32> to vector<256x128xf32>
    %150 = arith.mulf %147, %149 : vector<256x128xf32>
    %151 = vector.extract_strided_slice %134 {offsets = [2, 0], sizes = [1, 128], strides = [1, 1]} : vector<3x128xf32> to vector<1x128xf32>
    %152 = vector.broadcast %151 : vector<1x128xf32> to vector<256x128xf32>
    %153 = arith.addf %150, %152 : vector<256x128xf32>
    %cst_66 = arith.constant 0.000000e+00 : f32
    %154 = vector.broadcast %cst_66 : f32 to vector<256x128xf32>
    %155 = arith.maximumf %153, %154 : vector<256x128xf32>
    %c0_67 = arith.constant 0 : index
    %c0_68 = arith.constant 0 : index
    %156 = vector.load %arg17[%c0_67, %c0_68] : memref<128x4xf32, #tpu.memory_space<vmem>>, vector<128x4xf32>
    %cst_69 = arith.constant dense<0.000000e+00> : vector<256x4xf32>
    %157 = tpu.matmul %155, %156, %cst_69 {dimension_numbers = #tpu.dot_dimension_numbers<[1], [0], [0], [1], [0, 0, 1, 1], [], []>} : vector<256x128xf32>, vector<128x4xf32>, vector<256x4xf32> -> vector<256x4xf32>
    %c0_70 = arith.constant 0 : index
    %c0_71 = arith.constant 0 : index
    %158 = vector.load %arg18[%c0_70, %c0_71] : memref<1x4xf32, #tpu.memory_space<vmem>>, vector<1x4xf32>
    %159 = vector.broadcast %158 : vector<1x4xf32> to vector<256x4xf32>
    %160 = arith.addf %157, %159 : vector<256x4xf32>
    %cst_72 = arith.constant dense<0xFF800000> : vector<256xf32>
    %161 = vector.multi_reduction <maximumf>, %160, %cst_72 [1] : vector<256x4xf32> to vector<256xf32>
    %162 = vector.shape_cast %161 : vector<256xf32> to vector<256x1xf32>
    %163 = vector.broadcast %162 : vector<256x1xf32> to vector<256x4xf32>
    %164 = arith.subf %160, %163 : vector<256x4xf32>
    %165 = math.exp %164 : vector<256x4xf32>
    %cst_73 = arith.constant dense<0.000000e+00> : vector<256xf32>
    %166 = vector.multi_reduction <add>, %165, %cst_73 [1] : vector<256x4xf32> to vector<256xf32>
    %167 = vector.shape_cast %166 : vector<256xf32> to vector<256x1xf32>
    %168 = tpu.reciprocal %167 {approx = true} : vector<256x1xf32> -> vector<256x1xf32>
    %169 = vector.broadcast %168 : vector<256x1xf32> to vector<256x4xf32>
    %170 = arith.mulf %165, %169 : vector<256x4xf32>
    %c0_74 = arith.constant 0 : index
    %c0_75 = arith.constant 0 : index
    %171 = vector.load %arg19[%c0_74, %c0_75] : memref<256x4xf32, #tpu.memory_space<vmem>>, vector<256x4xf32>
    tpu.vector_store %arg19[%c0_74, %c0_75], %170 {strides = array<i32>} : memref<256x4xf32, #tpu.memory_space<vmem>>, vector<256x4xf32>,
    return
  }
  func.func @transform_0(%arg0: i32) -> (i32, i32) {
    %c0_i32 = arith.constant 0 : i32
    %c0_i32_0 = arith.constant 0 : i32
    return %arg0, %c0_i32 : i32, i32
  }
  func.func @transform_1(%arg0: i32) -> (i32, i32) {
    %c0_i32 = arith.constant 0 : i32
    %c0_i32_0 = arith.constant 0 : i32
    %c0_i32_1 = arith.constant 0 : i32
    return %c0_i32, %c0_i32_0 : i32, i32
  }
  func.func @transform_2(%arg0: i32) -> (i32, i32) {
    %c0_i32 = arith.constant 0 : i32
    %c0_i32_0 = arith.constant 0 : i32
    %c0_i32_1 = arith.constant 0 : i32
    return %c0_i32, %c0_i32_0 : i32, i32
  }
  func.func @transform_3(%arg0: i32) -> (i32, i32) {
    %c0_i32 = arith.constant 0 : i32
    %c0_i32_0 = arith.constant 0 : i32
    %c0_i32_1 = arith.constant 0 : i32
    return %c0_i32, %c0_i32_0 : i32, i32
  }
  func.func @transform_4(%arg0: i32) -> (i32, i32) {
    %c0_i32 = arith.constant 0 : i32
    %c0_i32_0 = arith.constant 0 : i32
    %c0_i32_1 = arith.constant 0 : i32
    return %c0_i32, %c0_i32_0 : i32, i32
  }
  func.func @transform_5(%arg0: i32) -> (i32, i32) {
    %c0_i32 = arith.constant 0 : i32
    %c0_i32_0 = arith.constant 0 : i32
    %c0_i32_1 = arith.constant 0 : i32
    return %c0_i32, %c0_i32_0 : i32, i32
  }
  func.func @transform_6(%arg0: i32) -> (i32, i32) {
    %c0_i32 = arith.constant 0 : i32
    %c0_i32_0 = arith.constant 0 : i32
    %c0_i32_1 = arith.constant 0 : i32
    return %c0_i32, %c0_i32_0 : i32, i32
  }
  func.func @transform_7(%arg0: i32) -> (i32, i32) {
    %c0_i32 = arith.constant 0 : i32
    %c0_i32_0 = arith.constant 0 : i32
    %c0_i32_1 = arith.constant 0 : i32
    return %c0_i32, %c0_i32_0 : i32, i32
  }
  func.func @transform_8(%arg0: i32) -> (i32, i32) {
    %c0_i32 = arith.constant 0 : i32
    %c0_i32_0 = arith.constant 0 : i32
    %c0_i32_1 = arith.constant 0 : i32
    return %c0_i32, %c0_i32_0 : i32, i32
  }
  func.func @transform_9(%arg0: i32) -> (i32, i32) {
    %c0_i32 = arith.constant 0 : i32
    %c0_i32_0 = arith.constant 0 : i32
    %c0_i32_1 = arith.constant 0 : i32
    return %c0_i32, %c0_i32_0 : i32, i32
  }
  func.func @transform_10(%arg0: i32) -> (i32, i32) {
    %c0_i32 = arith.constant 0 : i32
    %c0_i32_0 = arith.constant 0 : i32
    %c0_i32_1 = arith.constant 0 : i32
    return %c0_i32, %c0_i32_0 : i32, i32
  }
  func.func @transform_11(%arg0: i32) -> (i32, i32) {
    %c0_i32 = arith.constant 0 : i32
    %c0_i32_0 = arith.constant 0 : i32
    %c0_i32_1 = arith.constant 0 : i32
    return %c0_i32, %c0_i32_0 : i32, i32
  }
  func.func @transform_12(%arg0: i32) -> (i32, i32) {
    %c0_i32 = arith.constant 0 : i32
    %c0_i32_0 = arith.constant 0 : i32
    %c0_i32_1 = arith.constant 0 : i32
    return %c0_i32, %c0_i32_0 : i32, i32
  }
  func.func @transform_13(%arg0: i32) -> (i32, i32) {
    %c0_i32 = arith.constant 0 : i32
    %c0_i32_0 = arith.constant 0 : i32
    %c0_i32_1 = arith.constant 0 : i32
    return %c0_i32, %c0_i32_0 : i32, i32
  }
  func.func @transform_14(%arg0: i32) -> (i32, i32) {
    %c0_i32 = arith.constant 0 : i32
    %c0_i32_0 = arith.constant 0 : i32
    %c0_i32_1 = arith.constant 0 : i32
    return %c0_i32, %c0_i32_0 : i32, i32
  }
  func.func @transform_15(%arg0: i32) -> (i32, i32) {
    %c0_i32 = arith.constant 0 : i32
    %c0_i32_0 = arith.constant 0 : i32
    %c0_i32_1 = arith.constant 0 : i32
    return %c0_i32, %c0_i32_0 : i32, i32
  }
  func.func @transform_16(%arg0: i32) -> (i32, i32) {
    %c0_i32 = arith.constant 0 : i32
    %c0_i32_0 = arith.constant 0 : i32
    %c0_i32_1 = arith.constant 0 : i32
    return %c0_i32, %c0_i32_0 : i32, i32
  }
  func.func @transform_17(%arg0: i32) -> (i32, i32) {
    %c0_i32 = arith.constant 0 : i32
    %c0_i32_0 = arith.constant 0 : i32
    %c0_i32_1 = arith.constant 0 : i32
    return %c0_i32, %c0_i32_0 : i32, i32
  }
  func.func @transform_18(%arg0: i32) -> (i32, i32) {
    %c0_i32 = arith.constant 0 : i32
    %c0_i32_0 = arith.constant 0 : i32
    return %arg0, %c0_i32 : i32, i32
  }
  func.func @transform_19(%arg0: i32) -> (i32, i32) {
    %c0_i32 = arith.constant 0 : i32
    %c0_i32_0 = arith.constant 0 : i32
    return %arg0, %c0_i32 : i32, i32
  }
}

</mosaic_0001>

<bundles_post_ra>
// kernel: tpu_custom_call.1
= control target key start
LH: loop header
LB: loop body
LE: loop exit
PB: predicated region body
PF: predicated region fallthrough
CT: control target
= control target key end

     0   :  { %s12965_s0 = inlined_call_operand.vmem [shape: f32[512,32], index: 0, kind: input, shape index: {}]   ;;  %s12966_s1 = inlined_call_operand.hbm [shape: f32[32,64], index: 1, kind: input, shape index: {}]   ;;  %s12967_s2 = inlined_call_operand.vmem [shape: f32[3,64], index: 2, kind: input, shape index: {}]   ;;  %s12968_s3 = inlined_call_operand.hbm [shape: f32[64,128], index: 3, kind: input, shape index: {}]   ;;  %s12969_s4 = inlined_call_operand.hbm [shape: f32[3,128], index: 4, kind: input, shape index: {}]   ;;  %s12970_s5 = inlined_call_operand.vmem [shape: f32[128,128], index: 5, kind: input, shape index: {}]   ;;  %s12971_s6 = inlined_call_operand.vmem [shape: f32[128,128], index: 6, kind: input, shape index: {}]   ;;  %s12972_s7 = inlined_call_operand.hbm [shape: f32[3,128], index: 7, kind: input, shape index: {}]   ;;  %s12973_s8 = inlined_call_operand.vmem [shape: f32[128,128], index: 8, kind: input, shape index: {}]   ;;  %s12974_s9 = inlined_call_operand.vmem [shape: f32[3,128], index: 9, kind: input, shape index: {}]   ;;  %s12975_s10 = inlined_call_operand.vmem [shape: f32[128,128], index: 10, kind: input, shape index: {}]   ;;  %s12976_s11 = inlined_call_operand.hbm [shape: f32[1,128], index: 11, kind: input, shape index: {}]   ;;  %s12977_s12 = inlined_call_operand.vmem [shape: f32[128,128], index: 12, kind: input, shape index: {}]   ;;  %s12978_s13 = inlined_call_operand.hbm [shape: f32[3,128], index: 13, kind: input, shape index: {}]   ;;  %s12979_s14 = inlined_call_operand.hbm [shape: f32[128,128], index: 14, kind: input, shape index: {}]   ;;  %s12980_s15 = inlined_call_operand.hbm [shape: f32[3,128], index: 15, kind: input, shape index: {}]   ;;  %s12981_s16 = inlined_call_operand.vmem [shape: f32[128,4], index: 16, kind: input, shape index: {}]   ;;  %s12982_s17 = inlined_call_operand.hbm [shape: f32[1,4], index: 17, kind: input, shape index: {}]   ;;  %s12983_s18 = inlined_call_operand.vmem [shape: f32[512,4], index: 18, kind: output, shape index: {0}]   ;;  %s12984_s19 = inlined_call_operand.hbm [shape: f32[512,128], index: 19, kind: output, shape index: {1}]  }
   0x1   :  { %13045 = sst [smem:[#allocation47_spill]] %s12965_s0 }
   0x2   :  { %13046 = sst [smem:[#allocation48_spill]] %s12966_s1 }
   0x3   :  { %13047 = sst [smem:[#allocation49_spill]] %s12967_s2 }
   0x4   :  { %13048 = sst [smem:[#allocation50_spill]] %s12968_s3 }
   0x5   :  { %13049 = sst [smem:[#allocation51_spill]] %s12972_s7 }
   0x6   :  { %13050 = sst [smem:[#allocation52_spill]] %s12981_s16 }
   0x7   :  { %13051 = sst [smem:[#allocation53_spill]] %s12983_s18 }
   0x8   :  { %13052 = sst [smem:[#allocation54_spill]] %s12984_s19 }
   0x9   :  { %25 = vsyncpa [#allocation3], 0 }
   0xa   :  { %26 = vsyncpa [#allocation6], 0 }
   0xb   :  { %27 = vsyncpa [#allocation9], 0 }
   0xc   :  { %28 = vsyncpa [#allocation12], 0 }
   0xd   :  { %29 = vsyncpa [#allocation15], 0 }
   0xe   :  { %30 = vsyncpa [#allocation4], 0 }
   0xf   :  { %32 = vsyncpa [#allocation4 + $0x1], 0  ;;  %s8449_s0 = smov 0   ;;  %s8451_s30 = smov 0  }
  0x10   :  { %s8453_s20 = smov 0   ;;  %s8455_s21 = smov 0  }
  0x11 LB: > { %13053 = sst [smem:[#allocation24_spill]] %s8320_s0  ;;  %s8470_s1 = sadd.s32 4294967295, %s8332_s21   ;;  %s8332_s21 = sphi %s8455_s21, %s13147_s21   ;;  %s8328_s20 = sphi %s8453_s20, %s13149_s20   ;;  %s8324_s30 = sphi %s8451_s30, %s13151_s30   ;;  %s8320_s0 = sphi %s8449_s0, %s13150_s0  }
  0x12   : > { %13054 = sst [smem:[#allocation25_spill]] %s8328_s20  ;;  %s7160_s22 = sadd.s32 4294967294, %s8332_s21  }
  0x13   : > { %13055 = sst [smem:[#allocation26_spill]] %s8332_s21  ;;  %s8474_s2 = sadd.s32 1, %s8332_s21  }
  0x14   : > { %13056 = sst [smem:[#allocation27_spill]] %s8474_s2  ;;  %s454_s23 = sadd.s32 1, %s8328_s20 }
  0x15   : > { %s451_s24 = ssub.s32 %s8332_s21, %s8474_s2  ;;  %p464_p0 = scmp.ne.s32.totalorder %s8328_s20, %s8324_s30 }
  0x16   : > { %p452_p1 = scmp.eq.s32.totalorder %s451_s24, 0  ;;  %p465_p2 = scmp.eq.s32.totalorder %s8470_s1, 1 }
  0x17   : > { %p470_p3 = scmp.ne.s32.totalorder %s8324_s30, %s8320_s0  ;;  %p471_p4 = scmp.eq.s32.totalorder %s7160_s22, 1 }
  0x18   : > { %s8485_s25 = scalar_select %p452_p1, %s8328_s20, %s454_s23  }
  0x19   : > { %p8487_p5 = por %p465_p2, %p464_p0  ;;  %p8491_p6 = por %p471_p4, %p470_p3 }
  0x1a   : > { %13057 = sst [smem:[#allocation28_spill]] %s8485_s25  ;;  %p7161_p7 = scmp.ge.s32.totalorder %s8332_s21, 1 }
  0x1b   : > { %s13058_s3 = scalar_select %p8487_p5, 1, 0 }
  0x1c   : > { %s13060_s26 = scalar_select %p8491_p6, 1, 0 }
  0x1d   : > { %13059 = sst [smem:[#allocation29_spill]] %s13058_s3  ;;  %p478_p8 = scmp.lt.s32.totalorder %s8332_s21, 3 }
  0x1e   : > { %13061 = sst [smem:[#allocation30_spill]] %s13060_s26  ;;  %p7343_p9 = scmp.eq.s32.totalorder %s8470_s1, 0 }
  0x1f   : > { %p8498_p10 = pnand %p7161_p7, %p478_p8  ;;  %s13063_s22 = sld [smem:[#allocation50_spill]] }
  0x20   : > { %s13064_s7 = sld [smem:[#allocation51_spill]]  ;;  %s8334_s26 = smov [#allocation5]  }
  0x21   : > { %p7311_p11 = pneg %p8498_p10  ;;  %s508_s0 = sshll.u32 %s8334_s26, 4  ;;  %s509_s0 = int_to_ptr.vmem [resolvable:$true] %s508_s0 }
  0x22   : > { %s12995_s28 = smov 128   ;;  %s8336_s29 = smov 8  }
  0x23   : > { %p8512_p12 = pnand %p7343_p9, %p7311_p11  ;;  %s8337_s25 = smov [#allocation8]  }
  0x24   : > { %s575_s21 = sshll.u32 %s12978_s13, 4  ;;  %s601_s19 = sshll.u32 %s12980_s15, 4  ;;  %s576_s21 = int_to_ptr.hbm [resolvable:$true] %s575_s21  ;;  %s602_s19 = int_to_ptr.hbm [resolvable:$true] %s601_s19 }
  0x25   : > { %s506_s23 = sshll.u32 %s13063_s22, 4  ;;  %s541_s22 = sshll.u32 %s8337_s25, 4  ;;  %s507_s23 = int_to_ptr.hbm [resolvable:$true] %s506_s23  ;;  %s542_s22 = int_to_ptr.vmem [resolvable:$true] %s541_s22 }
  0x26   : > { %s539_s20 = sshll.u32 %s13064_s7, 4  ;;  %s8338_s18 = smov [#allocation11]   ;;  %s540_s20 = int_to_ptr.hbm [resolvable:$true] %s539_s20 }
  0x27   : > { %7317 = dma.hbm_to_vmem [thread:$0]  (!%p8512_p12), %s507_s23, 1024, %s509_s0, [#allocation6], %s12995_s28, %s12995_s28, %s8336_s29  }
  0x28   : > { %7323 = dma.hbm_to_vmem [thread:$0]  (!%p8512_p12), %s540_s20, 64, %s542_s22, [#allocation9]  }
  0x29   : > { %s577_s16 = sshll.u32 %s8338_s18, 4  ;;  %s8339_s0 = smov [#allocation14]   ;;  %s578_s16 = int_to_ptr.vmem [resolvable:$true] %s577_s16 }
  0x2a   : > { %7329 = dma.hbm_to_vmem [thread:$0]  (!%p8512_p12), %s576_s21, 64, %s578_s16, [#allocation12]  }
  0x2b   : > { %s603_s23 = sshll.u32 %s8339_s0, 4  ;;  %s13066_s24 = sld [smem:[#allocation48_spill]]  ;;  %s604_s23 = int_to_ptr.vmem [resolvable:$true] %s603_s23 }
  0x2c   : > { %7335 = dma.hbm_to_vmem [thread:$0]  (!%p8512_p12), %s602_s19, 64, %s604_s23, [#allocation15]  }
  0x2d   : > { %s521_s22 = sshll.u32 %s12969_s4, 4  ;;  %s8340_s18 = smov [#allocation2]   ;;  %s522_s22 = int_to_ptr.hbm [resolvable:$true] %s521_s22 }
  0x2e   : > { %s491_s26 = sshll.u32 %s8340_s18, 4  ;;  %s13067_s16 = smov 128   ;;  %s492_s26 = int_to_ptr.vmem [resolvable:$true] %s491_s26 }
  0x2f   : > { %s8341_s21 = smov [#allocation7]   ;;  %s560_s19 = sshll.u32 %s12976_s11, 4  ;;  %s561_s19 = int_to_ptr.hbm [resolvable:$true] %s560_s19 }
  0x30   : > { %s523_s0 = sshll.u32 %s8341_s21, 4  ;;  %s586_s20 = sshll.u32 %s12979_s14, 4  ;;  %s524_s0 = int_to_ptr.vmem [resolvable:$true] %s523_s0  ;;  %s587_s20 = int_to_ptr.hbm [resolvable:$true] %s586_s20 }
  0x31   : > { %s489_s28 = sshll.u32 %s13066_s24, 4  ;;  %s8342_s3 = smov [#allocation10]   ;;  %s490_s28 = int_to_ptr.hbm [resolvable:$true] %s489_s28 }
  0x32   : > { %7314 = dma.hbm_to_vmem [thread:$0]  (!%p8512_p12), %s490_s28, 512, %s492_s26, [#allocation3], %s13067_s16, %s13067_s16, %s8336_s29  }
  0x33   : > { %7320 = dma.hbm_to_vmem [thread:$0]  (!%p8512_p12), %s522_s22, 64, %s524_s0, [#allocation6]  }
  0x34   : > { %s562_s18 = sshll.u32 %s8342_s3, 4  ;;  %s8343_s28 = smov [#allocation13]   ;;  %s563_s18 = int_to_ptr.vmem [resolvable:$true] %s562_s18 }
  0x35   : > { %7326 = dma.hbm_to_vmem [thread:$0]  (!%p8512_p12), %s561_s19, 16, %s563_s18, [#allocation9]  }
  0x36   : > { %s588_s26 = sshll.u32 %s8343_s28, 4  ;;  %s616_s25 = sshll.u32 %s12982_s17, 4  ;;  %s589_s26 = int_to_ptr.vmem [resolvable:$true] %s588_s26  ;;  %s617_s25 = int_to_ptr.hbm [resolvable:$true] %s616_s25 }
  0x37   : > { %7332 = dma.hbm_to_vmem [thread:$0]  (!%p8512_p12), %s587_s20, 2048, %s589_s26, [#allocation12], %s13067_s16, %s13067_s16, %s8336_s29  }
  0x38   : > { %s8344_s22 = smov [#allocation16]   ;;  %640 = sbr.rel (%p8498_p10) target bundleno = 3478 (0xd96), region = 92 }
  0x39   : > { %s618_s0 = sshll.u32 %s8344_s22, 4  ;;  %s619_s0 = int_to_ptr.vmem [resolvable:$true] %s618_s0 }
  0x3a   : > { %7338 = dma.hbm_to_vmem [thread:$0]  (!%p8512_p12), %s617_s25, 16, %s619_s0, [#allocation15]  }
  0x3d   : > { %8295 = dma.done.wait (%p7343_p9), [#allocation3], 512  }
  0x3e   : > { %8297 = vsyncadd (%p7343_p9), [#allocation3], 4294966784 }
  0x3f   : > { %8299 = dma.done.wait (%p7343_p9), [#allocation6], 1088  }
  0x40   : > { %8301 = vsyncadd (%p7343_p9), [#allocation6], 4294966208 }
  0x41   : > { %8303 = dma.done.wait (%p7343_p9), [#allocation9], 80  }
  0x42   : > { %8305 = vsyncadd (%p7343_p9), [#allocation9], 4294967216 }
  0x43   : > { %8307 = dma.done.wait (%p7343_p9), [#allocation12], 2112  }
  0x44   : > { %8309 = vsyncadd (%p7343_p9), [#allocation12], 4294965184 }
  0x45   : > { %8311 = dma.done.wait (%p7343_p9), [#allocation15], 80  }
  0x46   : > { %8313 = vsyncadd (%p7343_p9), [#allocation15], 4294967216  ;;  %s7183_s2 = sshll.u32 %s8470_s1, 5  ;;  %v807_v0 = vld [vmem:[#allocation2 + $0x18] sm:$0xff]  ;;  %v806_v1 = vld [vmem:[#allocation2 + $0x10] sm:$0xff]  ;;  %s13068_s19 = sld [smem:[#allocation47_spill]] }
  0x47   : > { %p743_p13 = scmp.lt.s32.totalorder %s7183_s2, 63  ;;  %918 = vmatpush.msra.mxu0 %v807_v0  ;;  %v805_v2 = vld [vmem:[#allocation2 + $0x8] sm:$0xff]  ;;  %v804_v3 = vld [vmem:[#allocation2] sm:$0xff]  ;;  %vm809_vm0 = vcmask 261120   ;;  %s13069_s3 = sld [smem:[#allocation49_spill]]  ;;  %vm1019_vm1 = vcmask 523264  }
  0x48   : > { %v8345_v41 = vmov 64.0   ;;  %s739_s29 = sand.u32 1, %s8324_s30   ;;  %s13140_s18 = sld [smem:[#allocation52_spill]] }
  0x49   : > { %s13153_s2 = smov (!%p743_p13, %s7183_s2), 63  ;;  %919 = vmatpush.msra.mxu0 %v806_v1  ;;  %7411 = vrcp.f32 %v8345_v41 }
  0x4a   : > { %s7184_s27 = sshll.u32 %s13153_s2, 3  ;;  %s7256_s2 = sshll.u32 %s8470_s1, 8 }
  0x4b   : > { %920 = vmatpush.msra.mxu0 %v805_v2  ;;  %s6966_s1 = scalar_lea.sflag [#allocation4], %s739_s29 }
  0x4c   : > { %s8595_s23 = scalar_lea.vmem %s13068_s19, %s7184_s27 }
  0x4d   : > { %v771_v4 = vld [vmem:[%s8595_s23] sm:$0xff]  ;;  %921 = vmatpush.msra.mxu0 %v804_v3  ;;  %v772_v5 = vld [vmem:[%s8595_s23 + $0x8] sm:$0xff]  ;;  %v773_v6 = vld [vmem:[%s8595_s23 + $0x10] sm:$0xff] }
  0x4e   : > { %7187 = vmatmul.msk.f32.vlgmr.msra.gmra.mxu0 %vm809_vm0, %v771_v4  ;;  %v774_v7 = vld [vmem:[%s8595_s23 + $0x18] sm:$0xff]  ;;  %v775_v8 = vld [vmem:[%s8595_s23 + $0x20] sm:$0xff]  ;;  %v776_v9 = vld [vmem:[%s8595_s23 + $0x28] sm:$0xff] }
  0x4f   : > { %v777_v10 = vld [vmem:[%s8595_s23 + $0x30] sm:$0xff]  ;;  %v778_v11 = vld [vmem:[%s8595_s23 + $0x38] sm:$0xff]  ;;  %v779_v12 = vld [vmem:[%s8595_s23 + $0x40] sm:$0xff]  ;;  %v7412_v42 = vpop.eup %7411 }
  0x50   : > { %v780_v13 = vld [vmem:[%s8595_s23 + $0x48] sm:$0xff]  ;;  %v8620_v14 = vld [vmem:[%s13069_s3] sm:$0x7]  ;;  %v781_v15 = vld [vmem:[%s8595_s23 + $0x50] sm:$0xff]  ;;  %v1117_v43 = vmul.f32 64.0, %v7412_v42  ;;  %vm1121_vm2 = vweird.f32 %v7412_v42  ;;  %s13142_s3 = sld [smem:[#allocation54_spill]] }
  0x51   : > { %v8624_v16 = vperm.slane %v8620_v14, 0  ;;  %v782_v20 = vld [vmem:[%s8595_s23 + $0x58] sm:$0xff]  ;;  %v783_v24 = vld [vmem:[%s8595_s23 + $0x60] sm:$0xff]  ;;  %v784_v28 = vld [vmem:[%s8595_s23 + $0x68] sm:$0xff] }
  0x52   : > { %v785_v44 = vld [vmem:[%s8595_s23 + $0x70] sm:$0xff]  ;;  %v1118_v45 = vsub.f32 1.0, %v1117_v43  ;;  %v786_v47 = vld [vmem:[%s8595_s23 + $0x78] sm:$0xff]  ;;  %v787_v53 = vld [vmem:[%s8595_s23 + $0x80] sm:$0xff] }
  0x53   : > { %v788_v61 = vld [vmem:[%s8595_s23 + $0x88] sm:$0xff] }
  0x54   : > { %v1119_v46 = vmul.f32 %v7412_v42, %v1118_v45 }
  0x56   : > { %7188 = vmatmul.msk.f32.gmra.mxu0 %vm809_vm0, %v772_v5  ;;  %v1120_v48 = vadd.f32 %v7412_v42, %v1119_v46  ;;  %s6981_s28 = scalar_lea.hbm %s13142_s3, %s7256_s2  ;;  %s8270_s19 = scalar_lea.hbm %s13142_s3, 512 }
  0x57   : > { %s6984_s25 = sshll.u32 %s6981_s28, 4  ;;  %s6985_s25 = int_to_ptr.hbm [resolvable:$true] %s6984_s25 }
  0x58   : > { %v8663_v50 = vsel %vm1121_vm2, %v7412_v42, %v1120_v48  ;;  %s8264_s22 = sshra.s32 %s6985_s25, 4  ;;  %s8265_s22 = int_to_ptr.hbm [resolvable:$true] %s8264_s22 }
  0x59   : > { %s8266_s0 = scalar_lea.hbm %s8265_s22, 256  ;;  %p8271_p3 = scmp.lt.s32.totalorder %s8265_s22, %s13142_s3 }
  0x5a   : > { %p8267_p0 = scmp.ne.s32.totalorder %s8265_s22, %s8266_s0  ;;  %p8272_p4 = scmp.lt.s32.totalorder %s8270_s19, %s8266_s0 }
  0x5c   : > { %p8268_p1 = pnand %p8267_p0, %p8487_p5  ;;  %p8273_p7 = por %p8272_p4, %p8271_p3 }
  0x5e   : > { %7189 = vmatmul.msk.f32.gmra.mxu0 %vm809_vm0, %v773_v6  ;;  %v789_v6 = vld [vmem:[%s8595_s23 + $0x90] sm:$0xff]  ;;  %p8269_p2 = pneg %p8268_p1 }
  0x60   : > { %p8274_p8 = pnand %p8273_p7, %p8269_p2 }
  0x66   : > { %7190 = vmatmul.msk.f32.gmra.mxu0 %vm809_vm0, %v774_v7 }
  0x6e   : > { %7191 = vmatmul.msk.f32.gmra.mxu0 %vm809_vm0, %v775_v8 }
  0x76   : > { %7192 = vmatmul.msk.f32.gmra.mxu0 %vm809_vm0, %v776_v9 }
  0x7e   : > { %7193 = vmatmul.msk.f32.gmra.mxu0 %vm809_vm0, %v777_v10 }
  0x86   : > { %7194 = vmatmul.msk.f32.gmra.mxu0 %vm809_vm0, %v778_v11 }
  0x8e   : > { %7195 = vmatmul.msk.f32.gmra.mxu0 %vm809_vm0, %v779_v12 }
  0x96   : > { %7196 = vmatmul.msk.f32.gmra.mxu0 %vm809_vm0, %v780_v13  ;;  %v790_v13 = vld [vmem:[%s8595_s23 + $0x98] sm:$0xff] }
  0x9e   : > { %7197 = vmatmul.msk.f32.gmra.mxu0 %vm809_vm0, %v781_v15 }
  0xa6   : > { %7198 = vmatmul.msk.f32.gmra.mxu0 %vm809_vm0, %v782_v20 }
  0xae   : > { %7199 = vmatmul.msk.f32.gmra.mxu0 %vm809_vm0, %v783_v24 }
  0xb6   : > { %7200 = vmatmul.msk.f32.gmra.mxu0 %vm809_vm0, %v784_v28 }
  0xbe   : > { %7201 = vmatmul.msk.f32.gmra.mxu0 %vm809_vm0, %v785_v44 }
  0xc6   : > { %7202 = vmatmul.msk.f32.gmra.mxu0 %vm809_vm0, %v786_v47 }
  0xcb   : > { %v923_v17 = vpop.f32.mrf.mxu0 }
  0xcc   : > { %v924_v18 = vadd.f32 %v923_v17, %v8624_v16 }
  0xce   : > { %v1020_v19 = vsel %vm1019_vm1, %v924_v18, 0.0  ;;  %7203 = vmatmul.msk.f32.gmra.mxu0 %vm809_vm0, %v787_v53  ;;  %v1834_v53 = vld [vmem:[#allocation5 + $0x20] sm:$0xff] }
  0xcf   : > { %1021 = vadd.xlane.f32.xlu0 %v1020_v19 }
  0xd3   : > { %v926_v21 = vpop.f32.mrf.mxu0 }
  0xd4   : > { %v927_v22 = vadd.f32 %v926_v21, %v8624_v16 }
  0xd6   : > { %v1023_v23 = vsel %vm1019_vm1, %v927_v22, 0.0  ;;  %7204 = vmatmul.msk.f32.gmra.mxu0 %vm809_vm0, %v788_v61 }
  0xd7   : > { %1024 = vadd.xlane.f32.xlu0 %v1023_v23  ;;  %v791_v23 = vld [vmem:[%s8595_s23 + $0xa0] sm:$0xff] }
  0xdb   : > { %v929_v25 = vpop.f32.mrf.mxu0 }
  0xdc   : > { %v930_v26 = vadd.f32 %v929_v25, %v8624_v16 }
  0xde   : > { %v1026_v27 = vsel %vm1019_vm1, %v930_v26, 0.0  ;;  %7205 = vmatmul.msk.f32.gmra.mxu0 %vm809_vm0, %v789_v6 }
  0xdf   : > { %1027 = vadd.xlane.f32.xlu1 %v1026_v27 }
  0xe3   : > { %v932_v29 = vpop.f32.mrf.mxu0 }
  0xe4   : > { %v8640_v30 = vadd.f32 %v932_v29, %v8624_v16 }
  0xe6   : > { %v1029_v31 = vsel %vm1019_vm1, %v8640_v30, 0.0  ;;  %7206 = vmatmul.msk.f32.gmra.mxu0 %vm809_vm0, %v790_v13 }
  0xe7   : > { %1030 = vadd.xlane.f32.xlu1 %v1029_v31 }
  0xeb   : > { %v935_v32 = vpop.f32.mrf.mxu0 }
  0xec   : > { %v8645_v33 = vadd.f32 %v935_v32, %v8624_v16 }
  0xee   : > { %v1032_v34 = vsel %vm1019_vm1, %v8645_v33, 0.0  ;;  %7207 = vmatmul.msk.f32.gmra.mxu0 %vm809_vm0, %v791_v23 }
  0xef   : > { %1033 = vadd.xlane.f32.xlu2 %v1032_v34 }
  0xf3   : > { %v938_v35 = vpop.f32.mrf.mxu0 }
  0xf4   : > { %v8650_v36 = vadd.f32 %v938_v35, %v8624_v16 }
  0xf6   : > { %v1035_v37 = vsel %vm1019_vm1, %v8650_v36, 0.0 }
  0xf7   : > { %1036 = vadd.xlane.f32.xlu2 %v1035_v37 }
  0xfb   : > { %v941_v38 = vpop.f32.mrf.mxu0 }
  0xfc   : > { %v8655_v39 = vadd.f32 %v941_v38, %v8624_v16 }
  0xfe   : > { %v1038_v40 = vsel %vm1019_vm1, %v8655_v39, 0.0 }
  0xff   : > { %1039 = vadd.xlane.f32.xlu1 %v1038_v40 }
 0x103   : > { %v944_v49 = vpop.f32.mrf.mxu0 }
 0x104   : > { %v8675_v60 = vadd.f32 %v944_v49, %v8624_v16 }
 0x106   : > { %v1041_v63 = vsel %vm1019_vm1, %v8675_v60, 0.0 }
 0x10b   : > { %v947_v55 = vpop.f32.mrf.mxu0 }
 0x10c   : > { %v8688_v5 = vadd.f32 %v947_v55, %v8624_v16  ;;  %v1833_v55 = vld [vmem:[#allocation5 + $0x18] sm:$0xff] }
 0x10e   : > { %v1044_v9 = vsel %vm1019_vm1, %v8688_v5, 0.0 }
 0x113   : > { %v950_v1 = vpop.f32.mrf.mxu0 }
 0x114   : > { %v8702_v17 = vadd.f32 %v950_v1, %v8624_v16  ;;  %v793_v1 = vld [vmem:[%s8595_s23 + $0xb0] sm:$0xff] }
 0x116   : > { %v1047_v19 = vsel %vm1019_vm1, %v8702_v17, 0.0 }
 0x11b   : > { %v953_v12 = vpop.f32.mrf.mxu0 }
 0x11c   : > { %v8716_v25 = vadd.f32 %v953_v12, %v8624_v16 }
 0x11e   : > { %v1050_v28 = vsel %vm1019_vm1, %v8716_v25, 0.0 }
 0x142   : > { %v1022_v51 = vpop.xlane.xlu0 %1021 }
 0x143   : > { %v1123_v52 = vmul.f32 %v8663_v50, %v1022_v51  ;;  %v1836_v51 = vld [vmem:[#allocation5 + $0x30] sm:$0xff] }
 0x145   : > { %v8668_v54 = vsub.f32 %v924_v18, %v1123_v52  ;;  %v1835_v52 = vld [vmem:[#allocation5 + $0x28] sm:$0xff] }
 0x147   : > { %v1187_v56 = vmul.f32 %v8668_v54, %v8668_v54 }
 0x149   : > { %v1219_v57 = vsel %vm1019_vm1, %v1187_v56, 0.0  ;;  %v792_v56 = vld [vmem:[%s8595_s23 + $0xa8] sm:$0xff] }
 0x14a   : > { %1220 = vadd.xlane.f32.xlu0 %v1219_v57  ;;  %v1025_v58 = vpop.xlane.xlu0 %1024  ;;  %v1832_v57 = vld [vmem:[#allocation5 + $0x10] sm:$0xff]  ;;  %7208 = vmatmul.msk.f32.gmra.mxu0 %vm809_vm0, %v792_v56 }
 0x14b   : > { %v1124_v59 = vmul.f32 %v8663_v50, %v1025_v58  ;;  %v1831_v58 = vld [vmem:[#allocation5 + $0x8] sm:$0xff] }
 0x14d   : > { %v8679_v62 = vsub.f32 %v927_v22, %v1124_v59  ;;  %v1830_v59 = vld [vmem:[#allocation5] sm:$0xff] }
 0x14f   : > { %v1188_v0 = vmul.f32 %v8679_v62, %v8679_v62 }
 0x151   : > { %v1222_v2 = vsel %vm1019_vm1, %v1188_v0, 0.0 }
 0x152   : > { %v1028_v3 = vpop.xlane.xlu1 %1027  ;;  %1042 = vadd.xlane.f32.xlu0 %v1041_v63  ;;  %1223 = vadd.xlane.f32.xlu2 %v1222_v2 }
 0x153   : > { %v1125_v4 = vmul.f32 %v8663_v50, %v1028_v3  ;;  %7209 = vmatmul.msk.f32.gmra.mxu0 %vm809_vm0, %v793_v1 }
 0x155   : > { %v8692_v7 = vsub.f32 %v930_v26, %v1125_v4  ;;  %v956_v26 = vpop.f32.mrf.mxu0 }
 0x156   : > { %v8729_v34 = vadd.f32 %v956_v26, %v8624_v16 }
 0x157   : > { %v1189_v8 = vmul.f32 %v8692_v7, %v8692_v7 }
 0x158   : > { %v1053_v38 = vsel %vm1019_vm1, %v8729_v34, 0.0 }
 0x159   : > { %v1225_v10 = vsel %vm1019_vm1, %v1189_v8, 0.0 }
 0x15a   : > { %1226 = vadd.xlane.f32.xlu1 %v1225_v10  ;;  %v1031_v11 = vpop.xlane.xlu1 %1030  ;;  %1045 = vadd.xlane.f32.xlu2 %v1044_v9  ;;  %v794_v9 = vld [vmem:[%s8595_s23 + $0xb8] sm:$0xff] }
 0x15b   : > { %v1126_v15 = vmul.f32 %v8663_v50, %v1031_v11  ;;  %7210 = vmatmul.msk.f32.gmra.mxu0 %vm809_vm0, %v794_v9 }
 0x15d   : > { %v8706_v18 = vsub.f32 %v8640_v30, %v1126_v15 }
 0x15f   : > { %v1190_v20 = vmul.f32 %v8706_v18, %v8706_v18 }
 0x161   : > { %v1228_v21 = vsel %vm1019_vm1, %v1190_v20, 0.0 }
 0x162   : > { %v1034_v22 = vpop.xlane.xlu2 %1033  ;;  %1048 = vadd.xlane.f32.xlu1 %v1047_v19  ;;  %1229 = vadd.xlane.f32.xlu0 %v1228_v21 }
 0x163   : > { %v1127_v24 = vmul.f32 %v8663_v50, %v1034_v22 }
 0x165   : > { %v8720_v27 = vsub.f32 %v8645_v33, %v1127_v24  ;;  %v959_v33 = vpop.f32.mrf.mxu0 }
 0x166   : > { %v8741_v43 = vadd.f32 %v959_v33, %v8624_v16 }
 0x167   : > { %v1191_v29 = vmul.f32 %v8720_v27, %v8720_v27 }
 0x168   : > { %v1056_v44 = vsel %vm1019_vm1, %v8741_v43, 0.0 }
 0x169   : > { %v1231_v30 = vsel %vm1019_vm1, %v1191_v29, 0.0  ;;  %v795_v29 = vld [vmem:[%s8595_s23 + $0xc0] sm:$0xff] }
 0x16a   : > { %v1037_v31 = vpop.xlane.xlu2 %1036  ;;  %1051 = vadd.xlane.f32.xlu0 %v1050_v28  ;;  %1232 = vadd.xlane.f32.xlu2 %v1231_v30 }
 0x16b   : > { %v1128_v32 = vmul.f32 %v8663_v50, %v1037_v31  ;;  %7211 = vmatmul.msk.f32.gmra.mxu0 %vm809_vm0, %v795_v29 }
 0x16d   : > { %v8732_v35 = vsub.f32 %v8650_v36, %v1128_v32  ;;  %v962_v46 = vpop.f32.mrf.mxu0 }
 0x16e   : > { %v8752_v48 = vadd.f32 %v962_v46, %v8624_v16 }
 0x16f   : > { %v1192_v37 = vmul.f32 %v8732_v35, %v8732_v35 }
 0x170   : > { %v1059_v49 = vsel %vm1019_vm1, %v8752_v48, 0.0 }
 0x171   : > { %v1234_v40 = vsel %vm1019_vm1, %v1192_v37, 0.0 }
 0x172   : > { %1235 = vadd.xlane.f32.xlu1 %v1234_v40  ;;  %v1040_v41 = vpop.xlane.xlu1 %1039  ;;  %1054 = vadd.xlane.f32.xlu2 %v1053_v38  ;;  %v8784_v40 = vperm.slane %v8620_v14, 1 }
 0x173   : > { %v1129_v42 = vmul.f32 %v8663_v50, %v1040_v41 }
 0x175   : > { %v8744_v36 = vsub.f32 %v8655_v39, %v1129_v42  ;;  %v1837_v39 = vld [vmem:[#allocation5 + $0x38] sm:$0xff]  ;;  %v965_v0 = vpop.f32.mrf.mxu0 }
 0x176   : > { %1943 = vmatpush.msra.mxu1 %v1837_v39 }
 0x177   : > { %v1193_v45 = vmul.f32 %v8744_v36, %v8744_v36 }
 0x178   : > { %1944 = vmatpush.msra.mxu1 %v1836_v51 }
 0x179   : > { %v1237_v47 = vsel %vm1019_vm1, %v1193_v45, 0.0 }
 0x17a   : > { %1057 = vadd.xlane.f32.xlu1 %v1056_v44  ;;  %1238 = vadd.xlane.f32.xlu0 %v1237_v47 }
 0x17b   : > { %1945 = vmatpush.msra.mxu1 %v1835_v52 }
 0x17d   : > { %1946 = vmatpush.msra.mxu1 %v1834_v53  ;;  %v968_v13 = vpop.f32.mrf.mxu0 }
 0x17e   : > { %v8799_v56 = vadd.f32 %v968_v13, %v8624_v16 }
 0x17f   : > { %1947 = vmatpush.msra.mxu1 %v1833_v55 }
 0x181   : > { %1948 = vmatpush.msra.mxu1 %v1832_v57 }
 0x182   : > { %1060 = vadd.xlane.f32.xlu0 %v1059_v49  ;;  %v8794_v49 = vperm.slane %v8620_v14, 2 }
 0x183   : > { %1949 = vmatpush.msra.mxu1 %v1831_v58  ;;  %v796_v58 = vld [vmem:[%s8595_s23 + $0xc8] sm:$0xff] }
 0x184   : > { %7212 = vmatmul.msk.f32.gmra.mxu0 %vm809_vm0, %v796_v58 }
 0x185   : > { %1950 = vmatpush.msra.mxu1 %v1830_v59  ;;  %v971_v44 = vpop.f32.mrf.mxu0 }
 0x1bd   : > { %v1221_v61 = vpop.xlane.xlu0 %1220 }
 0x1be   : > { %v1315_v63 = vmul.f32 %v1221_v61, %v8663_v50 }
 0x1c0   : > { %v1347_v2 = vadd.f32 1e-05, %v1315_v63 }
 0x1c2   : > { %7413 = vrsqrt.f32 %v1347_v2  ;;  %vm1385_vm4 = vweird.f32 %v1347_v2 }
 0x1c5   : > { %v1224_v3 = vpop.xlane.xlu2 %1223  ;;  %v1043_v4 = vpop.xlane.xlu0 %1042 }
 0x1c6   : > { %v1316_v6 = vmul.f32 %v1224_v3, %v8663_v50  ;;  %v1130_v8 = vmul.f32 %v8663_v50, %v1043_v4  ;;  %v1065_v4 = vsel %vm1019_vm1, %v8799_v56, 0.0 }
 0x1c8   : > { %v7414_v10 = vpop.eup %7413  ;;  %v1348_v11 = vadd.f32 1e-05, %v1316_v6  ;;  %v8766_v12 = vsub.f32 %v8675_v60, %v1130_v8  ;;  %v8774_v60 = vadd.f32 %v965_v0, %v8624_v16 }
 0x1c9   : > { %v1380_v15 = vmul.f32 %v7414_v10, %v1347_v2  ;;  %vm1386_vm3 = vweird.f32 %v7414_v10 }
 0x1ca   : > { %7415 = vrsqrt.f32 %v1348_v11  ;;  %v1194_v19 = vmul.f32 %v8766_v12, %v8766_v12  ;;  %vm1387_vm5 = vmor %vm1385_vm4, %vm1386_vm3  ;;  %v1062_v42 = vsel %vm1019_vm1, %v8774_v60, 0.0  ;;  %vm1395_vm7 = vweird.f32 %v1348_v11 }
 0x1cb   : > { %v1381_v20 = vmul.f32 %v7414_v10, %v1380_v15 }
 0x1cc   : > { %v1240_v21 = vsel %vm1019_vm1, %v1194_v19, 0.0 }
 0x1cd   : > { %v1382_v22 = vmul.f32 0.5, %v1381_v20  ;;  %v1227_v23 = vpop.xlane.xlu1 %1226  ;;  %v1046_v24 = vpop.xlane.xlu2 %1045  ;;  %1241 = vadd.xlane.f32.xlu2 %v1240_v21  ;;  %v8822_v21 = vadd.f32 %v971_v44, %v8624_v16 }
 0x1ce   : > { %v1317_v26 = vmul.f32 %v1227_v23, %v8663_v50  ;;  %v1131_v28 = vmul.f32 %v8663_v50, %v1046_v24  ;;  %v797_v23 = vld [vmem:[%s8595_s23 + $0xd0] sm:$0xff] }
 0x1cf   : > { %v1383_v30 = vsub.f32 1.5, %v1382_v22  ;;  %7213 = vmatmul.msk.f32.gmra.mxu0 %vm809_vm0, %v797_v23 }
 0x1d0   : > { %v7416_v31 = vpop.eup %7415  ;;  %v8778_v32 = vadd.f32 1e-05, %v1317_v26  ;;  %v8781_v33 = vsub.f32 %v8688_v5, %v1131_v28 }
 0x1d1   : > { %v1384_v37 = vmul.f32 %v7414_v10, %v1383_v30  ;;  %v1390_v38 = vmul.f32 %v7416_v31, %v1348_v11  ;;  %vm1396_vm6 = vweird.f32 %v7416_v31 }
 0x1d2   : > { %7417 = vrsqrt.f32 %v8778_v32  ;;  %v1195_v41 = vmul.f32 %v8781_v33, %v8781_v33  ;;  %vm1397_vm8 = vmor %vm1395_vm7, %vm1396_vm6  ;;  %vm1405_vm10 = vweird.f32 %v8778_v32 }
 0x1d3   : > { %v1391_v45 = vmul.f32 %v7416_v31, %v1390_v38  ;;  %v1388_v5 = vsel %vm1387_vm5, %v7414_v10, %v1384_v37  ;;  %v974_v10 = vpop.f32.mrf.mxu0  ;;  %v1068_v38 = vsel %vm1019_vm1, %v8822_v21, 0.0 }
 0x1d4   : > { %v1243_v46 = vsel %vm1019_vm1, %v1195_v41, 0.0  ;;  %v1699_v47 = vmul.f32 %v1388_v5, %v8668_v54 }
 0x1d5   : > { %v1392_v39 = vmul.f32 0.5, %v1391_v45  ;;  %v1049_v51 = vpop.xlane.xlu1 %1048  ;;  %1244 = vadd.xlane.f32.xlu1 %v1243_v46  ;;  %1063 = vadd.xlane.f32.xlu2 %v1062_v42  ;;  %v1230_v52 = vpop.xlane.xlu0 %1229 }
 0x1d6   : > { %v1132_v53 = vmul.f32 %v8663_v50, %v1049_v51  ;;  %v1318_v55 = vmul.f32 %v1230_v52, %v8663_v50  ;;  %v1732_v57 = vmul.f32 %v8784_v40, %v1699_v47  ;;  %v798_v47 = vld [vmem:[%s8595_s23 + $0xd8] sm:$0xff]  ;;  %v8847_v52 = vadd.f32 %v974_v10, %v8624_v16 }
 0x1d7   : > { %v1393_v59 = vsub.f32 1.5, %v1392_v39  ;;  %7214 = vmatmul.msk.f32.gmra.mxu0 %vm809_vm0, %v798_v47 }
 0x1d8   : > { %v7418_v14 = vpop.eup %7417  ;;  %v8805_v54 = vsub.f32 %v8702_v17, %v1132_v53  ;;  %v8807_v61 = vadd.f32 1e-05, %v1318_v55  ;;  %v1765_v63 = vadd.f32 %v8794_v49, %v1732_v57 }
 0x1d9   : > { %v1394_v0 = vmul.f32 %v7416_v31, %v1393_v59  ;;  %v1400_v1 = vmul.f32 %v7418_v14, %v8778_v32  ;;  %vm1406_vm9 = vweird.f32 %v7418_v14 }
 0x1da   : > { %7419 = vrsqrt.f32 %v8807_v61  ;;  %v1797_v2 = vmax.f32 %v1765_v63, 0.0  ;;  %v1196_v3 = vmul.f32 %v8805_v54, %v8805_v54  ;;  %vm1407_vm11 = vmor %vm1405_vm10, %vm1406_vm9  ;;  %vm1415_vm13 = vweird.f32 %v8807_v61 }
 0x1db   : > { %v1401_v17 = vmul.f32 %v7418_v14, %v1400_v1  ;;  %v1398_v6 = vsel %vm1397_vm8, %v7416_v31, %v1394_v0  ;;  %v977_v57 = vpop.f32.mrf.mxu0 }
 0x1dc   : > { %7219 = vmatmul.msk.f32.vlgmr.msra.gmra.mxu1 %vm1019_vm1, %v1797_v2  ;;  %v1246_v8 = vsel %vm1019_vm1, %v1196_v3, 0.0  ;;  %v1700_v9 = vmul.f32 %v1398_v6, %v8679_v62  ;;  %v1071_v3 = vsel %vm1019_vm1, %v8847_v52, 0.0 }
 0x1dd   : > { %v1402_v11 = vmul.f32 0.5, %v1401_v17  ;;  %1247 = vadd.xlane.f32.xlu0 %v1246_v8  ;;  %1066 = vadd.xlane.f32.xlu1 %v1065_v4  ;;  %v1233_v13 = vpop.xlane.xlu2 %1232  ;;  %v1052_v15 = vpop.xlane.xlu0 %1051 }
 0x1de   : > { %v1319_v19 = vmul.f32 %v1233_v13, %v8663_v50  ;;  %v1133_v20 = vmul.f32 %v8663_v50, %v1052_v15  ;;  %v1733_v22 = vmul.f32 %v8784_v40, %v1700_v9  ;;  %v8867_v13 = vadd.f32 %v977_v57, %v8624_v16 }
 0x1df   : > { %v1403_v24 = vsub.f32 1.5, %v1402_v11 }
 0x1e0   : > { %v7420_v62 = vpop.eup %7419  ;;  %v8827_v26 = vadd.f32 1e-05, %v1319_v19  ;;  %v8830_v28 = vsub.f32 %v8716_v25, %v1133_v20  ;;  %v1766_v29 = vadd.f32 %v8794_v49, %v1733_v22 }
 0x1e1   : > { %v1404_v30 = vmul.f32 %v7418_v14, %v1403_v24  ;;  %v1410_v31 = vmul.f32 %v7420_v62, %v8807_v61  ;;  %vm1416_vm12 = vweird.f32 %v7420_v62 }
 0x1e2   : > { %7421 = vrsqrt.f32 %v8827_v26  ;;  %v1798_v37 = vmax.f32 %v1766_v29, 0.0  ;;  %v1197_v41 = vmul.f32 %v8830_v28, %v8830_v28  ;;  %vm1417_vm14 = vmor %vm1415_vm13, %vm1416_vm12  ;;  %vm1425_vm2 = vweird.f32 %v8827_v26 }
 0x1e3   : > { %v1411_v25 = vmul.f32 %v7420_v62, %v1410_v31  ;;  %v1408_v42 = vsel %vm1407_vm11, %v7418_v14, %v1404_v30  ;;  %v980_v29 = vpop.f32.mrf.mxu0 }
 0x1e4   : > { %7220 = vmatmul.msk.f32.gmra.mxu1 %vm1019_vm1, %v1798_v37  ;;  %v1249_v44 = vsel %vm1019_vm1, %v1197_v41, 0.0  ;;  %v1701_v32 = vmul.f32 %v1408_v42, %v8692_v7  ;;  %v1074_v37 = vsel %vm1019_vm1, %v8867_v13, 0.0 }
 0x1e5   : > { %v1412_v45 = vmul.f32 0.5, %v1411_v25  ;;  %v1236_v5 = vpop.xlane.xlu1 %1235  ;;  %1069 = vadd.xlane.f32.xlu0 %v1068_v38  ;;  %v1055_v46 = vpop.xlane.xlu2 %1054  ;;  %1250 = vadd.xlane.f32.xlu2 %v1249_v44 }
 0x1e6   : > { %v1320_v39 = vmul.f32 %v1236_v5, %v8663_v50  ;;  %v1134_v51 = vmul.f32 %v8663_v50, %v1055_v46  ;;  %v1734_v53 = vmul.f32 %v8784_v40, %v1701_v32  ;;  %v8884_v32 = vadd.f32 %v980_v29, %v8624_v16 }
 0x1e7   : > { %v1413_v55 = vsub.f32 1.5, %v1412_v45 }
 0x1e8   : > { %v7422_v7 = vpop.eup %7421  ;;  %v1352_v58 = vadd.f32 1e-05, %v1320_v39  ;;  %v8852_v59 = vsub.f32 %v8729_v34, %v1134_v51  ;;  %v1767_v14 = vadd.f32 %v8794_v49, %v1734_v53 }
 0x1e9   : > { %v1414_v63 = vmul.f32 %v7420_v62, %v1413_v55  ;;  %v1420_v0 = vmul.f32 %v7422_v7, %v8827_v26  ;;  %vm1426_vm15 = vweird.f32 %v7422_v7  ;;  %v1077_v55 = vsel %vm1019_vm1, %v8884_v32, 0.0 }
 0x1ea   : > { %7423 = vrsqrt.f32 %v1352_v58  ;;  %v1799_v1 = vmax.f32 %v1767_v14, 0.0  ;;  %v1198_v2 = vmul.f32 %v8852_v59, %v8852_v59  ;;  %vm1427_vm3 = vmor %vm1425_vm2, %vm1426_vm15  ;;  %vm1435_vm5 = vweird.f32 %v1352_v58 }
 0x1eb   : > { %v1421_v4 = vmul.f32 %v7422_v7, %v1420_v0  ;;  %v1418_v17 = vsel %vm1417_vm14, %v7420_v62, %v1414_v63  ;;  %v983_v14 = vpop.f32.mrf.mxu0 }
 0x1ec   : > { %7221 = vmatmul.msk.f32.gmra.mxu1 %vm1019_vm1, %v1799_v1  ;;  %v1252_v34 = vsel %vm1019_vm1, %v1198_v2, 0.0  ;;  %v1702_v6 = vmul.f32 %v1418_v17, %v8706_v18 }
 0x1ed   : > { %v1422_v61 = vmul.f32 0.5, %v1421_v4  ;;  %v1058_v8 = vpop.xlane.xlu1 %1057  ;;  %1253 = vadd.xlane.f32.xlu1 %v1252_v34  ;;  %1072 = vadd.xlane.f32.xlu2 %v1071_v3  ;;  %v1239_v9 = vpop.xlane.xlu0 %1238 }
 0x1ee   : > { %v1135_v10 = vmul.f32 %v8663_v50, %v1058_v8  ;;  %v1321_v11 = vmul.f32 %v1239_v9, %v8663_v50  ;;  %v1735_v15 = vmul.f32 %v8784_v40, %v1702_v6 }
 0x1ef   : > { %v1423_v19 = vsub.f32 1.5, %v1422_v61 }
 0x1f0   : > { %v7424_v20 = vpop.eup %7423  ;;  %v8871_v22 = vsub.f32 %v8741_v43, %v1135_v10  ;;  %v1353_v18 = vadd.f32 1e-05, %v1321_v11  ;;  %v1768_v23 = vadd.f32 %v8794_v49, %v1735_v15  ;;  %v799_v11 = vld [vmem:[%s8595_s23 + $0xe0] sm:$0xff] }
 0x1f1   : > { %v1424_v24 = vmul.f32 %v7422_v7, %v1423_v19  ;;  %v1430_v62 = vmul.f32 %v7424_v20, %v1352_v58  ;;  %vm1436_vm4 = vweird.f32 %v7424_v20  ;;  %v8899_v58 = vadd.f32 %v983_v14, %v8624_v16  ;;  %7215 = vmatmul.msk.f32.gmra.mxu0 %vm809_vm0, %v799_v11 }
 0x1f2   : > { %7425 = vrsqrt.f32 %v1353_v18  ;;  %v1800_v30 = vmax.f32 %v1768_v23, 0.0  ;;  %v1199_v31 = vmul.f32 %v8871_v22, %v8871_v22  ;;  %vm1437_vm6 = vmor %vm1435_vm5, %vm1436_vm4  ;;  %vm1445_vm8 = vweird.f32 %v1353_v18 }
 0x1f3   : > { %v1431_v38 = vmul.f32 %v7424_v20, %v1430_v62  ;;  %v1428_v43 = vsel %vm1427_vm3, %v7422_v7, %v1424_v24 }
 0x1f4   : > { %7222 = vmatmul.msk.f32.gmra.mxu1 %vm1019_vm1, %v1800_v30  ;;  %v1255_v41 = vsel %vm1019_vm1, %v1199_v31, 0.0  ;;  %v1703_v25 = vmul.f32 %v1428_v43, %v8720_v27  ;;  %v801_v30 = vld [vmem:[%s8595_s23 + $0xf0] sm:$0xff] }
 0x1f5   : > { %v1432_v26 = vmul.f32 0.5, %v1431_v38  ;;  %1256 = vadd.xlane.f32.xlu0 %v1255_v41  ;;  %1075 = vadd.xlane.f32.xlu1 %v1074_v37  ;;  %v1061_v42 = vpop.xlane.xlu0 %1060 }
 0x1f6   : > { %v1136_v44 = vmul.f32 %v8663_v50, %v1061_v42  ;;  %v1736_v45 = vmul.f32 %v8784_v40, %v1703_v25 }
 0x1f7   : > { %v1433_v5 = vsub.f32 1.5, %v1432_v26 }
 0x1f8   : > { %v7426_v46 = vpop.eup %7425  ;;  %v8888_v47 = vsub.f32 %v8752_v48, %v1136_v44  ;;  %v1769_v39 = vadd.f32 %v8794_v49, %v1736_v45 }
 0x1f9   : > { %v1434_v27 = vmul.f32 %v7424_v20, %v1433_v5  ;;  %v1440_v51 = vmul.f32 %v7426_v46, %v1353_v18  ;;  %vm1446_vm7 = vweird.f32 %v7426_v46  ;;  %v800_v18 = vld [vmem:[%s8595_s23 + $0xe8] sm:$0xff] }
 0x1fa   : > { %v1801_v53 = vmax.f32 %v1769_v39, 0.0  ;;  %v1200_v57 = vmul.f32 %v8888_v47, %v8888_v47  ;;  %vm1447_vm9 = vmor %vm1445_vm8, %vm1446_vm7  ;;  %7216 = vmatmul.msk.f32.gmra.mxu0 %vm809_vm0, %v800_v18 }
 0x1fb   : > { %v1441_v7 = vmul.f32 %v7426_v46, %v1440_v51  ;;  %v1438_v63 = vsel %vm1437_vm6, %v7424_v20, %v1434_v27  ;;  %v986_v20 = vpop.f32.mrf.mxu0  ;;  %v802_v27 = vld [vmem:[%s8595_s23 + $0xf8] sm:$0xff]  ;;  %s7182_s23 = sshll.u32 %s739_s29, 8 }
 0x1fc   : > { %7223 = vmatmul.msk.f32.gmra.mxu1 %vm1019_vm1, %v1801_v53  ;;  %v1258_v48 = vsel %vm1019_vm1, %v1200_v57, 0.0  ;;  %v1704_v0 = vmul.f32 %v1438_v63, %v8732_v35  ;;  %v1080_v35 = vsel %vm1019_vm1, %v8899_v58, 0.0  ;;  %s11286_s21 = scalar_lea.vmem [#allocation17], %s7182_s23  ;;  %s13141_s23 = sld [smem:[#allocation53_spill]] }
 0x1fd   : > { %v1442_v1 = vmul.f32 0.5, %v1441_v7  ;;  %1078 = vadd.xlane.f32.xlu0 %v1077_v55  ;;  %1259 = vadd.xlane.f32.xlu2 %v1258_v48  ;;  %s6982_s7 = sshll.u32 %s11286_s21, 4  ;;  %s6983_s7 = int_to_ptr.vmem [resolvable:$true] %s6982_s7 }
 0x1fe   : > { %v1737_v2 = vmul.f32 %v8784_v40, %v1704_v0 }
 0x1ff   : > { %v1443_v3 = vsub.f32 1.5, %v1442_v1 }
 0x200   : > { %v1770_v4 = vadd.f32 %v8794_v49, %v1737_v2 }
 0x201   : > { %v1444_v17 = vmul.f32 %v7426_v46, %v1443_v3 }
 0x202   : > { %v1802_v34 = vmax.f32 %v1770_v4, 0.0  ;;  %7217 = vmatmul.msk.f32.gmra.mxu0 %vm809_vm0, %v801_v30  ;;  %s12731_s24 = scalar_lea.vmem %s13141_s23, %s7184_s27 }
 0x203   : > { %v1448_v6 = vsel %vm1447_vm9, %v7426_v46, %v1444_v17  ;;  %v989_v43 = vpop.f32.mrf.mxu0 }
 0x204   : > { %7224 = vmatmul.msk.f32.gmra.mxu1 %vm1019_vm1, %v1802_v34  ;;  %v1705_v61 = vmul.f32 %v1448_v6, %v8744_v36 }
 0x205   : > { %1081 = vadd.xlane.f32.xlu2 %v1080_v35 }
 0x206   : > { %v1738_v8 = vmul.f32 %v8784_v40, %v1705_v61  ;;  %v8944_v61 = vadd.f32 %v989_v43, %v8624_v16 }
 0x208   : > { %v1771_v9 = vadd.f32 %v8794_v49, %v1738_v8 }
 0x20a   : > { %v1803_v10 = vmax.f32 %v1771_v9, 0.0  ;;  %7218 = vmatmul.msk.f32.gmra.mxu0 %vm809_vm0, %v802_v27 }
 0x20b   : > { %v992_v0 = vpop.f32.mrf.mxu0 }
 0x20c   : > { %7225 = vmatmul.msk.f32.gmra.mxu1 %vm1019_vm1, %v1803_v10 }
 0x213   : > { %v995_v30 = vpop.f32.mrf.mxu0 }
 0x240   : > { %v1242_v15 = vpop.xlane.xlu2 %1241 }
 0x241   : > { %v1322_v19 = vmul.f32 %v1242_v15, %v8663_v50 }
 0x243   : > { %v1354_v36 = vadd.f32 1e-05, %v1322_v19 }
 0x245   : > { %7427 = vrsqrt.f32 %v1354_v36  ;;  %vm1455_vm11 = vweird.f32 %v1354_v36 }
 0x248   : > { %v1245_v23 = vpop.xlane.xlu1 %1244  ;;  %v1064_v24 = vpop.xlane.xlu2 %1063 }
 0x249   : > { %v1323_v62 = vmul.f32 %v1245_v23, %v8663_v50  ;;  %v1137_v29 = vmul.f32 %v8663_v50, %v1064_v24 }
 0x24b   : > { %v7428_v31 = vpop.eup %7427  ;;  %v1355_v37 = vadd.f32 1e-05, %v1323_v62  ;;  %v8920_v38 = vsub.f32 %v8774_v60, %v1137_v29  ;;  %v8928_v60 = vadd.f32 %v986_v20, %v8624_v16 }
 0x24c   : > { %v1450_v41 = vmul.f32 %v7428_v31, %v1354_v36  ;;  %vm1456_vm10 = vweird.f32 %v7428_v31  ;;  %v1086_v36 = vsel %vm1019_vm1, %v8944_v61, 0.0 }
 0x24d   : > { %7429 = vrsqrt.f32 %v1355_v37  ;;  %v1201_v25 = vmul.f32 %v8920_v38, %v8920_v38  ;;  %vm1457_vm12 = vmor %vm1455_vm11, %vm1456_vm10  ;;  %v1083_v48 = vsel %vm1019_vm1, %v8928_v60, 0.0  ;;  %vm1465_vm13 = vweird.f32 %v1355_v37 }
 0x24e   : > { %v1451_v26 = vmul.f32 %v7428_v31, %v1450_v41 }
 0x24f   : > { %v1261_v42 = vsel %vm1019_vm1, %v1201_v25, 0.0 }
 0x250   : > { %v1452_v44 = vmul.f32 0.5, %v1451_v26  ;;  %v1067_v45 = vpop.xlane.xlu1 %1066  ;;  %1262 = vadd.xlane.f32.xlu1 %v1261_v42  ;;  %v1248_v5 = vpop.xlane.xlu0 %1247  ;;  %v8964_v26 = vadd.f32 %v992_v0, %v8624_v16 }
 0x251   : > { %v1138_v46 = vmul.f32 %v8663_v50, %v1067_v45  ;;  %v1324_v39 = vmul.f32 %v1248_v5, %v8663_v50 }
 0x252   : > { %v1453_v51 = vsub.f32 1.5, %v1452_v44 }
 0x253   : > { %v7430_v53 = vpop.eup %7429  ;;  %v8933_v55 = vsub.f32 %v8799_v56, %v1138_v46  ;;  %v1356_v57 = vadd.f32 1e-05, %v1324_v39 }
 0x254   : > { %v1454_v7 = vmul.f32 %v7428_v31, %v1453_v51  ;;  %v1460_v14 = vmul.f32 %v7430_v53, %v1355_v37  ;;  %vm1466_vm0 = vweird.f32 %v7430_v53 }
 0x255   : > { %7431 = vrsqrt.f32 %v1356_v57  ;;  %v1202_v63 = vmul.f32 %v8933_v55, %v8933_v55  ;;  %vm1467_vm14 = vmor %vm1465_vm13, %vm1466_vm0  ;;  %vm1475_vm2 = vweird.f32 %v1356_v57 }
 0x256   : > { %v1461_v1 = vmul.f32 %v7430_v53, %v1460_v14  ;;  %v1458_v2 = vsel %vm1457_vm12, %v7428_v31, %v1454_v7  ;;  %v1089_v7 = vsel %vm1019_vm1, %v8964_v26, 0.0 }
 0x257   : > { %v1264_v3 = vsel %vm1019_vm1, %v1202_v63, 0.0  ;;  %v1706_v56 = vmul.f32 %v1458_v2, %v8766_v12 }
 0x258   : > { %v1462_v4 = vmul.f32 0.5, %v1461_v1  ;;  %1265 = vadd.xlane.f32.xlu0 %v1264_v3  ;;  %1084 = vadd.xlane.f32.xlu1 %v1083_v48  ;;  %v1251_v17 = vpop.xlane.xlu2 %1250  ;;  %v1070_v34 = vpop.xlane.xlu0 %1069 }
 0x259   : > { %v1325_v35 = vmul.f32 %v1251_v17, %v8663_v50  ;;  %v1139_v6 = vmul.f32 %v8663_v50, %v1070_v34  ;;  %v1739_v8 = vmul.f32 %v8784_v40, %v1706_v56  ;;  %v8985_v56 = vadd.f32 %v995_v30, %v8624_v16  ;;  %v998_v34 = vpop.f32.mrf.mxu0 }
 0x25a   : > { %v1463_v9 = vsub.f32 1.5, %v1462_v4  ;;  %v9004_v30 = vadd.f32 %v998_v34, %v8624_v16 }
 0x25b   : > { %v7432_v10 = vpop.eup %7431  ;;  %v8947_v11 = vadd.f32 1e-05, %v1325_v35  ;;  %v8950_v12 = vsub.f32 %v8822_v21, %v1139_v6  ;;  %v1772_v15 = vadd.f32 %v8794_v49, %v1739_v8 }
 0x25c   : > { %v1464_v19 = vmul.f32 %v7430_v53, %v1463_v9  ;;  %v1470_v20 = vmul.f32 %v7432_v10, %v1356_v57  ;;  %vm1476_vm15 = vweird.f32 %v7432_v10 }
 0x25d   : > { %7433 = vrsqrt.f32 %v8947_v11  ;;  %v1804_v18 = vmax.f32 %v1772_v15, 0.0  ;;  %v1203_v23 = vmul.f32 %v8950_v12, %v8950_v12  ;;  %vm1477_vm3 = vmor %vm1475_vm2, %vm1476_vm15  ;;  %vm1485_vm5 = vweird.f32 %v8947_v11 }
 0x25e   : > { %v1471_v24 = vmul.f32 %v7432_v10, %v1470_v20  ;;  %v1468_v62 = vsel %vm1467_vm14, %v7430_v53, %v1464_v19  ;;  %v1092_v20 = vsel %vm1019_vm1, %v8985_v56, 0.0 }
 0x25f   : > { %7226 = vmatmul.msk.f32.gmra.mxu1 %vm1019_vm1, %v1804_v18  ;;  %v1267_v21 = vsel %vm1019_vm1, %v1203_v23, 0.0  ;;  %v1707_v29 = vmul.f32 %v1468_v62, %v8781_v33 }
 0x260   : > { %v1472_v31 = vmul.f32 0.5, %v1471_v24  ;;  %1087 = vadd.xlane.f32.xlu0 %v1086_v36  ;;  %v1254_v37 = vpop.xlane.xlu1 %1253  ;;  %v1073_v43 = vpop.xlane.xlu2 %1072  ;;  %1268 = vadd.xlane.f32.xlu2 %v1267_v21 }
 0x261   : > { %v1326_v41 = vmul.f32 %v1254_v37, %v8663_v50  ;;  %v1140_v25 = vmul.f32 %v8663_v50, %v1073_v43  ;;  %v1740_v42 = vmul.f32 %v8784_v40, %v1707_v29 }
 0x262   : > { %v1473_v44 = vsub.f32 1.5, %v1472_v31 }
 0x263   : > { %v7434_v45 = vpop.eup %7433  ;;  %v8967_v5 = vadd.f32 1e-05, %v1326_v41  ;;  %v8970_v33 = vsub.f32 %v8847_v52, %v1140_v25  ;;  %v1773_v46 = vadd.f32 %v8794_v49, %v1740_v42 }
 0x264   : > { %v1474_v39 = vmul.f32 %v7432_v10, %v1473_v44  ;;  %v1480_v27 = vmul.f32 %v7434_v45, %v8947_v11  ;;  %vm1486_vm4 = vweird.f32 %v7434_v45 }
 0x265   : > { %7435 = vrsqrt.f32 %v8967_v5  ;;  %v1805_v51 = vmax.f32 %v1773_v46, 0.0  ;;  %v1204_v53 = vmul.f32 %v8970_v33, %v8970_v33  ;;  %vm1487_vm6 = vmor %vm1485_vm5, %vm1486_vm4  ;;  %vm1495_vm8 = vweird.f32 %v8967_v5 }
 0x266   : > { %v1481_v14 = vmul.f32 %v7434_v45, %v1480_v27  ;;  %v1478_v63 = vsel %vm1477_vm3, %v7432_v10, %v1474_v39  ;;  %v1095_v39 = vsel %vm1019_vm1, %v9004_v30, 0.0 }
 0x267   : > { %7227 = vmatmul.msk.f32.gmra.mxu1 %vm1019_vm1, %v1805_v51  ;;  %v1270_v52 = vsel %vm1019_vm1, %v1204_v53, 0.0  ;;  %v1708_v57 = vmul.f32 %v1478_v63, %v8805_v54 }
 0x268   : > { %v1482_v48 = vmul.f32 0.5, %v1481_v14  ;;  %v1076_v0 = vpop.xlane.xlu1 %1075  ;;  %1271 = vadd.xlane.f32.xlu1 %v1270_v52  ;;  %1090 = vadd.xlane.f32.xlu2 %v1089_v7  ;;  %v1257_v1 = vpop.xlane.xlu0 %1256 }
 0x269   : > { %v1141_v2 = vmul.f32 %v8663_v50, %v1076_v0  ;;  %v1327_v3 = vmul.f32 %v1257_v1, %v8663_v50  ;;  %v1741_v4 = vmul.f32 %v8784_v40, %v1708_v57 }
 0x26a   : > { %v1483_v17 = vsub.f32 1.5, %v1482_v48 }
 0x26b   : > { %v7436_v35 = vpop.eup %7435  ;;  %v8989_v54 = vsub.f32 %v8867_v13, %v1141_v2  ;;  %v1359_v6 = vadd.f32 1e-05, %v1327_v3  ;;  %v1774_v8 = vadd.f32 %v8794_v49, %v1741_v4 }
 0x26c   : > { %v1484_v9 = vmul.f32 %v7434_v45, %v1483_v17  ;;  %v1490_v10 = vmul.f32 %v7436_v35, %v8967_v5  ;;  %vm1496_vm7 = vweird.f32 %v7436_v35 }
 0x26d   : > { %7437 = vrsqrt.f32 %v1359_v6  ;;  %v1806_v15 = vmax.f32 %v1774_v8, 0.0  ;;  %v1205_v19 = vmul.f32 %v8989_v54, %v8989_v54  ;;  %vm1497_vm9 = vmor %vm1495_vm8, %vm1496_vm7  ;;  %vm1505_vm11 = vweird.f32 %v1359_v6 }
 0x26e   : > { %v1491_v18 = vmul.f32 %v7436_v35, %v1490_v10  ;;  %v1488_v13 = vsel %vm1487_vm6, %v7434_v45, %v1484_v9  ;;  %v1001_v45 = vpop.f32.mrf.mxu0 }
 0x26f   : > { %7228 = vmatmul.msk.f32.gmra.mxu1 %vm1019_vm1, %v1806_v15  ;;  %v1273_v36 = vsel %vm1019_vm1, %v1205_v19, 0.0  ;;  %v1709_v23 = vmul.f32 %v1488_v13, %v8830_v28  ;;  %v9021_v52 = vadd.f32 %v1001_v45, %v8624_v16 }
 0x270   : > { %v1492_v11 = vmul.f32 0.5, %v1491_v18  ;;  %1274 = vadd.xlane.f32.xlu0 %v1273_v36  ;;  %1093 = vadd.xlane.f32.xlu1 %v1092_v20  ;;  %v1260_v24 = vpop.xlane.xlu2 %1259  ;;  %v1079_v62 = vpop.xlane.xlu0 %1078 }
 0x271   : > { %v1328_v21 = vmul.f32 %v1260_v24, %v8663_v50  ;;  %v1142_v29 = vmul.f32 %v8663_v50, %v1079_v62  ;;  %v1742_v31 = vmul.f32 %v8784_v40, %v1709_v23  ;;  %v1098_v34 = vsel %vm1019_vm1, %v9021_v52, 0.0 }
 0x272   : > { %v1493_v37 = vsub.f32 1.5, %v1492_v11 }
 0x273   : > { %v7438_v43 = vpop.eup %7437  ;;  %v1360_v41 = vadd.f32 1e-05, %v1328_v21  ;;  %v9008_v28 = vsub.f32 %v8884_v32, %v1142_v29  ;;  %v1775_v25 = vadd.f32 %v8794_v49, %v1742_v31 }
 0x274   : > { %v1494_v42 = vmul.f32 %v7436_v35, %v1493_v37  ;;  %v1500_v44 = vmul.f32 %v7438_v43, %v1359_v6  ;;  %vm1506_vm10 = vweird.f32 %v7438_v43 }
 0x275   : > { %7439 = vrsqrt.f32 %v1360_v41  ;;  %v1807_v46 = vmax.f32 %v1775_v25, 0.0  ;;  %v1206_v27 = vmul.f32 %v9008_v28, %v9008_v28  ;;  %vm1507_vm12 = vmor %vm1505_vm11, %vm1506_vm10  ;;  %vm1515_vm13 = vweird.f32 %v1360_v41 }
 0x276   : > { %v1501_v51 = vmul.f32 %v7438_v43, %v1500_v44  ;;  %v1498_v53 = vsel %vm1497_vm9, %v7436_v35, %v1494_v42  ;;  %v1004_v8 = vpop.f32.mrf.mxu0 }
 0x277   : > { %7229 = vmatmul.msk.f32.gmra.mxu1 %vm1019_vm1, %v1807_v46  ;;  %v1276_v32 = vsel %vm1019_vm1, %v1206_v27, 0.0  ;;  %v1710_v7 = vmul.f32 %v1498_v53, %v8852_v59  ;;  %v9036_v6 = vadd.f32 %v1004_v8, %v8624_v16 }
 0x278   : > { %v1502_v5 = vmul.f32 0.5, %v1501_v51  ;;  %1096 = vadd.xlane.f32.xlu0 %v1095_v39  ;;  %v1082_v14 = vpop.xlane.xlu2 %1081  ;;  %1277 = vadd.xlane.f32.xlu2 %v1276_v32 }
 0x279   : > { %v1143_v63 = vmul.f32 %v8663_v50, %v1082_v14  ;;  %v1743_v57 = vmul.f32 %v8784_v40, %v1710_v7  ;;  %v1101_v23 = vsel %vm1019_vm1, %v9036_v6, 0.0 }
 0x27a   : > { %v1503_v48 = vsub.f32 1.5, %v1502_v5 }
 0x27b   : > { %v7440_v0 = vpop.eup %7439  ;;  %v9025_v1 = vsub.f32 %v8899_v58, %v1143_v63  ;;  %v1776_v2 = vadd.f32 %v8794_v49, %v1743_v57 }
 0x27c   : > { %v1504_v59 = vmul.f32 %v7438_v43, %v1503_v48  ;;  %v1510_v3 = vmul.f32 %v7440_v0, %v1360_v41  ;;  %vm1516_vm0 = vweird.f32 %v7440_v0 }
 0x27d   : > { %v1808_v4 = vmax.f32 %v1776_v2, 0.0  ;;  %v1207_v17 = vmul.f32 %v9025_v1, %v9025_v1  ;;  %vm1517_vm14 = vmor %vm1515_vm13, %vm1516_vm0 }
 0x27e   : > { %v1511_v35 = vmul.f32 %v7440_v0, %v1510_v3  ;;  %v1508_v9 = vsel %vm1507_vm12, %v7438_v43, %v1504_v59  ;;  %v1007_v43 = vpop.f32.mrf.mxu0 }
 0x27f   : > { %7230 = vmatmul.msk.f32.gmra.mxu1 %vm1019_vm1, %v1808_v4  ;;  %v1279_v58 = vsel %vm1019_vm1, %v1207_v17, 0.0  ;;  %v1711_v10 = vmul.f32 %v1508_v9, %v8871_v22 }
 0x280   : > { %v1512_v15 = vmul.f32 0.5, %v1511_v35  ;;  %1280 = vadd.xlane.f32.xlu1 %v1279_v58  ;;  %1099 = vadd.xlane.f32.xlu2 %v1098_v34 }
 0x281   : > { %v1744_v19 = vmul.f32 %v8784_v40, %v1711_v10 }
 0x282   : > { %v1513_v20 = vsub.f32 1.5, %v1512_v15 }
 0x283   : > { %v1777_v18 = vadd.f32 %v8794_v49, %v1744_v19 }
 0x284   : > { %v1514_v13 = vmul.f32 %v7440_v0, %v1513_v20 }
 0x285   : > { %v1809_v36 = vmax.f32 %v1777_v18, 0.0 }
 0x286   : > { %v1518_v22 = vsel %vm1517_vm14, %v7440_v0, %v1514_v13  ;;  %v1010_v48 = vpop.f32.mrf.mxu0 }
 0x287   : > { %7231 = vmatmul.msk.f32.gmra.mxu1 %vm1019_vm1, %v1809_v36  ;;  %v1712_v11 = vmul.f32 %v1518_v22, %v8888_v47  ;;  %v9076_v18 = vadd.f32 %v1010_v48, %v8624_v16  ;;  %v1952_v22 = vpop.f32.mrf.mxu1 }
 0x288   : > { %1102 = vadd.xlane.f32.xlu1 %v1101_v23 }
 0x289   : > { %v1745_v24 = vmul.f32 %v8784_v40, %v1712_v11 }
 0x28b   : > { %v1778_v62 = vadd.f32 %v8794_v49, %v1745_v24 }
 0x28d   : > { %v1810_v21 = vmax.f32 %v1778_v62, 0.0 }
 0x28f   : > { %7232 = vmatmul.msk.f32.gmra.mxu1 %vm1019_vm1, %v1810_v21 }
 0x2c3   : > { %v1263_v29 = vpop.xlane.xlu1 %1262 }
 0x2c4   : > { %v1329_v31 = vmul.f32 %v1263_v29, %v8663_v50  ;;  %v1013_v29 = vpop.f32.mrf.mxu0 }
 0x2c6   : > { %v1361_v37 = vadd.f32 1e-05, %v1329_v31 }
 0x2c8   : > { %7441 = vrsqrt.f32 %v1361_v37  ;;  %vm1525_vm2 = vweird.f32 %v1361_v37 }
 0x2cb   : > { %v1085_v41 = vpop.xlane.xlu1 %1084  ;;  %v1266_v25 = vpop.xlane.xlu0 %1265 }
 0x2cc   : > { %v1144_v42 = vmul.f32 %v8663_v50, %v1085_v41  ;;  %v1330_v47 = vmul.f32 %v1266_v25, %v8663_v50 }
 0x2ce   : > { %v7442_v44 = vpop.eup %7441  ;;  %v9051_v45 = vsub.f32 %v8928_v60, %v1144_v42  ;;  %v1362_v46 = vadd.f32 1e-05, %v1330_v47  ;;  %v9059_v60 = vadd.f32 %v1007_v43, %v8624_v16  ;;  %v1107_v43 = vsel %vm1019_vm1, %v9076_v18, 0.0 }
 0x2cf   : > { %v1520_v39 = vmul.f32 %v7442_v44, %v1361_v37  ;;  %vm1526_vm15 = vweird.f32 %v7442_v44 }
 0x2d0   : > { %7443 = vrsqrt.f32 %v1362_v46  ;;  %v1208_v27 = vmul.f32 %v9051_v45, %v9051_v45  ;;  %vm1527_vm3 = vmor %vm1525_vm2, %vm1526_vm15  ;;  %v1104_v17 = vsel %vm1019_vm1, %v9059_v60, 0.0  ;;  %vm1535_vm5 = vweird.f32 %v1362_v46 }
 0x2d1   : > { %v1521_v51 = vmul.f32 %v7442_v44, %v1520_v39  ;;  %v9094_v39 = vld [vmem:[#allocation7] sm:$0x7] }
 0x2d2   : > { %v1282_v53 = vsel %vm1019_vm1, %v1208_v27, 0.0 }
 0x2d3   : > { %v1522_v32 = vmul.f32 0.5, %v1521_v51  ;;  %1283 = vadd.xlane.f32.xlu0 %v1282_v53  ;;  %v1269_v7 = vpop.xlane.xlu2 %1268  ;;  %v1088_v5 = vpop.xlane.xlu0 %1087  ;;  %v9099_v53 = vadd.f32 %v1013_v29, %v8624_v16 }
 0x2d4   : > { %v1331_v14 = vmul.f32 %v1269_v7, %v8663_v50  ;;  %v1145_v63 = vmul.f32 %v8663_v50, %v1088_v5 }
 0x2d5   : > { %v1523_v57 = vsub.f32 1.5, %v1522_v32 }
 0x2d6   : > { %v7444_v0 = vpop.eup %7443  ;;  %v9061_v2 = vadd.f32 1e-05, %v1331_v14  ;;  %v9064_v59 = vsub.f32 %v8944_v61, %v1145_v63 }
 0x2d7   : > { %v1524_v3 = vmul.f32 %v7442_v44, %v1523_v57  ;;  %v1530_v4 = vmul.f32 %v7444_v0, %v1362_v46  ;;  %vm1536_vm4 = vweird.f32 %v7444_v0  ;;  %v9109_v57 = vperm.slane %v9094_v39, 0 }
 0x2d8   : > { %7445 = vrsqrt.f32 %v9061_v2  ;;  %v1209_v34 = vmul.f32 %v9064_v59, %v9064_v59  ;;  %vm1537_vm6 = vmor %vm1535_vm5, %vm1536_vm4  ;;  %vm1545_vm8 = vweird.f32 %v9061_v2 }
 0x2d9   : > { %v1531_v35 = vmul.f32 %v7444_v0, %v1530_v4  ;;  %v1528_v8 = vsel %vm1527_vm3, %v7442_v44, %v1524_v3  ;;  %v1955_v3 = vpop.f32.mrf.mxu1 }
 0x2da   : > { %v1285_v9 = vsel %vm1019_vm1, %v1209_v34, 0.0  ;;  %v1713_v58 = vmul.f32 %v1528_v8, %v8920_v38 }
 0x2db   : > { %v1532_v61 = vmul.f32 0.5, %v1531_v35  ;;  %1105 = vadd.xlane.f32.xlu0 %v1104_v17  ;;  %v1272_v10 = vpop.xlane.xlu1 %1271  ;;  %v1091_v15 = vpop.xlane.xlu2 %1090  ;;  %1286 = vadd.xlane.f32.xlu2 %v1285_v9  ;;  %v1110_v17 = vsel %vm1019_vm1, %v9099_v53, 0.0  ;;  %v9121_v9 = vadd.f32 %v1952_v22, %v9109_v57 }
 0x2dc   : > { %v1332_v19 = vmul.f32 %v1272_v10, %v8663_v50  ;;  %v1146_v20 = vmul.f32 %v8663_v50, %v1091_v15  ;;  %v1746_v13 = vmul.f32 %v8784_v40, %v1713_v58  ;;  %v1016_v35 = vpop.f32.mrf.mxu0 }
 0x2dd   : > { %v1533_v36 = vsub.f32 1.5, %v1532_v61 }
 0x2de   : > { %v7446_v23 = vpop.eup %7445  ;;  %v9079_v11 = vadd.f32 1e-05, %v1332_v19  ;;  %v9082_v38 = vsub.f32 %v8964_v26, %v1146_v20  ;;  %v1779_v24 = vadd.f32 %v8794_v49, %v1746_v13  ;;  %v9128_v13 = vadd.f32 %v1016_v35, %v8624_v16 }
 0x2df   : > { %v1534_v62 = vmul.f32 %v7444_v0, %v1533_v36  ;;  %v1540_v21 = vmul.f32 %v7446_v23, %v9061_v2  ;;  %vm1546_vm7 = vweird.f32 %v7446_v23 }
 0x2e0   : > { %7447 = vrsqrt.f32 %v9079_v11  ;;  %v1811_v31 = vmax.f32 %v1779_v24, 0.0  ;;  %v1210_v37 = vmul.f32 %v9082_v38, %v9082_v38  ;;  %vm1547_vm9 = vmor %vm1545_vm8, %vm1546_vm7  ;;  %vm1555_vm11 = vweird.f32 %v9079_v11 }
 0x2e1   : > { %v1541_v41 = vmul.f32 %v7446_v23, %v1540_v21  ;;  %v1538_v26 = vsel %vm1537_vm6, %v7444_v0, %v1534_v62 }
 0x2e2   : > { %7233 = vmatmul.msk.f32.gmra.mxu1 %vm1019_vm1, %v1811_v31  ;;  %v1288_v25 = vsel %vm1019_vm1, %v1210_v37, 0.0  ;;  %v1714_v42 = vmul.f32 %v1538_v26, %v8933_v55  ;;  %v1113_v31 = vsel %vm1019_vm1, %v9128_v13, 0.0  ;;  %v9143_v26 = vadd.f32 %v1955_v3, %v9109_v57 }
 0x2e3   : > { %v1542_v47 = vmul.f32 0.5, %v1541_v41  ;;  %v1094_v44 = vpop.xlane.xlu1 %1093  ;;  %1289 = vadd.xlane.f32.xlu1 %v1288_v25  ;;  %1108 = vadd.xlane.f32.xlu2 %v1107_v43  ;;  %v1275_v46 = vpop.xlane.xlu0 %1274 }
 0x2e4   : > { %v1147_v27 = vmul.f32 %v8663_v50, %v1094_v44  ;;  %v1333_v51 = vmul.f32 %v1275_v46, %v8663_v50  ;;  %v1747_v32 = vmul.f32 %v8784_v40, %v1714_v42 }
 0x2e5   : > { %v1543_v7 = vsub.f32 1.5, %v1542_v47 }
 0x2e6   : > { %v7448_v5 = vpop.eup %7447  ;;  %v9103_v55 = vsub.f32 %v8985_v56, %v1147_v27  ;;  %v9105_v14 = vadd.f32 1e-05, %v1333_v51  ;;  %v1780_v63 = vadd.f32 %v8794_v49, %v1747_v32 }
 0x2e7   : > { %v1544_v48 = vmul.f32 %v7446_v23, %v1543_v7  ;;  %v1550_v0 = vmul.f32 %v7448_v5, %v9079_v11  ;;  %vm1556_vm10 = vweird.f32 %v7448_v5 }
 0x2e8   : > { %7449 = vrsqrt.f32 %v9105_v14  ;;  %v1812_v4 = vmax.f32 %v1780_v63, 0.0  ;;  %v1211_v56 = vmul.f32 %v9103_v55, %v9103_v55  ;;  %vm1557_vm12 = vmor %vm1555_vm11, %vm1556_vm10  ;;  %vm1565_vm13 = vweird.f32 %v9105_v14 }
 0x2e9   : > { %v1551_v34 = vmul.f32 %v7448_v5, %v1550_v0  ;;  %v1548_v8 = vsel %vm1547_vm9, %v7446_v23, %v1544_v48 }
 0x2ea   : > { %7234 = vmatmul.msk.f32.gmra.mxu1 %vm1019_vm1, %v1812_v4  ;;  %v1291_v2 = vsel %vm1019_vm1, %v1211_v56, 0.0  ;;  %v1715_v58 = vmul.f32 %v1548_v8, %v8950_v12 }
 0x2eb   : > { %v1552_v61 = vmul.f32 0.5, %v1551_v34  ;;  %1292 = vadd.xlane.f32.xlu0 %v1291_v2  ;;  %1111 = vadd.xlane.f32.xlu1 %v1110_v17  ;;  %v1278_v10 = vpop.xlane.xlu2 %1277  ;;  %v1097_v15 = vpop.xlane.xlu0 %1096 }
 0x2ec   : > { %v1334_v19 = vmul.f32 %v1278_v10, %v8663_v50  ;;  %2048 = vadd.xlane.f32.xlu2 %v9121_v9  ;;  %v1148_v20 = vmul.f32 %v8663_v50, %v1097_v15  ;;  %v1748_v36 = vmul.f32 %v8784_v40, %v1715_v58 }
 0x2ed   : > { %v1553_v23 = vsub.f32 1.5, %v1552_v61 }
 0x2ee   : > { %v7450_v22 = vpop.eup %7449  ;;  %v1366_v12 = vadd.f32 1e-05, %v1334_v19  ;;  %v9132_v24 = vsub.f32 %v9004_v30, %v1148_v20  ;;  %v1781_v62 = vadd.f32 %v8794_v49, %v1748_v36  ;;  %v1958_v30 = vpop.f32.mrf.mxu1 }
 0x2ef   : > { %v1554_v21 = vmul.f32 %v7448_v5, %v1553_v23  ;;  %v1560_v29 = vmul.f32 %v7450_v22, %v9105_v14  ;;  %vm1566_vm0 = vweird.f32 %v7450_v22  ;;  %v9159_v17 = vadd.f32 %v1958_v30, %v9109_v57 }
 0x2f0   : > { %7451 = vrsqrt.f32 %v1366_v12  ;;  %v1813_v16 = vmax.f32 %v1781_v62, 0.0  ;;  %v1212_v37 = vmul.f32 %v9132_v24, %v9132_v24  ;;  %vm1567_vm14 = vmor %vm1565_vm13, %vm1566_vm0  ;;  %vm1575_vm2 = vweird.f32 %v1366_v12 }
 0x2f1   : > { %v1561_v43 = vmul.f32 %v7450_v22, %v1560_v29  ;;  %v1558_v41 = vsel %vm1557_vm12, %v7448_v5, %v1554_v21 }
 0x2f2   : > { %7235 = vmatmul.msk.f32.gmra.mxu1 %vm1019_vm1, %v1813_v16  ;;  %v1294_v11 = vsel %vm1019_vm1, %v1212_v37, 0.0  ;;  %v1716_v25 = vmul.f32 %v1558_v41, %v8970_v33 }
 0x2f3   : > { %v1562_v42 = vmul.f32 0.5, %v1561_v43  ;;  %v1281_v47 = vpop.xlane.xlu1 %1280  ;;  %1114 = vadd.xlane.f32.xlu1 %v1113_v31  ;;  %v1100_v44 = vpop.xlane.xlu2 %1099  ;;  %1295 = vadd.xlane.f32.xlu0 %v1294_v11 }
 0x2f4   : > { %v1335_v46 = vmul.f32 %v1281_v47, %v8663_v50  ;;  %v1149_v27 = vmul.f32 %v8663_v50, %v1100_v44  ;;  %2050 = vadd.xlane.f32.xlu2 %v9143_v26  ;;  %v1749_v51 = vmul.f32 %v8784_v40, %v1716_v25 }
 0x2f5   : > { %v1563_v32 = vsub.f32 1.5, %v1562_v42 }
 0x2f6   : > { %v7452_v7 = vpop.eup %7451  ;;  %v1367_v5 = vadd.f32 1e-05, %v1335_v46  ;;  %v9152_v63 = vsub.f32 %v9021_v52, %v1149_v27  ;;  %v1782_v33 = vadd.f32 %v8794_v49, %v1749_v51  ;;  %v1961_v2 = vpop.f32.mrf.mxu1  ;;  %v8346_v27 = vmov 128.0  }
 0x2f7   : > { %v1564_v48 = vmul.f32 %v7450_v22, %v1563_v32  ;;  %v1570_v0 = vmul.f32 %v7452_v7, %v1366_v12  ;;  %vm1576_vm15 = vweird.f32 %v7452_v7  ;;  %v9174_v21 = vadd.f32 %v1961_v2, %v9109_v57 }
 0x2f8   : > { %7453 = vrsqrt.f32 %v1367_v5  ;;  %v1814_v3 = vmax.f32 %v1782_v33, 0.0  ;;  %v1213_v4 = vmul.f32 %v9152_v63, %v9152_v63  ;;  %vm1577_vm3 = vmor %vm1575_vm2, %vm1576_vm15  ;;  %vm1585_vm5 = vweird.f32 %v1367_v5 }
 0x2f9   : > { %v1571_v56 = vmul.f32 %v7452_v7, %v1570_v0  ;;  %v1568_v34 = vsel %vm1567_vm14, %v7450_v22, %v1564_v48  ;;  %7455 = vrcp.f32 %v8346_v27 }
 0x2fa   : > { %7236 = vmatmul.msk.f32.gmra.mxu1 %vm1019_vm1, %v1814_v3  ;;  %v1297_v52 = vsel %vm1019_vm1, %v1213_v4, 0.0  ;;  %v1717_v35 = vmul.f32 %v1568_v34, %v8989_v54 }
 0x2fb   : > { %v1572_v8 = vmul.f32 0.5, %v1571_v56  ;;  %v1103_v14 = vpop.xlane.xlu1 %1102  ;;  %2052 = vadd.xlane.f32.xlu1 %v9159_v17  ;;  %1298 = vadd.xlane.f32.xlu0 %v1297_v52 }
 0x2fc   : > { %v1150_v58 = vmul.f32 %v8663_v50, %v1103_v14  ;;  %v1750_v61 = vmul.f32 %v8784_v40, %v1717_v35 }
 0x2fd   : > { %v1573_v10 = vsub.f32 1.5, %v1572_v8 }
 0x2fe   : > { %v7454_v15 = vpop.eup %7453  ;;  %v9168_v19 = vsub.f32 %v9036_v6, %v1150_v58  ;;  %v1783_v20 = vadd.f32 %v8794_v49, %v1750_v61  ;;  %v1964_v43 = vpop.f32.mrf.mxu1 }
 0x2ff   : > { %v1574_v36 = vmul.f32 %v7452_v7, %v1573_v10  ;;  %v1580_v54 = vmul.f32 %v7454_v15, %v1367_v5  ;;  %vm1586_vm4 = vweird.f32 %v7454_v15  ;;  %v9183_v42 = vadd.f32 %v1964_v43, %v9109_v57  ;;  %v7456_v5 = vpop.eup %7455 }
 0x300   : > { %v1815_v23 = vmax.f32 %v1783_v20, 0.0  ;;  %v1214_v22 = vmul.f32 %v9168_v19, %v9168_v19  ;;  %vm1587_vm6 = vmor %vm1585_vm5, %vm1586_vm4  ;;  %v2113_v48 = vmul.f32 128.0, %v7456_v5  ;;  %vm2117_vm9 = vweird.f32 %v7456_v5 }
 0x301   : > { %v1581_v62 = vmul.f32 %v7454_v15, %v1580_v54  ;;  %v1578_v29 = vsel %vm1577_vm3, %v7452_v7, %v1574_v36 }
 0x302   : > { %7237 = vmatmul.msk.f32.gmra.mxu1 %vm1019_vm1, %v1815_v23  ;;  %v1300_v6 = vsel %vm1019_vm1, %v1214_v22, 0.0  ;;  %v1718_v16 = vmul.f32 %v1578_v29, %v9008_v28  ;;  %v2114_v35 = vsub.f32 1.0, %v2113_v48 }
 0x303   : > { %v1582_v31 = vmul.f32 0.5, %v1581_v62  ;;  %1301 = vadd.xlane.f32.xlu2 %v1300_v6  ;;  %2054 = vadd.xlane.f32.xlu0 %v9174_v21 }
 0x304   : > { %v1751_v12 = vmul.f32 %v8784_v40, %v1718_v16  ;;  %v2115_v61 = vmul.f32 %v7456_v5, %v2114_v35 }
 0x305   : > { %v1583_v37 = vsub.f32 1.5, %v1582_v31 }
 0x306   : > { %v1784_v41 = vadd.f32 %v8794_v49, %v1751_v12  ;;  %v1967_v33 = vpop.f32.mrf.mxu1  ;;  %v2116_v6 = vadd.f32 %v7456_v5, %v2115_v61 }
 0x307   : > { %v1584_v30 = vmul.f32 %v7454_v15, %v1583_v37 }
 0x308   : > { %v1816_v11 = vmax.f32 %v1784_v41, 0.0  ;;  %v9211_v41 = vadd.f32 %v1967_v33, %v9109_v57 }
 0x309   : > { %v1588_v25 = vsel %vm1587_vm6, %v7454_v15, %v1584_v30  ;;  %v9213_v30 = vsel %vm2117_vm9, %v7456_v5, %v2116_v6 }
 0x30a   : > { %7238 = vmatmul.msk.f32.gmra.mxu1 %vm1019_vm1, %v1816_v11  ;;  %v1719_v28 = vmul.f32 %v1588_v25, %v9025_v1 }
 0x30b   : > { %2056 = vadd.xlane.f32.xlu2 %v9183_v42 }
 0x30c   : > { %v1752_v47 = vmul.f32 %v8784_v40, %v1719_v28 }
 0x30e   : > { %v1785_v44 = vadd.f32 %v8794_v49, %v1752_v47 }
 0x310   : > { %v1817_v46 = vmax.f32 %v1785_v44, 0.0 }
 0x312   : > { %7239 = vmatmul.msk.f32.gmra.mxu1 %vm1019_vm1, %v1817_v46 }
 0x346   : > { %v1284_v51 = vpop.xlane.xlu0 %1283 }
 0x347   : > { %v1336_v32 = vmul.f32 %v1284_v51, %v8663_v50 }
 0x349   : > { %v1368_v7 = vadd.f32 1e-05, %v1336_v32 }
 0x34b   : > { %7457 = vrsqrt.f32 %v1368_v7  ;;  %vm1595_vm8 = vweird.f32 %v1368_v7 }
 0x34e   : > { %v1287_v1 = vpop.xlane.xlu2 %1286  ;;  %v1106_v0 = vpop.xlane.xlu0 %1105 }
 0x34f   : > { %v1337_v3 = vmul.f32 %v1287_v1, %v8663_v50  ;;  %v1151_v4 = vmul.f32 %v8663_v50, %v1106_v0 }
 0x351   : > { %v7458_v56 = vpop.eup %7457  ;;  %v1369_v34 = vadd.f32 1e-05, %v1337_v3  ;;  %v9195_v52 = vsub.f32 %v9059_v60, %v1151_v4  ;;  %v1970_v60 = vpop.f32.mrf.mxu1 }
 0x352   : > { %v1590_v8 = vmul.f32 %v7458_v56, %v1368_v7  ;;  %vm1596_vm7 = vweird.f32 %v7458_v56 }
 0x353   : > { %7459 = vrsqrt.f32 %v1369_v34  ;;  %v1215_v14 = vmul.f32 %v9195_v52, %v9195_v52  ;;  %vm1597_vm10 = vmor %vm1595_vm8, %vm1596_vm7  ;;  %vm1605_vm12 = vweird.f32 %v1369_v34 }
 0x354   : > { %v1591_v2 = vmul.f32 %v7458_v56, %v1590_v8 }
 0x355   : > { %v1303_v58 = vsel %vm1019_vm1, %v1215_v14, 0.0 }
 0x356   : > { %v1592_v10 = vmul.f32 0.5, %v1591_v2  ;;  %v1290_v15 = vpop.xlane.xlu1 %1289  ;;  %v1109_v20 = vpop.xlane.xlu2 %1108  ;;  %1304 = vadd.xlane.f32.xlu1 %v1303_v58  ;;  %v9240_v2 = vadd.f32 %v1970_v60, %v9109_v57 }
 0x357   : > { %v1338_v36 = vmul.f32 %v1290_v15, %v8663_v50  ;;  %v1152_v54 = vmul.f32 %v8663_v50, %v1109_v20 }
 0x358   : > { %v1593_v23 = vsub.f32 1.5, %v1592_v10 }
 0x359   : > { %v7460_v22 = vpop.eup %7459  ;;  %v9202_v62 = vadd.f32 1e-05, %v1338_v36  ;;  %v9205_v29 = vsub.f32 %v9076_v18, %v1152_v54  ;;  %v1973_v32 = vpop.f32.mrf.mxu1 }
 0x35a   : > { %v1594_v16 = vmul.f32 %v7458_v56, %v1593_v23  ;;  %v1600_v31 = vmul.f32 %v7460_v22, %v1369_v34  ;;  %vm1606_vm11 = vweird.f32 %v7460_v22 }
 0x35b   : > { %7461 = vrsqrt.f32 %v9202_v62  ;;  %v1216_v12 = vmul.f32 %v9205_v29, %v9205_v29  ;;  %vm1607_vm0 = vmor %vm1605_vm12, %vm1606_vm11  ;;  %vm1615_vm14 = vweird.f32 %v9202_v62 }
 0x35c   : > { %v1598_v37 = vsel %vm1597_vm10, %v7458_v56, %v1594_v16  ;;  %v1601_v43 = vmul.f32 %v7460_v22, %v1600_v31 }
 0x35d   : > { %v1306_v18 = vsel %vm1019_vm1, %v1216_v12, 0.0  ;;  %v1720_v11 = vmul.f32 %v1598_v37, %v9051_v45 }
 0x35e   : > { %v1602_v25 = vmul.f32 0.5, %v1601_v43  ;;  %v1112_v28 = vpop.xlane.xlu1 %1111  ;;  %1307 = vadd.xlane.f32.xlu0 %v1306_v18  ;;  %2058 = vadd.xlane.f32.xlu1 %v9211_v41  ;;  %v1293_v47 = vpop.xlane.xlu0 %1292 }
 0x35f   : > { %v1153_v44 = vmul.f32 %v8663_v50, %v1112_v28  ;;  %v2049_v46 = vpop.xlane.xlu2 %2048  ;;  %v1339_v27 = vmul.f32 %v1293_v47, %v8663_v50  ;;  %v1753_v51 = vmul.f32 %v8784_v40, %v1720_v11  ;;  %v9267_v47 = vadd.f32 %v1973_v32, %v9109_v57 }
 0x360   : > { %v1603_v7 = vsub.f32 1.5, %v1602_v25  ;;  %v2119_v5 = vmul.f32 %v9213_v30, %v2049_v46 }
 0x361   : > { %v7462_v33 = vpop.eup %7461  ;;  %v9223_v45 = vsub.f32 %v9099_v53, %v1153_v44  ;;  %v9225_v48 = vadd.f32 1e-05, %v1339_v27  ;;  %v1786_v1 = vadd.f32 %v8794_v49, %v1753_v51  ;;  %v1976_v31 = vpop.f32.mrf.mxu1 }
 0x362   : > { %v1604_v0 = vmul.f32 %v7460_v22, %v1603_v7  ;;  %v1610_v3 = vmul.f32 %v7462_v33, %v9202_v62  ;;  %v9230_v4 = vsub.f32 %v9121_v9, %v2119_v5  ;;  %vm1616_vm13 = vweird.f32 %v7462_v33 }
 0x363   : > { %7463 = vrsqrt.f32 %v9225_v48  ;;  %v1818_v56 = vmax.f32 %v1786_v1, 0.0  ;;  %v1217_v35 = vmul.f32 %v9223_v45, %v9223_v45  ;;  %vm1617_vm15 = vmor %vm1615_vm14, %vm1616_vm13  ;;  %vm1625_vm3 = vweird.f32 %v9225_v48 }
 0x364   : > { %v1608_v53 = vsel %vm1607_vm0, %v7460_v22, %v1604_v0  ;;  %v1611_v8 = vmul.f32 %v7462_v33, %v1610_v3  ;;  %v2183_v14 = vmul.f32 %v9230_v4, %v9230_v4 }
 0x365   : > { %7240 = vmatmul.msk.f32.gmra.mxu1 %vm1019_vm1, %v1818_v56  ;;  %v1309_v34 = vsel %vm1019_vm1, %v1217_v35, 0.0  ;;  %v1721_v9 = vmul.f32 %v1608_v53, %v9064_v59 }
 0x366   : > { %v1612_v58 = vmul.f32 0.5, %v1611_v8  ;;  %v1115_v61 = vpop.xlane.xlu1 %1114  ;;  %1310 = vadd.xlane.f32.xlu2 %v1309_v34  ;;  %2215 = vadd.xlane.f32.xlu0 %v2183_v14  ;;  %v1296_v10 = vpop.xlane.xlu0 %1295 }
 0x367   : > { %v1154_v15 = vmul.f32 %v8663_v50, %v1115_v61  ;;  %v2051_v20 = vpop.xlane.xlu2 %2050  ;;  %2060 = vadd.xlane.f32.xlu1 %v9240_v2  ;;  %v1340_v36 = vmul.f32 %v1296_v10, %v8663_v50  ;;  %v1754_v54 = vmul.f32 %v8784_v40, %v1721_v9 }
 0x368   : > { %v1613_v23 = vsub.f32 1.5, %v1612_v58  ;;  %v2120_v60 = vmul.f32 %v9213_v30, %v2051_v20 }
 0x369   : > { %v7464_v22 = vpop.eup %7463  ;;  %v9249_v59 = vsub.f32 %v9128_v13, %v1154_v15  ;;  %v9251_v6 = vadd.f32 1e-05, %v1340_v36  ;;  %v1787_v16 = vadd.f32 %v8794_v49, %v1754_v54  ;;  %v1979_v8 = vpop.f32.mrf.mxu1 }
 0x36a   : > { %v1614_v12 = vmul.f32 %v7462_v33, %v1613_v23  ;;  %v1620_v37 = vmul.f32 %v7464_v22, %v9225_v48  ;;  %v9257_v43 = vsub.f32 %v9143_v26, %v2120_v60  ;;  %vm1626_vm2 = vweird.f32 %v7464_v22 }
 0x36b   : > { %7465 = vrsqrt.f32 %v9251_v6  ;;  %v1819_v18 = vmax.f32 %v1787_v16, 0.0  ;;  %v1218_v13 = vmul.f32 %v9249_v59, %v9249_v59  ;;  %vm1627_vm4 = vmor %vm1625_vm3, %vm1626_vm2  ;;  %vm1635_vm6 = vweird.f32 %v9251_v6 }
 0x36c   : > { %v1618_v11 = vsel %vm1617_vm15, %v7462_v33, %v1614_v12  ;;  %v1621_v25 = vmul.f32 %v7464_v22, %v1620_v37  ;;  %v2184_v28 = vmul.f32 %v9257_v43, %v9257_v43 }
 0x36d   : > { %7241 = vmatmul.msk.f32.gmra.mxu1 %vm1019_vm1, %v1819_v18  ;;  %v1312_v62 = vsel %vm1019_vm1, %v1218_v13, 0.0  ;;  %v1722_v26 = vmul.f32 %v1618_v11, %v9082_v38  ;;  %v9299_v13 = vadd.f32 %v1979_v8, %v9109_v57 }
 0x36e   : > { %v1622_v44 = vmul.f32 0.5, %v1621_v25  ;;  %v2053_v46 = vpop.xlane.xlu1 %2052  ;;  %1313 = vadd.xlane.f32.xlu2 %v1312_v62  ;;  %2217 = vadd.xlane.f32.xlu0 %v2184_v28  ;;  %v1299_v27 = vpop.xlane.xlu0 %1298 }
 0x36f   : > { %v2121_v51 = vmul.f32 %v9213_v30, %v2053_v46  ;;  %2062 = vadd.xlane.f32.xlu1 %v9267_v47  ;;  %v1341_v7 = vmul.f32 %v1299_v27, %v8663_v50  ;;  %v1755_v5 = vmul.f32 %v8784_v40, %v1722_v26 }
 0x370   : > { %v1623_v33 = vsub.f32 1.5, %v1622_v44 }
 0x371   : > { %v7466_v1 = vpop.eup %7465  ;;  %v9275_v32 = vsub.f32 %v9159_v17, %v2121_v51  ;;  %v1373_v38 = vadd.f32 1e-05, %v1341_v7  ;;  %v1788_v0 = vadd.f32 %v8794_v49, %v1755_v5  ;;  %v9283_v17 = vadd.f32 %v1976_v31, %v9109_v57  ;;  %v1982_v11 = vpop.f32.mrf.mxu1 }
 0x372   : > { %v1624_v3 = vmul.f32 %v7464_v22, %v1623_v33  ;;  %v1630_v56 = vmul.f32 %v7466_v1, %v9251_v6  ;;  %vm1636_vm5 = vweird.f32 %v7466_v1 }
 0x373   : > { %7467 = vrsqrt.f32 %v1373_v38  ;;  %v1820_v35 = vmax.f32 %v1788_v0, 0.0  ;;  %v2185_v53 = vmul.f32 %v9275_v32, %v9275_v32  ;;  %vm1637_vm7 = vmor %vm1635_vm6, %vm1636_vm5  ;;  %vm1645_vm9 = vweird.f32 %v1373_v38 }
 0x374   : > { %v1628_v14 = vsel %vm1627_vm4, %v7464_v22, %v1624_v3  ;;  %v1631_v34 = vmul.f32 %v7466_v1, %v1630_v56  ;;  %v9313_v0 = vadd.f32 %v1982_v11, %v9109_v57  ;;  %v2798_v11 = vld [vmem:[%s12971_s6 + $0x20] sm:$0xff] }
 0x375   : > { %v1723_v9 = vmul.f32 %v1628_v14, %v9103_v55  ;;  %7242 = vmatmul.msk.f32.gmra.mxu1 %vm1019_vm1, %v1820_v35 }
 0x376   : > { %v1632_v58 = vmul.f32 0.5, %v1631_v34  ;;  %2219 = vadd.xlane.f32.xlu2 %v2185_v53  ;;  %v1302_v48 = vpop.xlane.xlu2 %1301  ;;  %2064 = vadd.xlane.f32.xlu0 %v9283_v17  ;;  %v2055_v61 = vpop.xlane.xlu0 %2054 }
 0x377   : > { %v1342_v10 = vmul.f32 %v1302_v48, %v8663_v50  ;;  %v2122_v15 = vmul.f32 %v9213_v30, %v2055_v61  ;;  %v1756_v20 = vmul.f32 %v8784_v40, %v1723_v9 }
 0x378   : > { %v1633_v36 = vsub.f32 1.5, %v1632_v58 }
 0x379   : > { %v7468_v54 = vpop.eup %7467  ;;  %v1374_v23 = vadd.f32 1e-05, %v1342_v10  ;;  %v9292_v55 = vsub.f32 %v9174_v21, %v2122_v15  ;;  %v1789_v60 = vadd.f32 %v8794_v49, %v1756_v20  ;;  %v1985_v56 = vpop.f32.mrf.mxu1  ;;  %v2809_v10 = vld [vmem:[%s12971_s6 + $0x78] sm:$0xff]  ;;  %v2807_v15 = vld [vmem:[%s12971_s6 + $0x68] sm:$0xff]  ;;  %v2806_v20 = vld [vmem:[%s12971_s6 + $0x60] sm:$0xff] }
 0x37a   : > { %v1634_v22 = vmul.f32 %v7466_v1, %v1633_v36  ;;  %v1640_v16 = vmul.f32 %v7468_v54, %v1373_v38  ;;  %vm1646_vm8 = vweird.f32 %v7468_v54  ;;  %v9321_v14 = vadd.f32 %v1985_v56, %v9109_v57  ;;  %2811 = vmatpush.msra.mxu2 %v2809_v10  ;;  %v2805_v36 = vld [vmem:[%s12971_s6 + $0x58] sm:$0xff] }
 0x37b   : > { %7469 = vrsqrt.f32 %v1374_v23  ;;  %v1821_v31 = vmax.f32 %v1789_v60, 0.0  ;;  %v2186_v12 = vmul.f32 %v9292_v55, %v9292_v55  ;;  %vm1647_vm10 = vmor %vm1645_vm9, %vm1646_vm8  ;;  %vm1655_vm12 = vweird.f32 %v1374_v23  ;;  %v2802_v60 = vld [vmem:[%s12971_s6 + $0x40] sm:$0xff] }
 0x37c   : > { %v1638_v37 = vsel %vm1637_vm7, %v7466_v1, %v1634_v22  ;;  %v1641_v18 = vmul.f32 %v7468_v54, %v1640_v16 }
 0x37d   : > { %v1724_v21 = vmul.f32 %v1638_v37, %v9132_v24  ;;  %7243 = vmatmul.msk.f32.gmra.mxu1 %vm1019_vm1, %v1821_v31  ;;  %2221 = vadd.xlane.f32.xlu1 %v2186_v12  ;;  %v2801_v31 = vld [vmem:[%s12971_s6 + $0x38] sm:$0xff]  ;;  %v2800_v37 = vld [vmem:[%s12971_s6 + $0x30] sm:$0xff] }
 0x37e   : > { %v1642_v25 = vmul.f32 0.5, %v1641_v18  ;;  %2066 = vadd.xlane.f32.xlu2 %v9299_v13  ;;  %v2057_v6 = vpop.xlane.xlu2 %2056  ;;  %v2799_v18 = vld [vmem:[%s12971_s6 + $0x28] sm:$0xff] }
 0x37f   : > { %v2123_v28 = vmul.f32 %v9213_v30, %v2057_v6  ;;  %v1757_v62 = vmul.f32 %v8784_v40, %v1724_v21 }
 0x380   : > { %v1643_v26 = vsub.f32 1.5, %v1642_v25 }
 0x381   : > { %v7470_v44 = vpop.eup %7469  ;;  %v9307_v46 = vsub.f32 %v9183_v42, %v2123_v28  ;;  %v1790_v24 = vadd.f32 %v8794_v49, %v1757_v62  ;;  %v1988_v21 = vpop.f32.mrf.mxu1 }
 0x382   : > { %v1644_v27 = vmul.f32 %v7468_v54, %v1643_v26  ;;  %v1650_v51 = vmul.f32 %v7470_v44, %v1374_v23  ;;  %vm1656_vm11 = vweird.f32 %v7470_v44  ;;  %v2803_v23 = vld [vmem:[%s12971_s6 + $0x48] sm:$0xff]  ;;  %v2797_v26 = vld [vmem:[%s12971_s6 + $0x18] sm:$0xff] }
 0x383   : > { %v2187_v7 = vmul.f32 %v9307_v46, %v9307_v46  ;;  %v1822_v5 = vmax.f32 %v1790_v24, 0.0  ;;  %vm1657_vm0 = vmor %vm1655_vm12, %vm1656_vm11 }
 0x384   : > { %v1648_v33 = vsel %vm1647_vm10, %v7468_v54, %v1644_v27  ;;  %v1651_v1 = vmul.f32 %v7470_v44, %v1650_v51  ;;  %v2804_v54 = vld [vmem:[%s12971_s6 + $0x50] sm:$0xff] }
 0x385   : > { %v1725_v3 = vmul.f32 %v1648_v33, %v9152_v63  ;;  %2223 = vadd.xlane.f32.xlu0 %v2187_v7  ;;  %7244 = vmatmul.msk.f32.gmra.mxu1 %vm1019_vm1, %v1822_v5  ;;  %v2796_v7 = vld [vmem:[%s12971_s6 + $0x10] sm:$0xff] }
 0x386   : > { %v1652_v42 = vmul.f32 0.5, %v1651_v1  ;;  %2068 = vadd.xlane.f32.xlu1 %v9313_v0  ;;  %v2795_v1 = vld [vmem:[%s12971_s6 + $0x8] sm:$0xff] }
 0x387   : > { %v1758_v38 = vmul.f32 %v8784_v40, %v1725_v3 }
 0x388   : > { %v1653_v35 = vsub.f32 1.5, %v1652_v42 }
 0x389   : > { %v1791_v53 = vadd.f32 %v8794_v49, %v1758_v38  ;;  %v2794_v38 = vld [vmem:[%s12971_s6] sm:$0xff]  ;;  %v1991_v56 = vpop.f32.mrf.mxu1 }
 0x38a   : > { %v1654_v8 = vmul.f32 %v7470_v44, %v1653_v35 }
 0x38b   : > { %v1823_v63 = vmax.f32 %v1791_v53, 0.0 }
 0x38c   : > { %v1658_v34 = vsel %vm1657_vm0, %v7470_v44, %v1654_v8 }
 0x38d   : > { %v1726_v9 = vmul.f32 %v1658_v34, %v9168_v19  ;;  %2070 = vadd.xlane.f32.xlu0 %v9321_v14  ;;  %7245 = vmatmul.msk.f32.gmra.mxu1 %vm1019_vm1, %v1823_v63  ;;  %v2808_v19 = vld [vmem:[%s12971_s6 + $0x70] sm:$0xff] }
 0x38e   : > { %2812 = vmatpush.msra.mxu2 %v2808_v19 }
 0x38f   : > { %v1759_v58 = vmul.f32 %v8784_v40, %v1726_v9 }
 0x390   : > { %2813 = vmatpush.msra.mxu2 %v2807_v15  ;;  %v9397_v15 = vadd.f32 %v1988_v21, %v9109_v57 }
 0x391   : > { %v1792_v48 = vadd.f32 %v8794_v49, %v1759_v58 }
 0x392   : > { %2814 = vmatpush.msra.mxu2 %v2806_v20 }
 0x393   : > { %v1824_v61 = vmax.f32 %v1792_v48, 0.0 }
 0x394   : > { %2815 = vmatpush.msra.mxu2 %v2805_v36 }
 0x395   : > { %7246 = vmatmul.msk.f32.gmra.mxu1 %vm1019_vm1, %v1824_v61 }
 0x396   : > { %2816 = vmatpush.msra.mxu2 %v2804_v54 }
 0x398   : > { %2817 = vmatpush.msra.mxu2 %v2803_v23 }
 0x39a   : > { %2818 = vmatpush.msra.mxu2 %v2802_v60 }
 0x39c   : > { %2819 = vmatpush.msra.mxu2 %v2801_v31 }
 0x39e   : > { %2820 = vmatpush.msra.mxu2 %v2800_v37 }
 0x3a0   : > { %2821 = vmatpush.msra.mxu2 %v2799_v18 }
 0x3a2   : > { %2822 = vmatpush.msra.mxu2 %v2798_v11 }
 0x3a4   : > { %2823 = vmatpush.msra.mxu2 %v2797_v26 }
 0x3a6   : > { %2824 = vmatpush.msra.mxu2 %v2796_v7 }
 0x3a8   : > { %2825 = vmatpush.msra.mxu2 %v2795_v1 }
 0x3aa   : > { %2826 = vmatpush.msra.mxu2 %v2794_v38 }
 0x3c9   : > { %v1305_v22 = vpop.xlane.xlu1 %1304 }
 0x3ca   : > { %v1343_v16 = vmul.f32 %v1305_v22, %v8663_v50 }
 0x3cc   : > { %v1375_v12 = vadd.f32 1e-05, %v1343_v16  ;;  %v1994_v16 = vpop.f32.mrf.mxu1 }
 0x3ce   : > { %7471 = vrsqrt.f32 %v1375_v12  ;;  %vm1665_vm14 = vweird.f32 %v1375_v12 }
 0x3d1   : > { %v2059_v25 = vpop.xlane.xlu1 %2058  ;;  %v1308_v6 = vpop.xlane.xlu0 %1307 }
 0x3d2   : > { %v2124_v28 = vmul.f32 %v9213_v30, %v2059_v25  ;;  %v1344_v62 = vmul.f32 %v1308_v6, %v8663_v50 }
 0x3d4   : > { %v7472_v44 = vpop.eup %7471  ;;  %v9372_v24 = vsub.f32 %v9211_v41, %v2124_v28  ;;  %v1376_v27 = vadd.f32 1e-05, %v1344_v62 }
 0x3d5   : > { %v1660_v51 = vmul.f32 %v7472_v44, %v1375_v12  ;;  %vm1666_vm13 = vweird.f32 %v7472_v44 }
 0x3d6   : > { %7473 = vrsqrt.f32 %v1376_v27  ;;  %v2188_v5 = vmul.f32 %v9372_v24, %v9372_v24  ;;  %vm1667_vm15 = vmor %vm1665_vm14, %vm1666_vm13  ;;  %vm1675_vm3 = vweird.f32 %v1376_v27 }
 0x3d7   : > { %v1661_v33 = vmul.f32 %v7472_v44, %v1660_v51 }
 0x3d8   : > { %2225 = vadd.xlane.f32.xlu2 %v2188_v5 }
 0x3d9   : > { %v1662_v41 = vmul.f32 0.5, %v1661_v33  ;;  %v1311_v3 = vpop.xlane.xlu2 %1310  ;;  %v2216_v42 = vpop.xlane.xlu0 %2215  ;;  %v9421_v33 = vadd.f32 %v1991_v56, %v9109_v57 }
 0x3da   : > { %v1345_v35 = vmul.f32 %v1311_v3, %v8663_v50  ;;  %v2061_v53 = vpop.xlane.xlu1 %2060  ;;  %v2279_v8 = vmul.f32 %v2216_v42, %v9213_v30 }
 0x3db   : > { %v1663_v63 = vsub.f32 1.5, %v1662_v41  ;;  %v2125_v34 = vmul.f32 %v9213_v30, %v2061_v53 }
 0x3dc   : > { %v7474_v9 = vpop.eup %7473  ;;  %v9388_v58 = vadd.f32 1e-05, %v1345_v35  ;;  %v9390_v48 = vadd.f32 1e-05, %v2279_v8 }
 0x3dd   : > { %v1664_v61 = vmul.f32 %v7472_v44, %v1663_v63  ;;  %v1670_v10 = vmul.f32 %v7474_v9, %v1376_v27  ;;  %v9393_v19 = vsub.f32 %v9240_v2, %v2125_v34  ;;  %vm1676_vm2 = vweird.f32 %v7474_v9  ;;  %v1997_v34 = vpop.f32.mrf.mxu1 }
 0x3de   : > { %7475 = vrsqrt.f32 %v9388_v58  ;;  %vm1677_vm4 = vmor %vm1675_vm3, %vm1676_vm2  ;;  %vm1685_vm7 = vweird.f32 %v9388_v58  ;;  %vm2349_vm9 = vweird.f32 %v9390_v48 }
 0x3df   : > { %v1668_v20 = vsel %vm1667_vm15, %v7472_v44, %v1664_v61  ;;  %v1671_v36 = vmul.f32 %v7474_v9, %v1670_v10  ;;  %7477 = vrsqrt.f32 %v9390_v48  ;;  %v2189_v54 = vmul.f32 %v9393_v19, %v9393_v19 }
 0x3e0   : > { %v1727_v23 = vmul.f32 %v1668_v20, %v9195_v52  ;;  %2072 = vadd.xlane.f32.xlu2 %v9397_v15 }
 0x3e1   : > { %v1672_v60 = vmul.f32 0.5, %v1671_v36  ;;  %2227 = vadd.xlane.f32.xlu1 %v2189_v54  ;;  %v1314_v2 = vpop.xlane.xlu2 %1313  ;;  %v2218_v22 = vpop.xlane.xlu0 %2217 }
 0x3e2   : > { %v1346_v31 = vmul.f32 %v1314_v2, %v8663_v50  ;;  %v2063_v12 = vpop.xlane.xlu1 %2062  ;;  %v2280_v37 = vmul.f32 %v2218_v22, %v9213_v30  ;;  %v1760_v18 = vmul.f32 %v8784_v40, %v1727_v23 }
 0x3e3   : > { %v1673_v21 = vsub.f32 1.5, %v1672_v60  ;;  %v2126_v11 = vmul.f32 %v9213_v30, %v2063_v12  ;;  %v9442_v60 = vadd.f32 %v1994_v16, %v9109_v57 }
 0x3e4   : > { %v7476_v25 = vpop.eup %7475  ;;  %v9408_v52 = vadd.f32 1e-05, %v1346_v31  ;;  %v9410_v6 = vadd.f32 1e-05, %v2280_v37  ;;  %v1793_v28 = vadd.f32 %v8794_v49, %v1760_v18 }
 0x3e5   : > { %v7478_v62 = vpop.eup %7477  ;;  %v1674_v26 = vmul.f32 %v7474_v9, %v1673_v21  ;;  %v1680_v50 = vmul.f32 %v7476_v25, %v9388_v58  ;;  %v9415_v44 = vsub.f32 %v9267_v47, %v2126_v11  ;;  %vm1686_vm5 = vweird.f32 %v7476_v25 }
 0x3e6   : > { %v2344_v51 = vmul.f32 %v7478_v62, %v9390_v48  ;;  %7479 = vrsqrt.f32 %v9408_v52  ;;  %v1825_v47 = vmax.f32 %v1793_v28, 0.0  ;;  %vm2350_vm6 = vweird.f32 %v7478_v62  ;;  %vm1687_vm8 = vmor %vm1685_vm7, %vm1686_vm5 }
 0x3e7   : > { %v1678_v7 = vsel %vm1677_vm4, %v7474_v9, %v1674_v26  ;;  %v1681_v5 = vmul.f32 %v7476_v25, %v1680_v50  ;;  %7481 = vrsqrt.f32 %v9410_v6  ;;  %v2190_v41 = vmul.f32 %v9415_v44, %v9415_v44  ;;  %vm2351_vm10 = vmor %vm2349_vm9, %vm2350_vm6 }
 0x3e8   : > { %v1728_v1 = vmul.f32 %v1678_v7, %v9205_v29  ;;  %v2345_v27 = vmul.f32 %v7478_v62, %v2344_v51  ;;  %7247 = vmatmul.msk.f32.gmra.mxu1 %vm1019_vm1, %v1825_v47  ;;  %v9450_v58 = vperm.slane %v9094_v39, 1  ;;  %v9463_v7 = vperm.slane %v9094_v39, 2 }
 0x3e9   : > { %v1682_v3 = vmul.f32 0.5, %v1681_v5  ;;  %2074 = vadd.xlane.f32.xlu1 %v9421_v33  ;;  %v2220_v42 = vpop.xlane.xlu2 %2219  ;;  %v2065_v38 = vpop.xlane.xlu0 %2064  ;;  %2229 = vadd.xlane.f32.xlu0 %v2190_v41  ;;  %vm1695_vm0 = vweird.f32 %v9408_v52  ;;  %vm2359_vm14 = vweird.f32 %v9410_v6 }
 0x3ea   : > { %v2346_v35 = vmul.f32 0.5, %v2345_v27  ;;  %v2281_v53 = vmul.f32 %v2220_v42, %v9213_v30  ;;  %v2127_v56 = vmul.f32 %v9213_v30, %v2065_v38  ;;  %v1761_v29 = vmul.f32 %v8784_v40, %v1728_v1  ;;  %v2000_v42 = vpop.f32.mrf.mxu1 }
 0x3eb   : > { %v1683_v8 = vsub.f32 1.5, %v1682_v3 }
 0x3ec   : > { %v7480_v63 = vpop.eup %7479  ;;  %v2347_v9 = vsub.f32 1.5, %v2346_v35  ;;  %v9431_v61 = vadd.f32 1e-05, %v2281_v53  ;;  %v9434_v10 = vsub.f32 %v9283_v17, %v2127_v56  ;;  %v1794_v20 = vadd.f32 %v8794_v49, %v1761_v29 }
 0x3ed   : > { %v9437_v36 = vpop.eup %7481  ;;  %v1684_v54 = vmul.f32 %v7476_v25, %v1683_v8  ;;  %v1690_v23 = vmul.f32 %v7480_v63, %v9408_v52  ;;  %vm1696_vm11 = vweird.f32 %v7480_v63  ;;  %v9485_v8 = vadd.f32 %v1997_v34, %v9109_v57 }
 0x3ee   : > { %v2348_v2 = vmul.f32 %v7478_v62, %v2347_v9  ;;  %v2354_v17 = vmul.f32 %v9437_v36, %v9410_v6  ;;  %7483 = vrsqrt.f32 %v9431_v61  ;;  %v1826_v12 = vmax.f32 %v1794_v20, 0.0  ;;  %vm1697_vm13 = vmor %vm1695_vm0, %vm1696_vm11 }
 0x3ef   : > { %v1688_v22 = vsel %vm1687_vm8, %v7476_v25, %v1684_v54  ;;  %v1691_v31 = vmul.f32 %v7480_v63, %v1690_v23  ;;  %v2191_v48 = vmul.f32 %v9434_v10, %v9434_v10  ;;  %vm2360_vm12 = vweird.f32 %v9437_v36 }
 0x3f0   : > { %v1729_v16 = vmul.f32 %v1688_v22, %v9223_v45  ;;  %v2355_v37 = vmul.f32 %v9437_v36, %v2354_v17  ;;  %v2222_v18 = vpop.xlane.xlu1 %2221  ;;  %v2352_v21 = vsel %vm2351_vm10, %v7478_v62, %v2348_v2  ;;  %7248 = vmatmul.msk.f32.gmra.mxu1 %vm1019_vm1, %v1826_v12  ;;  %vm2361_vm15 = vmor %vm2359_vm14, %vm2360_vm12  ;;  %vm2369_vm3 = vweird.f32 %v9431_v61 }
 0x3f1   : > { %v1692_v11 = vmul.f32 0.5, %v1691_v31  ;;  %v2282_v28 = vmul.f32 %v2222_v18, %v9213_v30  ;;  %v2067_v25 = vpop.xlane.xlu2 %2066  ;;  %v2663_v26 = vmul.f32 %v2352_v21, %v9230_v4  ;;  %2076 = vadd.xlane.f32.xlu0 %v9442_v60  ;;  %2231 = vadd.xlane.f32.xlu2 %v2191_v48  ;;  %v9510_v21 = vadd.f32 %v2000_v42, %v9109_v57 }
 0x3f2   : > { %v2356_v50 = vmul.f32 0.5, %v2355_v37  ;;  %v2128_v45 = vmul.f32 %v9213_v30, %v2067_v25  ;;  %v1762_v51 = vmul.f32 %v8784_v40, %v1729_v16 }
 0x3f3   : > { %v1693_v5 = vsub.f32 1.5, %v1692_v11  ;;  %v9465_v62 = vadd.f32 1e-05, %v2282_v28  ;;  %v2696_v1 = vmul.f32 %v9450_v58, %v2663_v26 }
 0x3f4   : > { %v7484_v4 = vpop.eup %7483  ;;  %v2357_v27 = vsub.f32 1.5, %v2356_v50  ;;  %v9470_v41 = vsub.f32 %v9299_v13, %v2128_v45  ;;  %v1795_v47 = vadd.f32 %v8794_v49, %v1762_v51 }
 0x3f5   : > { %v1694_v3 = vmul.f32 %v7480_v63, %v1693_v5  ;;  %v2364_v39 = vmul.f32 %v7484_v4, %v9431_v61  ;;  %7485 = vrsqrt.f32 %v9465_v62  ;;  %v9481_v29 = vadd.f32 %v9463_v7, %v2696_v1 }
 0x3f6   : > { %v2358_v38 = vmul.f32 %v9437_v36, %v2357_v27  ;;  %v2192_v35 = vmul.f32 %v9470_v41, %v9470_v41  ;;  %v1827_v13 = vmax.f32 %v1795_v47, 0.0  ;;  %vm2370_vm2 = vweird.f32 %v7484_v4 }
 0x3f7   : > { %v1698_v53 = vsel %vm1697_vm13, %v7480_v63, %v1694_v3  ;;  %v2365_v56 = vmul.f32 %v7484_v4, %v2364_v39  ;;  %v13015_v23 = vmax.f32 %v9481_v29, 0.0  ;;  %vm2371_vm4 = vmor %vm2369_vm3, %vm2370_vm2  ;;  %vm2379_vm6 = vweird.f32 %v9465_v62 }
 0x3f8   : > { %v1730_v52 = vmul.f32 %v1698_v53, %v9249_v59  ;;  %2233 = vadd.xlane.f32.xlu1 %v2192_v35  ;;  %v2224_v9 = vpop.xlane.xlu0 %2223  ;;  %v2362_v20 = vsel %vm2361_vm15, %v9437_v36, %v2358_v38  ;;  %7249 = vmatmul.msk.f32.gmra.mxu1 %vm1019_vm1, %v1827_v13 }
 0x3f9   : > { %v2366_v6 = vmul.f32 0.5, %v2365_v56  ;;  %v2069_v54 = vpop.xlane.xlu1 %2068  ;;  %v2283_v63 = vmul.f32 %v2224_v9, %v9213_v30  ;;  %v2664_v2 = vmul.f32 %v2362_v20, %v9257_v43  ;;  %2827 = vmatmul.f32.vlgmr.msra.gmra.mxu2 %v13015_v23  ;;  %2078 = vadd.xlane.f32.xlu2 %v9485_v8 }
 0x3fa   : > { %v2129_v17 = vmul.f32 %v9213_v30, %v2069_v54  ;;  %v1763_v59 = vmul.f32 %v8784_v40, %v1730_v52 }
 0x3fb   : > { %v7486_v22 = vpop.eup %7485  ;;  %v2367_v34 = vsub.f32 1.5, %v2366_v6  ;;  %v2315_v36 = vadd.f32 1e-05, %v2283_v63  ;;  %v2697_v31 = vmul.f32 %v9450_v58, %v2664_v2 }
 0x3fc   : > { %v2374_v12 = vmul.f32 %v7486_v22, %v9465_v62  ;;  %v9500_v43 = vsub.f32 %v9313_v0, %v2129_v17  ;;  %v1796_v16 = vadd.f32 %v8794_v49, %v1763_v59  ;;  %v2003_v49 = vpop.f32.mrf.mxu1  ;;  %vm2380_vm5 = vweird.f32 %v7486_v22  ;;  %v9559_v17 = vld [vmem:[%s12970_s5 + $0x78] sm:$0xff]  ;;  %v9574_v59 = vld [vmem:[%s12970_s5 + $0x68] sm:$0xff] }
 0x3fd   : > { %v2368_v37 = vmul.f32 %v7484_v4, %v2367_v34  ;;  %7487 = vrsqrt.f32 %v2315_v36  ;;  %v9505_v40 = vadd.f32 %v9463_v7, %v2697_v31  ;;  %vm2381_vm7 = vmor %vm2379_vm6, %vm2380_vm5  ;;  %v9530_v39 = vadd.f32 %v2003_v49, %v9109_v57  ;;  %2924 = vmatpush.msra.mxu3 %v9559_v17  ;;  %3101 = vmatpush.msrb.mxu0 %v9559_v17  ;;  %v9590_v34 = vld [vmem:[%s12970_s5 + $0x58] sm:$0xff]  ;;  %v9598_v31 = vld [vmem:[%s12970_s5 + $0x50] sm:$0xff] }
 0x3fe   : > { %v2375_v18 = vmul.f32 %v7486_v22, %v2374_v12  ;;  %v2193_v48 = vmul.f32 %v9500_v43, %v9500_v43  ;;  %v1828_v11 = vmax.f32 %v1796_v16, 0.0  ;;  %vm2389_vm8 = vweird.f32 %v2315_v36  ;;  %3795 = vmatpush.msrb.mxu2 %v9559_v17  ;;  %v9607_v16 = vld [vmem:[%s12970_s5 + $0x48] sm:$0xff]  ;;  %v9634_v49 = vld [vmem:[%s12970_s5 + $0x30] sm:$0xff] }
 0x3ff   : > { %v13014_v0 = vmax.f32 %v9505_v40, 0.0  ;;  %v2372_v28 = vsel %vm2371_vm4, %v7484_v4, %v2368_v37 }
 0x400   : > { %v2376_v25 = vmul.f32 0.5, %v2375_v18  ;;  %2235 = vadd.xlane.f32.xlu0 %v2193_v48  ;;  %2080 = vadd.xlane.f32.xlu1 %v9510_v21  ;;  %v2071_v61 = vpop.xlane.xlu0 %2070  ;;  %v2665_v26 = vmul.f32 %v2372_v28, %v9275_v32  ;;  %v9617_v18 = vld [vmem:[%s12970_s5 + $0x40] sm:$0xff]  ;;  %v9626_v48 = vld [vmem:[%s12970_s5 + $0x38] sm:$0xff] }
 0x401   : > { %v2130_v50 = vmul.f32 %v9213_v30, %v2071_v61  ;;  %7250 = vmatmul.msk.f32.gmra.mxu1 %vm1019_vm1, %v1828_v11  ;;  %2830 = vmatmul.f32.gmra.mxu2 %v13014_v0 }
 0x402   : > { %v2377_v45 = vsub.f32 1.5, %v2376_v25  ;;  %v2698_v51 = vmul.f32 %v9450_v58, %v2665_v26 }
 0x403   : > { %v7488_v5 = vpop.eup %7487  ;;  %v9521_v1 = vsub.f32 %v9321_v14, %v2130_v50  ;;  %v9644_v50 = vld [vmem:[%s12970_s5 + $0x28] sm:$0xff] }
 0x404   : > { %v2378_v4 = vmul.f32 %v7486_v22, %v2377_v45  ;;  %v2384_v27 = vmul.f32 %v7488_v5, %v2315_v36  ;;  %v9525_v32 = vadd.f32 %v9463_v7, %v2698_v51  ;;  %v2006_v13 = vpop.f32.mrf.mxu1  ;;  %vm2390_vm1 = vweird.f32 %v7488_v5 }
 0x405   : > { %v2194_v47 = vmul.f32 %v9521_v1, %v9521_v1  ;;  %vm2391_vm9 = vmor %vm2389_vm8, %vm2390_vm1  ;;  %v9542_v9 = vadd.f32 %v2006_v13, %v9109_v57 }
 0x406   : > { %v2385_v3 = vmul.f32 %v7488_v5, %v2384_v27  ;;  %v2382_v42 = vsel %vm2381_vm7, %v7486_v22, %v2378_v4  ;;  %v13013_v14 = vmax.f32 %v9525_v32, 0.0  ;;  %v9582_v22 = vld [vmem:[%s12970_s5 + $0x60] sm:$0xff] }
 0x407   : > { %2237 = vadd.xlane.f32.xlu2 %v2194_v47  ;;  %v2666_v38 = vmul.f32 %v2382_v42, %v9292_v55  ;;  %v9658_v27 = vld [vmem:[%s12970_s5 + $0x20] sm:$0xff] }
 0x408   : > { %v2386_v35 = vmul.f32 0.5, %v2385_v3  ;;  %2082 = vadd.xlane.f32.xlu0 %v9530_v39  ;;  %v9669_v3 = vld [vmem:[%s12970_s5 + $0x18] sm:$0xff] }
 0x409   : > { %v2699_v62 = vmul.f32 %v9450_v58, %v2666_v38  ;;  %2833 = vmatmul.f32.gmra.mxu2 %v13013_v14  ;;  %v9676_v38 = vld [vmem:[%s12970_s5 + $0x10] sm:$0xff] }
 0x40a   : > { %v2387_v53 = vsub.f32 1.5, %v2386_v35 }
 0x40b   : > { %v9539_v56 = vadd.f32 %v9463_v7, %v2699_v62 }
 0x40c   : > { %v2388_v52 = vmul.f32 %v7488_v5, %v2387_v53  ;;  %v2009_v11 = vpop.f32.mrf.mxu1 }
 0x40d   : > { %v12999_v20 = vmax.f32 %v9539_v56, 0.0 }
 0x40e   : > { %v2392_v55 = vsel %vm2391_vm9, %v7488_v5, %v2388_v52 }
 0x40f   : > { %2084 = vadd.xlane.f32.xlu2 %v9542_v9  ;;  %v2667_v6 = vmul.f32 %v2392_v55, %v9307_v46  ;;  %v9566_v46 = vld [vmem:[%s12970_s5 + $0x70] sm:$0xff]  ;;  %v9685_v55 = vld [vmem:[%s12970_s5 + $0x8] sm:$0xff] }
 0x410   : > { %2925 = vmatpush.msra.mxu3 %v9566_v46  ;;  %3102 = vmatpush.msrb.mxu0 %v9566_v46 }
 0x411   : > { %v2700_v54 = vmul.f32 %v9450_v58, %v2667_v6  ;;  %2836 = vmatmul.f32.gmra.mxu2 %v12999_v20 }
 0x412   : > { %3796 = vmatpush.msrb.mxu2 %v9566_v46  ;;  %2926 = vmatpush.msra.mxu3 %v9574_v59 }
 0x413   : > { %v9551_v63 = vadd.f32 %v9463_v7, %v2700_v54  ;;  %3103 = vmatpush.msrb.mxu0 %v9574_v59 }
 0x414   : > { %3797 = vmatpush.msrb.mxu2 %v9574_v59  ;;  %2927 = vmatpush.msra.mxu3 %v9582_v22  ;;  %v2012_v35 = vpop.f32.mrf.mxu1 }
 0x415   : > { %v12998_v2 = vmax.f32 %v9551_v63, 0.0  ;;  %3104 = vmatpush.msrb.mxu0 %v9582_v22 }
 0x416   : > { %3798 = vmatpush.msrb.mxu2 %v9582_v22  ;;  %2928 = vmatpush.msra.mxu3 %v9590_v34 }
 0x417   : > { %3105 = vmatpush.msrb.mxu0 %v9590_v34 }
 0x418   : > { %3799 = vmatpush.msrb.mxu2 %v9590_v34  ;;  %2929 = vmatpush.msra.mxu3 %v9598_v31 }
 0x419   : > { %2839 = vmatmul.f32.gmra.mxu2 %v12998_v2  ;;  %3106 = vmatpush.msrb.mxu0 %v9598_v31 }
 0x41a   : > { %3800 = vmatpush.msrb.mxu2 %v9598_v31  ;;  %2930 = vmatpush.msra.mxu3 %v9607_v16 }
 0x41b   : > { %3107 = vmatpush.msrb.mxu0 %v9607_v16 }
 0x41c   : > { %3801 = vmatpush.msrb.mxu2 %v9607_v16  ;;  %2931 = vmatpush.msra.mxu3 %v9617_v18 }
 0x41d   : > { %3108 = vmatpush.msrb.mxu0 %v9617_v18 }
 0x41e   : > { %3802 = vmatpush.msrb.mxu2 %v9617_v18  ;;  %2932 = vmatpush.msra.mxu3 %v9626_v48 }
 0x41f   : > { %3109 = vmatpush.msrb.mxu0 %v9626_v48 }
 0x420   : > { %3803 = vmatpush.msrb.mxu2 %v9626_v48  ;;  %2933 = vmatpush.msra.mxu3 %v9634_v49 }
 0x421   : > { %3110 = vmatpush.msrb.mxu0 %v9634_v49 }
 0x422   : > { %3804 = vmatpush.msrb.mxu2 %v9634_v49  ;;  %2934 = vmatpush.msra.mxu3 %v9644_v50 }
 0x423   : > { %3111 = vmatpush.msrb.mxu0 %v9644_v50 }
 0x424   : > { %3805 = vmatpush.msrb.mxu2 %v9644_v50  ;;  %2935 = vmatpush.msra.mxu3 %v9658_v27 }
 0x425   : > { %3112 = vmatpush.msrb.mxu0 %v9658_v27 }
 0x426   : > { %3806 = vmatpush.msrb.mxu2 %v9658_v27  ;;  %2936 = vmatpush.msra.mxu3 %v9669_v3 }
 0x427   : > { %3113 = vmatpush.msrb.mxu0 %v9669_v3 }
 0x428   : > { %3807 = vmatpush.msrb.mxu2 %v9669_v3  ;;  %2937 = vmatpush.msra.mxu3 %v9676_v38 }
 0x429   : > { %3114 = vmatpush.msrb.mxu0 %v9676_v38 }
 0x42a   : > { %3808 = vmatpush.msrb.mxu2 %v9676_v38  ;;  %2938 = vmatpush.msra.mxu3 %v9685_v55 }
 0x42b   : > { %3115 = vmatpush.msrb.mxu0 %v9685_v55 }
 0x42c   : > { %3809 = vmatpush.msrb.mxu2 %v9685_v55 }
 0x44b   : > { %v2226_v36 = vpop.xlane.xlu2 %2225 }
 0x44c   : > { %v2284_v12 = vmul.f32 %v2226_v36, %v9213_v30 }
 0x44e   : > { %v9610_v37 = vadd.f32 1e-05, %v2284_v12 }
 0x450   : > { %7489 = vrsqrt.f32 %v9610_v37  ;;  %vm2399_vm11 = vweird.f32 %v9610_v37 }
 0x453   : > { %v2073_v28 = vpop.xlane.xlu2 %2072 }
 0x454   : > { %v2131_v25 = vmul.f32 %v9213_v30, %v2073_v28  ;;  %v2228_v61 = vpop.xlane.xlu1 %2227  ;;  %v9698_v28 = vld [vmem:[%s12970_s5] sm:$0xff] }
 0x455   : > { %v2285_v26 = vmul.f32 %v2228_v61, %v9213_v30  ;;  %2939 = vmatpush.msra.mxu3 %v9698_v28  ;;  %3116 = vmatpush.msrb.mxu0 %v9698_v28 }
 0x456   : > { %v7490_v45 = vpop.eup %7489  ;;  %v9648_v51 = vsub.f32 %v9397_v15, %v2131_v25  ;;  %3810 = vmatpush.msrb.mxu2 %v9698_v28 }
 0x457   : > { %v2394_v5 = vmul.f32 %v7490_v45, %v9610_v37  ;;  %v9653_v4 = vadd.f32 1e-05, %v2285_v26  ;;  %vm2400_vm10 = vweird.f32 %v7490_v45  ;;  %v9707_v37 = vadd.f32 %v2009_v11, %v9109_v57  ;;  %3972 = vmatpush.msrb.mxu3 %v9559_v17  ;;  %v2015_v11 = vpop.f32.mrf.mxu1 }
 0x458   : > { %v2195_v47 = vmul.f32 %v9648_v51, %v9648_v51  ;;  %vm2401_vm12 = vmor %vm2399_vm11, %vm2400_vm10  ;;  %4831 = vmatpush.msra.mxu2 %v9559_v17 }
 0x459   : > { %v2395_v15 = vmul.f32 %v7490_v45, %v2394_v5  ;;  %7491 = vrsqrt.f32 %v9653_v4  ;;  %3973 = vmatpush.msrb.mxu3 %v9566_v46  ;;  %vm2409_vm13 = vweird.f32 %v9653_v4 }
 0x45a   : > { %2239 = vadd.xlane.f32.xlu1 %v2195_v47  ;;  %4832 = vmatpush.msra.mxu2 %v9566_v46 }
 0x45b   : > { %v2396_v42 = vmul.f32 0.5, %v2395_v15  ;;  %3974 = vmatpush.msrb.mxu3 %v9574_v59 }
 0x45c   : > { %v2075_v62 = vpop.xlane.xlu1 %2074  ;;  %v2230_v52 = vpop.xlane.xlu0 %2229  ;;  %4833 = vmatpush.msra.mxu2 %v9574_v59 }
 0x45d   : > { %v2397_v13 = vsub.f32 1.5, %v2396_v42  ;;  %v2132_v53 = vmul.f32 %v9213_v30, %v2075_v62  ;;  %v2286_v6 = vmul.f32 %v2230_v52, %v9213_v30  ;;  %3975 = vmatpush.msrb.mxu3 %v9582_v22 }
 0x45e   : > { %4834 = vmatpush.msra.mxu2 %v9582_v22 }
 0x45f   : > { %v7492_v54 = vpop.eup %7491  ;;  %v2398_v36 = vmul.f32 %v7490_v45, %v2397_v13  ;;  %v9693_v12 = vsub.f32 %v9421_v33, %v2132_v53  ;;  %v9704_v61 = vadd.f32 1e-05, %v2286_v6  ;;  %3976 = vmatpush.msrb.mxu3 %v9590_v34 }
 0x460   : > { %v2404_v25 = vmul.f32 %v7492_v54, %v9653_v4  ;;  %vm2410_vm0 = vweird.f32 %v7492_v54  ;;  %4835 = vmatpush.msra.mxu2 %v9590_v34 }
 0x461   : > { %v2196_v33 = vmul.f32 %v9693_v12, %v9693_v12  ;;  %v2402_v26 = vsel %vm2401_vm12, %v7490_v45, %v2398_v36  ;;  %7493 = vrsqrt.f32 %v9704_v61  ;;  %vm2411_vm14 = vmor %vm2409_vm13, %vm2410_vm0  ;;  %3977 = vmatpush.msrb.mxu3 %v9598_v31  ;;  %vm2419_vm2 = vweird.f32 %v9704_v61 }
 0x462   : > { %v2405_v5 = vmul.f32 %v7492_v54, %v2404_v25  ;;  %2086 = vadd.xlane.f32.xlu1 %v9707_v37  ;;  %v2668_v47 = vmul.f32 %v2402_v26, %v9372_v24  ;;  %4836 = vmatpush.msra.mxu2 %v9598_v31 }
 0x463   : > { %2241 = vadd.xlane.f32.xlu0 %v2196_v33  ;;  %3978 = vmatpush.msrb.mxu3 %v9607_v16 }
 0x464   : > { %v2406_v15 = vmul.f32 0.5, %v2405_v5  ;;  %v2701_v45 = vmul.f32 %v9450_v58, %v2668_v47  ;;  %v2077_v42 = vpop.xlane.xlu0 %2076  ;;  %v2232_v13 = vpop.xlane.xlu2 %2231  ;;  %v9739_v47 = vadd.f32 %v2012_v35, %v9109_v57  ;;  %4837 = vmatpush.msra.mxu2 %v9607_v16 }
 0x465   : > { %v2133_v53 = vmul.f32 %v9213_v30, %v2077_v42  ;;  %v2287_v52 = vmul.f32 %v2232_v13, %v9213_v30  ;;  %v2018_v13 = vpop.f32.mrf.mxu1  ;;  %3979 = vmatpush.msrb.mxu3 %v9617_v18 }
 0x466   : > { %v2407_v62 = vsub.f32 1.5, %v2406_v15  ;;  %v9724_v24 = vadd.f32 %v9463_v7, %v2701_v45  ;;  %4838 = vmatpush.msra.mxu2 %v9617_v18 }
 0x467   : > { %v7494_v6 = vpop.eup %7493  ;;  %v9731_v25 = vsub.f32 %v9442_v60, %v2133_v53  ;;  %v9736_v5 = vadd.f32 1e-05, %v2287_v52  ;;  %3980 = vmatpush.msrb.mxu3 %v9626_v48 }
 0x468   : > { %v2408_v36 = vmul.f32 %v7492_v54, %v2407_v62  ;;  %v12997_v33 = vmax.f32 %v9724_v24, 0.0  ;;  %v2414_v26 = vmul.f32 %v7494_v6, %v9704_v61  ;;  %vm2420_vm15 = vweird.f32 %v7494_v6  ;;  %4839 = vmatpush.msra.mxu2 %v9626_v48 }
 0x469   : > { %v2197_v60 = vmul.f32 %v9731_v25, %v9731_v25  ;;  %7495 = vrsqrt.f32 %v9736_v5  ;;  %vm2421_vm3 = vmor %vm2419_vm2, %vm2420_vm15  ;;  %3981 = vmatpush.msrb.mxu3 %v9634_v49  ;;  %vm2429_vm5 = vweird.f32 %v9736_v5 }
 0x46a   : > { %2842 = vmatmul.f32.gmra.mxu2 %v12997_v33  ;;  %v2412_v4 = vsel %vm2411_vm14, %v7492_v54, %v2408_v36  ;;  %v2415_v15 = vmul.f32 %v7494_v6, %v2414_v26 }
 0x46b   : > { %2088 = vadd.xlane.f32.xlu0 %v9739_v47  ;;  %v2234_v45 = vpop.xlane.xlu1 %2233  ;;  %v2669_v35 = vmul.f32 %v2412_v4, %v9393_v19  ;;  %2243 = vadd.xlane.f32.xlu2 %v2197_v60 }
 0x46c   : > { %v2288_v42 = vmul.f32 %v2234_v45, %v9213_v30  ;;  %v2416_v62 = vmul.f32 0.5, %v2415_v15  ;;  %v2079_v52 = vpop.xlane.xlu2 %2078  ;;  %3982 = vmatpush.msrb.mxu3 %v9644_v50  ;;  %4840 = vmatpush.msra.mxu2 %v9634_v49 }
 0x46d   : > { %v2702_v54 = vmul.f32 %v9450_v58, %v2669_v35  ;;  %v2134_v19 = vmul.f32 %v9213_v30, %v2079_v52 }
 0x46e   : > { %v9755_v53 = vadd.f32 1e-05, %v2288_v42  ;;  %v2417_v36 = vsub.f32 1.5, %v2416_v62  ;;  %v9773_v42 = vadd.f32 %v2015_v11, %v9109_v57  ;;  %3983 = vmatpush.msrb.mxu3 %v9658_v27  ;;  %4841 = vmatpush.msra.mxu2 %v9644_v50 }
 0x46f   : > { %v9760_v26 = vadd.f32 %v9463_v7, %v2702_v54  ;;  %v7496_v60 = vpop.eup %7495  ;;  %v9767_v15 = vsub.f32 %v9485_v8, %v2134_v19 }
 0x470   : > { %7497 = vrsqrt.f32 %v9755_v53  ;;  %v2418_v4 = vmul.f32 %v7494_v6, %v2417_v36  ;;  %v2424_v35 = vmul.f32 %v7496_v60, %v9736_v5  ;;  %vm2430_vm4 = vweird.f32 %v7496_v60  ;;  %3984 = vmatpush.msrb.mxu3 %v9669_v3  ;;  %4842 = vmatpush.msra.mxu2 %v9658_v27 }
 0x471   : > { %v13000_v45 = vmax.f32 %v9760_v26, 0.0  ;;  %v2198_v62 = vmul.f32 %v9767_v15, %v9767_v15  ;;  %vm9808_vm6 = vmor %vm2429_vm5, %vm2430_vm4  ;;  %vm2439_vm1 = vweird.f32 %v9755_v53 }
 0x472   : > { %v2422_v54 = vsel %vm2421_vm3, %v7494_v6, %v2418_v4  ;;  %v2425_v52 = vmul.f32 %v7496_v60, %v2424_v35  ;;  %3985 = vmatpush.msrb.mxu3 %v9676_v38  ;;  %4843 = vmatpush.msra.mxu2 %v9669_v3 }
 0x473   : > { %2845 = vmatmul.f32.gmra.mxu2 %v13000_v45  ;;  %v2236_v8 = vpop.xlane.xlu0 %2235  ;;  %v2081_v61 = vpop.xlane.xlu1 %2080  ;;  %2090 = vadd.xlane.f32.xlu2 %v9773_v42  ;;  %v2670_v11 = vmul.f32 %v2422_v54, %v9415_v44 }
 0x474   : > { %v2289_v36 = vmul.f32 %v2236_v8, %v9213_v30  ;;  %v2135_v19 = vmul.f32 %v9213_v30, %v2081_v61  ;;  %2245 = vadd.xlane.f32.xlu1 %v2198_v62  ;;  %v2426_v2 = vmul.f32 0.5, %v2425_v52  ;;  %v2021_v44 = vpop.f32.mrf.mxu1  ;;  %v2793_v61 = vld [vmem:[#allocation8] sm:$0x7]  ;;  %3986 = vmatpush.msrb.mxu3 %v9685_v55 }
 0x475   : > { %v2703_v6 = vmul.f32 %v9450_v58, %v2670_v11  ;;  %4844 = vmatpush.msra.mxu2 %v9676_v38 }
 0x476   : > { %v9785_v33 = vpop.eup %7497  ;;  %v9787_v20 = vadd.f32 1e-05, %v2289_v36  ;;  %v9790_v45 = vsub.f32 %v9510_v21, %v2135_v19  ;;  %v2427_v35 = vsub.f32 1.5, %v2426_v2  ;;  %v9813_v19 = vadd.f32 %v2018_v13, %v9109_v57  ;;  %3987 = vmatpush.msrb.mxu3 %v9698_v28 }
 0x477   : > { %v2434_v4 = vmul.f32 %v9785_v33, %v9755_v53  ;;  %v9803_v8 = vadd.f32 %v9463_v7, %v2703_v6  ;;  %vm2440_vm7 = vweird.f32 %v9785_v33  ;;  %v9849_v53 = vadd.f32 %v2021_v44, %v9109_v57  ;;  %4845 = vmatpush.msra.mxu2 %v9685_v55 }
 0x478   : > { %7499 = vrsqrt.f32 %v9787_v20  ;;  %v2199_v62 = vmul.f32 %v9790_v45, %v9790_v45  ;;  %v2428_v54 = vmul.f32 %v7496_v60, %v2427_v35  ;;  %v9819_v35 = vperm.slane %v2793_v61, 0  ;;  %vm2441_vm8 = vmor %vm2439_vm1, %vm2440_vm7 }
 0x479   : > { %v2435_v21 = vmul.f32 %v9785_v33, %v2434_v4  ;;  %v13001_v6 = vmax.f32 %v9803_v8, 0.0  ;;  %vm2449_vm10 = vweird.f32 %v9787_v20  ;;  %4846 = vmatpush.msra.mxu2 %v9698_v28 }
 0x47a   : > { %2247 = vadd.xlane.f32.xlu0 %v2199_v62  ;;  %v2238_v2 = vpop.xlane.xlu2 %2237  ;;  %v2432_v62 = vsel %vm9808_vm6, %v7496_v60, %v2428_v54 }
 0x47b   : > { %v2436_v36 = vmul.f32 0.5, %v2435_v21  ;;  %v2290_v11 = vmul.f32 %v2238_v2, %v9213_v30  ;;  %v2083_v4 = vpop.xlane.xlu0 %2082  ;;  %2848 = vmatmul.f32.gmra.mxu2 %v13001_v6  ;;  %v2671_v2 = vmul.f32 %v2432_v62, %v9434_v10 }
 0x47c   : > { %v2136_v5 = vmul.f32 %v9213_v30, %v2083_v4  ;;  %2092 = vadd.xlane.f32.xlu1 %v9813_v19  ;;  %v2828_v52 = vpop.f32.mrf.mxu2  ;;  %v2024_v62 = vpop.f32.mrf.mxu1 }
 0x47d   : > { %v2437_v21 = vsub.f32 1.5, %v2436_v36  ;;  %v9826_v13 = vadd.f32 1e-05, %v2290_v11  ;;  %v9841_v10 = vadd.f32 %v2828_v52, %v9819_v35  ;;  %v2704_v36 = vmul.f32 %v9450_v58, %v2671_v2 }
 0x47e   : > { %v7500_v4 = vpop.eup %7499  ;;  %v9832_v61 = vsub.f32 %v9530_v39, %v2136_v5 }
 0x47f   : > { %v2438_v60 = vmul.f32 %v9785_v33, %v2437_v21  ;;  %v2444_v54 = vmul.f32 %v7500_v4, %v9787_v20  ;;  %7501 = vrsqrt.f32 %v9826_v13  ;;  %2940 = vmatmul.f32.vlgmr.msra.gmra.mxu3 %v9841_v10  ;;  %v9854_v52 = vadd.f32 %v9463_v7, %v2704_v36 }
 0x480   : > { %v2200_v39 = vmul.f32 %v9832_v61, %v9832_v61  ;;  %5008 = vmatpush.msra.mxu3 %v9559_v17  ;;  %vm2450_vm9 = vweird.f32 %v7500_v4  ;;  %vm2459_vm0 = vweird.f32 %v9826_v13 }
 0x481   : > { %v2445_v11 = vmul.f32 %v7500_v4, %v2444_v54  ;;  %v2442_v5 = vsel %vm2441_vm8, %v9785_v33, %v2438_v60  ;;  %v13006_v44 = vmax.f32 %v9854_v52, 0.0  ;;  %vm2451_vm11 = vmor %vm2449_vm10, %vm2450_vm9 }
 0x482   : > { %2249 = vadd.xlane.f32.xlu2 %v2200_v39  ;;  %v2085_v21 = vpop.xlane.xlu2 %2084  ;;  %v2672_v2 = vmul.f32 %v2442_v5, %v9470_v41  ;;  %2094 = vadd.xlane.f32.xlu0 %v9849_v53 }
 0x483   : > { %v2446_v6 = vmul.f32 0.5, %v2445_v11  ;;  %v2137_v54 = vmul.f32 %v9213_v30, %v2085_v21  ;;  %2851 = vmatmul.f32.gmra.mxu2 %v13006_v44  ;;  %5009 = vmatpush.msra.mxu3 %v9566_v46 }
 0x484   : > { %v2705_v33 = vmul.f32 %v9450_v58, %v2672_v2  ;;  %v2831_v11 = vpop.f32.mrf.mxu2  ;;  %v9882_v2 = vadd.f32 %v2024_v62, %v9109_v57 }
 0x485   : > { %v7502_v60 = vpop.eup %7501  ;;  %v2447_v39 = vsub.f32 1.5, %v2446_v6  ;;  %v9865_v41 = vsub.f32 %v9542_v9, %v2137_v54  ;;  %v9876_v6 = vadd.f32 %v2831_v11, %v9819_v35  ;;  %5010 = vmatpush.msra.mxu3 %v9574_v59 }
 0x486   : > { %v2454_v36 = vmul.f32 %v7502_v60, %v9826_v13  ;;  %v9871_v5 = vadd.f32 %v9463_v7, %v2705_v33  ;;  %vm2460_vm12 = vweird.f32 %v7502_v60 }
 0x487   : > { %v2448_v17 = vmul.f32 %v7500_v4, %v2447_v39  ;;  %v2201_v9 = vmul.f32 %v9865_v41, %v9865_v41  ;;  %2943 = vmatmul.f32.gmra.mxu3 %v9876_v6  ;;  %v2027_v39 = vpop.f32.mrf.mxu1  ;;  %vm2461_vm13 = vmor %vm2459_vm0, %vm2460_vm12 }
 0x488   : > { %v2455_v21 = vmul.f32 %v7502_v60, %v2454_v36  ;;  %v13005_v20 = vmax.f32 %v9871_v5, 0.0  ;;  %5011 = vmatpush.msra.mxu3 %v9582_v22  ;;  %v9902_v22 = vadd.f32 %v2027_v39, %v9109_v57 }
 0x489   : > { %2251 = vadd.xlane.f32.xlu1 %v2201_v9  ;;  %v2452_v46 = vsel %vm2451_vm11, %v7500_v4, %v2448_v17 }
 0x48a   : > { %v2456_v54 = vmul.f32 0.5, %v2455_v21  ;;  %2096 = vadd.xlane.f32.xlu2 %v9882_v2  ;;  %v2673_v33 = vmul.f32 %v2452_v46, %v9500_v43  ;;  %5012 = vmatpush.msra.mxu3 %v9590_v34 }
 0x48b   : > { %2854 = vmatmul.f32.gmra.mxu2 %v13005_v20 }
 0x48c   : > { %v2457_v36 = vsub.f32 1.5, %v2456_v54  ;;  %v2706_v62 = vmul.f32 %v9450_v58, %v2673_v33  ;;  %v2834_v4 = vpop.f32.mrf.mxu2  ;;  %5013 = vmatpush.msra.mxu3 %v9598_v31 }
 0x48d   : > { %v9899_v43 = vadd.f32 %v2834_v4, %v9819_v35 }
 0x48e   : > { %v2458_v59 = vmul.f32 %v7502_v60, %v2457_v36  ;;  %v9896_v11 = vadd.f32 %v9463_v7, %v2706_v62  ;;  %5014 = vmatpush.msra.mxu3 %v9607_v16 }
 0x48f   : > { %2946 = vmatmul.f32.gmra.mxu3 %v9899_v43  ;;  %v2030_v54 = vpop.f32.mrf.mxu1 }
 0x490   : > { %v2462_v34 = vsel %vm2461_vm13, %v7502_v60, %v2458_v59  ;;  %v13004_v17 = vmax.f32 %v9896_v11, 0.0  ;;  %5015 = vmatpush.msra.mxu3 %v9617_v18 }
 0x491   : > { %2098 = vadd.xlane.f32.xlu1 %v9902_v22  ;;  %v2674_v13 = vmul.f32 %v2462_v34, %v9521_v1 }
 0x492   : > { %5016 = vmatpush.msra.mxu3 %v9626_v48 }
 0x493   : > { %v2707_v9 = vmul.f32 %v9450_v58, %v2674_v13  ;;  %2857 = vmatmul.f32.gmra.mxu2 %v13004_v17 }
 0x494   : > { %v2837_v31 = vpop.f32.mrf.mxu2  ;;  %5017 = vmatpush.msra.mxu3 %v9634_v49 }
 0x495   : > { %v9916_v60 = vadd.f32 %v9463_v7, %v2707_v9  ;;  %v9919_v1 = vadd.f32 %v2837_v31, %v9819_v35 }
 0x496   : > { %5018 = vmatpush.msra.mxu3 %v9644_v50 }
 0x497   : > { %2949 = vmatmul.f32.gmra.mxu3 %v9919_v1  ;;  %v13003_v16 = vmax.f32 %v9916_v60, 0.0 }
 0x498   : > { %5019 = vmatpush.msra.mxu3 %v9658_v27 }
 0x49a   : > { %5020 = vmatpush.msra.mxu3 %v9669_v3 }
 0x49b   : > { %2860 = vmatmul.f32.gmra.mxu2 %v13003_v16 }
 0x49c   : > { %v2840_v18 = vpop.f32.mrf.mxu2  ;;  %5021 = vmatpush.msra.mxu3 %v9676_v38 }
 0x49d   : > { %v9930_v48 = vadd.f32 %v2840_v18, %v9819_v35 }
 0x49e   : > { %5022 = vmatpush.msra.mxu3 %v9685_v55 }
 0x49f   : > { %2952 = vmatmul.f32.gmra.mxu3 %v9930_v48 }
 0x4a0   : > { %5023 = vmatpush.msra.mxu3 %v9698_v28 }
 0x4cd   : > { %v2240_v49 = vpop.xlane.xlu1 %2239 }
 0x4ce   : > { %v2291_v50 = vmul.f32 %v2240_v49, %v9213_v30 }
 0x4d0   : > { %v2323_v27 = vadd.f32 1e-05, %v2291_v50 }
 0x4d2   : > { %7503 = vrsqrt.f32 %v2323_v27  ;;  %vm2469_vm15 = vweird.f32 %v2323_v27 }
 0x4d5   : > { %v2087_v3 = vpop.xlane.xlu1 %2086 }
 0x4d6   : > { %v2138_v21 = vmul.f32 %v9213_v30, %v2087_v3  ;;  %v2242_v46 = vpop.xlane.xlu0 %2241 }
 0x4d7   : > { %v2292_v33 = vmul.f32 %v2242_v46, %v9213_v30  ;;  %v9950_v46 = vadd.f32 %v2030_v54, %v9109_v57 }
 0x4d8   : > { %v7504_v39 = vpop.eup %7503  ;;  %v9940_v38 = vsub.f32 %v9707_v37, %v2138_v21  ;;  %v2033_v37 = vpop.f32.mrf.mxu1 }
 0x4d9   : > { %v2464_v55 = vmul.f32 %v7504_v39, %v2323_v27  ;;  %v2324_v36 = vadd.f32 1e-05, %v2292_v33  ;;  %vm2470_vm14 = vweird.f32 %v7504_v39 }
 0x4da   : > { %v2202_v28 = vmul.f32 %v9940_v38, %v9940_v38  ;;  %vm2471_vm2 = vmor %vm2469_vm15, %vm2470_vm14 }
 0x4db   : > { %v2465_v62 = vmul.f32 %v7504_v39, %v2464_v55  ;;  %7505 = vrsqrt.f32 %v2324_v36  ;;  %vm2479_vm4 = vweird.f32 %v2324_v36 }
 0x4dc   : > { %2253 = vadd.xlane.f32.xlu0 %v2202_v28 }
 0x4dd   : > { %v2466_v59 = vmul.f32 0.5, %v2465_v62 }
 0x4de   : > { %v2089_v4 = vpop.xlane.xlu0 %2088  ;;  %v2244_v13 = vpop.xlane.xlu2 %2243 }
 0x4df   : > { %v2467_v34 = vsub.f32 1.5, %v2466_v59  ;;  %v2139_v9 = vmul.f32 %v9213_v30, %v2089_v4  ;;  %v2293_v31 = vmul.f32 %v2244_v13, %v9213_v30 }
 0x4e1   : > { %v7506_v18 = vpop.eup %7505  ;;  %v2468_v49 = vmul.f32 %v7504_v39, %v2467_v34  ;;  %v9947_v50 = vsub.f32 %v9739_v47, %v2139_v9  ;;  %v2325_v21 = vadd.f32 1e-05, %v2293_v31 }
 0x4e2   : > { %v2474_v3 = vmul.f32 %v7506_v18, %v2324_v36  ;;  %vm2480_vm3 = vweird.f32 %v7506_v18 }
 0x4e3   : > { %v2203_v33 = vmul.f32 %v9947_v50, %v9947_v50  ;;  %v2472_v55 = vsel %vm2471_vm2, %v7504_v39, %v2468_v49  ;;  %7507 = vrsqrt.f32 %v2325_v21  ;;  %v2036_v39 = vpop.f32.mrf.mxu1  ;;  %vm2481_vm5 = vmor %vm2479_vm4, %vm2480_vm3  ;;  %vm2489_vm7 = vweird.f32 %v2325_v21 }
 0x4e4   : > { %v2475_v28 = vmul.f32 %v7506_v18, %v2474_v3  ;;  %2100 = vadd.xlane.f32.xlu0 %v9950_v46  ;;  %v2675_v62 = vmul.f32 %v2472_v55, %v9648_v51 }
 0x4e5   : > { %2255 = vadd.xlane.f32.xlu2 %v2203_v33 }
 0x4e6   : > { %v2476_v27 = vmul.f32 0.5, %v2475_v28  ;;  %v2708_v47 = vmul.f32 %v9450_v58, %v2675_v62  ;;  %v2091_v59 = vpop.xlane.xlu2 %2090  ;;  %v9969_v28 = vadd.f32 %v2033_v37, %v9109_v57 }
 0x4e7   : > { %v2246_v34 = vpop.xlane.xlu1 %2245  ;;  %v2140_v54 = vmul.f32 %v9213_v30, %v2091_v59 }
 0x4e8   : > { %v2477_v4 = vsub.f32 1.5, %v2476_v27  ;;  %v9959_v13 = vadd.f32 %v9463_v7, %v2708_v47  ;;  %v2294_v9 = vmul.f32 %v2246_v34, %v9213_v30 }
 0x4e9   : > { %v7508_v31 = vpop.eup %7507  ;;  %v9963_v51 = vsub.f32 %v9773_v42, %v2140_v54 }
 0x4ea   : > { %v2478_v49 = vmul.f32 %v7506_v18, %v2477_v4  ;;  %v13002_v3 = vmax.f32 %v9959_v13, 0.0  ;;  %v2484_v33 = vmul.f32 %v7508_v31, %v2325_v21  ;;  %v9966_v55 = vadd.f32 1e-05, %v2294_v9 }
 0x4eb   : > { %v2204_v62 = vmul.f32 %v9963_v51, %v9963_v51  ;;  %vm2490_vm6 = vweird.f32 %v7508_v31 }
 0x4ec   : > { %2863 = vmatmul.f32.gmra.mxu2 %v13002_v3  ;;  %v2482_v27 = vsel %vm2481_vm5, %v7506_v18, %v2478_v49  ;;  %v2485_v36 = vmul.f32 %v7508_v31, %v2484_v33  ;;  %7509 = vrsqrt.f32 %v9966_v55  ;;  %vm2491_vm1 = vmor %vm2489_vm7, %vm2490_vm6  ;;  %vm2499_vm9 = vweird.f32 %v9966_v55 }
 0x4ed   : > { %2102 = vadd.xlane.f32.xlu2 %v9969_v28  ;;  %v2843_v42 = vpop.f32.mrf.mxu2  ;;  %v2248_v47 = vpop.xlane.xlu0 %2247  ;;  %v2676_v59 = vmul.f32 %v2482_v27, %v9693_v12  ;;  %2257 = vadd.xlane.f32.xlu1 %v2204_v62 }
 0x4ee   : > { %v2295_v37 = vmul.f32 %v2248_v47, %v9213_v30  ;;  %v9980_v4 = vadd.f32 %v2843_v42, %v9819_v35  ;;  %v2486_v34 = vmul.f32 0.5, %v2485_v36  ;;  %v2039_v27 = vpop.f32.mrf.mxu1 }
 0x4ef   : > { %v2709_v54 = vmul.f32 %v9450_v58, %v2676_v59  ;;  %v2093_v9 = vpop.xlane.xlu1 %2092 }
 0x4f0   : > { %v9983_v18 = vadd.f32 1e-05, %v2295_v37  ;;  %2955 = vmatmul.f32.gmra.mxu3 %v9980_v4  ;;  %v2487_v49 = vsub.f32 1.5, %v2486_v34  ;;  %v2141_v33 = vmul.f32 %v9213_v30, %v2093_v9  ;;  %v9997_v37 = vadd.f32 %v2036_v39, %v9109_v57 }
 0x4f1   : > { %v9988_v12 = vadd.f32 %v9463_v7, %v2709_v54 }
 0x4f2   : > { %7511 = vrsqrt.f32 %v9983_v18  ;;  %v7510_v62 = vpop.eup %7509  ;;  %v2488_v42 = vmul.f32 %v7508_v31, %v2487_v49  ;;  %v9992_v36 = vsub.f32 %v9813_v19, %v2141_v33  ;;  %vm2509_vm12 = vweird.f32 %v9983_v18 }
 0x4f3   : > { %v13007_v47 = vmax.f32 %v9988_v12, 0.0  ;;  %v2494_v59 = vmul.f32 %v7510_v62, %v9966_v55  ;;  %vm2500_vm8 = vweird.f32 %v7510_v62 }
 0x4f4   : > { %v2205_v34 = vmul.f32 %v9992_v36, %v9992_v36  ;;  %v2492_v9 = vsel %vm2491_vm1, %v7508_v31, %v2488_v42  ;;  %vm2501_vm10 = vmor %vm2499_vm9, %vm2500_vm8 }
 0x4f5   : > { %v2250_v54 = vpop.xlane.xlu2 %2249  ;;  %2866 = vmatmul.f32.gmra.mxu2 %v13007_v47  ;;  %v2495_v21 = vmul.f32 %v7510_v62, %v2494_v59  ;;  %2104 = vadd.xlane.f32.xlu1 %v9997_v37  ;;  %v2095_v33 = vpop.xlane.xlu0 %2094  ;;  %v2677_v3 = vmul.f32 %v2492_v9, %v9731_v25 }
 0x4f6   : > { %v2296_v19 = vmul.f32 %v2250_v54, %v9213_v30  ;;  %v2846_v49 = vpop.f32.mrf.mxu2  ;;  %2259 = vadd.xlane.f32.xlu0 %v2205_v34  ;;  %v2142_v39 = vmul.f32 %v9213_v30, %v2095_v33 }
 0x4f7   : > { %v10008_v16 = vadd.f32 %v2846_v49, %v9819_v35  ;;  %v2496_v20 = vmul.f32 0.5, %v2495_v21  ;;  %v2710_v31 = vmul.f32 %v9450_v58, %v2677_v3 }
 0x4f8   : > { %v7512_v17 = vpop.eup %7511  ;;  %v10010_v44 = vadd.f32 1e-05, %v2296_v19  ;;  %v10015_v59 = vsub.f32 %v9849_v53, %v2142_v39  ;;  %v2042_v19 = vpop.f32.mrf.mxu1 }
 0x4f9   : > { %v2504_v42 = vmul.f32 %v7512_v17, %v9983_v18  ;;  %2958 = vmatmul.f32.gmra.mxu3 %v10008_v16  ;;  %v2497_v25 = vsub.f32 1.5, %v2496_v20  ;;  %v10020_v34 = vadd.f32 %v9463_v7, %v2710_v31  ;;  %v10027_v20 = vadd.f32 %v2039_v27, %v9109_v57 }
 0x4fa   : > { %7513 = vrsqrt.f32 %v10010_v44  ;;  %v2206_v9 = vmul.f32 %v10015_v59, %v10015_v59  ;;  %vm2510_vm11 = vweird.f32 %v7512_v17  ;;  %vm2519_vm14 = vweird.f32 %v10010_v44 }
 0x4fb   : > { %v2505_v54 = vmul.f32 %v7512_v17, %v2504_v42  ;;  %v2498_v21 = vmul.f32 %v7510_v62, %v2497_v25  ;;  %v13008_v53 = vmax.f32 %v10020_v34, 0.0  ;;  %vm2511_vm0 = vmor %vm2509_vm12, %vm2510_vm11 }
 0x4fc   : > { %v2252_v3 = vpop.xlane.xlu1 %2251  ;;  %2261 = vadd.xlane.f32.xlu2 %v2206_v9 }
 0x4fd   : > { %v2506_v49 = vmul.f32 0.5, %v2505_v54  ;;  %v2297_v33 = vmul.f32 %v2252_v3, %v9213_v30  ;;  %v2097_v39 = vpop.xlane.xlu2 %2096  ;;  %2869 = vmatmul.f32.gmra.mxu2 %v13008_v53  ;;  %v2502_v42 = vsel %vm2501_vm10, %v7510_v62, %v2498_v21 }
 0x4fe   : > { %v2143_v31 = vmul.f32 %v9213_v30, %v2097_v39  ;;  %2106 = vadd.xlane.f32.xlu0 %v10027_v20  ;;  %v2678_v54 = vmul.f32 %v2502_v42, %v9767_v15  ;;  %v2849_v3 = vpop.f32.mrf.mxu2 }
 0x4ff   : > { %v2507_v55 = vsub.f32 1.5, %v2506_v49  ;;  %v10034_v25 = vadd.f32 1e-05, %v2297_v33  ;;  %v10044_v62 = vadd.f32 %v2849_v3, %v9819_v35 }
 0x500   : > { %v7514_v27 = vpop.eup %7513  ;;  %v10038_v47 = vsub.f32 %v9882_v2, %v2143_v31  ;;  %v2711_v15 = vmul.f32 %v9450_v58, %v2678_v54  ;;  %v10050_v2 = vadd.f32 %v2042_v19, %v9109_v57 }
 0x501   : > { %v2508_v9 = vmul.f32 %v7512_v17, %v2507_v55  ;;  %v2514_v39 = vmul.f32 %v7514_v27, %v10010_v44  ;;  %7515 = vrsqrt.f32 %v10034_v25  ;;  %2961 = vmatmul.f32.gmra.mxu3 %v10044_v62  ;;  %vm2520_vm13 = vweird.f32 %v7514_v27 }
 0x502   : > { %v2207_v21 = vmul.f32 %v10038_v47, %v10038_v47  ;;  %v10054_v31 = vadd.f32 %v9463_v7, %v2711_v15  ;;  %v2941_v3 = vpop.f32.mrf.mxu3  ;;  %vm2521_vm15 = vmor %vm2519_vm14, %vm2520_vm13  ;;  %vm2529_vm3 = vweird.f32 %v10034_v25 }
 0x503   : > { %v2515_v49 = vmul.f32 %v7514_v27, %v2514_v39  ;;  %v2512_v33 = vsel %vm2511_vm0, %v7512_v17, %v2508_v9  ;;  %v10060_v54 = vsub.f32 %v9841_v10, %v2941_v3  ;;  %v2045_v39 = vpop.f32.mrf.mxu1 }
 0x504   : > { %2263 = vadd.xlane.f32.xlu1 %v2207_v21  ;;  %v2099_v18 = vpop.xlane.xlu1 %2098  ;;  %13072 = vst [vmem:[#allocation31_spill] sm:$0xff] %v10054_v31  ;;  %v2679_v42 = vmul.f32 %v2512_v33, %v9790_v45  ;;  %2108 = vadd.xlane.f32.xlu2 %v10050_v2  ;;  %v13009_v17 = vmax.f32 %v10054_v31, 0.0 }
 0x505   : > { %v2516_v55 = vmul.f32 0.5, %v2515_v49  ;;  %v2144_v53 = vmul.f32 %v9213_v30, %v2099_v18  ;;  %v3069_v49 = vmul.f32 %v10060_v54, %v10060_v54 }
 0x506   : > { %v2712_v19 = vmul.f32 %v9450_v58, %v2679_v42  ;;  %2872 = vmatmul.f32.gmra.mxu2 %v13009_v17  ;;  %v2852_v18 = vpop.f32.mrf.mxu2 }
 0x507   : > { %v7516_v9 = vpop.eup %7515  ;;  %v2517_v21 = vsub.f32 1.5, %v2516_v55  ;;  %v10065_v15 = vsub.f32 %v9902_v22, %v2144_v53  ;;  %3117 = vmatmul.f32.vlgmr.msrb.gmra.mxu0 %v3069_v49  ;;  %v10079_v53 = vadd.f32 %v2852_v18, %v9819_v35  ;;  %v10082_v55 = vadd.f32 %v2045_v39, %v9109_v57 }
 0x508   : > { %v2524_v45 = vmul.f32 %v7516_v9, %v10034_v25  ;;  %v10073_v10 = vadd.f32 %v9463_v7, %v2712_v19  ;;  %vm2530_vm2 = vweird.f32 %v7516_v9 }
 0x509   : > { %v2518_v33 = vmul.f32 %v7514_v27, %v2517_v21  ;;  %v2208_v42 = vmul.f32 %v10065_v15, %v10065_v15  ;;  %2964 = vmatmul.f32.gmra.mxu3 %v10079_v53  ;;  %vm2531_vm4 = vmor %vm2529_vm3, %vm2530_vm2 }
 0x50a   : > { %13073 = vst [vmem:[#allocation32_spill] sm:$0xff] %v10073_v10  ;;  %v2525_v22 = vmul.f32 %v7516_v9, %v2524_v45  ;;  %v13012_v44 = vmax.f32 %v10073_v10, 0.0  ;;  %v2944_v17 = vpop.f32.mrf.mxu3 }
 0x50b   : > { %2265 = vadd.xlane.f32.xlu0 %v2208_v42  ;;  %v2522_v3 = vsel %vm2521_vm15, %v7514_v27, %v2518_v33  ;;  %v10089_v49 = vsub.f32 %v9876_v6, %v2944_v17 }
 0x50c   : > { %v2526_v19 = vmul.f32 0.5, %v2525_v22  ;;  %2110 = vadd.xlane.f32.xlu1 %v10082_v55  ;;  %v2680_v21 = vmul.f32 %v2522_v3, %v9832_v61 }
 0x50d   : > { %v3070_v27 = vmul.f32 %v10089_v49, %v10089_v49 }
 0x50e   : > { %v2527_v45 = vsub.f32 1.5, %v2526_v19  ;;  %v2713_v57 = vmul.f32 %v9450_v58, %v2680_v21  ;;  %2875 = vmatmul.f32.gmra.mxu2 %v13012_v44  ;;  %v2855_v61 = vpop.f32.mrf.mxu2 }
 0x50f   : > { %3120 = vmatmul.f32.gmra.mxu0 %v3070_v27  ;;  %v10101_v6 = vadd.f32 %v2855_v61, %v9819_v35 }
 0x510   : > { %v2528_v39 = vmul.f32 %v7516_v9, %v2527_v45  ;;  %v10098_v33 = vadd.f32 %v9463_v7, %v2713_v57 }
 0x511   : > { %2967 = vmatmul.f32.gmra.mxu3 %v10101_v6 }
 0x512   : > { %13074 = vst [vmem:[#allocation33_spill] sm:$0xff] %v10098_v33  ;;  %v2532_v17 = vsel %vm2531_vm4, %v7516_v9, %v2528_v39  ;;  %v13011_v25 = vmax.f32 %v10098_v33, 0.0  ;;  %v2947_v42 = vpop.f32.mrf.mxu3 }
 0x513   : > { %v2681_v18 = vmul.f32 %v2532_v17, %v9865_v41  ;;  %v10108_v3 = vsub.f32 %v9899_v43, %v2947_v42 }
 0x515   : > { %v2714_v22 = vmul.f32 %v9450_v58, %v2681_v18  ;;  %v3071_v19 = vmul.f32 %v10108_v3, %v10108_v3 }
 0x516   : > { %2878 = vmatmul.f32.gmra.mxu2 %v13011_v25  ;;  %v2858_v41 = vpop.f32.mrf.mxu2 }
 0x517   : > { %v10115_v9 = vadd.f32 %v9463_v7, %v2714_v22  ;;  %3123 = vmatmul.f32.gmra.mxu0 %v3071_v19  ;;  %v10118_v21 = vadd.f32 %v2858_v41, %v9819_v35 }
 0x519   : > { %13075 = vst [vmem:[#allocation34_spill] sm:$0xff] %v10115_v9  ;;  %2970 = vmatmul.f32.gmra.mxu3 %v10118_v21  ;;  %v13010_v45 = vmax.f32 %v10115_v9, 0.0 }
 0x51a   : > { %v2950_v43 = vpop.f32.mrf.mxu3 }
 0x51b   : > { %v10123_v57 = vsub.f32 %v9919_v1, %v2950_v43 }
 0x51d   : > { %v3072_v39 = vmul.f32 %v10123_v57, %v10123_v57 }
 0x51e   : > { %2881 = vmatmul.f32.gmra.mxu2 %v13010_v45  ;;  %v2861_v27 = vpop.f32.mrf.mxu2 }
 0x51f   : > { %3126 = vmatmul.f32.gmra.mxu0 %v3072_v39  ;;  %v10130_v61 = vadd.f32 %v2861_v27, %v9819_v35 }
 0x521   : > { %2973 = vmatmul.f32.gmra.mxu3 %v10130_v61 }
 0x522   : > { %v2953_v17 = vpop.f32.mrf.mxu3 }
 0x523   : > { %v10134_v18 = vsub.f32 %v9930_v48, %v2953_v17 }
 0x525   : > { %v3073_v1 = vmul.f32 %v10134_v18, %v10134_v18 }
 0x527   : > { %3129 = vmatmul.f32.gmra.mxu0 %v3073_v1 }
 0x54f   : > { %v2254_v42 = vpop.xlane.xlu0 %2253 }
 0x550   : > { %v2298_v22 = vmul.f32 %v2254_v42, %v9213_v30 }
 0x552   : > { %v2330_v19 = vadd.f32 1e-05, %v2298_v22 }
 0x554   : > { %7517 = vrsqrt.f32 %v2330_v19  ;;  %vm2539_vm6 = vweird.f32 %v2330_v19 }
 0x557   : > { %v2101_v41 = vpop.xlane.xlu0 %2100 }
 0x558   : > { %v2256_v43 = vpop.xlane.xlu2 %2255  ;;  %v2145_v39 = vmul.f32 %v9213_v30, %v2101_v41 }
 0x559   : > { %v2299_v27 = vmul.f32 %v2256_v43, %v9213_v30 }
 0x55a   : > { %v7518_v45 = vpop.eup %7517  ;;  %v10142_v25 = vsub.f32 %v9950_v46, %v2145_v39 }
 0x55b   : > { %v2534_v48 = vmul.f32 %v7518_v45, %v2330_v19  ;;  %v2331_v17 = vadd.f32 1e-05, %v2299_v27  ;;  %vm2540_vm5 = vweird.f32 %v7518_v45 }
 0x55c   : > { %v2209_v1 = vmul.f32 %v10142_v25, %v10142_v25  ;;  %vm2541_vm7 = vmor %vm2539_vm6, %vm2540_vm5 }
 0x55d   : > { %v2535_v44 = vmul.f32 %v7518_v45, %v2534_v48  ;;  %7519 = vrsqrt.f32 %v2331_v17  ;;  %vm2549_vm8 = vweird.f32 %v2331_v17 }
 0x55e   : > { %2267 = vadd.xlane.f32.xlu2 %v2209_v1 }
 0x55f   : > { %v2536_v42 = vmul.f32 0.5, %v2535_v44  ;;  %v3680_v44 = vld [vmem:[%s12973_s8 + $0x78] sm:$0xff] }
 0x560   : > { %v2103_v22 = vpop.xlane.xlu2 %2102  ;;  %v2258_v0 = vpop.xlane.xlu1 %2257  ;;  %3682 = vmatpush.msrb.mxu1 %v3680_v44 }
 0x561   : > { %v2537_v14 = vsub.f32 1.5, %v2536_v42  ;;  %v2146_v41 = vmul.f32 %v9213_v30, %v2103_v22  ;;  %v2300_v43 = vmul.f32 %v2258_v0, %v9213_v30 }
 0x563   : > { %v7520_v23 = vpop.eup %7519  ;;  %v2538_v46 = vmul.f32 %v7518_v45, %v2537_v14  ;;  %v10149_v39 = vsub.f32 %v9969_v28, %v2146_v41  ;;  %v10151_v48 = vadd.f32 1e-05, %v2300_v43  ;;  %v3679_v28 = vld [vmem:[%s12973_s8 + $0x70] sm:$0xff] }
 0x564   : > { %v2544_v27 = vmul.f32 %v7520_v23, %v2331_v17  ;;  %3683 = vmatpush.msrb.mxu1 %v3679_v28  ;;  %vm2550_vm1 = vweird.f32 %v7520_v23 }
 0x565   : > { %v2210_v1 = vmul.f32 %v10149_v39, %v10149_v39  ;;  %v2542_v42 = vsel %vm2541_vm7, %v7518_v45, %v2538_v46  ;;  %7521 = vrsqrt.f32 %v10151_v48  ;;  %v3678_v45 = vld [vmem:[%s12973_s8 + $0x68] sm:$0xff]  ;;  %vm2551_vm9 = vmor %vm2549_vm8, %vm2550_vm1  ;;  %vm2559_vm11 = vweird.f32 %v10151_v48 }
 0x566   : > { %v2545_v0 = vmul.f32 %v7520_v23, %v2544_v27  ;;  %v2682_v14 = vmul.f32 %v2542_v42, %v9940_v38  ;;  %3684 = vmatpush.msrb.mxu1 %v3678_v45 }
 0x567   : > { %2269 = vadd.xlane.f32.xlu0 %v2210_v1  ;;  %v3677_v1 = vld [vmem:[%s12973_s8 + $0x60] sm:$0xff] }
 0x568   : > { %v2546_v19 = vmul.f32 0.5, %v2545_v0  ;;  %v2715_v22 = vmul.f32 %v9450_v58, %v2682_v14  ;;  %v2105_v41 = vpop.xlane.xlu1 %2104  ;;  %3685 = vmatpush.msrb.mxu1 %v3677_v1 }
 0x569   : > { %v2147_v46 = vmul.f32 %v9213_v30, %v2105_v41  ;;  %v2260_v27 = vpop.xlane.xlu0 %2259  ;;  %v3676_v41 = vld [vmem:[%s12973_s8 + $0x58] sm:$0xff] }
 0x56a   : > { %v2547_v43 = vsub.f32 1.5, %v2546_v19  ;;  %v10169_v38 = vadd.f32 %v9463_v7, %v2715_v22  ;;  %v2301_v44 = vmul.f32 %v2260_v27, %v9213_v30  ;;  %3686 = vmatpush.msrb.mxu1 %v3676_v41  ;;  %v3675_v27 = vld [vmem:[%s12973_s8 + $0x50] sm:$0xff] }
 0x56b   : > { %v7522_v42 = vpop.eup %7521  ;;  %v10176_v14 = vsub.f32 %v9997_v37, %v2147_v46 }
 0x56c   : > { %13076 = vst [vmem:[#allocation35_spill] sm:$0xff] %v10169_v38  ;;  %v2548_v0 = vmul.f32 %v7520_v23, %v2547_v43  ;;  %v13017_v28 = vmax.f32 %v10169_v38, 0.0  ;;  %v2554_v19 = vmul.f32 %v7522_v42, %v10151_v48  ;;  %v10180_v22 = vadd.f32 1e-05, %v2301_v44  ;;  %3687 = vmatpush.msrb.mxu1 %v3675_v27 }
 0x56d   : > { %v2211_v45 = vmul.f32 %v10176_v14, %v10176_v14  ;;  %vm2560_vm10 = vweird.f32 %v7522_v42 }
 0x56e   : > { %2884 = vmatmul.f32.gmra.mxu2 %v13017_v28  ;;  %v2552_v37 = vsel %vm2551_vm9, %v7520_v23, %v2548_v0  ;;  %v2555_v17 = vmul.f32 %v7522_v42, %v2554_v19  ;;  %7523 = vrsqrt.f32 %v10180_v22  ;;  %v3674_v19 = vld [vmem:[%s12973_s8 + $0x48] sm:$0xff]  ;;  %vm2561_vm12 = vmor %vm2559_vm11, %vm2560_vm10  ;;  %vm2569_vm13 = vweird.f32 %v10180_v22 }
 0x56f   : > { %v2864_v43 = vpop.f32.mrf.mxu2  ;;  %v2683_v46 = vmul.f32 %v2552_v37, %v9947_v50  ;;  %2271 = vadd.xlane.f32.xlu1 %v2211_v45  ;;  %v2262_v44 = vpop.xlane.xlu2 %2261  ;;  %3688 = vmatpush.msrb.mxu1 %v3674_v19 }
 0x570   : > { %v10195_v1 = vadd.f32 %v2864_v43, %v9819_v35  ;;  %v2556_v38 = vmul.f32 0.5, %v2555_v17  ;;  %v2302_v23 = vmul.f32 %v2262_v44, %v9213_v30 }
 0x571   : > { %v2716_v0 = vmul.f32 %v9450_v58, %v2683_v46  ;;  %v2107_v50 = vpop.xlane.xlu0 %2106  ;;  %v3673_v46 = vld [vmem:[%s12973_s8 + $0x40] sm:$0xff] }
 0x572   : > { %2976 = vmatmul.f32.gmra.mxu3 %v10195_v1  ;;  %v2557_v41 = vsub.f32 1.5, %v2556_v38  ;;  %v10203_v45 = vadd.f32 1e-05, %v2302_v23  ;;  %v2148_v37 = vmul.f32 %v9213_v30, %v2107_v50  ;;  %3689 = vmatpush.msrb.mxu1 %v3673_v46  ;;  %v3672_v23 = vld [vmem:[%s12973_s8 + $0x38] sm:$0xff] }
 0x573   : > { %v2956_v43 = vpop.f32.mrf.mxu3  ;;  %v10207_v17 = vadd.f32 %v9463_v7, %v2716_v0 }
 0x574   : > { %v10213_v27 = vsub.f32 %v9980_v4, %v2956_v43  ;;  %v10215_v44 = vpop.eup %7523  ;;  %v2558_v19 = vmul.f32 %v7522_v42, %v2557_v41  ;;  %7525 = vrsqrt.f32 %v10203_v45  ;;  %v10220_v38 = vsub.f32 %v10027_v20, %v2148_v37  ;;  %3690 = vmatpush.msrb.mxu1 %v3672_v23  ;;  %v3671_v37 = vld [vmem:[%s12973_s8 + $0x30] sm:$0xff] }
 0x575   : > { %13077 = vst [vmem:[#allocation36_spill] sm:$0xff] %v10207_v17  ;;  %v2564_v4 = vmul.f32 %v10215_v44, %v10180_v22  ;;  %v13020_v50 = vmax.f32 %v10207_v17, 0.0  ;;  %vm2570_vm0 = vweird.f32 %v10215_v44  ;;  %vm2579_vm2 = vweird.f32 %v10203_v45 }
 0x576   : > { %v3074_v0 = vmul.f32 %v10213_v27, %v10213_v27  ;;  %v2212_v20 = vmul.f32 %v10220_v38, %v10220_v38  ;;  %v2562_v41 = vsel %vm2561_vm12, %v7522_v42, %v2558_v19  ;;  %3691 = vmatpush.msrb.mxu1 %v3671_v37  ;;  %v3670_v19 = vld [vmem:[%s12973_s8 + $0x28] sm:$0xff]  ;;  %v3668_v37 = vld [vmem:[%s12973_s8 + $0x18] sm:$0xff]  ;;  %vm2571_vm14 = vmor %vm2569_vm13, %vm2570_vm0 }
 0x577   : > { %v2264_v48 = vpop.xlane.xlu1 %2263  ;;  %v2565_v43 = vmul.f32 %v10215_v44, %v2564_v4  ;;  %2887 = vmatmul.f32.gmra.mxu2 %v13020_v50  ;;  %v2109_v9 = vpop.xlane.xlu2 %2108  ;;  %v2684_v23 = vmul.f32 %v2562_v41, %v9963_v51  ;;  %v3669_v51 = vld [vmem:[%s12973_s8 + $0x20] sm:$0xff] }
 0x578   : > { %v2303_v46 = vmul.f32 %v2264_v48, %v9213_v30  ;;  %v2867_v28 = vpop.f32.mrf.mxu2  ;;  %3132 = vmatmul.f32.gmra.mxu0 %v3074_v0  ;;  %2273 = vadd.xlane.f32.xlu2 %v2212_v20  ;;  %v2149_v33 = vmul.f32 %v9213_v30, %v2109_v9 }
 0x579   : > { %v10243_v42 = vadd.f32 %v2867_v28, %v9819_v35  ;;  %v2566_v4 = vmul.f32 0.5, %v2565_v43  ;;  %v2717_v50 = vmul.f32 %v9450_v58, %v2684_v23  ;;  %3692 = vmatpush.msrb.mxu1 %v3670_v19 }
 0x57a   : > { %v10248_v48 = vadd.f32 1e-05, %v2303_v46  ;;  %v7526_v17 = vpop.eup %7525  ;;  %v10252_v0 = vsub.f32 %v10050_v2, %v2149_v33 }
 0x57b   : > { %2979 = vmatmul.f32.gmra.mxu3 %v10243_v42  ;;  %v2567_v9 = vsub.f32 1.5, %v2566_v4  ;;  %v2574_v28 = vmul.f32 %v7526_v17, %v10203_v45  ;;  %v10267_v33 = vadd.f32 %v9463_v7, %v2717_v50  ;;  %3693 = vmatpush.msrb.mxu1 %v3669_v51  ;;  %v3667_v51 = vld [vmem:[%s12973_s8 + $0x10] sm:$0xff]  ;;  %vm2580_vm15 = vweird.f32 %v7526_v17 }
 0x57c   : > { %7527 = vrsqrt.f32 %v10248_v48  ;;  %v2959_v20 = vpop.f32.mrf.mxu3  ;;  %v2213_v2 = vmul.f32 %v10252_v0, %v10252_v0  ;;  %vm2581_vm3 = vmor %vm2579_vm2, %vm2580_vm15  ;;  %vm2589_vm5 = vweird.f32 %v10248_v48 }
 0x57d   : > { %v10262_v41 = vsub.f32 %v10008_v16, %v2959_v20  ;;  %13078 = vst [vmem:[#allocation37_spill] sm:$0xff] %v10267_v33  ;;  %v2568_v43 = vmul.f32 %v10215_v44, %v2567_v9  ;;  %v2575_v46 = vmul.f32 %v7526_v17, %v2574_v28  ;;  %v13024_v50 = vmax.f32 %v10267_v33, 0.0  ;;  %3694 = vmatpush.msrb.mxu1 %v3668_v37  ;;  %v3666_v37 = vld [vmem:[%s12973_s8 + $0x8] sm:$0xff] }
 0x57e   : > { %v2266_v23 = vpop.xlane.xlu0 %2265  ;;  %2275 = vadd.xlane.f32.xlu0 %v2213_v2 }
 0x57f   : > { %v3075_v16 = vmul.f32 %v10262_v41, %v10262_v41  ;;  %v2111_v19 = vpop.xlane.xlu1 %2110  ;;  %v2304_v4 = vmul.f32 %v2266_v23, %v9213_v30  ;;  %v2576_v9 = vmul.f32 0.5, %v2575_v46  ;;  %v2572_v28 = vsel %vm2571_vm14, %v10215_v44, %v2568_v43  ;;  %2890 = vmatmul.f32.gmra.mxu2 %v13024_v50  ;;  %3695 = vmatpush.msrb.mxu1 %v3667_v51 }
 0x580   : > { %v2150_v22 = vmul.f32 %v9213_v30, %v2111_v19  ;;  %v2870_v2 = vpop.f32.mrf.mxu2  ;;  %v2685_v10 = vmul.f32 %v2572_v28, %v9992_v36  ;;  %v3665_v36 = vld [vmem:[%s12973_s8] sm:$0xff] }
 0x581   : > { %v10285_v20 = vadd.f32 1e-05, %v2304_v4  ;;  %3135 = vmatmul.f32.gmra.mxu0 %v3075_v16  ;;  %v2577_v31 = vsub.f32 1.5, %v2576_v9  ;;  %v10295_v44 = vadd.f32 %v2870_v2, %v9819_v35  ;;  %3696 = vmatpush.msrb.mxu1 %v3666_v37 }
 0x582   : > { %v7528_v23 = vpop.eup %7527  ;;  %v10292_v46 = vsub.f32 %v10082_v55, %v2150_v22  ;;  %v2718_v19 = vmul.f32 %v9450_v58, %v2685_v10 }
 0x583   : > { %v2584_v43 = vmul.f32 %v7528_v23, %v10248_v48  ;;  %7529 = vrsqrt.f32 %v10285_v20  ;;  %v2578_v16 = vmul.f32 %v7526_v17, %v2577_v31  ;;  %2982 = vmatmul.f32.gmra.mxu3 %v10295_v44  ;;  %3697 = vmatpush.msrb.mxu1 %v3665_v36  ;;  %vm2590_vm4 = vweird.f32 %v7528_v23 }
 0x584   : > { %v2214_v55 = vmul.f32 %v10292_v46, %v10292_v46  ;;  %v10308_v51 = vadd.f32 %v9463_v7, %v2718_v19  ;;  %v2962_v31 = vpop.f32.mrf.mxu3  ;;  %v3118_v28 = vpop.f32.mrf.mxu0  ;;  %vm2591_vm6 = vmor %vm2589_vm5, %vm2590_vm4  ;;  %vm2599_vm1 = vweird.f32 %v10285_v20 }
 0x585   : > { %v2585_v4 = vmul.f32 %v7528_v23, %v2584_v43  ;;  %v2582_v9 = vsel %vm2581_vm3, %v7526_v17, %v2578_v16  ;;  %v10312_v2 = vsub.f32 %v10044_v62, %v2962_v31  ;;  %v3119_v50 = vadd.f32 1e-05, %v3118_v28 }
 0x586   : > { %2277 = vadd.xlane.f32.xlu1 %v2214_v55  ;;  %13079 = vst [vmem:[#allocation38_spill] sm:$0xff] %v10308_v51  ;;  %v2686_v45 = vmul.f32 %v2582_v9, %v10015_v59  ;;  %v13027_v10 = vmax.f32 %v10308_v51, 0.0 }
 0x587   : > { %v2586_v22 = vmul.f32 0.5, %v2585_v4  ;;  %v3076_v17 = vmul.f32 %v10312_v2, %v10312_v2  ;;  %7531 = vrsqrt.f32 %v3119_v50  ;;  %vm3220_vm10 = vweird.f32 %v3119_v50 }
 0x588   : > { %v2719_v43 = vmul.f32 %v9450_v58, %v2686_v45  ;;  %2893 = vmatmul.f32.gmra.mxu2 %v13027_v10 }
 0x589   : > { %v7530_v37 = vpop.eup %7529  ;;  %v2587_v33 = vsub.f32 1.5, %v2586_v22  ;;  %v2873_v62 = vpop.f32.mrf.mxu2  ;;  %3138 = vmatmul.f32.gmra.mxu0 %v3076_v17 }
 0x58a   : > { %v2594_v55 = vmul.f32 %v7530_v37, %v10285_v20  ;;  %v10323_v36 = vadd.f32 %v9463_v7, %v2719_v43  ;;  %v10326_v19 = vadd.f32 %v2873_v62, %v9819_v35  ;;  %vm2600_vm7 = vweird.f32 %v7530_v37 }
 0x58b   : > { %v2588_v59 = vmul.f32 %v7528_v23, %v2587_v33  ;;  %vm2601_vm8 = vmor %vm2599_vm1, %vm2600_vm7 }
 0x58c   : > { %13080 = vst [vmem:[#allocation39_spill] sm:$0xff] %v10323_v36  ;;  %v2595_v16 = vmul.f32 %v7530_v37, %v2594_v55  ;;  %2985 = vmatmul.f32.gmra.mxu3 %v10326_v19  ;;  %v13026_v22 = vmax.f32 %v10323_v36, 0.0  ;;  %v2965_v48 = vpop.f32.mrf.mxu3  ;;  %v3121_v31 = vpop.f32.mrf.mxu0 }
 0x58d   : > { %v2592_v4 = vsel %vm2591_vm6, %v7528_v23, %v2588_v59  ;;  %v7532_v28 = vpop.eup %7531  ;;  %v10332_v43 = vsub.f32 %v10079_v53, %v2965_v48  ;;  %v3122_v55 = vadd.f32 1e-05, %v3121_v31 }
 0x58e   : > { %v2596_v9 = vmul.f32 0.5, %v2595_v16  ;;  %v2687_v33 = vmul.f32 %v2592_v4, %v10038_v47  ;;  %v3215_v62 = vmul.f32 %v7532_v28, %v3119_v50  ;;  %vm3221_vm9 = vweird.f32 %v7532_v28 }
 0x58f   : > { %v3077_v59 = vmul.f32 %v10332_v43, %v10332_v43  ;;  %7533 = vrsqrt.f32 %v3122_v55  ;;  %vm3222_vm11 = vmor %vm3220_vm10, %vm3221_vm9  ;;  %vm3230_vm0 = vweird.f32 %v3122_v55 }
 0x590   : > { %v2597_v45 = vsub.f32 1.5, %v2596_v9  ;;  %v2720_v17 = vmul.f32 %v9450_v58, %v2687_v33  ;;  %2896 = vmatmul.f32.gmra.mxu2 %v13026_v22  ;;  %v3216_v47 = vmul.f32 %v7532_v28, %v3215_v62 }
 0x591   : > { %v2876_v16 = vpop.f32.mrf.mxu2  ;;  %3141 = vmatmul.f32.gmra.mxu0 %v3077_v59 }
 0x592   : > { %v2598_v23 = vmul.f32 %v7530_v37, %v2597_v45  ;;  %v10341_v53 = vadd.f32 %v9463_v7, %v2720_v17  ;;  %v10344_v9 = vadd.f32 %v2876_v16, %v9819_v35  ;;  %v3217_v33 = vmul.f32 0.5, %v3216_v47  ;;  %v7927_v16 = vld [vmem:[#allocation8] sm:$0x7] }
 0x594   : > { %13081 = vst [vmem:[#allocation40_spill] sm:$0xff] %v10341_v53  ;;  %v2602_v4 = vsel %vm2601_vm8, %v7530_v37, %v2598_v23  ;;  %2988 = vmatmul.f32.gmra.mxu3 %v10344_v9  ;;  %v13029_v48 = vmax.f32 %v10341_v53, 0.0  ;;  %v3218_v31 = vsub.f32 1.5, %v3217_v33  ;;  %v2968_v45 = vpop.f32.mrf.mxu3  ;;  %v3124_v62 = vpop.f32.mrf.mxu0 }
 0x595   : > { %v2688_v20 = vmul.f32 %v2602_v4, %v10065_v15  ;;  %v7534_v17 = vpop.eup %7533  ;;  %v10351_v37 = vsub.f32 %v10101_v6, %v2968_v45  ;;  %v3125_v23 = vadd.f32 1e-05, %v3124_v62  ;;  %v10353_v15 = vperm.slane %v7927_v16, 1 }
 0x596   : > { %v3219_v59 = vmul.f32 %v7532_v28, %v3218_v31  ;;  %v3225_v47 = vmul.f32 %v7534_v17, %v3122_v55  ;;  %v10362_v31 = vperm.slane %v7927_v16, 2  ;;  %vm3231_vm12 = vweird.f32 %v7534_v17 }
 0x597   : > { %v2721_v22 = vmul.f32 %v9450_v58, %v2688_v20  ;;  %v3078_v4 = vmul.f32 %v10351_v37, %v10351_v37  ;;  %7535 = vrsqrt.f32 %v3125_v23  ;;  %vm3232_vm13 = vmor %vm3230_vm0, %vm3231_vm12  ;;  %vm3240_vm15 = vweird.f32 %v3125_v23 }
 0x598   : > { %2899 = vmatmul.f32.gmra.mxu2 %v13029_v48  ;;  %v3223_v6 = vsel %vm3222_vm11, %v7532_v28, %v3219_v59  ;;  %v3226_v20 = vmul.f32 %v7534_v17, %v3225_v47 }
 0x599   : > { %v10360_v33 = vadd.f32 %v9463_v7, %v2721_v22  ;;  %v2879_v45 = vpop.f32.mrf.mxu2  ;;  %v3534_v50 = vmul.f32 %v3223_v6, %v10060_v54  ;;  %3144 = vmatmul.f32.gmra.mxu0 %v3078_v4 }
 0x59a   : > { %v10366_v62 = vadd.f32 %v2879_v45, %v9819_v35  ;;  %v3227_v10 = vmul.f32 0.5, %v3226_v20 }
 0x59b   : > { %13082 = vst [vmem:[#allocation41_spill] sm:$0xff] %v10360_v33  ;;  %v13032_v53 = vmax.f32 %v10360_v33, 0.0  ;;  %v3567_v48 = vmul.f32 %v10353_v15, %v3534_v50 }
 0x59c   : > { %2991 = vmatmul.f32.gmra.mxu3 %v10366_v62  ;;  %v3228_v22 = vsub.f32 1.5, %v3227_v10  ;;  %v2971_v28 = vpop.f32.mrf.mxu3  ;;  %v3127_v59 = vpop.f32.mrf.mxu0 }
 0x59d   : > { %v7536_v47 = vpop.eup %7535  ;;  %v10372_v16 = vsub.f32 %v10118_v21, %v2971_v28  ;;  %v3128_v54 = vadd.f32 1e-05, %v3127_v59  ;;  %v3600_v4 = vadd.f32 %v10362_v31, %v3567_v48 }
 0x59e   : > { %v3229_v6 = vmul.f32 %v7534_v17, %v3228_v22  ;;  %v3235_v20 = vmul.f32 %v7536_v47, %v3125_v23  ;;  %vm3241_vm14 = vweird.f32 %v7536_v47 }
 0x59f   : > { %v3079_v45 = vmul.f32 %v10372_v16, %v10372_v16  ;;  %7537 = vrsqrt.f32 %v3128_v54  ;;  %v3632_v10 = vmax.f32 %v3600_v4, 0.0  ;;  %vm3242_vm2 = vmor %vm3240_vm15, %vm3241_vm14  ;;  %vm3250_vm4 = vweird.f32 %v3128_v54 }
 0x5a0   : > { %2902 = vmatmul.f32.gmra.mxu2 %v13032_v53  ;;  %v3236_v50 = vmul.f32 %v7536_v47, %v3235_v20  ;;  %v3233_v51 = vsel %vm3232_vm13, %v7534_v17, %v3229_v6 }
 0x5a1   : > { %v2882_v36 = vpop.f32.mrf.mxu2  ;;  %3147 = vmatmul.f32.gmra.mxu0 %v3079_v45  ;;  %3698 = vmatmul.f32.vlgmr.msrb.gmra.mxu1 %v3632_v10  ;;  %v3535_v55 = vmul.f32 %v3233_v51, %v10089_v49 }
 0x5a2   : > { %v10380_v21 = vadd.f32 %v2882_v36, %v9819_v35  ;;  %v3237_v48 = vmul.f32 0.5, %v3236_v50 }
 0x5a3   : > { %v3568_v22 = vmul.f32 %v10353_v15, %v3535_v55 }
 0x5a4   : > { %2994 = vmatmul.f32.gmra.mxu3 %v10380_v21  ;;  %v3238_v28 = vsub.f32 1.5, %v3237_v48  ;;  %v2974_v59 = vpop.f32.mrf.mxu3  ;;  %v3130_v53 = vpop.f32.mrf.mxu0 }
 0x5a5   : > { %v7538_v4 = vpop.eup %7537  ;;  %v10386_v20 = vsub.f32 %v10130_v61, %v2974_v59  ;;  %v3131_v17 = vadd.f32 1e-05, %v3130_v53  ;;  %v3601_v6 = vadd.f32 %v10362_v31, %v3568_v22 }
 0x5a6   : > { %v3239_v36 = vmul.f32 %v7536_v47, %v3238_v28  ;;  %v3245_v45 = vmul.f32 %v7538_v4, %v3128_v54  ;;  %vm3251_vm3 = vweird.f32 %v7538_v4 }
 0x5a7   : > { %v3080_v49 = vmul.f32 %v10386_v20, %v10386_v20  ;;  %7539 = vrsqrt.f32 %v3131_v17  ;;  %v3633_v51 = vmax.f32 %v3601_v6, 0.0  ;;  %vm3252_vm5 = vmor %vm3250_vm4, %vm3251_vm3  ;;  %vm3260_vm7 = vweird.f32 %v3131_v17 }
 0x5a8   : > { %v3246_v10 = vmul.f32 %v7538_v4, %v3245_v45  ;;  %v3243_v50 = vsel %vm3242_vm2, %v7536_v47, %v3239_v36 }
 0x5a9   : > { %3150 = vmatmul.f32.gmra.mxu0 %v3080_v49  ;;  %3701 = vmatmul.f32.gmra.mxu1 %v3633_v51  ;;  %v3536_v55 = vmul.f32 %v3243_v50, %v10108_v3 }
 0x5aa   : > { %v3247_v61 = vmul.f32 0.5, %v3246_v10 }
 0x5ab   : > { %v3569_v53 = vmul.f32 %v10353_v15, %v3536_v55 }
 0x5ac   : > { %v3248_v48 = vsub.f32 1.5, %v3247_v61 }
 0x5ad   : > { %v7540_v22 = vpop.eup %7539  ;;  %v3602_v23 = vadd.f32 %v10362_v31, %v3569_v53 }
 0x5ae   : > { %v3249_v28 = vmul.f32 %v7538_v4, %v3248_v48  ;;  %v3255_v59 = vmul.f32 %v7540_v22, %v3131_v17  ;;  %vm3261_vm6 = vweird.f32 %v7540_v22 }
 0x5af   : > { %v3634_v33 = vmax.f32 %v3602_v23, 0.0  ;;  %vm3262_vm1 = vmor %vm3260_vm7, %vm3261_vm6 }
 0x5b0   : > { %v3256_v6 = vmul.f32 %v7540_v22, %v3255_v59  ;;  %v3253_v45 = vsel %vm3252_vm5, %v7538_v4, %v3249_v28 }
 0x5b1   : > { %3704 = vmatmul.f32.gmra.mxu1 %v3634_v33  ;;  %v3537_v47 = vmul.f32 %v3253_v45, %v10123_v57 }
 0x5b2   : > { %v3257_v36 = vmul.f32 0.5, %v3256_v6 }
 0x5b3   : > { %v3570_v3 = vmul.f32 %v10353_v15, %v3537_v47 }
 0x5b4   : > { %v3258_v49 = vsub.f32 1.5, %v3257_v36 }
 0x5b5   : > { %v3603_v51 = vadd.f32 %v10362_v31, %v3570_v3 }
 0x5b6   : > { %v3259_v10 = vmul.f32 %v7540_v22, %v3258_v49 }
 0x5b7   : > { %v3635_v50 = vmax.f32 %v3603_v51, 0.0 }
 0x5b8   : > { %v3263_v54 = vsel %vm3262_vm1, %v7540_v22, %v3259_v10 }
 0x5b9   : > { %3707 = vmatmul.f32.gmra.mxu1 %v3635_v50  ;;  %v3538_v55 = vmul.f32 %v3263_v54, %v10134_v18 }
 0x5bb   : > { %v3571_v4 = vmul.f32 %v10353_v15, %v3538_v55 }
 0x5bd   : > { %v3604_v33 = vadd.f32 %v10362_v31, %v3571_v4 }
 0x5bf   : > { %v3636_v57 = vmax.f32 %v3604_v33, 0.0 }
 0x5c1   : > { %3710 = vmatmul.f32.gmra.mxu1 %v3636_v57 }
 0x5d1   : > { %v2268_v61 = vpop.xlane.xlu2 %2267 }
 0x5d2   : > { %v2305_v53 = vmul.f32 %v2268_v61, %v9213_v30 }
 0x5d4   : > { %v2337_v48 = vadd.f32 1e-05, %v2305_v53 }
 0x5d6   : > { %7541 = vrsqrt.f32 %v2337_v48  ;;  %vm2609_vm9 = vweird.f32 %v2337_v48 }
 0x5da   : > { %v2270_v23 = vpop.xlane.xlu0 %2269 }
 0x5db   : > { %v2306_v17 = vmul.f32 %v2270_v23, %v9213_v30 }
 0x5dc   : > { %v7542_v28 = vpop.eup %7541 }
 0x5dd   : > { %v2604_v59 = vmul.f32 %v7542_v28, %v2337_v48  ;;  %v2338_v22 = vadd.f32 1e-05, %v2306_v17  ;;  %vm2610_vm8 = vweird.f32 %v7542_v28 }
 0x5de   : > { %vm2611_vm10 = vmor %vm2609_vm9, %vm2610_vm8 }
 0x5df   : > { %v2605_v6 = vmul.f32 %v7542_v28, %v2604_v59  ;;  %7543 = vrsqrt.f32 %v2338_v22  ;;  %vm2619_vm12 = vweird.f32 %v2338_v22 }
 0x5e1   : > { %v2606_v18 = vmul.f32 0.5, %v2605_v6 }
 0x5e2   : > { %v2272_v47 = vpop.xlane.xlu1 %2271 }
 0x5e3   : > { %v2607_v45 = vsub.f32 1.5, %v2606_v18  ;;  %v2307_v36 = vmul.f32 %v2272_v47, %v9213_v30 }
 0x5e5   : > { %v7544_v3 = vpop.eup %7543  ;;  %v2608_v49 = vmul.f32 %v7542_v28, %v2607_v45  ;;  %v2339_v10 = vadd.f32 1e-05, %v2307_v36 }
 0x5e6   : > { %v2614_v51 = vmul.f32 %v7544_v3, %v2338_v22  ;;  %vm2620_vm11 = vweird.f32 %v7544_v3 }
 0x5e7   : > { %v2612_v50 = vsel %vm2611_vm10, %v7542_v28, %v2608_v49  ;;  %7545 = vrsqrt.f32 %v2339_v10  ;;  %vm2621_vm0 = vmor %vm2619_vm12, %vm2620_vm11  ;;  %vm2629_vm14 = vweird.f32 %v2339_v10 }
 0x5e8   : > { %v2615_v54 = vmul.f32 %v7544_v3, %v2614_v51  ;;  %v2689_v55 = vmul.f32 %v2612_v50, %v10142_v25 }
 0x5ea   : > { %v2616_v4 = vmul.f32 0.5, %v2615_v54  ;;  %v2722_v33 = vmul.f32 %v9450_v58, %v2689_v55 }
 0x5eb   : > { %v2274_v61 = vpop.xlane.xlu2 %2273 }
 0x5ec   : > { %v2617_v57 = vsub.f32 1.5, %v2616_v4  ;;  %v10406_v53 = vadd.f32 %v9463_v7, %v2722_v33  ;;  %v2308_v23 = vmul.f32 %v2274_v61, %v9213_v30 }
 0x5ed   : > { %v7546_v48 = vpop.eup %7545 }
 0x5ee   : > { %v2618_v17 = vmul.f32 %v7544_v3, %v2617_v57  ;;  %v13039_v28 = vmax.f32 %v10406_v53, 0.0  ;;  %v2624_v59 = vmul.f32 %v7546_v48, %v2339_v10  ;;  %v2340_v6 = vadd.f32 1e-05, %v2308_v23 }
 0x5ef   : > { %vm2630_vm13 = vweird.f32 %v7546_v48 }
 0x5f0   : > { %v2622_v25 = vsel %vm2621_vm0, %v7544_v3, %v2618_v17  ;;  %2905 = vmatmul.f32.gmra.mxu2 %v13039_v28  ;;  %v2625_v18 = vmul.f32 %v7546_v48, %v2624_v59  ;;  %7547 = vrsqrt.f32 %v2340_v6  ;;  %vm2631_vm15 = vmor %vm2629_vm14, %vm2630_vm13  ;;  %vm2639_vm3 = vweird.f32 %v2340_v6 }
 0x5f1   : > { %v2885_v45 = vpop.f32.mrf.mxu2  ;;  %v2690_v47 = vmul.f32 %v2622_v25, %v10149_v39  ;;  %v2276_v36 = vpop.xlane.xlu0 %2275 }
 0x5f2   : > { %v10414_v49 = vadd.f32 %v2885_v45, %v9819_v35  ;;  %v2626_v51 = vmul.f32 0.5, %v2625_v18  ;;  %v2309_v22 = vmul.f32 %v2276_v36, %v9213_v30 }
 0x5f3   : > { %v2723_v50 = vmul.f32 %v9450_v58, %v2690_v47 }
 0x5f4   : > { %2997 = vmatmul.f32.gmra.mxu3 %v10414_v49  ;;  %v2627_v3 = vsub.f32 1.5, %v2626_v51  ;;  %v10419_v54 = vadd.f32 1e-05, %v2309_v22 }
 0x5f5   : > { %v2977_v55 = vpop.f32.mrf.mxu3  ;;  %v3133_v4 = vpop.f32.mrf.mxu0  ;;  %v10422_v33 = vadd.f32 %v9463_v7, %v2723_v50 }
 0x5f6   : > { %v10425_v39 = vsub.f32 %v10195_v1, %v2977_v55  ;;  %v10427_v57 = vadd.f32 1e-05, %v3133_v4  ;;  %v7548_v61 = vpop.eup %7547  ;;  %v2628_v23 = vmul.f32 %v7546_v48, %v2627_v3  ;;  %7549 = vrsqrt.f32 %v10419_v54 }
 0x5f7   : > { %13083 = vst [vmem:[#allocation42_spill] sm:$0xff] %v10422_v33  ;;  %v13034_v17 = vmax.f32 %v10422_v33, 0.0  ;;  %v2634_v59 = vmul.f32 %v7548_v61, %v2340_v6  ;;  %vm2640_vm2 = vweird.f32 %v7548_v61  ;;  %vm2649_vm6 = vweird.f32 %v10419_v54 }
 0x5f8   : > { %v3081_v25 = vmul.f32 %v10425_v39, %v10425_v39  ;;  %7551 = vrsqrt.f32 %v10427_v57  ;;  %v2632_v18 = vsel %vm2631_vm15, %v7546_v48, %v2628_v23  ;;  %vm2641_vm4 = vmor %vm2639_vm3, %vm2640_vm2  ;;  %vm3270_vm8 = vweird.f32 %v10427_v57 }
 0x5f9   : > { %v2278_v45 = vpop.xlane.xlu1 %2277  ;;  %2908 = vmatmul.f32.gmra.mxu2 %v13034_v17  ;;  %v2635_v1 = vmul.f32 %v7548_v61, %v2634_v59  ;;  %v2691_v10 = vmul.f32 %v2632_v18, %v10176_v14 }
 0x5fa   : > { %v2310_v47 = vmul.f32 %v2278_v45, %v9213_v30  ;;  %3153 = vmatmul.f32.gmra.mxu0 %v3081_v25  ;;  %v2888_v36 = vpop.f32.mrf.mxu2 }
 0x5fb   : > { %v2636_v51 = vmul.f32 0.5, %v2635_v1  ;;  %v10441_v50 = vadd.f32 %v2888_v36, %v9819_v35  ;;  %v2724_v3 = vmul.f32 %v9450_v58, %v2691_v10 }
 0x5fc   : > { %v10438_v22 = vadd.f32 1e-05, %v2310_v47  ;;  %v7550_v48 = vpop.eup %7549 }
 0x5fd   : > { %v2637_v4 = vsub.f32 1.5, %v2636_v51  ;;  %v2644_v23 = vmul.f32 %v7550_v48, %v10419_v54  ;;  %3000 = vmatmul.f32.gmra.mxu3 %v10441_v50  ;;  %v10454_v47 = vadd.f32 %v9463_v7, %v2724_v3  ;;  %vm2650_vm5 = vweird.f32 %v7550_v48 }
 0x5fe   : > { %v7552_v55 = vpop.eup %7551  ;;  %7553 = vrsqrt.f32 %v10438_v22  ;;  %v2980_v30 = vpop.f32.mrf.mxu3  ;;  %vm2651_vm1 = vmor %vm2649_vm6, %vm2650_vm5  ;;  %vm2659_vm11 = vweird.f32 %v10438_v22 }
 0x5ff   : > { %v3136_v14 = vpop.f32.mrf.mxu0  ;;  %v3265_v59 = vmul.f32 %v7552_v55, %v10427_v57  ;;  %v10449_v25 = vsub.f32 %v10243_v42, %v2980_v30  ;;  %v2638_v18 = vmul.f32 %v7548_v61, %v2637_v4  ;;  %v2645_v45 = vmul.f32 %v7550_v48, %v2644_v23  ;;  %13084 = vst [vmem:[#allocation43_spill] sm:$0xff] %v10454_v47 }
 0x600   : > { %v10451_v1 = vadd.f32 1e-05, %v3136_v14  ;;  %v13035_v42 = vmax.f32 %v10454_v47, 0.0  ;;  %vm3271_vm7 = vweird.f32 %v7552_v55 }
 0x601   : > { %v3266_v10 = vmul.f32 %v7552_v55, %v3265_v59  ;;  %v3082_v36 = vmul.f32 %v10449_v25, %v10449_v25  ;;  %v2642_v51 = vsel %vm2641_vm4, %v7548_v61, %v2638_v18  ;;  %v2646_v17 = vmul.f32 0.5, %v2645_v45  ;;  %vm3272_vm9 = vmor %vm3270_vm8, %vm3271_vm7 }
 0x602   : > { %7555 = vrsqrt.f32 %v10451_v1  ;;  %v2692_v4 = vmul.f32 %v2642_v51, %v10220_v38  ;;  %v2891_v3 = vpop.f32.mrf.mxu2  ;;  %2911 = vmatmul.f32.gmra.mxu2 %v13035_v42  ;;  %vm3280_vm13 = vweird.f32 %v10451_v1 }
 0x603   : > { %v3267_v6 = vmul.f32 0.5, %v3266_v10  ;;  %3156 = vmatmul.f32.gmra.mxu0 %v3082_v36  ;;  %v2647_v30 = vsub.f32 1.5, %v2646_v17  ;;  %v10465_v61 = vadd.f32 %v2891_v3, %v9819_v35 }
 0x604   : > { %v7554_v23 = vpop.eup %7553  ;;  %v2725_v45 = vmul.f32 %v9450_v58, %v2692_v4 }
 0x605   : > { %v3268_v14 = vsub.f32 1.5, %v3267_v6  ;;  %v2654_v59 = vmul.f32 %v7554_v23, %v10438_v22  ;;  %v2648_v18 = vmul.f32 %v7550_v48, %v2647_v30  ;;  %3003 = vmatmul.f32.gmra.mxu3 %v10465_v61  ;;  %vm2660_vm10 = vweird.f32 %v7554_v23 }
 0x606   : > { %v2983_v10 = vpop.f32.mrf.mxu3  ;;  %v10475_v30 = vadd.f32 %v9463_v7, %v2725_v45  ;;  %vm2661_vm12 = vmor %vm2659_vm11, %vm2660_vm10 }
 0x607   : > { %v3269_v38 = vmul.f32 %v7552_v55, %v3268_v14  ;;  %v2655_v17 = vmul.f32 %v7554_v23, %v2654_v59  ;;  %v2652_v51 = vsel %vm2651_vm1, %v7550_v48, %v2648_v18  ;;  %v10472_v6 = vsub.f32 %v10295_v44, %v2983_v10  ;;  %v3139_v3 = vpop.f32.mrf.mxu0 }
 0x608   : > { %v7556_v36 = vpop.eup %7555  ;;  %13085 = vst [vmem:[#allocation44_spill] sm:$0xff] %v10475_v30  ;;  %v2693_v14 = vmul.f32 %v2652_v51, %v10252_v0  ;;  %v10481_v48 = vadd.f32 1e-05, %v3139_v3  ;;  %v13038_v57 = vmax.f32 %v10475_v30, 0.0 }
 0x609   : > { %v2656_v54 = vmul.f32 0.5, %v2655_v17  ;;  %v3275_v4 = vmul.f32 %v7556_v36, %v10451_v1  ;;  %v3083_v59 = vmul.f32 %v10472_v6, %v10472_v6  ;;  %v3273_v44 = vsel %vm3272_vm9, %v7552_v55, %v3269_v38 }
 0x60a   : > { %v2726_v45 = vmul.f32 %v9450_v58, %v2693_v14  ;;  %v3539_v17 = vmul.f32 %v3273_v44, %v10213_v27  ;;  %7557 = vrsqrt.f32 %v10481_v48  ;;  %2914 = vmatmul.f32.gmra.mxu2 %v13038_v57  ;;  %vm3281_vm0 = vweird.f32 %v7556_v36 }
 0x60b   : > { %v2657_v18 = vsub.f32 1.5, %v2656_v54  ;;  %v3276_v10 = vmul.f32 %v7556_v36, %v3275_v4  ;;  %3159 = vmatmul.f32.gmra.mxu0 %v3083_v59  ;;  %v2894_v3 = vpop.f32.mrf.mxu2  ;;  %vm3282_vm14 = vmor %vm3280_vm13, %vm3281_vm0  ;;  %vm3290_vm2 = vweird.f32 %v10481_v48 }
 0x60c   : > { %v10491_v42 = vadd.f32 %v9463_v7, %v2726_v45  ;;  %v3572_v55 = vmul.f32 %v10353_v15, %v3539_v17  ;;  %v10496_v27 = vadd.f32 %v2894_v3, %v9819_v35 }
 0x60d   : > { %v2658_v0 = vmul.f32 %v7554_v23, %v2657_v18  ;;  %v3277_v51 = vmul.f32 0.5, %v3276_v10 }
 0x60e   : > { %13086 = vst [vmem:[#allocation45_spill] sm:$0xff] %v10491_v42  ;;  %v3605_v54 = vadd.f32 %v10362_v31, %v3572_v55  ;;  %3006 = vmatmul.f32.gmra.mxu3 %v10496_v27  ;;  %v13037_v18 = vmax.f32 %v10491_v42, 0.0 }
 0x60f   : > { %v2662_v22 = vsel %vm2661_vm12, %v7554_v23, %v2658_v0  ;;  %v3278_v38 = vsub.f32 1.5, %v3277_v51  ;;  %v2986_v59 = vpop.f32.mrf.mxu3  ;;  %v3142_v44 = vpop.f32.mrf.mxu0 }
 0x610   : > { %v2694_v4 = vmul.f32 %v2662_v22, %v10292_v46  ;;  %v3637_v10 = vmax.f32 %v3605_v54, 0.0  ;;  %v7558_v45 = vpop.eup %7557  ;;  %v10504_v23 = vsub.f32 %v10326_v19, %v2986_v59  ;;  %v3143_v17 = vadd.f32 1e-05, %v3142_v44 }
 0x611   : > { %v3279_v14 = vmul.f32 %v7556_v36, %v3278_v38  ;;  %v3285_v51 = vmul.f32 %v7558_v45, %v10481_v48  ;;  %vm3291_vm15 = vweird.f32 %v7558_v45 }
 0x612   : > { %v2727_v0 = vmul.f32 %v9450_v58, %v2694_v4  ;;  %3713 = vmatmul.f32.gmra.mxu1 %v3637_v10  ;;  %v3084_v1 = vmul.f32 %v10504_v23, %v10504_v23  ;;  %7559 = vrsqrt.f32 %v3143_v17  ;;  %2917 = vmatmul.f32.gmra.mxu2 %v13037_v18  ;;  %vm3292_vm3 = vmor %vm3290_vm2, %vm3291_vm15  ;;  %vm3300_vm5 = vweird.f32 %v3143_v17 }
 0x613   : > { %v3283_v46 = vsel %vm3282_vm14, %v7556_v36, %v3279_v14  ;;  %v3286_v3 = vmul.f32 %v7558_v45, %v3285_v51  ;;  %v2897_v55 = vpop.f32.mrf.mxu2 }
 0x614   : > { %v10513_v22 = vadd.f32 %v9463_v7, %v2727_v0  ;;  %v3540_v19 = vmul.f32 %v3283_v46, %v10262_v41  ;;  %3162 = vmatmul.f32.gmra.mxu0 %v3084_v1  ;;  %v10517_v58 = vadd.f32 %v2897_v55, %v9819_v35 }
 0x615   : > { %v3287_v38 = vmul.f32 0.5, %v3286_v3  ;;  %v3664_v3 = vld [vmem:[%s12974_s9] sm:$0x7] }
 0x616   : > { %13087 = vst [vmem:[#allocation46_spill] sm:$0xff] %v10513_v22  ;;  %v3573_v36 = vmul.f32 %v10353_v15, %v3540_v19  ;;  %3009 = vmatmul.f32.gmra.mxu3 %v10517_v58  ;;  %v13036_v59 = vmax.f32 %v10513_v22, 0.0 }
 0x617   : > { %v3288_v54 = vsub.f32 1.5, %v3287_v38  ;;  %v2989_v4 = vpop.f32.mrf.mxu3  ;;  %v3145_v14 = vpop.f32.mrf.mxu0 }
 0x618   : > { %v3606_v7 = vadd.f32 %v10362_v31, %v3573_v36  ;;  %v7560_v44 = vpop.eup %7559  ;;  %v10524_v41 = vsub.f32 %v10344_v9, %v2989_v4  ;;  %v10526_v10 = vadd.f32 1e-05, %v3145_v14 }
 0x619   : > { %v3289_v0 = vmul.f32 %v7558_v45, %v3288_v54  ;;  %v3295_v51 = vmul.f32 %v7560_v44, %v3143_v17  ;;  %v10541_v54 = vperm.slane %v3664_v3, 0  ;;  %vm3301_vm4 = vweird.f32 %v7560_v44 }
 0x61a   : > { %v3638_v46 = vmax.f32 %v3606_v7, 0.0  ;;  %v3085_v1 = vmul.f32 %v10524_v41, %v10524_v41  ;;  %7561 = vrsqrt.f32 %v10526_v10  ;;  %2920 = vmatmul.f32.gmra.mxu2 %v13036_v59  ;;  %vm3302_vm6 = vmor %vm3300_vm5, %vm3301_vm4  ;;  %vm3310_vm1 = vweird.f32 %v10526_v10 }
 0x61b   : > { %v3296_v55 = vmul.f32 %v7560_v44, %v3295_v51  ;;  %v2900_v9 = vpop.f32.mrf.mxu2  ;;  %v3293_v19 = vsel %vm3292_vm3, %v7558_v45, %v3289_v0 }
 0x61c   : > { %3716 = vmatmul.f32.gmra.mxu1 %v3638_v46  ;;  %v10538_v48 = vadd.f32 %v2900_v9, %v9819_v35  ;;  %3165 = vmatmul.f32.gmra.mxu0 %v3085_v1  ;;  %v3541_v38 = vmul.f32 %v3293_v19, %v10312_v2 }
 0x61d   : > { %v3297_v36 = vmul.f32 0.5, %v3296_v55 }
 0x61e   : > { %3012 = vmatmul.f32.gmra.mxu3 %v10538_v48  ;;  %v3574_v4 = vmul.f32 %v10353_v15, %v3541_v38  ;;  %v3699_v46 = vpop.f32.mrf.mxu1 }
 0x61f   : > { %v3298_v14 = vsub.f32 1.5, %v3297_v36  ;;  %v2992_v7 = vpop.f32.mrf.mxu3  ;;  %v3148_v51 = vpop.f32.mrf.mxu0  ;;  %v10553_v55 = vadd.f32 %v3699_v46, %v10541_v54 }
 0x620   : > { %v7562_v59 = vpop.eup %7561  ;;  %v10546_v45 = vsub.f32 %v10366_v62, %v2992_v7  ;;  %v10548_v0 = vadd.f32 1e-05, %v3148_v51  ;;  %v3607_v2 = vadd.f32 %v10362_v31, %v3574_v4  ;;  %v7928_v7 = vld [vmem:[%s12970_s5 + $0x78] sm:$0xff] }
 0x621   : > { %v3299_v1 = vmul.f32 %v7560_v44, %v3298_v14  ;;  %v3305_v3 = vmul.f32 %v7562_v59, %v10526_v10  ;;  %vm3311_vm7 = vweird.f32 %v7562_v59 }
 0x622   : > { %v3086_v9 = vmul.f32 %v10546_v45, %v10546_v45  ;;  %7563 = vrsqrt.f32 %v10548_v0  ;;  %v3639_v62 = vmax.f32 %v3607_v2, 0.0  ;;  %3811 = vmatmul.f32.vlgmr.msrb.gmra.mxu2 %v10553_v55  ;;  %vm3312_vm8 = vmor %vm3310_vm1, %vm3311_vm7  ;;  %vm3320_vm10 = vweird.f32 %v10548_v0 }
 0x623   : > { %v3306_v19 = vmul.f32 %v7562_v59, %v3305_v3  ;;  %v2903_v38 = vpop.f32.mrf.mxu2  ;;  %v3303_v36 = vsel %vm3302_vm6, %v7560_v44, %v3299_v1  ;;  %7257 = vmatpush.msrb.mxu2 %v7928_v7  ;;  %v7929_v1 = vld [vmem:[%s12970_s5 + $0x70] sm:$0xff] }
 0x624   : > { %v10560_v4 = vadd.f32 %v2903_v38, %v9819_v35  ;;  %3168 = vmatmul.f32.gmra.mxu0 %v3086_v9  ;;  %3719 = vmatmul.f32.gmra.mxu1 %v3639_v62  ;;  %v3542_v17 = vmul.f32 %v3303_v36, %v10332_v43 }
 0x625   : > { %v3307_v14 = vmul.f32 0.5, %v3306_v19  ;;  %7258 = vmatpush.msrb.mxu2 %v7929_v1 }
 0x626   : > { %3015 = vmatmul.f32.gmra.mxu3 %v10560_v4  ;;  %v3575_v51 = vmul.f32 %v10353_v15, %v3542_v17  ;;  %v3702_v62 = vpop.f32.mrf.mxu1 }
 0x627   : > { %v3308_v46 = vsub.f32 1.5, %v3307_v14  ;;  %v2995_v44 = vpop.f32.mrf.mxu3  ;;  %v3151_v2 = vpop.f32.mrf.mxu0  ;;  %v10578_v17 = vadd.f32 %v3702_v62, %v10541_v54  ;;  %v7930_v14 = vld [vmem:[%s12970_s5 + $0x68] sm:$0xff] }
 0x628   : > { %v7564_v43 = vpop.eup %7563  ;;  %v10572_v3 = vsub.f32 %v10380_v21, %v2995_v44  ;;  %v3152_v9 = vadd.f32 1e-05, %v3151_v2  ;;  %v3608_v19 = vadd.f32 %v10362_v31, %v3575_v51  ;;  %7259 = vmatpush.msrb.mxu2 %v7930_v14  ;;  %v7931_v2 = vld [vmem:[%s12970_s5 + $0x60] sm:$0xff] }
 0x629   : > { %v3309_v38 = vmul.f32 %v7562_v59, %v3308_v46  ;;  %v3315_v36 = vmul.f32 %v7564_v43, %v10548_v0  ;;  %vm3321_vm9 = vweird.f32 %v7564_v43  ;;  %v7934_v0 = vld [vmem:[%s12970_s5 + $0x48] sm:$0xff] }
 0x62a   : > { %v3087_v21 = vmul.f32 %v10572_v3, %v10572_v3  ;;  %7565 = vrsqrt.f32 %v3152_v9  ;;  %v3640_v7 = vmax.f32 %v3608_v19, 0.0  ;;  %3814 = vmatmul.f32.gmra.mxu2 %v10578_v17  ;;  %v7932_v19 = vld [vmem:[%s12970_s5 + $0x58] sm:$0xff]  ;;  %vm3322_vm11 = vmor %vm3320_vm10, %vm3321_vm9  ;;  %vm3330_vm0 = vweird.f32 %v3152_v9 }
 0x62b   : > { %v3316_v51 = vmul.f32 %v7564_v43, %v3315_v36  ;;  %v3313_v10 = vsel %vm3312_vm8, %v7562_v59, %v3309_v38  ;;  %7260 = vmatpush.msrb.mxu2 %v7931_v2 }
 0x62c   : > { %3171 = vmatmul.f32.gmra.mxu0 %v3087_v21  ;;  %3722 = vmatmul.f32.gmra.mxu1 %v3640_v7  ;;  %v3543_v46 = vmul.f32 %v3313_v10, %v10351_v37  ;;  %v7933_v7 = vld [vmem:[%s12970_s5 + $0x50] sm:$0xff] }
 0x62d   : > { %v3317_v44 = vmul.f32 0.5, %v3316_v51  ;;  %7261 = vmatpush.msrb.mxu2 %v7932_v19 }
 0x62e   : > { %v3576_v1 = vmul.f32 %v10353_v15, %v3543_v46  ;;  %v3705_v38 = vpop.f32.mrf.mxu1 }
 0x62f   : > { %v3318_v62 = vsub.f32 1.5, %v3317_v44  ;;  %v10598_v21 = vadd.f32 %v3705_v38, %v10541_v54  ;;  %7262 = vmatpush.msrb.mxu2 %v7933_v7  ;;  %v7937_v7 = vld [vmem:[%s12970_s5 + $0x30] sm:$0xff] }
 0x630   : > { %v7566_v59 = vpop.eup %7565  ;;  %v3609_v36 = vadd.f32 %v10362_v31, %v3576_v1 }
 0x631   : > { %v3319_v37 = vmul.f32 %v7564_v43, %v3318_v62  ;;  %v3325_v14 = vmul.f32 %v7566_v59, %v3152_v9  ;;  %7263 = vmatpush.msrb.mxu2 %v7934_v0  ;;  %v7935_v62 = vld [vmem:[%s12970_s5 + $0x40] sm:$0xff]  ;;  %vm3331_vm12 = vweird.f32 %v7566_v59  ;;  %v7938_v9 = vld [vmem:[%s12970_s5 + $0x28] sm:$0xff] }
 0x632   : > { %v3641_v51 = vmax.f32 %v3609_v36, 0.0  ;;  %3817 = vmatmul.f32.gmra.mxu2 %v10598_v21  ;;  %vm3332_vm13 = vmor %vm3330_vm0, %vm3331_vm12 }
 0x633   : > { %v3326_v10 = vmul.f32 %v7566_v59, %v3325_v14  ;;  %v3323_v46 = vsel %vm3322_vm11, %v7564_v43, %v3319_v37  ;;  %7264 = vmatpush.msrb.mxu2 %v7935_v62  ;;  %v7941_v62 = vld [vmem:[%s12970_s5 + $0x10] sm:$0xff] }
 0x634   : > { %3725 = vmatmul.f32.gmra.mxu1 %v3641_v51  ;;  %v3544_v44 = vmul.f32 %v3323_v46, %v10372_v16  ;;  %v7936_v16 = vld [vmem:[%s12970_s5 + $0x38] sm:$0xff] }
 0x635   : > { %v3327_v2 = vmul.f32 0.5, %v3326_v10  ;;  %7265 = vmatpush.msrb.mxu2 %v7936_v16 }
 0x636   : > { %v3577_v1 = vmul.f32 %v10353_v15, %v3544_v44  ;;  %v3708_v38 = vpop.f32.mrf.mxu1  ;;  %v7939_v44 = vld [vmem:[%s12970_s5 + $0x20] sm:$0xff] }
 0x637   : > { %v3328_v19 = vsub.f32 1.5, %v3327_v2  ;;  %v10617_v37 = vadd.f32 %v3708_v38, %v10541_v54  ;;  %7266 = vmatpush.msrb.mxu2 %v7937_v7  ;;  %v7943_v38 = vld [vmem:[%s12970_s5] sm:$0xff] }
 0x638   : > { %v3610_v43 = vadd.f32 %v10362_v31, %v3577_v1 }
 0x639   : > { %v3329_v36 = vmul.f32 %v7566_v59, %v3328_v19  ;;  %7267 = vmatpush.msrb.mxu2 %v7938_v9  ;;  %v7942_v19 = vld [vmem:[%s12970_s5 + $0x8] sm:$0xff] }
 0x63a   : > { %v3642_v14 = vmax.f32 %v3610_v43, 0.0  ;;  %3820 = vmatmul.f32.gmra.mxu2 %v10617_v37 }
 0x63b   : > { %v3333_v51 = vsel %vm3332_vm13, %v7566_v59, %v3329_v36  ;;  %7268 = vmatpush.msrb.mxu2 %v7939_v44  ;;  %v7940_v59 = vld [vmem:[%s12970_s5 + $0x18] sm:$0xff] }
 0x63c   : > { %3728 = vmatmul.f32.gmra.mxu1 %v3642_v14  ;;  %v3545_v10 = vmul.f32 %v3333_v51, %v10386_v20 }
 0x63d   : > { %7269 = vmatpush.msrb.mxu2 %v7940_v59 }
 0x63e   : > { %v3578_v46 = vmul.f32 %v10353_v15, %v3545_v10  ;;  %v3711_v0 = vpop.f32.mrf.mxu1 }
 0x63f   : > { %v10636_v20 = vadd.f32 %v3711_v0, %v10541_v54  ;;  %7270 = vmatpush.msrb.mxu2 %v7941_v62 }
 0x640   : > { %v3611_v2 = vadd.f32 %v10362_v31, %v3578_v46 }
 0x641   : > { %7271 = vmatpush.msrb.mxu2 %v7942_v19 }
 0x642   : > { %v3643_v1 = vmax.f32 %v3611_v2, 0.0  ;;  %3823 = vmatmul.f32.gmra.mxu2 %v10636_v20 }
 0x643   : > { %7272 = vmatpush.msrb.mxu2 %v7943_v38 }
 0x644   : > { %3731 = vmatmul.f32.gmra.mxu1 %v3643_v1 }
 0x673   : > { %v2906_v43 = vpop.f32.mrf.mxu2 }
 0x674   : > { %v10649_v16 = vadd.f32 %v2906_v43, %v9819_v35 }
 0x676   : > { %3018 = vmatmul.f32.gmra.mxu3 %v10649_v16 }
 0x677   : > { %v2998_v36 = vpop.f32.mrf.mxu3  ;;  %v3154_v14 = vpop.f32.mrf.mxu0 }
 0x678   : > { %v10653_v7 = vsub.f32 %v10414_v49, %v2998_v36  ;;  %v3155_v51 = vadd.f32 1e-05, %v3154_v14 }
 0x67a   : > { %v3088_v10 = vmul.f32 %v10653_v7, %v10653_v7  ;;  %7567 = vrsqrt.f32 %v3155_v51  ;;  %vm3340_vm15 = vweird.f32 %v3155_v51 }
 0x67c   : > { %v2909_v9 = vpop.f32.mrf.mxu2  ;;  %3174 = vmatmul.f32.gmra.mxu0 %v3088_v10 }
 0x67d   : > { %v10658_v46 = vadd.f32 %v2909_v9, %v9819_v35 }
 0x67f   : > { %3021 = vmatmul.f32.gmra.mxu3 %v10658_v46 }
 0x680   : > { %v7568_v44 = vpop.eup %7567  ;;  %v3157_v0 = vpop.f32.mrf.mxu0 }
 0x681   : > { %v3335_v2 = vmul.f32 %v7568_v44, %v3155_v51  ;;  %v3001_v59 = vpop.f32.mrf.mxu3  ;;  %v3158_v1 = vadd.f32 1e-05, %v3157_v0  ;;  %vm3341_vm14 = vweird.f32 %v7568_v44 }
 0x682   : > { %v10662_v49 = vsub.f32 %v10441_v50, %v3001_v59  ;;  %vm3342_vm2 = vmor %vm3340_vm15, %vm3341_vm14 }
 0x683   : > { %v3336_v62 = vmul.f32 %v7568_v44, %v3335_v2  ;;  %7569 = vrsqrt.f32 %v3158_v1  ;;  %vm3350_vm4 = vweird.f32 %v3158_v1 }
 0x684   : > { %v3089_v19 = vmul.f32 %v10662_v49, %v10662_v49 }
 0x685   : > { %v3337_v38 = vmul.f32 0.5, %v3336_v62  ;;  %v2912_v36 = vpop.f32.mrf.mxu2 }
 0x686   : > { %3177 = vmatmul.f32.gmra.mxu0 %v3089_v19  ;;  %v10667_v9 = vadd.f32 %v2912_v36, %v9819_v35 }
 0x687   : > { %v3338_v43 = vsub.f32 1.5, %v3337_v38 }
 0x688   : > { %v3160_v0 = vpop.f32.mrf.mxu0  ;;  %3024 = vmatmul.f32.gmra.mxu3 %v10667_v9 }
 0x689   : > { %v7570_v14 = vpop.eup %7569  ;;  %v3339_v10 = vmul.f32 %v7568_v44, %v3338_v43  ;;  %v3004_v59 = vpop.f32.mrf.mxu3  ;;  %v3161_v2 = vadd.f32 1e-05, %v3160_v0 }
 0x68a   : > { %v3345_v50 = vmul.f32 %v7570_v14, %v3158_v1  ;;  %v10671_v18 = vsub.f32 %v10465_v61, %v3004_v59  ;;  %vm3351_vm3 = vweird.f32 %v7570_v14 }
 0x68b   : > { %v3343_v62 = vsel %vm3342_vm2, %v7568_v44, %v3339_v10  ;;  %7571 = vrsqrt.f32 %v3161_v2  ;;  %vm3352_vm5 = vmor %vm3350_vm4, %vm3351_vm3  ;;  %vm3360_vm7 = vweird.f32 %v3161_v2 }
 0x68c   : > { %v3346_v19 = vmul.f32 %v7570_v14, %v3345_v50  ;;  %v3546_v38 = vmul.f32 %v3343_v62, %v10425_v39  ;;  %v3090_v51 = vmul.f32 %v10671_v18, %v10671_v18 }
 0x68d   : > { %v2915_v0 = vpop.f32.mrf.mxu2 }
 0x68e   : > { %v3347_v43 = vmul.f32 0.5, %v3346_v19  ;;  %v3579_v36 = vmul.f32 %v10353_v15, %v3546_v38  ;;  %3180 = vmatmul.f32.gmra.mxu0 %v3090_v51  ;;  %v10679_v61 = vadd.f32 %v2915_v0, %v9819_v35 }
 0x68f   : > { %v3714_v28 = vpop.f32.mrf.mxu1 }
 0x690   : > { %v3348_v57 = vsub.f32 1.5, %v3347_v43  ;;  %v3612_v22 = vadd.f32 %v10362_v31, %v3579_v36  ;;  %v10682_v44 = vadd.f32 %v3714_v28, %v10541_v54  ;;  %3027 = vmatmul.f32.gmra.mxu3 %v10679_v61 }
 0x691   : > { %v7572_v39 = vpop.eup %7571  ;;  %v3007_v62 = vpop.f32.mrf.mxu3 }
 0x692   : > { %v3349_v10 = vmul.f32 %v7570_v14, %v3348_v57  ;;  %v3644_v50 = vmax.f32 %v3612_v22, 0.0  ;;  %v3355_v59 = vmul.f32 %v7572_v39, %v3161_v2  ;;  %v3163_v19 = vpop.f32.mrf.mxu0  ;;  %3826 = vmatmul.f32.gmra.mxu2 %v10682_v44  ;;  %v10687_v38 = vsub.f32 %v10496_v27, %v3007_v62 }
 0x693   : > { %v3164_v51 = vadd.f32 1e-05, %v3163_v19  ;;  %vm3361_vm6 = vweird.f32 %v7572_v39 }
 0x694   : > { %3734 = vmatmul.f32.gmra.mxu1 %v3644_v50  ;;  %v3353_v43 = vsel %vm3352_vm5, %v7570_v14, %v3349_v10  ;;  %v3356_v28 = vmul.f32 %v7572_v39, %v3355_v59  ;;  %v3091_v57 = vmul.f32 %v10687_v38, %v10687_v38  ;;  %vm3362_vm1 = vmor %vm3360_vm7, %vm3361_vm6 }
 0x695   : > { %v3547_v36 = vmul.f32 %v3353_v43, %v10449_v25  ;;  %7573 = vrsqrt.f32 %v3164_v51  ;;  %v2918_v0 = vpop.f32.mrf.mxu2  ;;  %vm3370_vm9 = vweird.f32 %v3164_v51 }
 0x696   : > { %v3357_v22 = vmul.f32 0.5, %v3356_v28  ;;  %3183 = vmatmul.f32.gmra.mxu0 %v3091_v57  ;;  %v10694_v27 = vadd.f32 %v2918_v0, %v9819_v35 }
 0x697   : > { %v3580_v1 = vmul.f32 %v10353_v15, %v3547_v36 }
 0x698   : > { %v3358_v42 = vsub.f32 1.5, %v3357_v22  ;;  %3030 = vmatmul.f32.gmra.mxu3 %v10694_v27 }
 0x699   : > { %v3613_v50 = vadd.f32 %v10362_v31, %v3580_v1  ;;  %v3717_v14 = vpop.f32.mrf.mxu1  ;;  %v3010_v25 = vpop.f32.mrf.mxu3 }
 0x69a   : > { %v3359_v10 = vmul.f32 %v7572_v39, %v3358_v42  ;;  %v3166_v59 = vpop.f32.mrf.mxu0  ;;  %v10699_v62 = vadd.f32 %v3717_v14, %v10541_v54  ;;  %v10702_v28 = vsub.f32 %v10517_v58, %v3010_v25 }
 0x69b   : > { %v3645_v19 = vmax.f32 %v3613_v50, 0.0  ;;  %v7574_v43 = vpop.eup %7573  ;;  %v3167_v36 = vadd.f32 1e-05, %v3166_v59 }
 0x69c   : > { %v3365_v57 = vmul.f32 %v7574_v43, %v3164_v51  ;;  %3829 = vmatmul.f32.gmra.mxu2 %v10699_v62  ;;  %v3363_v42 = vsel %vm3362_vm1, %v7572_v39, %v3359_v10  ;;  %v3092_v2 = vmul.f32 %v10702_v28, %v10702_v28  ;;  %vm3371_vm8 = vweird.f32 %v7574_v43 }
 0x69d   : > { %3737 = vmatmul.f32.gmra.mxu1 %v3645_v19  ;;  %7575 = vrsqrt.f32 %v3167_v36  ;;  %v3548_v22 = vmul.f32 %v3363_v42, %v10472_v6  ;;  %v2921_v0 = vpop.f32.mrf.mxu2  ;;  %vm3372_vm10 = vmor %vm3370_vm9, %vm3371_vm8  ;;  %vm3380_vm12 = vweird.f32 %v3167_v36 }
 0x69e   : > { %v3366_v1 = vmul.f32 %v7574_v43, %v3365_v57  ;;  %3186 = vmatmul.f32.gmra.mxu0 %v3092_v2  ;;  %v10710_v58 = vadd.f32 %v2921_v0, %v9819_v35 }
 0x69f   : > { %v3581_v50 = vmul.f32 %v10353_v15, %v3548_v22 }
 0x6a0   : > { %v3367_v14 = vmul.f32 0.5, %v3366_v1  ;;  %3033 = vmatmul.f32.gmra.mxu3 %v10710_v58 }
 0x6a1   : > { %v3614_v25 = vadd.f32 %v10362_v31, %v3581_v50  ;;  %v3013_v39 = vpop.f32.mrf.mxu3  ;;  %v3720_v42 = vpop.f32.mrf.mxu1 }
 0x6a2   : > { %v3368_v59 = vsub.f32 1.5, %v3367_v14  ;;  %v3169_v10 = vpop.f32.mrf.mxu0  ;;  %v10715_v6 = vsub.f32 %v10538_v48, %v3013_v39  ;;  %v10720_v1 = vadd.f32 %v3720_v42, %v10541_v54 }
 0x6a3   : > { %v7576_v19 = vpop.eup %7575  ;;  %v10717_v57 = vadd.f32 1e-05, %v3169_v10  ;;  %v3646_v2 = vmax.f32 %v3614_v25, 0.0 }
 0x6a4   : > { %v3369_v22 = vmul.f32 %v7574_v43, %v3368_v59  ;;  %v3375_v35 = vmul.f32 %v7576_v19, %v3167_v36  ;;  %v3093_v0 = vmul.f32 %v10715_v6, %v10715_v6  ;;  %3832 = vmatmul.f32.gmra.mxu2 %v10720_v1  ;;  %vm3381_vm11 = vweird.f32 %v7576_v19  ;;  %v4715_v36 = vld [vmem:[%s12977_s12 + $0x70] sm:$0xff] }
 0x6a5   : > { %7577 = vrsqrt.f32 %v10717_v57  ;;  %3740 = vmatmul.f32.gmra.mxu1 %v3646_v2  ;;  %v3812_v14 = vpop.f32.mrf.mxu2  ;;  %vm3382_vm0 = vmor %vm3380_vm12, %vm3381_vm11  ;;  %vm3390_vm14 = vweird.f32 %v10717_v57 }
 0x6a6   : > { %v3376_v50 = vmul.f32 %v7576_v19, %v3375_v35  ;;  %v3373_v48 = vsel %vm3372_vm10, %v7574_v43, %v3369_v22  ;;  %3189 = vmatmul.f32.gmra.mxu0 %v3093_v0  ;;  %v10728_v59 = vsub.f32 %v10553_v55, %v3812_v14  ;;  %v4716_v14 = vld [vmem:[%s12977_s12 + $0x78] sm:$0xff] }
 0x6a7   : > { %v3549_v25 = vmul.f32 %v3373_v48, %v10504_v23  ;;  %4718 = vmatpush.msra.mxu1 %v4716_v14 }
 0x6a8   : > { %v3377_v51 = vmul.f32 0.5, %v3376_v50  ;;  %v3940_v42 = vmul.f32 %v10728_v59, %v10728_v59 }
 0x6a9   : > { %v3582_v39 = vmul.f32 %v10353_v15, %v3549_v25  ;;  %v3016_v2 = vpop.f32.mrf.mxu3  ;;  %v3723_v0 = vpop.f32.mrf.mxu1  ;;  %4719 = vmatpush.msra.mxu1 %v4715_v36 }
 0x6aa   : > { %v3378_v10 = vsub.f32 1.5, %v3377_v51  ;;  %v3172_v35 = vpop.f32.mrf.mxu0  ;;  %v10734_v43 = vsub.f32 %v10560_v4, %v3016_v2  ;;  %v10739_v48 = vadd.f32 %v3723_v0, %v10541_v54  ;;  %3988 = vmatmul.f32.vlgmr.msrb.gmra.mxu3 %v3940_v42  ;;  %v4714_v2 = vld [vmem:[%s12977_s12 + $0x68] sm:$0xff] }
 0x6ab   : > { %v7578_v30 = vpop.eup %7577  ;;  %v3173_v22 = vadd.f32 1e-05, %v3172_v35  ;;  %v3615_v23 = vadd.f32 %v10362_v31, %v3582_v39  ;;  %4720 = vmatpush.msra.mxu1 %v4714_v2 }
 0x6ac   : > { %v3379_v50 = vmul.f32 %v7576_v19, %v3378_v10  ;;  %v3385_v55 = vmul.f32 %v7578_v30, %v10717_v57  ;;  %v3094_v4 = vmul.f32 %v10734_v43, %v10734_v43  ;;  %3835 = vmatmul.f32.gmra.mxu2 %v10739_v48  ;;  %vm3391_vm13 = vweird.f32 %v7578_v30 }
 0x6ad   : > { %7579 = vrsqrt.f32 %v3173_v22  ;;  %v3647_v25 = vmax.f32 %v3615_v23, 0.0  ;;  %v3815_v10 = vpop.f32.mrf.mxu2  ;;  %vm3392_vm15 = vmor %vm3390_vm14, %vm3391_vm13  ;;  %vm3400_vm3 = vweird.f32 %v3173_v22 }
 0x6ae   : > { %v3386_v51 = vmul.f32 %v7578_v30, %v3385_v55  ;;  %v3383_v39 = vsel %vm3382_vm0, %v7576_v19, %v3379_v50  ;;  %3192 = vmatmul.f32.gmra.mxu0 %v3094_v4  ;;  %v10756_v0 = vsub.f32 %v10578_v17, %v3815_v10  ;;  %v4713_v19 = vld [vmem:[%s12977_s12 + $0x60] sm:$0xff] }
 0x6af   : > { %3743 = vmatmul.f32.gmra.mxu1 %v3647_v25  ;;  %v3550_v42 = vmul.f32 %v3383_v39, %v10524_v41 }
 0x6b0   : > { %v3387_v35 = vmul.f32 0.5, %v3386_v51  ;;  %v3941_v41 = vmul.f32 %v10756_v0, %v10756_v0  ;;  %4721 = vmatpush.msra.mxu1 %v4713_v19 }
 0x6b1   : > { %v3583_v23 = vmul.f32 %v10353_v15, %v3550_v42  ;;  %v3726_v14 = vpop.f32.mrf.mxu1 }
 0x6b2   : > { %v3388_v50 = vsub.f32 1.5, %v3387_v35  ;;  %v10767_v36 = vadd.f32 %v3726_v14, %v10541_v54  ;;  %3991 = vmatmul.f32.gmra.mxu3 %v3941_v41 }
 0x6b3   : > { %v7580_v55 = vpop.eup %7579  ;;  %v3616_v4 = vadd.f32 %v10362_v31, %v3583_v23 }
 0x6b4   : > { %v3389_v25 = vmul.f32 %v7578_v30, %v3388_v50  ;;  %v3395_v17 = vmul.f32 %v7580_v55, %v3173_v22  ;;  %3838 = vmatmul.f32.gmra.mxu2 %v10767_v36  ;;  %vm3401_vm2 = vweird.f32 %v7580_v55 }
 0x6b5   : > { %v3648_v51 = vmax.f32 %v3616_v4, 0.0  ;;  %v3818_v42 = vpop.f32.mrf.mxu2  ;;  %vm3402_vm4 = vmor %vm3400_vm3, %vm3401_vm2 }
 0x6b6   : > { %v3396_v39 = vmul.f32 %v7580_v55, %v3395_v17  ;;  %v3393_v10 = vsel %vm3392_vm15, %v7578_v30, %v3389_v25  ;;  %v10772_v23 = vsub.f32 %v10598_v21, %v3818_v42 }
 0x6b7   : > { %3746 = vmatmul.f32.gmra.mxu1 %v3648_v51  ;;  %v3551_v2 = vmul.f32 %v3393_v10, %v10546_v45 }
 0x6b8   : > { %v3397_v35 = vmul.f32 0.5, %v3396_v39  ;;  %v3942_v19 = vmul.f32 %v10772_v23, %v10772_v23 }
 0x6b9   : > { %v3584_v57 = vmul.f32 %v10353_v15, %v3551_v2  ;;  %v3729_v41 = vpop.f32.mrf.mxu1 }
 0x6ba   : > { %v3398_v50 = vsub.f32 1.5, %v3397_v35  ;;  %v10779_v30 = vadd.f32 %v3729_v41, %v10541_v54  ;;  %3994 = vmatmul.f32.gmra.mxu3 %v3942_v19 }
 0x6bb   : > { %v3617_v14 = vadd.f32 %v10362_v31, %v3584_v57  ;;  %v4712_v57 = vld [vmem:[%s12977_s12 + $0x58] sm:$0xff] }
 0x6bc   : > { %v3399_v4 = vmul.f32 %v7580_v55, %v3398_v50  ;;  %3841 = vmatmul.f32.gmra.mxu2 %v10779_v30  ;;  %4722 = vmatpush.msra.mxu1 %v4712_v57 }
 0x6bd   : > { %v3649_v45 = vmax.f32 %v3617_v14, 0.0  ;;  %v3821_v25 = vpop.f32.mrf.mxu2 }
 0x6be   : > { %v3403_v21 = vsel %vm3402_vm4, %v7580_v55, %v3399_v4  ;;  %v10784_v51 = vsub.f32 %v10617_v37, %v3821_v25 }
 0x6bf   : > { %3749 = vmatmul.f32.gmra.mxu1 %v3649_v45  ;;  %v3552_v17 = vmul.f32 %v3403_v21, %v10572_v3 }
 0x6c0   : > { %v3943_v22 = vmul.f32 %v10784_v51, %v10784_v51 }
 0x6c1   : > { %v3585_v39 = vmul.f32 %v10353_v15, %v3552_v17  ;;  %v3732_v10 = vpop.f32.mrf.mxu1 }
 0x6c2   : > { %v10791_v2 = vadd.f32 %v3732_v10, %v10541_v54  ;;  %3997 = vmatmul.f32.gmra.mxu3 %v3943_v22 }
 0x6c3   : > { %v3618_v42 = vadd.f32 %v10362_v31, %v3585_v39 }
 0x6c4   : > { %3844 = vmatmul.f32.gmra.mxu2 %v10791_v2 }
 0x6c5   : > { %v3650_v55 = vmax.f32 %v3618_v42, 0.0  ;;  %v3824_v35 = vpop.f32.mrf.mxu2  ;;  %v4711_v42 = vld [vmem:[%s12977_s12 + $0x50] sm:$0xff] }
 0x6c6   : > { %v10795_v3 = vsub.f32 %v10636_v20, %v3824_v35  ;;  %4723 = vmatpush.msra.mxu1 %v4711_v42 }
 0x6c7   : > { %3752 = vmatmul.f32.gmra.mxu1 %v3650_v55 }
 0x6c8   : > { %v3944_v37 = vmul.f32 %v10795_v3, %v10795_v3 }
 0x6ca   : > { %4000 = vmatmul.f32.gmra.mxu3 %v3944_v37 }
 0x6f9   : > { %v3019_v50 = vpop.f32.mrf.mxu3  ;;  %v3175_v19 = vpop.f32.mrf.mxu0 }
 0x6fa   : > { %v10803_v41 = vsub.f32 %v10649_v16, %v3019_v50  ;;  %v3176_v14 = vadd.f32 1e-05, %v3175_v19 }
 0x6fc   : > { %v3095_v4 = vmul.f32 %v10803_v41, %v10803_v41  ;;  %7581 = vrsqrt.f32 %v3176_v14  ;;  %vm3410_vm6 = vweird.f32 %v3176_v14 }
 0x6fe   : > { %3195 = vmatmul.f32.gmra.mxu0 %v3095_v4  ;;  %v4550_v4 = vld [vmem:[%s12975_s10 + $0x78] sm:$0xff] }
 0x6ff   : > { %4555 = vmatpush.msra.mxu0 %v4550_v4 }
 0x702   : > { %v7582_v20 = vpop.eup %7581  ;;  %v3022_v45 = vpop.f32.mrf.mxu3 }
 0x703   : > { %v3405_v21 = vmul.f32 %v7582_v20, %v3176_v14  ;;  %v10808_v25 = vsub.f32 %v10658_v46, %v3022_v45  ;;  %v3178_v17 = vpop.f32.mrf.mxu0  ;;  %vm3411_vm5 = vweird.f32 %v7582_v20  ;;  %v4549_v14 = vld [vmem:[%s12975_s10 + $0x70] sm:$0xff] }
 0x704   : > { %v3179_v39 = vadd.f32 1e-05, %v3178_v17  ;;  %vm3412_vm7 = vmor %vm3410_vm6, %vm3411_vm5  ;;  %4556 = vmatpush.msra.mxu0 %v4549_v14 }
 0x705   : > { %v3406_v22 = vmul.f32 %v7582_v20, %v3405_v21  ;;  %v3096_v10 = vmul.f32 %v10808_v25, %v10808_v25 }
 0x706   : > { %7583 = vrsqrt.f32 %v3179_v39  ;;  %vm3420_vm8 = vweird.f32 %v3179_v39 }
 0x707   : > { %v3407_v16 = vmul.f32 0.5, %v3406_v22  ;;  %3198 = vmatmul.f32.gmra.mxu0 %v3096_v10 }
 0x709   : > { %v3408_v55 = vsub.f32 1.5, %v3407_v16 }
 0x70b   : > { %v3409_v35 = vmul.f32 %v7582_v20, %v3408_v55  ;;  %v3181_v37 = vpop.f32.mrf.mxu0  ;;  %v3025_v45 = vpop.f32.mrf.mxu3 }
 0x70c   : > { %v7584_v46 = vpop.eup %7583  ;;  %v10815_v50 = vadd.f32 1e-05, %v3181_v37  ;;  %v10822_v22 = vsub.f32 %v10667_v9, %v3025_v45  ;;  %v4547_v37 = vld [vmem:[%s12975_s10 + $0x60] sm:$0xff] }
 0x70d   : > { %v3415_v57 = vmul.f32 %v7584_v46, %v3179_v39  ;;  %v3413_v19 = vsel %vm3412_vm7, %v7582_v20, %v3409_v35  ;;  %vm3421_vm1 = vweird.f32 %v7584_v46 }
 0x70e   : > { %v3553_v21 = vmul.f32 %v3413_v19, %v10653_v7  ;;  %7585 = vrsqrt.f32 %v10815_v50  ;;  %v3097_v16 = vmul.f32 %v10822_v22, %v10822_v22  ;;  %v4548_v7 = vld [vmem:[%s12975_s10 + $0x68] sm:$0xff]  ;;  %vm3422_vm9 = vmor %vm3420_vm8, %vm3421_vm1  ;;  %vm3430_vm11 = vweird.f32 %v10815_v50 }
 0x70f   : > { %v3416_v17 = vmul.f32 %v7584_v46, %v3415_v57  ;;  %4557 = vmatpush.msra.mxu0 %v4548_v7  ;;  %v4710_v7 = vld [vmem:[%s12977_s12 + $0x48] sm:$0xff] }
 0x710   : > { %v3586_v20 = vmul.f32 %v10353_v15, %v3553_v21  ;;  %3201 = vmatmul.f32.gmra.mxu0 %v3097_v16  ;;  %v4546_v21 = vld [vmem:[%s12975_s10 + $0x58] sm:$0xff]  ;;  %4724 = vmatpush.msra.mxu1 %v4710_v7 }
 0x711   : > { %v3417_v10 = vmul.f32 0.5, %v3416_v17  ;;  %v3735_v42 = vpop.f32.mrf.mxu1  ;;  %4558 = vmatpush.msra.mxu0 %v4547_v37 }
 0x712   : > { %v10835_v9 = vadd.f32 %v3735_v42, %v10541_v54  ;;  %v3619_v55 = vadd.f32 %v10362_v31, %v3586_v20 }
 0x713   : > { %v3418_v35 = vsub.f32 1.5, %v3417_v10  ;;  %v3184_v45 = vpop.f32.mrf.mxu0  ;;  %v3028_v14 = vpop.f32.mrf.mxu3  ;;  %4559 = vmatpush.msra.mxu0 %v4546_v21  ;;  %v4543_v21 = vld [vmem:[%s12975_s10 + $0x40] sm:$0xff] }
 0x714   : > { %3847 = vmatmul.f32.gmra.mxu2 %v10835_v9  ;;  %v3651_v57 = vmax.f32 %v3619_v55, 0.0  ;;  %v7586_v19 = vpop.eup %7585  ;;  %v10846_v20 = vadd.f32 1e-05, %v3184_v45  ;;  %v10849_v16 = vsub.f32 %v10679_v61, %v3028_v14  ;;  %v4545_v55 = vld [vmem:[%s12975_s10 + $0x50] sm:$0xff] }
 0x715   : > { %v3419_v4 = vmul.f32 %v7584_v46, %v3418_v35  ;;  %v3425_v17 = vmul.f32 %v7586_v19, %v10815_v50  ;;  %v3827_v10 = vpop.f32.mrf.mxu2  ;;  %4560 = vmatpush.msra.mxu0 %v4545_v55  ;;  %vm3431_vm10 = vweird.f32 %v7586_v19 }
 0x716   : > { %3755 = vmatmul.f32.gmra.mxu1 %v3651_v57  ;;  %v10852_v42 = vsub.f32 %v10682_v44, %v3827_v10  ;;  %7587 = vrsqrt.f32 %v10846_v20  ;;  %v3098_v61 = vmul.f32 %v10849_v16, %v10849_v16  ;;  %vm3432_vm12 = vmor %vm3430_vm11, %vm3431_vm10  ;;  %vm3440_vm13 = vweird.f32 %v10846_v20 }
 0x717   : > { %v3423_v39 = vsel %vm3422_vm9, %v7584_v46, %v3419_v4  ;;  %v3426_v35 = vmul.f32 %v7586_v19, %v3425_v17  ;;  %v4544_v46 = vld [vmem:[%s12975_s10 + $0x48] sm:$0xff] }
 0x718   : > { %v3554_v37 = vmul.f32 %v3423_v39, %v10662_v49  ;;  %v3945_v44 = vmul.f32 %v10852_v42, %v10852_v42  ;;  %4561 = vmatpush.msra.mxu0 %v4544_v46  ;;  %v4542_v39 = vld [vmem:[%s12975_s10 + $0x38] sm:$0xff] }
 0x719   : > { %v3427_v57 = vmul.f32 0.5, %v3426_v35  ;;  %3204 = vmatmul.f32.gmra.mxu0 %v3098_v61 }
 0x71a   : > { %v3738_v4 = vpop.f32.mrf.mxu1  ;;  %v3587_v45 = vmul.f32 %v10353_v15, %v3554_v37  ;;  %4003 = vmatmul.f32.gmra.mxu3 %v3945_v44  ;;  %4562 = vmatpush.msra.mxu0 %v4543_v21 }
 0x71b   : > { %v10871_v49 = vadd.f32 %v3738_v4, %v10541_v54  ;;  %v3428_v17 = vsub.f32 1.5, %v3427_v57  ;;  %v3187_v10 = vpop.f32.mrf.mxu0  ;;  %v3031_v35 = vpop.f32.mrf.mxu3  ;;  %v4541_v57 = vld [vmem:[%s12975_s10 + $0x30] sm:$0xff] }
 0x71c   : > { %v3620_v14 = vadd.f32 %v10362_v31, %v3587_v45  ;;  %v7588_v7 = vpop.eup %7587  ;;  %v10882_v37 = vadd.f32 1e-05, %v3187_v10  ;;  %4563 = vmatpush.msra.mxu0 %v4542_v39  ;;  %v10886_v46 = vsub.f32 %v10694_v27, %v3031_v35 }
 0x71d   : > { %3850 = vmatmul.f32.gmra.mxu2 %v10871_v49  ;;  %v3429_v55 = vmul.f32 %v7586_v19, %v3428_v17  ;;  %v3435_v44 = vmul.f32 %v7588_v7, %v10846_v20  ;;  %vm3441_vm0 = vweird.f32 %v7588_v7 }
 0x71e   : > { %v3652_v61 = vmax.f32 %v3620_v14, 0.0  ;;  %7589 = vrsqrt.f32 %v10882_v37  ;;  %4564 = vmatpush.msra.mxu0 %v4541_v57  ;;  %v3099_v21 = vmul.f32 %v10886_v46, %v10886_v46  ;;  %v4540_v14 = vld [vmem:[%s12975_s10 + $0x28] sm:$0xff]  ;;  %v4538_v57 = vld [vmem:[%s12975_s10 + $0x18] sm:$0xff]  ;;  %vm3442_vm14 = vmor %vm3440_vm13, %vm3441_vm0  ;;  %vm3450_vm2 = vweird.f32 %v10882_v37 }
 0x71f   : > { %v3830_v4 = vpop.f32.mrf.mxu2  ;;  %v3433_v50 = vsel %vm3432_vm12, %v7586_v19, %v3429_v55  ;;  %v3436_v45 = vmul.f32 %v7588_v7, %v3435_v44 }
 0x720   : > { %3758 = vmatmul.f32.gmra.mxu1 %v3652_v61  ;;  %v10895_v17 = vsub.f32 %v10699_v62, %v3830_v4  ;;  %v3555_v27 = vmul.f32 %v3433_v50, %v10671_v18  ;;  %4565 = vmatpush.msra.mxu0 %v4540_v14  ;;  %v4539_v62 = vld [vmem:[%s12975_s10 + $0x20] sm:$0xff] }
 0x721   : > { %v3437_v10 = vmul.f32 0.5, %v3436_v45  ;;  %3207 = vmatmul.f32.gmra.mxu0 %v3099_v21 }
 0x722   : > { %v3946_v39 = vmul.f32 %v10895_v17, %v10895_v17  ;;  %v3741_v19 = vpop.f32.mrf.mxu1  ;;  %v3588_v55 = vmul.f32 %v10353_v15, %v3555_v27  ;;  %4566 = vmatpush.msra.mxu0 %v4539_v62 }
 0x723   : > { %v10908_v35 = vadd.f32 %v3741_v19, %v10541_v54  ;;  %v3438_v18 = vsub.f32 1.5, %v3437_v10  ;;  %v3190_v61 = vpop.f32.mrf.mxu0  ;;  %v3034_v50 = vpop.f32.mrf.mxu3  ;;  %v4537_v10 = vld [vmem:[%s12975_s10 + $0x10] sm:$0xff] }
 0x724   : > { %4006 = vmatmul.f32.gmra.mxu3 %v3946_v39  ;;  %v3621_v44 = vadd.f32 %v10362_v31, %v3588_v55  ;;  %v7590_v4 = vpop.eup %7589  ;;  %v10914_v45 = vadd.f32 1e-05, %v3190_v61  ;;  %4567 = vmatpush.msra.mxu0 %v4538_v57  ;;  %v10920_v14 = vsub.f32 %v10710_v58, %v3034_v50  ;;  %v4536_v58 = vld [vmem:[%s12975_s10 + $0x8] sm:$0xff]  ;;  %v4709_v61 = vld [vmem:[%s12977_s12 + $0x40] sm:$0xff] }
 0x725   : > { %3853 = vmatmul.f32.gmra.mxu2 %v10908_v35  ;;  %v3439_v21 = vmul.f32 %v7588_v7, %v3438_v18  ;;  %v3445_v27 = vmul.f32 %v7590_v4, %v10882_v37  ;;  %4725 = vmatpush.msra.mxu1 %v4709_v61  ;;  %vm3451_vm15 = vweird.f32 %v7590_v4 }
 0x726   : > { %7591 = vrsqrt.f32 %v10914_v45  ;;  %v3653_v39 = vmax.f32 %v3621_v44, 0.0  ;;  %4568 = vmatpush.msra.mxu0 %v4537_v10  ;;  %v3100_v55 = vmul.f32 %v10920_v14, %v10920_v14  ;;  %vm3452_vm3 = vmor %vm3450_vm2, %vm3451_vm15  ;;  %vm3460_vm5 = vweird.f32 %v10914_v45 }
 0x727   : > { %v3446_v19 = vmul.f32 %v7590_v4, %v3445_v27  ;;  %v3443_v20 = vsel %vm3442_vm14, %v7588_v7, %v3439_v21  ;;  %v3833_v62 = vpop.f32.mrf.mxu2  ;;  %v4535_v7 = vld [vmem:[%s12975_s10] sm:$0xff] }
 0x728   : > { %3761 = vmatmul.f32.gmra.mxu1 %v3653_v39  ;;  %v3556_v18 = vmul.f32 %v3443_v20, %v10687_v38  ;;  %4569 = vmatpush.msra.mxu0 %v4536_v58  ;;  %v10937_v57 = vsub.f32 %v10720_v1, %v3833_v62 }
 0x729   : > { %v3447_v44 = vmul.f32 0.5, %v3446_v19  ;;  %3210 = vmatmul.f32.gmra.mxu0 %v3100_v55 }
 0x72a   : > { %v3589_v50 = vmul.f32 %v10353_v15, %v3556_v18  ;;  %4570 = vmatpush.msra.mxu0 %v4535_v7  ;;  %v3947_v38 = vmul.f32 %v10937_v57, %v10937_v57 }
 0x72b   : > { %v3448_v21 = vsub.f32 1.5, %v3447_v44  ;;  %v3193_v27 = vpop.f32.mrf.mxu0 }
 0x72c   : > { %v3744_v10 = vpop.f32.mrf.mxu1  ;;  %v7592_v39 = vpop.eup %7591  ;;  %v3194_v19 = vadd.f32 1e-05, %v3193_v27  ;;  %v3622_v55 = vadd.f32 %v10362_v31, %v3589_v50  ;;  %4009 = vmatmul.f32.gmra.mxu3 %v3947_v38 }
 0x72d   : > { %v10946_v1 = vadd.f32 %v3744_v10, %v10541_v54  ;;  %v3449_v20 = vmul.f32 %v7590_v4, %v3448_v21  ;;  %v3455_v58 = vmul.f32 %v7592_v39, %v10914_v45  ;;  %v3989_v62 = vpop.f32.mrf.mxu3  ;;  %vm3461_vm4 = vweird.f32 %v7592_v39  ;;  %v4708_v45 = vld [vmem:[%s12977_s12 + $0x38] sm:$0xff] }
 0x72e   : > { %7593 = vrsqrt.f32 %v3194_v19  ;;  %v3654_v18 = vmax.f32 %v3622_v55, 0.0  ;;  %v10952_v44 = vadd.f32 1e-05, %v3989_v62  ;;  %vm3462_vm6 = vmor %vm3460_vm5, %vm3461_vm4  ;;  %4726 = vmatpush.msra.mxu1 %v4708_v45  ;;  %vm3470_vm1 = vweird.f32 %v3194_v19 }
 0x72f   : > { %3856 = vmatmul.f32.gmra.mxu2 %v10946_v1  ;;  %v3456_v61 = vmul.f32 %v7592_v39, %v3455_v58  ;;  %v3453_v7 = vsel %vm3452_vm3, %v7590_v4, %v3449_v20  ;;  %v3836_v27 = vpop.f32.mrf.mxu2 }
 0x730   : > { %3764 = vmatmul.f32.gmra.mxu1 %v3654_v18  ;;  %v3557_v50 = vmul.f32 %v3453_v7, %v10702_v28  ;;  %7595 = vrsqrt.f32 %v10952_v44  ;;  %v10957_v37 = vsub.f32 %v10739_v48, %v3836_v27  ;;  %vm4091_vm10 = vweird.f32 %v10952_v44 }
 0x731   : > { %v3457_v21 = vmul.f32 0.5, %v3456_v61 }
 0x732   : > { %v3590_v38 = vmul.f32 %v10353_v15, %v3557_v50  ;;  %v3948_v55 = vmul.f32 %v10957_v37, %v10957_v37 }
 0x733   : > { %v3458_v10 = vsub.f32 1.5, %v3457_v21 }
 0x734   : > { %v3747_v58 = vpop.f32.mrf.mxu1  ;;  %v7594_v62 = vpop.eup %7593  ;;  %v3623_v28 = vadd.f32 %v10362_v31, %v3590_v38  ;;  %4012 = vmatmul.f32.gmra.mxu3 %v3948_v55 }
 0x735   : > { %v10963_v4 = vadd.f32 %v3747_v58, %v10541_v54  ;;  %v3459_v20 = vmul.f32 %v7592_v39, %v3458_v10  ;;  %v3465_v18 = vmul.f32 %v7594_v62, %v3194_v19  ;;  %v3992_v48 = vpop.f32.mrf.mxu3  ;;  %vm3471_vm7 = vweird.f32 %v7594_v62 }
 0x736   : > { %v3655_v61 = vmax.f32 %v3623_v28, 0.0  ;;  %v7596_v7 = vpop.eup %7595  ;;  %v10968_v50 = vadd.f32 1e-05, %v3992_v48  ;;  %vm3472_vm8 = vmor %vm3470_vm1, %vm3471_vm7 }
 0x737   : > { %3859 = vmatmul.f32.gmra.mxu2 %v10963_v4  ;;  %v3466_v27 = vmul.f32 %v7594_v62, %v3465_v18  ;;  %v3463_v21 = vsel %vm3462_vm6, %v7592_v39, %v3459_v20  ;;  %v4086_v58 = vmul.f32 %v7596_v7, %v10952_v44  ;;  %v3839_v47 = vpop.f32.mrf.mxu2  ;;  %vm4092_vm9 = vweird.f32 %v7596_v7 }
 0x738   : > { %3767 = vmatmul.f32.gmra.mxu1 %v3655_v61  ;;  %v3558_v38 = vmul.f32 %v3463_v21, %v10715_v6  ;;  %7597 = vrsqrt.f32 %v10968_v50  ;;  %v10977_v55 = vsub.f32 %v10767_v36, %v3839_v47  ;;  %vm4093_vm11 = vmor %vm4091_vm10, %vm4092_vm9  ;;  %vm4101_vm0 = vweird.f32 %v10968_v50 }
 0x739   : > { %v3467_v10 = vmul.f32 0.5, %v3466_v27  ;;  %v4087_v28 = vmul.f32 %v7596_v7, %v4086_v58 }
 0x73a   : > { %v3591_v39 = vmul.f32 %v10353_v15, %v3558_v38  ;;  %v3949_v18 = vmul.f32 %v10977_v55, %v10977_v55 }
 0x73b   : > { %v3468_v20 = vsub.f32 1.5, %v3467_v10  ;;  %v4088_v48 = vmul.f32 0.5, %v4087_v28 }
 0x73c   : > { %v3750_v6 = vpop.f32.mrf.mxu1  ;;  %v3624_v27 = vadd.f32 %v10362_v31, %v3591_v39  ;;  %4015 = vmatmul.f32.gmra.mxu3 %v3949_v18  ;;  %v7944_v18 = vld [vmem:[%s12974_s9] sm:$0x7] }
 0x73d   : > { %v10983_v61 = vadd.f32 %v3750_v6, %v10541_v54  ;;  %v3469_v21 = vmul.f32 %v7594_v62, %v3468_v20  ;;  %v4089_v47 = vsub.f32 1.5, %v4088_v48  ;;  %v3995_v36 = vpop.f32.mrf.mxu3  ;;  %v4707_v20 = vld [vmem:[%s12977_s12 + $0x30] sm:$0xff]  ;;  %v10998_v48 = vperm.slane %v7944_v18, 1 }
 0x73e   : > { %v3656_v58 = vmax.f32 %v3624_v27, 0.0  ;;  %v7598_v38 = vpop.eup %7597  ;;  %v10987_v45 = vadd.f32 1e-05, %v3995_v36  ;;  %4727 = vmatpush.msra.mxu1 %v4707_v20 }
 0x73f   : > { %3862 = vmatmul.f32.gmra.mxu2 %v10983_v61  ;;  %v3473_v10 = vsel %vm3472_vm8, %v7594_v62, %v3469_v21  ;;  %v4090_v28 = vmul.f32 %v7596_v7, %v4089_v47  ;;  %v4096_v6 = vmul.f32 %v7598_v38, %v10968_v50  ;;  %v3842_v39 = vpop.f32.mrf.mxu2  ;;  %v11006_v21 = vperm.slane %v7944_v18, 2  ;;  %v4706_v50 = vld [vmem:[%s12977_s12 + $0x28] sm:$0xff] }
 0x740   : > { %3770 = vmatmul.f32.gmra.mxu1 %v3656_v58  ;;  %v3559_v19 = vmul.f32 %v3473_v10, %v10734_v43  ;;  %7599 = vrsqrt.f32 %v10987_v45  ;;  %v11003_v44 = vsub.f32 %v10779_v30, %v3842_v39  ;;  %vm4102_vm12 = vweird.f32 %v7598_v38 }
 0x741   : > { %v4094_v62 = vsel %vm4093_vm11, %v7596_v7, %v4090_v28  ;;  %v4097_v43 = vmul.f32 %v7598_v38, %v4096_v6  ;;  %vm4103_vm13 = vmor %vm4101_vm0, %vm4102_vm12  ;;  %4728 = vmatpush.msra.mxu1 %v4706_v50  ;;  %vm4111_vm15 = vweird.f32 %v10987_v45 }
 0x742   : > { %v3592_v27 = vmul.f32 %v10353_v15, %v3559_v19  ;;  %v4405_v47 = vmul.f32 %v4094_v62, %v10728_v59  ;;  %v3950_v36 = vmul.f32 %v11003_v44, %v11003_v44 }
 0x743   : > { %v4098_v10 = vmul.f32 0.5, %v4097_v43 }
 0x744   : > { %v3753_v58 = vpop.f32.mrf.mxu1  ;;  %v3625_v30 = vadd.f32 %v10362_v31, %v3592_v27  ;;  %v4438_v39 = vmul.f32 %v10998_v48, %v4405_v47  ;;  %4018 = vmatmul.f32.gmra.mxu3 %v3950_v36 }
 0x745   : > { %v11012_v33 = vadd.f32 %v3753_v58, %v10541_v54  ;;  %v4099_v7 = vsub.f32 1.5, %v4098_v10  ;;  %v3998_v28 = vpop.f32.mrf.mxu3 }
 0x746   : > { %v3657_v6 = vmax.f32 %v3625_v30, 0.0  ;;  %v7600_v59 = vpop.eup %7599  ;;  %v3999_v19 = vadd.f32 1e-05, %v3998_v28  ;;  %v4471_v20 = vadd.f32 %v11006_v21, %v4438_v39  ;;  %v4705_v39 = vld [vmem:[%s12977_s12 + $0x20] sm:$0xff] }
 0x747   : > { %3865 = vmatmul.f32.gmra.mxu2 %v11012_v33  ;;  %v4100_v18 = vmul.f32 %v7598_v38, %v4099_v7  ;;  %v4106_v62 = vmul.f32 %v7600_v59, %v10987_v45  ;;  %v3845_v43 = vpop.f32.mrf.mxu2  ;;  %vm4112_vm14 = vweird.f32 %v7600_v59  ;;  %4729 = vmatpush.msra.mxu1 %v4705_v39 }
 0x748   : > { %3773 = vmatmul.f32.gmra.mxu1 %v3657_v6  ;;  %7601 = vrsqrt.f32 %v3999_v19  ;;  %v11021_v27 = vsub.f32 %v10791_v2, %v3845_v43  ;;  %v4503_v47 = vmax.f32 %v4471_v20, 0.0  ;;  %vm4113_vm2 = vmor %vm4111_vm15, %vm4112_vm14  ;;  %vm4121_vm4 = vweird.f32 %v3999_v19 }
 0x749   : > { %v4107_v36 = vmul.f32 %v7600_v59, %v4106_v62  ;;  %v4104_v58 = vsel %vm4103_vm13, %v7598_v38, %v4100_v18 }
 0x74a   : > { %v3951_v10 = vmul.f32 %v11021_v27, %v11021_v27  ;;  %4571 = vmatmul.f32.vlgmr.msra.gmra.mxu0 %v4503_v47  ;;  %v4406_v30 = vmul.f32 %v4104_v58, %v10756_v0 }
 0x74b   : > { %v4108_v7 = vmul.f32 0.5, %v4107_v36 }
 0x74c   : > { %4021 = vmatmul.f32.gmra.mxu3 %v3951_v10  ;;  %v4439_v2 = vmul.f32 %v10998_v48, %v4406_v30 }
 0x74d   : > { %v4109_v38 = vsub.f32 1.5, %v4108_v7  ;;  %v4001_v28 = vpop.f32.mrf.mxu3 }
 0x74e   : > { %v7602_v6 = vpop.eup %7601  ;;  %v4002_v20 = vadd.f32 1e-05, %v4001_v28  ;;  %v4472_v0 = vadd.f32 %v11006_v21, %v4439_v2 }
 0x74f   : > { %v4110_v18 = vmul.f32 %v7600_v59, %v4109_v38  ;;  %v4116_v62 = vmul.f32 %v7602_v6, %v3999_v19  ;;  %vm4122_vm3 = vweird.f32 %v7602_v6 }
 0x750   : > { %7603 = vrsqrt.f32 %v4002_v20  ;;  %v4504_v43 = vmax.f32 %v4472_v0, 0.0  ;;  %vm4123_vm5 = vmor %vm4121_vm4, %vm4122_vm3  ;;  %vm4131_vm7 = vweird.f32 %v4002_v20 }
 0x751   : > { %v4117_v47 = vmul.f32 %v7602_v6, %v4116_v62  ;;  %v4114_v36 = vsel %vm4113_vm2, %v7600_v59, %v4110_v18 }
 0x752   : > { %4574 = vmatmul.f32.gmra.mxu0 %v4504_v43  ;;  %v4407_v58 = vmul.f32 %v4114_v36, %v10772_v23 }
 0x753   : > { %v4118_v10 = vmul.f32 0.5, %v4117_v47 }
 0x754   : > { %v4440_v30 = vmul.f32 %v10998_v48, %v4407_v58 }
 0x755   : > { %v4119_v50 = vsub.f32 1.5, %v4118_v10 }
 0x756   : > { %v7604_v39 = vpop.eup %7603  ;;  %v4473_v7 = vadd.f32 %v11006_v21, %v4440_v30  ;;  %v4704_v30 = vld [vmem:[%s12977_s12 + $0x18] sm:$0xff] }
 0x757   : > { %v4120_v2 = vmul.f32 %v7602_v6, %v4119_v50  ;;  %v4126_v45 = vmul.f32 %v7604_v39, %v4002_v20  ;;  %vm4132_vm6 = vweird.f32 %v7604_v39  ;;  %4730 = vmatpush.msra.mxu1 %v4704_v30 }
 0x758   : > { %v4505_v38 = vmax.f32 %v4473_v7, 0.0  ;;  %vm4133_vm1 = vmor %vm4131_vm7, %vm4132_vm6 }
 0x759   : > { %v4127_v28 = vmul.f32 %v7604_v39, %v4126_v45  ;;  %v4124_v0 = vsel %vm4123_vm5, %v7602_v6, %v4120_v2 }
 0x75a   : > { %4577 = vmatmul.f32.gmra.mxu0 %v4505_v38  ;;  %v4408_v59 = vmul.f32 %v4124_v0, %v10784_v51 }
 0x75b   : > { %v4128_v18 = vmul.f32 0.5, %v4127_v28  ;;  %v4703_v28 = vld [vmem:[%s12977_s12 + $0x10] sm:$0xff] }
 0x75c   : > { %v4441_v23 = vmul.f32 %v10998_v48, %v4408_v59  ;;  %4731 = vmatpush.msra.mxu1 %v4703_v28 }
 0x75d   : > { %v4129_v62 = vsub.f32 1.5, %v4128_v18 }
 0x75e   : > { %v4474_v43 = vadd.f32 %v11006_v21, %v4441_v23 }
 0x75f   : > { %v4130_v47 = vmul.f32 %v7604_v39, %v4129_v62 }
 0x760   : > { %v4506_v36 = vmax.f32 %v4474_v43, 0.0 }
 0x761   : > { %v4134_v19 = vsel %vm4133_vm1, %v7604_v39, %v4130_v47 }
 0x762   : > { %4580 = vmatmul.f32.gmra.mxu0 %v4506_v36  ;;  %v4409_v58 = vmul.f32 %v4134_v19, %v10795_v3 }
 0x764   : > { %v4442_v6 = vmul.f32 %v10998_v48, %v4409_v58 }
 0x766   : > { %v4475_v10 = vadd.f32 %v11006_v21, %v4442_v6 }
 0x768   : > { %v4507_v51 = vmax.f32 %v4475_v10, 0.0 }
 0x76a   : > { %4583 = vmatmul.f32.gmra.mxu0 %v4507_v51 }
 0x77b   : > { %v3196_v50 = vpop.f32.mrf.mxu0 }
 0x77c   : > { %v3197_v7 = vadd.f32 1e-05, %v3196_v50 }
 0x77e   : > { %7605 = vrsqrt.f32 %v3197_v7  ;;  %vm3480_vm9 = vweird.f32 %v3197_v7 }
 0x784   : > { %v7606_v20 = vpop.eup %7605  ;;  %v3199_v2 = vpop.f32.mrf.mxu0 }
 0x785   : > { %v3475_v39 = vmul.f32 %v7606_v20, %v3197_v7  ;;  %v3200_v45 = vadd.f32 1e-05, %v3199_v2  ;;  %vm3481_vm8 = vweird.f32 %v7606_v20 }
 0x786   : > { %vm3482_vm10 = vmor %vm3480_vm9, %vm3481_vm8 }
 0x787   : > { %v3476_v38 = vmul.f32 %v7606_v20, %v3475_v39  ;;  %7607 = vrsqrt.f32 %v3200_v45  ;;  %vm3490_vm12 = vweird.f32 %v3200_v45 }
 0x789   : > { %v3477_v3 = vmul.f32 0.5, %v3476_v38 }
 0x78b   : > { %v3478_v0 = vsub.f32 1.5, %v3477_v3 }
 0x78d   : > { %v7608_v59 = vpop.eup %7607  ;;  %v3479_v18 = vmul.f32 %v7606_v20, %v3478_v0  ;;  %v3202_v47 = vpop.f32.mrf.mxu0 }
 0x78e   : > { %v3485_v23 = vmul.f32 %v7608_v59, %v3200_v45  ;;  %v3203_v19 = vadd.f32 1e-05, %v3202_v47  ;;  %vm3491_vm11 = vweird.f32 %v7608_v59 }
 0x78f   : > { %v3483_v62 = vsel %vm3482_vm10, %v7606_v20, %v3479_v18  ;;  %vm3492_vm0 = vmor %vm3490_vm12, %vm3491_vm11 }
 0x790   : > { %v3486_v43 = vmul.f32 %v7608_v59, %v3485_v23  ;;  %v3560_v36 = vmul.f32 %v3483_v62, %v10803_v41  ;;  %7609 = vrsqrt.f32 %v3203_v19  ;;  %v4702_v62 = vld [vmem:[%s12977_s12 + $0x8] sm:$0xff]  ;;  %vm3500_vm14 = vweird.f32 %v3203_v19 }
 0x791   : > { %4732 = vmatpush.msra.mxu1 %v4702_v62 }
 0x792   : > { %v3487_v58 = vmul.f32 0.5, %v3486_v43  ;;  %v3593_v6 = vmul.f32 %v10353_v15, %v3560_v36 }
 0x793   : > { %v3756_v10 = vpop.f32.mrf.mxu1 }
 0x794   : > { %v3488_v51 = vsub.f32 1.5, %v3487_v58  ;;  %v11053_v30 = vadd.f32 %v3756_v10, %v10541_v54  ;;  %v3626_v50 = vadd.f32 %v10362_v31, %v3593_v6 }
 0x796   : > { %v3489_v7 = vmul.f32 %v7608_v59, %v3488_v51  ;;  %3868 = vmatmul.f32.gmra.mxu2 %v11053_v30  ;;  %v3658_v20 = vmax.f32 %v3626_v50, 0.0  ;;  %v3205_v2 = vpop.f32.mrf.mxu0  ;;  %v7610_v3 = vpop.eup %7609 }
 0x797   : > { %v3848_v41 = vpop.f32.mrf.mxu2  ;;  %v3206_v28 = vadd.f32 1e-05, %v3205_v2  ;;  %v3495_v18 = vmul.f32 %v7610_v3, %v3203_v19  ;;  %vm3501_vm13 = vweird.f32 %v7610_v3 }
 0x798   : > { %v11058_v39 = vsub.f32 %v10835_v9, %v3848_v41  ;;  %3776 = vmatmul.f32.gmra.mxu1 %v3658_v20  ;;  %v3493_v38 = vsel %vm3492_vm0, %v7608_v59, %v3489_v7  ;;  %vm3502_vm15 = vmor %vm3500_vm14, %vm3501_vm13 }
 0x799   : > { %v3561_v0 = vmul.f32 %v3493_v38, %v10808_v25  ;;  %7611 = vrsqrt.f32 %v3206_v28  ;;  %v3496_v43 = vmul.f32 %v7610_v3, %v3495_v18  ;;  %vm3510_vm3 = vweird.f32 %v3206_v28 }
 0x79a   : > { %v3952_v23 = vmul.f32 %v11058_v39, %v11058_v39 }
 0x79b   : > { %v3594_v45 = vmul.f32 %v10353_v15, %v3561_v0  ;;  %v3497_v47 = vmul.f32 0.5, %v3496_v43 }
 0x79c   : > { %4024 = vmatmul.f32.gmra.mxu3 %v3952_v23 }
 0x79d   : > { %v3759_v9 = vpop.f32.mrf.mxu1  ;;  %v3627_v59 = vadd.f32 %v10362_v31, %v3594_v45  ;;  %v4004_v36 = vpop.f32.mrf.mxu3  ;;  %v3498_v10 = vsub.f32 1.5, %v3497_v47 }
 0x79e   : > { %v11069_v25 = vadd.f32 %v3759_v9, %v10541_v54  ;;  %v11071_v58 = vadd.f32 1e-05, %v4004_v36  ;;  %v3208_v51 = vpop.f32.mrf.mxu0 }
 0x79f   : > { %v3659_v6 = vmax.f32 %v3627_v59, 0.0  ;;  %v7612_v7 = vpop.eup %7611  ;;  %v11074_v20 = vadd.f32 1e-05, %v3208_v51  ;;  %v3499_v2 = vmul.f32 %v7610_v3, %v3498_v10 }
 0x7a0   : > { %3871 = vmatmul.f32.gmra.mxu2 %v11069_v25  ;;  %v3851_v50 = vpop.f32.mrf.mxu2  ;;  %7613 = vrsqrt.f32 %v11071_v58  ;;  %v3505_v38 = vmul.f32 %v7612_v7, %v3206_v28  ;;  %vm3511_vm2 = vweird.f32 %v7612_v7  ;;  %vm4141_vm7 = vweird.f32 %v11071_v58 }
 0x7a1   : > { %v11078_v41 = vsub.f32 %v10871_v49, %v3851_v50  ;;  %3779 = vmatmul.f32.gmra.mxu1 %v3659_v6  ;;  %7615 = vrsqrt.f32 %v11074_v20  ;;  %v3503_v23 = vsel %vm3502_vm15, %v7610_v3, %v3499_v2  ;;  %vm3512_vm4 = vmor %vm3510_vm3, %vm3511_vm2  ;;  %vm3520_vm1 = vweird.f32 %v11074_v20 }
 0x7a2   : > { %v3506_v18 = vmul.f32 %v7612_v7, %v3505_v38  ;;  %v3562_v45 = vmul.f32 %v3503_v23, %v10822_v22 }
 0x7a3   : > { %v3953_v0 = vmul.f32 %v11078_v41, %v11078_v41 }
 0x7a4   : > { %v3507_v62 = vmul.f32 0.5, %v3506_v18  ;;  %v3595_v9 = vmul.f32 %v10353_v15, %v3562_v45 }
 0x7a5   : > { %4027 = vmatmul.f32.gmra.mxu3 %v3953_v0  ;;  %v3762_v49 = vpop.f32.mrf.mxu1 }
 0x7a6   : > { %v11084_v43 = vpop.eup %7613  ;;  %v3508_v59 = vsub.f32 1.5, %v3507_v62  ;;  %v3211_v47 = vpop.f32.mrf.mxu0  ;;  %v11090_v36 = vadd.f32 %v3762_v49, %v10541_v54  ;;  %v3628_v50 = vadd.f32 %v10362_v31, %v3595_v9  ;;  %v4701_v49 = vld [vmem:[%s12977_s12] sm:$0xff] }
 0x7a7   : > { %v4136_v19 = vmul.f32 %v11084_v43, %v11071_v58  ;;  %v4007_v6 = vpop.f32.mrf.mxu3  ;;  %v7616_v10 = vpop.eup %7615  ;;  %v11092_v3 = vadd.f32 1e-05, %v3211_v47  ;;  %4733 = vmatpush.msra.mxu1 %v4701_v49  ;;  %vm4142_vm6 = vweird.f32 %v11084_v43 }
 0x7a8   : > { %v11094_v22 = vadd.f32 1e-05, %v4007_v6  ;;  %v3854_v51 = vpop.f32.mrf.mxu2  ;;  %v3509_v2 = vmul.f32 %v7612_v7, %v3508_v59  ;;  %v3515_v38 = vmul.f32 %v7616_v10, %v11074_v20  ;;  %3874 = vmatmul.f32.gmra.mxu2 %v11090_v36  ;;  %v3660_v62 = vmax.f32 %v3628_v50, 0.0  ;;  %v7945_v6 = vld [vmem:[%s12970_s5 + $0x78] sm:$0xff]  ;;  %vm11131_vm8 = vmor %vm4141_vm7, %vm4142_vm6 }
 0x7a9   : > { %v4137_v0 = vmul.f32 %v11084_v43, %v4136_v19  ;;  %7617 = vrsqrt.f32 %v11092_v3  ;;  %v11102_v18 = vsub.f32 %v10908_v35, %v3854_v51  ;;  %vm3521_vm5 = vweird.f32 %v7616_v10  ;;  %5702 = vmatpush.msrb.mxu1 %v7945_v6 }
 0x7aa   : > { %v3516_v23 = vmul.f32 %v7616_v10, %v3515_v38  ;;  %7619 = vrsqrt.f32 %v11094_v22  ;;  %v3513_v59 = vsel %vm3512_vm4, %v7612_v7, %v3509_v2  ;;  %3782 = vmatmul.f32.gmra.mxu1 %v3660_v62  ;;  %vm3522_vm9 = vmor %vm3520_vm1, %vm3521_vm5  ;;  %vm3530_vm12 = vweird.f32 %v11092_v3 }
 0x7ab   : > { %v4138_v45 = vmul.f32 0.5, %v4137_v0  ;;  %v3954_v9 = vmul.f32 %v11102_v18, %v11102_v18  ;;  %v3563_v35 = vmul.f32 %v3513_v59, %v10849_v16  ;;  %v7946_v16 = vld [vmem:[%s12970_s5 + $0x70] sm:$0xff]  ;;  %vm4151_vm13 = vweird.f32 %v11094_v22 }
 0x7ac   : > { %v3517_v28 = vmul.f32 0.5, %v3516_v23  ;;  %5703 = vmatpush.msrb.mxu1 %v7946_v16 }
 0x7ad   : > { %v4139_v19 = vsub.f32 1.5, %v4138_v45  ;;  %v3765_v47 = vpop.f32.mrf.mxu1  ;;  %4030 = vmatmul.f32.gmra.mxu3 %v3954_v9  ;;  %v3596_v2 = vmul.f32 %v10353_v15, %v3563_v35 }
 0x7ae   : > { %v3518_v51 = vsub.f32 1.5, %v3517_v28  ;;  %v11117_v7 = vadd.f32 %v3765_v47, %v10541_v54 }
 0x7af   : > { %v4140_v50 = vmul.f32 %v11084_v43, %v4139_v19  ;;  %v11120_v38 = vpop.eup %7617  ;;  %v4010_v58 = vpop.f32.mrf.mxu3  ;;  %v3629_v49 = vadd.f32 %v10362_v31, %v3596_v2  ;;  %v7947_v19 = vld [vmem:[%s12970_s5 + $0x68] sm:$0xff] }
 0x7b0   : > { %v11126_v0 = vpop.eup %7619  ;;  %v3519_v23 = vmul.f32 %v7616_v10, %v3518_v51  ;;  %v3525_v62 = vmul.f32 %v11120_v38, %v11092_v3  ;;  %3877 = vmatmul.f32.gmra.mxu2 %v11117_v7  ;;  %v11142_v20 = vadd.f32 1e-05, %v4010_v58  ;;  %5704 = vmatpush.msrb.mxu1 %v7947_v19  ;;  %vm3531_vm10 = vweird.f32 %v11120_v38 }
 0x7b1   : > { %v4146_v9 = vmul.f32 %v11126_v0, %v11094_v22  ;;  %v4144_v28 = vsel %vm11131_vm8, %v11084_v43, %v4140_v50  ;;  %v3661_v6 = vmax.f32 %v3629_v49, 0.0  ;;  %v7948_v43 = vld [vmem:[%s12970_s5 + $0x60] sm:$0xff]  ;;  %vm4152_vm11 = vweird.f32 %v11126_v0  ;;  %vm11185_vm0 = vmor %vm3530_vm12, %vm3531_vm10 }
 0x7b2   : > { %v3857_v59 = vpop.f32.mrf.mxu2  ;;  %v3526_v35 = vmul.f32 %v11120_v38, %v3525_v62  ;;  %v3523_v51 = vsel %vm3522_vm9, %v7616_v10, %v3519_v23  ;;  %7621 = vrsqrt.f32 %v11142_v20  ;;  %5705 = vmatpush.msrb.mxu1 %v7948_v43  ;;  %vm4153_vm14 = vmor %vm4151_vm13, %vm4152_vm11  ;;  %vm4161_vm2 = vweird.f32 %v11142_v20 }
 0x7b3   : > { %v11152_v47 = vsub.f32 %v10946_v1, %v3857_v59  ;;  %v4147_v2 = vmul.f32 %v11126_v0, %v4146_v9  ;;  %v3564_v16 = vmul.f32 %v3523_v51, %v10886_v46  ;;  %3785 = vmatmul.f32.gmra.mxu1 %v3661_v6  ;;  %v4410_v1 = vmul.f32 %v4144_v28, %v10852_v42  ;;  %v7949_v46 = vld [vmem:[%s12970_s5 + $0x58] sm:$0xff]  ;;  %v7950_v28 = vld [vmem:[%s12970_s5 + $0x50] sm:$0xff] }
 0x7b4   : > { %v3527_v50 = vmul.f32 0.5, %v3526_v35  ;;  %5706 = vmatpush.msrb.mxu1 %v7949_v46  ;;  %v7952_v46 = vld [vmem:[%s12970_s5 + $0x40] sm:$0xff] }
 0x7b5   : > { %v3955_v45 = vmul.f32 %v11152_v47, %v11152_v47  ;;  %v4148_v62 = vmul.f32 0.5, %v4147_v2  ;;  %v3768_v10 = vpop.f32.mrf.mxu1  ;;  %v3597_v23 = vmul.f32 %v10353_v15, %v3564_v16  ;;  %v4443_v9 = vmul.f32 %v10998_v48, %v4410_v1 }
 0x7b6   : > { %v3528_v58 = vsub.f32 1.5, %v3527_v50  ;;  %v11169_v49 = vadd.f32 %v3768_v10, %v10541_v54  ;;  %5707 = vmatpush.msrb.mxu1 %v7950_v28 }
 0x7b7   : > { %4033 = vmatmul.f32.gmra.mxu3 %v3955_v45  ;;  %v4149_v59 = vsub.f32 1.5, %v4148_v62  ;;  %v3630_v42 = vadd.f32 %v10362_v31, %v3597_v23  ;;  %v4013_v35 = vpop.f32.mrf.mxu3  ;;  %v4476_v6 = vadd.f32 %v11006_v21, %v4443_v9  ;;  %v7951_v45 = vld [vmem:[%s12970_s5 + $0x48] sm:$0xff] }
 0x7b8   : > { %v3529_v19 = vmul.f32 %v11120_v38, %v3528_v58  ;;  %3880 = vmatmul.f32.gmra.mxu2 %v11169_v49  ;;  %v11181_v51 = vpop.eup %7621  ;;  %v11191_v43 = vadd.f32 1e-05, %v4013_v35  ;;  %5708 = vmatpush.msrb.mxu1 %v7951_v45  ;;  %v7955_v45 = vld [vmem:[%s12970_s5 + $0x28] sm:$0xff] }
 0x7b9   : > { %v4150_v16 = vmul.f32 %v11126_v0, %v4149_v59  ;;  %v3662_v50 = vmax.f32 %v3630_v42, 0.0  ;;  %v4156_v1 = vmul.f32 %v11181_v51, %v11142_v20  ;;  %v4508_v10 = vmax.f32 %v4476_v6, 0.0 }
 0x7ba   : > { %v3860_v3 = vpop.f32.mrf.mxu2  ;;  %7623 = vrsqrt.f32 %v11191_v43  ;;  %v3533_v22 = vsel %vm11185_vm0, %v11120_v38, %v3529_v19  ;;  %5709 = vmatpush.msrb.mxu1 %v7952_v46  ;;  %v7953_v38 = vld [vmem:[%s12970_s5 + $0x38] sm:$0xff]  ;;  %vm4162_vm15 = vweird.f32 %v11181_v51  ;;  %v7956_v46 = vld [vmem:[%s12970_s5 + $0x20] sm:$0xff]  ;;  %vm4171_vm5 = vweird.f32 %v11191_v43 }
 0x7bb   : > { %v11201_v62 = vsub.f32 %v10963_v4, %v3860_v3  ;;  %v4154_v23 = vsel %vm4153_vm14, %v11126_v0, %v4150_v16  ;;  %v4157_v58 = vmul.f32 %v11181_v51, %v4156_v1  ;;  %3788 = vmatmul.f32.gmra.mxu1 %v3662_v50  ;;  %4586 = vmatmul.f32.gmra.mxu0 %v4508_v10  ;;  %vm4163_vm3 = vmor %vm4161_vm2, %vm4162_vm15 }
 0x7bc   : > { %v3565_v9 = vmul.f32 %v3533_v22, %v10920_v14  ;;  %v4411_v42 = vmul.f32 %v4154_v23, %v10895_v17  ;;  %5710 = vmatpush.msrb.mxu1 %v7953_v38  ;;  %v7954_v14 = vld [vmem:[%s12970_s5 + $0x30] sm:$0xff] }
 0x7bd   : > { %v3956_v4 = vmul.f32 %v11201_v62, %v11201_v62  ;;  %v3771_v59 = vpop.f32.mrf.mxu1  ;;  %v4158_v0 = vmul.f32 0.5, %v4157_v58 }
 0x7be   : > { %v11220_v28 = vadd.f32 %v3771_v59, %v10541_v54  ;;  %v3598_v19 = vmul.f32 %v10353_v15, %v3565_v9  ;;  %v4444_v35 = vmul.f32 %v10998_v48, %v4411_v42  ;;  %5711 = vmatpush.msrb.mxu1 %v7954_v14  ;;  %v11258_v9 = vld [vmem:[#allocation10] ss:$0 sm:$0xff] }
 0x7bf   : > { %4036 = vmatmul.f32.gmra.mxu3 %v3956_v4  ;;  %v4159_v17 = vsub.f32 1.5, %v4158_v0  ;;  %v4016_v6 = vpop.f32.mrf.mxu3  ;;  %v7957_v0 = vld [vmem:[%s12970_s5 + $0x18] sm:$0xff] }
 0x7c0   : > { %3883 = vmatmul.f32.gmra.mxu2 %v11220_v28  ;;  %v3631_v2 = vadd.f32 %v10362_v31, %v3598_v19  ;;  %v11230_v16 = vpop.eup %7623  ;;  %v11232_v3 = vadd.f32 1e-05, %v4016_v6  ;;  %v4477_v50 = vadd.f32 %v11006_v21, %v4444_v35  ;;  %5712 = vmatpush.msrb.mxu1 %v7955_v45 }
 0x7c1   : > { %v4160_v1 = vmul.f32 %v11181_v51, %v4159_v17  ;;  %v4166_v31 = vmul.f32 %v11230_v16, %v11191_v43  ;;  %vm4172_vm4 = vweird.f32 %v11230_v16 }
 0x7c2   : > { %v3863_v15 = vpop.f32.mrf.mxu2  ;;  %7625 = vrsqrt.f32 %v11232_v3  ;;  %v3663_v22 = vmax.f32 %v3631_v2, 0.0  ;;  %v4509_v23 = vmax.f32 %v4477_v50, 0.0  ;;  %5713 = vmatpush.msrb.mxu1 %v7956_v46  ;;  %vm4173_vm6 = vmor %vm4171_vm5, %vm4172_vm4  ;;  %vm4181_vm1 = vweird.f32 %v11232_v3 }
 0x7c3   : > { %v11243_v10 = vsub.f32 %v10983_v61, %v3863_v15  ;;  %v4167_v20 = vmul.f32 %v11230_v16, %v4166_v31  ;;  %v4164_v61 = vsel %vm4163_vm3, %v11181_v51, %v4160_v1 }
 0x7c4   : > { %3791 = vmatmul.f32.gmra.mxu1 %v3663_v22  ;;  %4589 = vmatmul.f32.gmra.mxu0 %v4509_v23  ;;  %v4412_v59 = vmul.f32 %v4164_v61, %v10937_v57  ;;  %v7958_v57 = vld [vmem:[%s12970_s5 + $0x10] sm:$0xff]  ;;  %v7959_v22 = vld [vmem:[%s12970_s5 + $0x8] sm:$0xff] }
 0x7c5   : > { %v3957_v58 = vmul.f32 %v11243_v10, %v11243_v10  ;;  %v3774_v4 = vpop.f32.mrf.mxu1  ;;  %v4168_v42 = vmul.f32 0.5, %v4167_v20  ;;  %5714 = vmatpush.msrb.mxu1 %v7957_v0  ;;  %v7960_v20 = vld [vmem:[%s12970_s5] sm:$0xff] }
 0x7c6   : > { %v11262_v38 = vadd.f32 %v3774_v4, %v10541_v54  ;;  %v4445_v51 = vmul.f32 %v10998_v48, %v4412_v59 }
 0x7c7   : > { %4039 = vmatmul.f32.gmra.mxu3 %v3957_v58  ;;  %v4169_v19 = vsub.f32 1.5, %v4168_v42  ;;  %v4019_v35 = vpop.f32.mrf.mxu3  ;;  %v4572_v14 = vpop.f32.mrf.mxu0  ;;  %5715 = vmatpush.msrb.mxu1 %v7958_v57  ;;  %v13092_v58 = vmax.f32 %v9481_v29, 0.0 }
 0x7c8   : > { %3886 = vmatmul.f32.gmra.mxu2 %v11262_v38  ;;  %v7626_v17 = vpop.eup %7625  ;;  %v4020_v6 = vadd.f32 1e-05, %v4019_v35  ;;  %v4573_v2 = vadd.f32 %v11258_v9, %v4572_v14  ;;  %v4478_v50 = vadd.f32 %v11006_v21, %v4445_v51 }
 0x7c9   : > { %v4170_v45 = vmul.f32 %v11230_v16, %v4169_v19  ;;  %v4176_v1 = vmul.f32 %v7626_v17, %v11232_v3  ;;  %5716 = vmatpush.msrb.mxu1 %v7959_v22  ;;  %vm4182_vm7 = vweird.f32 %v7626_v17 }
 0x7ca   : > { %v3866_v15 = vpop.f32.mrf.mxu2  ;;  %7627 = vrsqrt.f32 %v4020_v6  ;;  %4668 = vst [vmem:[%s11286_s21] sm:$0xff] %v4573_v2  ;;  %v4510_v23 = vmax.f32 %v4478_v50, 0.0  ;;  %vm4183_vm8 = vmor %vm4181_vm1, %vm4182_vm7  ;;  %v13093_v50 = vmax.f32 %v9505_v40, 0.0  ;;  %vm4191_vm10 = vweird.f32 %v4020_v6 }
 0x7cb   : > { %v11279_v31 = vsub.f32 %v11012_v33, %v3866_v15  ;;  %v4177_v43 = vmul.f32 %v7626_v17, %v4176_v1  ;;  %v4174_v33 = vsel %vm4173_vm6, %v11230_v16, %v4170_v45  ;;  %5717 = vmatpush.msrb.mxu1 %v7960_v20 }
 0x7cc   : > { %4734 = vmatmul.f32.vlgmr.msra.gmra.mxu1 %v13092_v58  ;;  %4592 = vmatmul.f32.gmra.mxu0 %v4510_v23  ;;  %v4413_v61 = vmul.f32 %v4174_v33, %v10957_v37 }
 0x7cd   : > { %v3958_v46 = vmul.f32 %v11279_v31, %v11279_v31  ;;  %v4178_v4 = vmul.f32 0.5, %v4177_v43 }
 0x7ce   : > { %v4446_v59 = vmul.f32 %v10998_v48, %v4413_v61  ;;  %v13094_v61 = vmax.f32 %v9525_v32, 0.0 }
 0x7cf   : > { %4042 = vmatmul.f32.gmra.mxu3 %v3958_v46  ;;  %v4179_v42 = vsub.f32 1.5, %v4178_v4  ;;  %v4022_v0 = vpop.f32.mrf.mxu3  ;;  %v4575_v16 = vpop.f32.mrf.mxu0 }
 0x7d0   : > { %v7628_v51 = vpop.eup %7627  ;;  %v4023_v19 = vadd.f32 1e-05, %v4022_v0  ;;  %v4576_v35 = vadd.f32 %v11258_v9, %v4575_v16  ;;  %v4479_v14 = vadd.f32 %v11006_v21, %v4446_v59 }
 0x7d1   : > { %v4180_v29 = vmul.f32 %v7626_v17, %v4179_v42  ;;  %v4186_v57 = vmul.f32 %v7628_v51, %v4020_v6  ;;  %vm4192_vm9 = vweird.f32 %v7628_v51 }
 0x7d2   : > { %7629 = vrsqrt.f32 %v4023_v19  ;;  %4669 = vst [vmem:[%s11286_s21 + $0x8] sm:$0xff] %v4576_v35  ;;  %v4511_v37 = vmax.f32 %v4479_v14, 0.0  ;;  %vm4193_vm11 = vmor %vm4191_vm10, %vm4192_vm9  ;;  %vm4201_vm0 = vweird.f32 %v4023_v19 }
 0x7d3   : > { %v4187_v2 = vmul.f32 %v7628_v51, %v4186_v57  ;;  %v4184_v15 = vsel %vm4183_vm8, %v7626_v17, %v4180_v29  ;;  %v13095_v29 = vmax.f32 %v9539_v56, 0.0  ;;  %v13098_v56 = vmax.f32 %v9760_v26, 0.0 }
 0x7d4   : > { %4737 = vmatmul.f32.gmra.mxu1 %v13093_v50  ;;  %4595 = vmatmul.f32.gmra.mxu0 %v4511_v37  ;;  %v4414_v45 = vmul.f32 %v4184_v15, %v10977_v55 }
 0x7d5   : > { %v4188_v1 = vmul.f32 0.5, %v4187_v2 }
 0x7d6   : > { %v4447_v22 = vmul.f32 %v10998_v48, %v4414_v45  ;;  %v13097_v45 = vmax.f32 %v9724_v24, 0.0 }
 0x7d7   : > { %v4189_v23 = vsub.f32 1.5, %v4188_v1  ;;  %v4578_v3 = vpop.f32.mrf.mxu0  ;;  %v13100_v1 = vmax.f32 %v9854_v52, 0.0  ;;  %v13102_v52 = vmax.f32 %v9896_v11, 0.0 }
 0x7d8   : > { %v7630_v43 = vpop.eup %7629  ;;  %v4579_v46 = vadd.f32 %v11258_v9, %v4578_v3  ;;  %v4480_v33 = vadd.f32 %v11006_v21, %v4447_v22 }
 0x7d9   : > { %v4190_v20 = vmul.f32 %v7628_v51, %v4189_v23  ;;  %v4196_v17 = vmul.f32 %v7630_v43, %v4023_v19  ;;  %vm4202_vm12 = vweird.f32 %v7630_v43  ;;  %v13096_v19 = vmax.f32 %v9551_v63, 0.0 }
 0x7da   : > { %4670 = vst [vmem:[%s11286_s21 + $0x10] sm:$0xff] %v4579_v46  ;;  %v4512_v40 = vmax.f32 %v4480_v33, 0.0  ;;  %vm4203_vm13 = vmor %vm4201_vm0, %vm4202_vm12  ;;  %v13101_v63 = vmax.f32 %v9871_v5, 0.0 }
 0x7db   : > { %v4197_v58 = vmul.f32 %v7630_v43, %v4196_v17  ;;  %v4194_v55 = vsel %vm4193_vm11, %v7628_v51, %v4190_v20  ;;  %v13103_v17 = vmax.f32 %v9916_v60, 0.0 }
 0x7dc   : > { %4740 = vmatmul.f32.gmra.mxu1 %v13094_v61  ;;  %4598 = vmatmul.f32.gmra.mxu0 %v4512_v40  ;;  %v4415_v4 = vmul.f32 %v4194_v55, %v11003_v44 }
 0x7dd   : > { %v4198_v59 = vmul.f32 0.5, %v4197_v58 }
 0x7de   : > { %v4448_v42 = vmul.f32 %v10998_v48, %v4415_v4 }
 0x7df   : > { %v4199_v0 = vsub.f32 1.5, %v4198_v59  ;;  %v4581_v16 = vpop.f32.mrf.mxu0 }
 0x7e0   : > { %v4582_v6 = vadd.f32 %v11258_v9, %v4581_v16  ;;  %v4481_v35 = vadd.f32 %v11006_v21, %v4448_v42  ;;  %v13104_v16 = vmax.f32 %v9959_v13, 0.0 }
 0x7e1   : > { %v4200_v14 = vmul.f32 %v7630_v43, %v4199_v0 }
 0x7e2   : > { %4671 = vst [vmem:[%s11286_s21 + $0x18] sm:$0xff] %v4582_v6  ;;  %v4513_v32 = vmax.f32 %v4481_v35, 0.0 }
 0x7e3   : > { %v4204_v51 = vsel %vm4203_vm13, %v7630_v43, %v4200_v14 }
 0x7e4   : > { %4743 = vmatmul.f32.gmra.mxu1 %v13095_v29  ;;  %4601 = vmatmul.f32.gmra.mxu0 %v4513_v32  ;;  %v4416_v44 = vmul.f32 %v4204_v51, %v11021_v27  ;;  %v13099_v27 = vmax.f32 %v9803_v8, 0.0 }
 0x7e6   : > { %v4449_v57 = vmul.f32 %v10998_v48, %v4416_v44 }
 0x7e7   : > { %v4584_v37 = vpop.f32.mrf.mxu0 }
 0x7e8   : > { %v4585_v2 = vadd.f32 %v11258_v9, %v4584_v37  ;;  %v4482_v15 = vadd.f32 %v11006_v21, %v4449_v57 }
 0x7ea   : > { %4672 = vst [vmem:[%s11286_s21 + $0x20] sm:$0xff] %v4585_v2  ;;  %v4514_v50 = vmax.f32 %v4482_v15, 0.0 }
 0x7ec   : > { %4746 = vmatmul.f32.gmra.mxu1 %v13096_v19  ;;  %4604 = vmatmul.f32.gmra.mxu0 %v4514_v50 }
 0x7f4   : > { %4749 = vmatmul.f32.gmra.mxu1 %v13097_v45  ;;  %v13105_v45 = vmax.f32 %v9988_v12, 0.0 }
 0x7fc   : > { %4752 = vmatmul.f32.gmra.mxu1 %v13098_v56 }
 0x804   : > { %4755 = vmatmul.f32.gmra.mxu1 %v13099_v27 }
 0x80c   : > { %4758 = vmatmul.f32.gmra.mxu1 %v13100_v1 }
 0x814   : > { %4761 = vmatmul.f32.gmra.mxu1 %v13101_v63 }
 0x815   : > { %v3777_v22 = vpop.f32.mrf.mxu1 }
 0x816   : > { %v11335_v23 = vadd.f32 %v3777_v22, %v10541_v54 }
 0x818   : > { %3889 = vmatmul.f32.gmra.mxu2 %v11335_v23 }
 0x819   : > { %v3869_v24 = vpop.f32.mrf.mxu2 }
 0x81a   : > { %v11341_v3 = vsub.f32 %v11053_v30, %v3869_v24 }
 0x81c   : > { %v3959_v26 = vmul.f32 %v11341_v3, %v11341_v3  ;;  %4764 = vmatmul.f32.gmra.mxu1 %v13102_v52 }
 0x81e   : > { %v3780_v8 = vpop.f32.mrf.mxu1  ;;  %4045 = vmatmul.f32.gmra.mxu3 %v3959_v26 }
 0x81f   : > { %v11348_v43 = vadd.f32 %v3780_v8, %v10541_v54  ;;  %v4025_v46 = vpop.f32.mrf.mxu3 }
 0x820   : > { %v4026_v5 = vadd.f32 1e-05, %v4025_v46 }
 0x821   : > { %3892 = vmatmul.f32.gmra.mxu2 %v11348_v43 }
 0x822   : > { %7631 = vrsqrt.f32 %v4026_v5  ;;  %vm4211_vm15 = vweird.f32 %v4026_v5 }
 0x823   : > { %v3872_v33 = vpop.f32.mrf.mxu2 }
 0x824   : > { %v11352_v30 = vsub.f32 %v11069_v25, %v3872_v33  ;;  %4767 = vmatmul.f32.gmra.mxu1 %v13103_v17 }
 0x826   : > { %v3960_v20 = vmul.f32 %v11352_v30, %v11352_v30 }
 0x827   : > { %v3783_v4 = vpop.f32.mrf.mxu1 }
 0x828   : > { %v7632_v11 = vpop.eup %7631  ;;  %4048 = vmatmul.f32.gmra.mxu3 %v3960_v20  ;;  %v4028_v40 = vpop.f32.mrf.mxu3  ;;  %v11359_v59 = vadd.f32 %v3783_v4, %v10541_v54 }
 0x829   : > { %v4206_v58 = vmul.f32 %v7632_v11, %v4026_v5  ;;  %v4029_v55 = vadd.f32 1e-05, %v4028_v40  ;;  %vm4212_vm14 = vweird.f32 %v7632_v11 }
 0x82a   : > { %3895 = vmatmul.f32.gmra.mxu2 %v11359_v59  ;;  %vm4213_vm2 = vmor %vm4211_vm15, %vm4212_vm14 }
 0x82b   : > { %v4207_v61 = vmul.f32 %v7632_v11, %v4206_v58  ;;  %7633 = vrsqrt.f32 %v4029_v55  ;;  %v3875_v25 = vpop.f32.mrf.mxu2  ;;  %vm4221_vm4 = vweird.f32 %v4029_v55 }
 0x82c   : > { %v11363_v0 = vsub.f32 %v11090_v36, %v3875_v25  ;;  %4770 = vmatmul.f32.gmra.mxu1 %v13104_v16 }
 0x82d   : > { %v4208_v42 = vmul.f32 0.5, %v4207_v61 }
 0x82e   : > { %v3961_v6 = vmul.f32 %v11363_v0, %v11363_v0 }
 0x82f   : > { %v4209_v60 = vsub.f32 1.5, %v4208_v42 }
 0x830   : > { %4051 = vmatmul.f32.gmra.mxu3 %v3961_v6  ;;  %v4031_v51 = vpop.f32.mrf.mxu3  ;;  %v3786_v29 = vpop.f32.mrf.mxu1 }
 0x831   : > { %v7634_v35 = vpop.eup %7633  ;;  %v4210_v14 = vmul.f32 %v7632_v11, %v4209_v60  ;;  %v4032_v44 = vadd.f32 1e-05, %v4031_v51  ;;  %v11370_v37 = vadd.f32 %v3786_v29, %v10541_v54 }
 0x832   : > { %v4216_v32 = vmul.f32 %v7634_v35, %v4029_v55  ;;  %vm4222_vm3 = vweird.f32 %v7634_v35 }
 0x833   : > { %v4214_v57 = vsel %vm4213_vm2, %v7632_v11, %v4210_v14  ;;  %7635 = vrsqrt.f32 %v4032_v44  ;;  %v3878_v2 = vpop.f32.mrf.mxu2  ;;  %3898 = vmatmul.f32.gmra.mxu2 %v11370_v37  ;;  %vm4223_vm5 = vmor %vm4221_vm4, %vm4222_vm3  ;;  %v13106_v11 = vmax.f32 %v10020_v34, 0.0  ;;  %vm4231_vm7 = vweird.f32 %v4032_v44 }
 0x834   : > { %v4217_v36 = vmul.f32 %v7634_v35, %v4216_v32  ;;  %v4417_v13 = vmul.f32 %v4214_v57, %v11058_v39  ;;  %v11375_v50 = vsub.f32 %v11117_v7, %v3878_v2  ;;  %4773 = vmatmul.f32.gmra.mxu1 %v13105_v45  ;;  %v4700_v57 = vld [vmem:[#allocation11] sm:$0x7] }
 0x835   : > { %v11416_v45 = vperm.slane %v4700_v57, 0 }
 0x836   : > { %v4218_v15 = vmul.f32 0.5, %v4217_v36  ;;  %v4450_v19 = vmul.f32 %v10998_v48, %v4417_v13  ;;  %v3962_v27 = vmul.f32 %v11375_v50, %v11375_v50 }
 0x838   : > { %v4219_v56 = vsub.f32 1.5, %v4218_v15  ;;  %v4483_v1 = vadd.f32 %v11006_v21, %v4450_v19  ;;  %4054 = vmatmul.f32.gmra.mxu3 %v3962_v27  ;;  %v3789_v7 = vpop.f32.mrf.mxu1  ;;  %v4587_v52 = vpop.f32.mrf.mxu0 }
 0x839   : > { %v7636_v63 = vpop.eup %7635  ;;  %v11384_v12 = vadd.f32 %v3789_v7, %v10541_v54  ;;  %v4588_v46 = vadd.f32 %v11258_v9, %v4587_v52 }
 0x83a   : > { %v4220_v39 = vmul.f32 %v7634_v35, %v4219_v56  ;;  %v4515_v22 = vmax.f32 %v4483_v1, 0.0  ;;  %v4034_v24 = vpop.f32.mrf.mxu3  ;;  %v4226_v26 = vmul.f32 %v7636_v63, %v4032_v44  ;;  %vm4232_vm6 = vweird.f32 %v7636_v63  ;;  %v13107_v44 = vld [vmem:[#allocation31_spill] sm:$0xff] }
 0x83b   : > { %v4035_v8 = vadd.f32 1e-05, %v4034_v24  ;;  %v3881_v5 = vpop.f32.mrf.mxu2  ;;  %3901 = vmatmul.f32.gmra.mxu2 %v11384_v12  ;;  %4673 = vst [vmem:[%s11286_s21 + $0x28] sm:$0xff] %v4588_v46  ;;  %vm4233_vm1 = vmor %vm4231_vm7, %vm4232_vm6  ;;  %v13108_v13 = vmax.f32 %v13107_v44, 0.0 }
 0x83c   : > { %4607 = vmatmul.f32.gmra.mxu0 %v4515_v22  ;;  %v4224_v33 = vsel %vm4223_vm5, %v7634_v35, %v4220_v39  ;;  %v4227_v20 = vmul.f32 %v7636_v63, %v4226_v26  ;;  %v11389_v17 = vsub.f32 %v11169_v49, %v3881_v5  ;;  %4776 = vmatmul.f32.gmra.mxu1 %v13106_v11 }
 0x83d   : > { %7637 = vrsqrt.f32 %v4035_v8  ;;  %v4418_v40 = vmul.f32 %v4224_v33, %v11078_v41  ;;  %vm4241_vm9 = vweird.f32 %v4035_v8 }
 0x83e   : > { %v4228_v58 = vmul.f32 0.5, %v4227_v20  ;;  %v3963_v55 = vmul.f32 %v11389_v17, %v11389_v17  ;;  %v13109_v20 = vld [vmem:[#allocation32_spill] sm:$0xff] }
 0x83f   : > { %v4451_v61 = vmul.f32 %v10998_v48, %v4418_v40  ;;  %v13110_v11 = vmax.f32 %v13109_v20, 0.0 }
 0x840   : > { %v4229_v4 = vsub.f32 1.5, %v4228_v58  ;;  %4057 = vmatmul.f32.gmra.mxu3 %v3963_v55 }
 0x841   : > { %v4484_v25 = vadd.f32 %v11006_v21, %v4451_v61  ;;  %v3792_v16 = vpop.f32.mrf.mxu1  ;;  %v4590_v6 = vpop.f32.mrf.mxu0 }
 0x842   : > { %v4037_v42 = vpop.f32.mrf.mxu3  ;;  %v4230_v60 = vmul.f32 %v7636_v63, %v4229_v4  ;;  %v11402_v35 = vadd.f32 %v3792_v16, %v10541_v54  ;;  %v4591_v14 = vadd.f32 %v11258_v9, %v4590_v6 }
 0x843   : > { %v7638_v49 = vpop.eup %7637  ;;  %v11399_v34 = vadd.f32 1e-05, %v4037_v42  ;;  %v3884_v32 = vpop.f32.mrf.mxu2  ;;  %v4516_v29 = vmax.f32 %v4484_v25, 0.0 }
 0x844   : > { %v4236_v41 = vmul.f32 %v7638_v49, %v4035_v8  ;;  %v11407_v51 = vsub.f32 %v11220_v28, %v3884_v32  ;;  %4674 = vst [vmem:[%s11286_s21 + $0x30] sm:$0xff] %v4591_v14  ;;  %3904 = vmatmul.f32.gmra.mxu2 %v11402_v35  ;;  %4779 = vmatmul.f32.gmra.mxu1 %v13108_v13  ;;  %vm4242_vm8 = vweird.f32 %v7638_v49 }
 0x845   : > { %7639 = vrsqrt.f32 %v11399_v34  ;;  %v4234_v54 = vsel %vm4233_vm1, %v7636_v63, %v4230_v60  ;;  %4610 = vmatmul.f32.gmra.mxu0 %v4516_v29  ;;  %vm4243_vm10 = vmor %vm4241_vm9, %vm4242_vm8  ;;  %vm4251_vm12 = vweird.f32 %v11399_v34 }
 0x846   : > { %v4237_v36 = vmul.f32 %v7638_v49, %v4236_v41  ;;  %v3964_v2 = vmul.f32 %v11407_v51, %v11407_v51  ;;  %v4419_v15 = vmul.f32 %v4234_v54, %v11102_v18  ;;  %v5587_v54 = vld [vmem:[#allocation13 + $0x78] sm:$0xff] }
 0x847   : > { %5589 = vmatpush.msrb.mxu0 %v5587_v54 }
 0x848   : > { %v4238_v19 = vmul.f32 0.5, %v4237_v36  ;;  %4060 = vmatmul.f32.gmra.mxu3 %v3964_v2  ;;  %v4452_v28 = vmul.f32 %v10998_v48, %v4419_v15  ;;  %v13111_v36 = vld [vmem:[#allocation33_spill] sm:$0xff] }
 0x849   : > { %v4735_v39 = vpop.f32.mrf.mxu1  ;;  %v4593_v7 = vpop.f32.mrf.mxu0  ;;  %v13112_v44 = vmax.f32 %v13111_v36, 0.0 }
 0x84a   : > { %v4239_v56 = vsub.f32 1.5, %v4238_v19  ;;  %v4040_v27 = vpop.f32.mrf.mxu3  ;;  %v4485_v63 = vadd.f32 %v11006_v21, %v4452_v28  ;;  %v11422_v26 = vadd.f32 %v4735_v39, %v11416_v45  ;;  %v4594_v46 = vadd.f32 %v11258_v9, %v4593_v7 }
 0x84b   : > { %v7640_v1 = vpop.eup %7639  ;;  %v4041_v22 = vadd.f32 1e-05, %v4040_v27  ;;  %v3887_v52 = vpop.f32.mrf.mxu2 }
 0x84c   : > { %v4240_v24 = vmul.f32 %v7638_v49, %v4239_v56  ;;  %v4246_v18 = vmul.f32 %v7640_v1, %v11399_v34  ;;  %v11426_v5 = vsub.f32 %v11262_v38, %v3887_v52  ;;  %4782 = vmatmul.f32.gmra.mxu1 %v13110_v11  ;;  %4847 = vmatmul.f32.vlgmr.msra.gmra.mxu2 %v11422_v26  ;;  %v4517_v8 = vmax.f32 %v4485_v63, 0.0  ;;  %v13113_v52 = vld [vmem:[#allocation34_spill] sm:$0xff] }
 0x84d   : > { %7641 = vrsqrt.f32 %v4041_v22  ;;  %4675 = vst [vmem:[%s11286_s21 + $0x38] sm:$0xff] %v4594_v46  ;;  %vm4252_vm11 = vweird.f32 %v7640_v1  ;;  %vm4261_vm14 = vweird.f32 %v4041_v22  ;;  %v13114_v46 = vmax.f32 %v13113_v52, 0.0 }
 0x84e   : > { %v4247_v33 = vmul.f32 %v7640_v1, %v4246_v18  ;;  %v4244_v40 = vsel %vm4243_vm10, %v7638_v49, %v4240_v24  ;;  %v3965_v58 = vmul.f32 %v11426_v5, %v11426_v5  ;;  %4613 = vmatmul.f32.gmra.mxu0 %v4517_v8  ;;  %vm4253_vm0 = vmor %vm4251_vm12, %vm4252_vm11 }
 0x84f   : > { %v4420_v55 = vmul.f32 %v4244_v40, %v11152_v47 }
 0x850   : > { %v4248_v61 = vmul.f32 0.5, %v4247_v33  ;;  %4063 = vmatmul.f32.gmra.mxu3 %v3965_v58 }
 0x851   : > { %v4453_v38 = vmul.f32 %v10998_v48, %v4420_v55  ;;  %v4738_v60 = vpop.f32.mrf.mxu1  ;;  %v4596_v6 = vpop.f32.mrf.mxu0 }
 0x852   : > { %v4249_v4 = vsub.f32 1.5, %v4248_v61  ;;  %v4043_v42 = vpop.f32.mrf.mxu3  ;;  %v11439_v47 = vadd.f32 %v4738_v60, %v11416_v45  ;;  %v4597_v32 = vadd.f32 %v11258_v9, %v4596_v6  ;;  %v5586_v6 = vld [vmem:[#allocation13 + $0x70] sm:$0xff] }
 0x853   : > { %v7642_v25 = vpop.eup %7641  ;;  %v4044_v16 = vadd.f32 1e-05, %v4043_v42  ;;  %v4486_v49 = vadd.f32 %v11006_v21, %v4453_v38  ;;  %5590 = vmatpush.msrb.mxu0 %v5586_v6 }
 0x854   : > { %v4250_v41 = vmul.f32 %v7640_v1, %v4249_v4  ;;  %v4256_v14 = vmul.f32 %v7642_v25, %v4041_v22  ;;  %4785 = vmatmul.f32.gmra.mxu1 %v13112_v44  ;;  %4850 = vmatmul.f32.gmra.mxu2 %v11439_v47  ;;  %4676 = vst [vmem:[%s11286_s21 + $0x40] sm:$0xff] %v4597_v32  ;;  %vm4262_vm13 = vweird.f32 %v7642_v25  ;;  %v13117_v44 = vld [vmem:[#allocation36_spill] sm:$0xff] }
 0x855   : > { %7643 = vrsqrt.f32 %v4044_v16  ;;  %v4518_v29 = vmax.f32 %v4486_v49, 0.0  ;;  %vm4263_vm15 = vmor %vm4261_vm14, %vm4262_vm13  ;;  %vm4271_vm3 = vweird.f32 %v4044_v16 }
 0x856   : > { %v4257_v57 = vmul.f32 %v7642_v25, %v4256_v14  ;;  %v4254_v13 = vsel %vm4253_vm0, %v7640_v1, %v4250_v41 }
 0x857   : > { %v4421_v34 = vmul.f32 %v4254_v13, %v11201_v62  ;;  %4616 = vmatmul.f32.gmra.mxu0 %v4518_v29  ;;  %v13118_v13 = vmax.f32 %v13117_v44, 0.0 }
 0x858   : > { %v4258_v2 = vmul.f32 0.5, %v4257_v57 }
 0x859   : > { %v4454_v15 = vmul.f32 %v10998_v48, %v4421_v34  ;;  %v4741_v56 = vpop.f32.mrf.mxu1  ;;  %v4599_v27 = vpop.f32.mrf.mxu0  ;;  %v13119_v34 = vld [vmem:[#allocation37_spill] sm:$0xff] }
 0x85a   : > { %v4259_v19 = vsub.f32 1.5, %v4258_v2  ;;  %v11450_v63 = vadd.f32 %v4741_v56, %v11416_v45  ;;  %v4600_v62 = vadd.f32 %v11258_v9, %v4599_v27  ;;  %v13120_v2 = vmax.f32 %v13119_v34, 0.0  ;;  %v13121_v56 = vld [vmem:[#allocation38_spill] sm:$0xff] }
 0x85b   : > { %v7644_v28 = vpop.eup %7643  ;;  %v4487_v39 = vadd.f32 %v11006_v21, %v4454_v15  ;;  %v5585_v15 = vld [vmem:[#allocation13 + $0x68] sm:$0xff]  ;;  %v13122_v27 = vmax.f32 %v13121_v56, 0.0 }
 0x85c   : > { %v4260_v7 = vmul.f32 %v7642_v25, %v4259_v19  ;;  %v4266_v1 = vmul.f32 %v7644_v28, %v4044_v16  ;;  %4788 = vmatmul.f32.gmra.mxu1 %v13114_v46  ;;  %4853 = vmatmul.f32.gmra.mxu2 %v11450_v63  ;;  %4677 = vst [vmem:[%s11286_s21 + $0x48] sm:$0xff] %v4600_v62  ;;  %vm4272_vm2 = vweird.f32 %v7644_v28  ;;  %v13125_v46 = vld [vmem:[#allocation40_spill] sm:$0xff] }
 0x85d   : > { %v4519_v24 = vmax.f32 %v4487_v39, 0.0  ;;  %vm4273_vm4 = vmor %vm4271_vm3, %vm4272_vm2  ;;  %5591 = vmatpush.msrb.mxu0 %v5585_v15 }
 0x85e   : > { %v4267_v18 = vmul.f32 %v7644_v28, %v4266_v1  ;;  %v4264_v33 = vsel %vm4263_vm15, %v7642_v25, %v4260_v7  ;;  %v13123_v1 = vld [vmem:[#allocation39_spill] sm:$0xff] }
 0x85f   : > { %v4422_v20 = vmul.f32 %v4264_v33, %v11243_v10  ;;  %4619 = vmatmul.f32.gmra.mxu0 %v4519_v24  ;;  %v13115_v10 = vld [vmem:[#allocation35_spill] sm:$0xff]  ;;  %v13124_v62 = vmax.f32 %v13123_v1, 0.0  ;;  %v13126_v33 = vmax.f32 %v13125_v46, 0.0 }
 0x860   : > { %v4268_v22 = vmul.f32 0.5, %v4267_v18  ;;  %v13116_v25 = vmax.f32 %v13115_v10, 0.0  ;;  %v5584_v24 = vld [vmem:[#allocation13 + $0x60] sm:$0xff]  ;;  %v13129_v10 = vmax.f32 %v10406_v53, 0.0 }
 0x861   : > { %v4455_v11 = vmul.f32 %v10998_v48, %v4422_v20  ;;  %v4744_v40 = vpop.f32.mrf.mxu1  ;;  %v4602_v58 = vpop.f32.mrf.mxu0  ;;  %5592 = vmatpush.msrb.mxu0 %v5584_v24 }
 0x862   : > { %v4269_v8 = vsub.f32 1.5, %v4268_v22  ;;  %v11461_v38 = vadd.f32 %v4744_v40, %v11416_v45  ;;  %v4603_v4 = vadd.f32 %v11258_v9, %v4602_v58 }
 0x863   : > { %v4488_v55 = vadd.f32 %v11006_v21, %v4455_v11  ;;  %v13127_v11 = vld [vmem:[#allocation41_spill] sm:$0xff] }
 0x864   : > { %v4270_v61 = vmul.f32 %v7644_v28, %v4269_v8  ;;  %4678 = vst [vmem:[%s11286_s21 + $0x50] sm:$0xff] %v4603_v4  ;;  %4791 = vmatmul.f32.gmra.mxu1 %v13116_v25  ;;  %4856 = vmatmul.f32.gmra.mxu2 %v11461_v38  ;;  %v13128_v8 = vmax.f32 %v13127_v11, 0.0  ;;  %v5583_v4 = vld [vmem:[#allocation13 + $0x58] sm:$0xff] }
 0x865   : > { %v4520_v42 = vmax.f32 %v4488_v55, 0.0  ;;  %5593 = vmatpush.msrb.mxu0 %v5583_v4 }
 0x866   : > { %v4274_v60 = vsel %vm4273_vm4, %v7644_v28, %v4270_v61 }
 0x867   : > { %v4423_v49 = vmul.f32 %v4274_v60, %v11279_v31  ;;  %4622 = vmatmul.f32.gmra.mxu0 %v4520_v42 }
 0x869   : > { %v4456_v16 = vmul.f32 %v10998_v48, %v4423_v49  ;;  %v4747_v41 = vpop.f32.mrf.mxu1  ;;  %v4605_v14 = vpop.f32.mrf.mxu0 }
 0x86a   : > { %v11472_v29 = vadd.f32 %v4747_v41, %v11416_v45  ;;  %v4606_v57 = vadd.f32 %v11258_v9, %v4605_v14  ;;  %v13130_v41 = vld [vmem:[#allocation42_spill] sm:$0xff] }
 0x86b   : > { %v4489_v32 = vadd.f32 %v11006_v21, %v4456_v16  ;;  %v13131_v14 = vmax.f32 %v13130_v41, 0.0 }
 0x86c   : > { %4679 = vst [vmem:[%s11286_s21 + $0x58] sm:$0xff] %v4606_v57  ;;  %4794 = vmatmul.f32.gmra.mxu1 %v13118_v13  ;;  %4859 = vmatmul.f32.gmra.mxu2 %v11472_v29 }
 0x86d   : > { %v4521_v36 = vmax.f32 %v4489_v32, 0.0 }
 0x86f   : > { %4625 = vmatmul.f32.gmra.mxu0 %v4521_v36 }
 0x871   : > { %v4750_v31 = vpop.f32.mrf.mxu1 }
 0x872   : > { %v11480_v54 = vadd.f32 %v4750_v31, %v11416_v45 }
 0x874   : > { %4797 = vmatmul.f32.gmra.mxu1 %v13120_v2  ;;  %4862 = vmatmul.f32.gmra.mxu2 %v11480_v54  ;;  %v13132_v2 = vld [vmem:[#allocation43_spill] sm:$0xff] }
 0x875   : > { %v13133_v15 = vmax.f32 %v13132_v2, 0.0  ;;  %v13136_v2 = vld [vmem:[#allocation45_spill] sm:$0xff] }
 0x879   : > { %v4753_v19 = vpop.f32.mrf.mxu1 }
 0x87a   : > { %v11486_v28 = vadd.f32 %v4753_v19, %v11416_v45  ;;  %v5582_v19 = vld [vmem:[#allocation13 + $0x50] sm:$0xff] }
 0x87b   : > { %5594 = vmatpush.msrb.mxu0 %v5582_v19 }
 0x87c   : > { %4800 = vmatmul.f32.gmra.mxu1 %v13122_v27  ;;  %4865 = vmatmul.f32.gmra.mxu2 %v11486_v28 }
 0x881   : > { %v4756_v39 = vpop.f32.mrf.mxu1 }
 0x882   : > { %v11492_v7 = vadd.f32 %v4756_v39, %v11416_v45 }
 0x884   : > { %4803 = vmatmul.f32.gmra.mxu1 %v13124_v62  ;;  %4868 = vmatmul.f32.gmra.mxu2 %v11492_v7 }
 0x889   : > { %v4759_v18 = vpop.f32.mrf.mxu1 }
 0x88a   : > { %v11498_v52 = vadd.f32 %v4759_v18, %v11416_v45 }
 0x88c   : > { %4806 = vmatmul.f32.gmra.mxu1 %v13126_v33  ;;  %4871 = vmatmul.f32.gmra.mxu2 %v11498_v52 }
 0x891   : > { %v4762_v20 = vpop.f32.mrf.mxu1 }
 0x892   : > { %v11504_v22 = vadd.f32 %v4762_v20, %v11416_v45 }
 0x894   : > { %4809 = vmatmul.f32.gmra.mxu1 %v13128_v8  ;;  %4874 = vmatmul.f32.gmra.mxu2 %v11504_v22 }
 0x899   : > { %v4765_v58 = vpop.f32.mrf.mxu1 }
 0x89a   : > { %v11513_v61 = vadd.f32 %v4765_v58, %v11416_v45  ;;  %v13134_v58 = vld [vmem:[#allocation44_spill] sm:$0xff] }
 0x89b   : > { %v3890_v40 = vpop.f32.mrf.mxu2  ;;  %v13135_v4 = vmax.f32 %v13134_v58, 0.0 }
 0x89c   : > { %v11510_v55 = vsub.f32 %v11335_v23, %v3890_v40  ;;  %4812 = vmatmul.f32.gmra.mxu1 %v13129_v10  ;;  %4877 = vmatmul.f32.gmra.mxu2 %v11513_v61 }
 0x89e   : > { %v3966_v42 = vmul.f32 %v11510_v55, %v11510_v55 }
 0x8a0   : > { %4066 = vmatmul.f32.gmra.mxu3 %v3966_v42 }
 0x8a1   : > { %v4046_v25 = vpop.f32.mrf.mxu3  ;;  %v4768_v6 = vpop.f32.mrf.mxu1 }
 0x8a2   : > { %v4047_v60 = vadd.f32 1e-05, %v4046_v25  ;;  %v11521_v49 = vadd.f32 %v4768_v6, %v11416_v45 }
 0x8a4   : > { %7645 = vrsqrt.f32 %v4047_v60  ;;  %v3893_v23 = vpop.f32.mrf.mxu2  ;;  %4815 = vmatmul.f32.gmra.mxu1 %v13131_v14  ;;  %4880 = vmatmul.f32.gmra.mxu2 %v11521_v49  ;;  %vm4281_vm6 = vweird.f32 %v4047_v60 }
 0x8a5   : > { %v11524_v16 = vsub.f32 %v11348_v43, %v3893_v23 }
 0x8a7   : > { %v3967_v53 = vmul.f32 %v11524_v16, %v11524_v16 }
 0x8a9   : > { %4069 = vmatmul.f32.gmra.mxu3 %v3967_v53  ;;  %v4771_v44 = vpop.f32.mrf.mxu1 }
 0x8aa   : > { %v7646_v32 = vpop.eup %7645  ;;  %v11532_v34 = vadd.f32 %v4771_v44, %v11416_v45 }
 0x8ab   : > { %v4276_v57 = vmul.f32 %v7646_v32, %v4047_v60  ;;  %v4049_v36 = vpop.f32.mrf.mxu3  ;;  %vm4282_vm5 = vweird.f32 %v7646_v32 }
 0x8ac   : > { %v4050_v13 = vadd.f32 1e-05, %v4049_v36  ;;  %4818 = vmatmul.f32.gmra.mxu1 %v13133_v15  ;;  %4883 = vmatmul.f32.gmra.mxu2 %v11532_v34  ;;  %vm4283_vm7 = vmor %vm4281_vm6, %vm4282_vm5  ;;  %v13137_v15 = vmax.f32 %v13136_v2, 0.0 }
 0x8ad   : > { %v4277_v31 = vmul.f32 %v7646_v32, %v4276_v57  ;;  %v3896_v27 = vpop.f32.mrf.mxu2 }
 0x8ae   : > { %7647 = vrsqrt.f32 %v4050_v13  ;;  %v11538_v39 = vsub.f32 %v11359_v59, %v3896_v27  ;;  %vm4291_vm8 = vweird.f32 %v4050_v13 }
 0x8af   : > { %v4278_v43 = vmul.f32 0.5, %v4277_v31 }
 0x8b0   : > { %v3968_v24 = vmul.f32 %v11538_v39, %v11538_v39 }
 0x8b1   : > { %v4279_v56 = vsub.f32 1.5, %v4278_v43  ;;  %v4774_v18 = vpop.f32.mrf.mxu1 }
 0x8b2   : > { %v11543_v33 = vadd.f32 %v4774_v18, %v11416_v45  ;;  %4072 = vmatmul.f32.gmra.mxu3 %v3968_v24 }
 0x8b3   : > { %v4280_v1 = vmul.f32 %v7646_v32, %v4279_v56  ;;  %v4052_v20 = vpop.f32.mrf.mxu3  ;;  %v5581_v56 = vld [vmem:[#allocation13 + $0x48] sm:$0xff] }
 0x8b4   : > { %v7648_v62 = vpop.eup %7647  ;;  %v4053_v8 = vadd.f32 1e-05, %v4052_v20  ;;  %4821 = vmatmul.f32.gmra.mxu1 %v13135_v4  ;;  %4886 = vmatmul.f32.gmra.mxu2 %v11543_v33 }
 0x8b5   : > { %v4286_v46 = vmul.f32 %v7648_v62, %v4050_v13  ;;  %v4284_v11 = vsel %vm4283_vm7, %v7646_v32, %v4280_v1  ;;  %vm4292_vm1 = vweird.f32 %v7648_v62  ;;  %5595 = vmatpush.msrb.mxu0 %v5581_v56 }
 0x8b6   : > { %v4424_v40 = vmul.f32 %v4284_v11, %v11341_v3  ;;  %7649 = vrsqrt.f32 %v4053_v8  ;;  %v3899_v25 = vpop.f32.mrf.mxu2  ;;  %vm4293_vm9 = vmor %vm4291_vm8, %vm4292_vm1  ;;  %vm4301_vm11 = vweird.f32 %v4053_v8 }
 0x8b7   : > { %v4287_v59 = vmul.f32 %v7648_v62, %v4286_v46  ;;  %v11551_v6 = vsub.f32 %v11370_v37, %v3899_v25 }
 0x8b8   : > { %v4457_v42 = vmul.f32 %v10998_v48, %v4424_v40 }
 0x8b9   : > { %v4288_v10 = vmul.f32 0.5, %v4287_v59  ;;  %v4608_v60 = vpop.f32.mrf.mxu0  ;;  %v3969_v14 = vmul.f32 %v11551_v6, %v11551_v6  ;;  %v4777_v53 = vpop.f32.mrf.mxu1 }
 0x8ba   : > { %v4609_v23 = vadd.f32 %v11258_v9, %v4608_v60  ;;  %v4490_v3 = vadd.f32 %v11006_v21, %v4457_v42  ;;  %v11559_v36 = vadd.f32 %v4777_v53, %v11416_v45 }
 0x8bb   : > { %v4289_v41 = vsub.f32 1.5, %v4288_v10  ;;  %v4055_v44 = vpop.f32.mrf.mxu3  ;;  %4075 = vmatmul.f32.gmra.mxu3 %v3969_v14 }
 0x8bc   : > { %4680 = vst [vmem:[%s11286_s21 + $0x60] sm:$0xff] %v4609_v23  ;;  %v4522_v32 = vmax.f32 %v4490_v3, 0.0  ;;  %v7650_v37 = vpop.eup %7649  ;;  %v4056_v31 = vadd.f32 1e-05, %v4055_v44  ;;  %4824 = vmatmul.f32.gmra.mxu1 %v13137_v15  ;;  %4889 = vmatmul.f32.gmra.mxu2 %v11559_v36  ;;  %v13138_v23 = vld [vmem:[#allocation46_spill] sm:$0xff] }
 0x8bd   : > { %v4290_v57 = vmul.f32 %v7648_v62, %v4289_v41  ;;  %v4296_v43 = vmul.f32 %v7650_v37, %v4053_v8  ;;  %vm4302_vm10 = vweird.f32 %v7650_v37  ;;  %v13139_v3 = vmax.f32 %v13138_v23, 0.0  ;;  %v5580_v41 = vld [vmem:[#allocation13 + $0x40] sm:$0xff] }
 0x8be   : > { %4628 = vmatmul.f32.gmra.mxu0 %v4522_v32  ;;  %7651 = vrsqrt.f32 %v4056_v31  ;;  %v3902_v1 = vpop.f32.mrf.mxu2  ;;  %vm4303_vm12 = vmor %vm4301_vm11, %vm4302_vm10  ;;  %vm4311_vm13 = vweird.f32 %v4056_v31 }
 0x8bf   : > { %v4294_v19 = vsel %vm4293_vm9, %v7648_v62, %v4290_v57  ;;  %v4297_v27 = vmul.f32 %v7650_v37, %v4296_v43  ;;  %v11566_v24 = vsub.f32 %v11384_v12, %v3902_v1  ;;  %5596 = vmatpush.msrb.mxu0 %v5580_v41 }
 0x8c0   : > { %v4425_v13 = vmul.f32 %v4294_v19, %v11352_v30 }
 0x8c1   : > { %v4298_v46 = vmul.f32 0.5, %v4297_v27  ;;  %v3970_v20 = vmul.f32 %v11566_v24, %v11566_v24  ;;  %v4780_v11 = vpop.f32.mrf.mxu1 }
 0x8c2   : > { %v4458_v18 = vmul.f32 %v10998_v48, %v4425_v13  ;;  %v11573_v59 = vadd.f32 %v4780_v11, %v11416_v45  ;;  %v4611_v58 = vpop.f32.mrf.mxu0 }
 0x8c3   : > { %v4299_v62 = vsub.f32 1.5, %v4298_v46  ;;  %v4058_v30 = vpop.f32.mrf.mxu3  ;;  %4078 = vmatmul.f32.gmra.mxu3 %v3970_v20  ;;  %v4612_v42 = vadd.f32 %v11258_v9, %v4611_v58 }
 0x8c4   : > { %v4491_v40 = vadd.f32 %v11006_v21, %v4458_v18  ;;  %v7652_v4 = vpop.eup %7651  ;;  %v11575_v12 = vadd.f32 1e-05, %v4058_v30  ;;  %4827 = vmatmul.f32.gmra.mxu1 %v13139_v3  ;;  %4892 = vmatmul.f32.gmra.mxu2 %v11573_v59 }
 0x8c5   : > { %v4300_v25 = vmul.f32 %v7650_v37, %v4299_v62  ;;  %v4306_v60 = vmul.f32 %v7652_v4, %v4056_v31  ;;  %4681 = vst [vmem:[%s11286_s21 + $0x68] sm:$0xff] %v4612_v42  ;;  %vm4312_vm0 = vweird.f32 %v7652_v4 }
 0x8c6   : > { %v4523_v10 = vmax.f32 %v4491_v40, 0.0  ;;  %7653 = vrsqrt.f32 %v11575_v12  ;;  %vm4313_vm14 = vmor %vm4311_vm13, %vm4312_vm0  ;;  %vm4321_vm2 = vweird.f32 %v11575_v12 }
 0x8c7   : > { %v4307_v14 = vmul.f32 %v7652_v4, %v4306_v60  ;;  %v4304_v53 = vsel %vm4303_vm12, %v7650_v37, %v4300_v25  ;;  %v3905_v32 = vpop.f32.mrf.mxu2 }
 0x8c8   : > { %4631 = vmatmul.f32.gmra.mxu0 %v4523_v10  ;;  %v4426_v57 = vmul.f32 %v4304_v53, %v11363_v0  ;;  %v11586_v44 = vsub.f32 %v11402_v35, %v3905_v32  ;;  %v11616_v53 = vld [vmem:[#allocation10] ss:$0 sm:$0xff] }
 0x8c9   : > { %v4308_v8 = vmul.f32 0.5, %v4307_v14  ;;  %v4783_v43 = vpop.f32.mrf.mxu1 }
 0x8ca   : > { %v4459_v2 = vmul.f32 %v10998_v48, %v4426_v57  ;;  %v3971_v19 = vmul.f32 %v11586_v44, %v11586_v44  ;;  %v11592_v56 = vadd.f32 %v4783_v43, %v11416_v45  ;;  %v5579_v57 = vld [vmem:[#allocation13 + $0x38] sm:$0xff] }
 0x8cb   : > { %v4309_v15 = vsub.f32 1.5, %v4308_v8  ;;  %v4061_v37 = vpop.f32.mrf.mxu3  ;;  %v4614_v0 = vpop.f32.mrf.mxu0  ;;  %5597 = vmatpush.msrb.mxu0 %v5579_v57 }
 0x8cc   : > { %v7654_v13 = vpop.eup %7653  ;;  %v11594_v27 = vadd.f32 1e-05, %v4061_v37  ;;  %v4492_v35 = vadd.f32 %v11006_v21, %v4459_v2  ;;  %4081 = vmatmul.f32.gmra.mxu3 %v3971_v19  ;;  %4895 = vmatmul.f32.gmra.mxu2 %v11592_v56  ;;  %v4615_v46 = vadd.f32 %v11258_v9, %v4614_v0 }
 0x8cd   : > { %v4310_v1 = vmul.f32 %v7652_v4, %v4309_v15  ;;  %v4316_v18 = vmul.f32 %v7654_v13, %v11575_v12  ;;  %vm4322_vm15 = vweird.f32 %v7654_v13 }
 0x8ce   : > { %7655 = vrsqrt.f32 %v11594_v27  ;;  %v4524_v20 = vmax.f32 %v4492_v35, 0.0  ;;  %4682 = vst [vmem:[%s11286_s21 + $0x70] sm:$0xff] %v4615_v46  ;;  %vm4323_vm3 = vmor %vm4321_vm2, %vm4322_vm15  ;;  %vm4331_vm5 = vweird.f32 %v11594_v27 }
 0x8cf   : > { %v4317_v11 = vmul.f32 %v7654_v13, %v4316_v18  ;;  %v4314_v40 = vsel %vm4313_vm14, %v7652_v4, %v4310_v1  ;;  %v4848_v62 = vpop.f32.mrf.mxu2 }
 0x8d0   : > { %4634 = vmatmul.f32.gmra.mxu0 %v4524_v20  ;;  %v4427_v30 = vmul.f32 %v4314_v40, %v11375_v50  ;;  %v11604_v31 = vsub.f32 %v11422_v26, %v4848_v62 }
 0x8d1   : > { %v4318_v58 = vmul.f32 0.5, %v4317_v11  ;;  %v4786_v42 = vpop.f32.mrf.mxu1 }
 0x8d2   : > { %v4460_v10 = vmul.f32 %v10998_v48, %v4427_v30  ;;  %v4976_v9 = vmul.f32 %v11604_v31, %v11604_v31  ;;  %v11610_v60 = vadd.f32 %v4786_v42, %v11416_v45 }
 0x8d3   : > { %v4319_v25 = vsub.f32 1.5, %v4318_v58  ;;  %v4064_v4 = vpop.f32.mrf.mxu3 }
 0x8d4   : > { %v7656_v23 = vpop.eup %7655  ;;  %v4065_v3 = vadd.f32 1e-05, %v4064_v4  ;;  %v4617_v50 = vpop.f32.mrf.mxu0  ;;  %v4493_v41 = vadd.f32 %v11006_v21, %v4460_v10  ;;  %4898 = vmatmul.f32.gmra.mxu2 %v11610_v60  ;;  %5024 = vmatmul.f32.vlgmr.msra.gmra.mxu3 %v4976_v9 }
 0x8d5   : > { %v4320_v26 = vmul.f32 %v7654_v13, %v4319_v25  ;;  %v4326_v14 = vmul.f32 %v7656_v23, %v11594_v27  ;;  %v4618_v32 = vadd.f32 %v11616_v53, %v4617_v50  ;;  %vm4332_vm4 = vweird.f32 %v7656_v23 }
 0x8d6   : > { %7657 = vrsqrt.f32 %v4065_v3  ;;  %v4525_v8 = vmax.f32 %v4493_v41, 0.0  ;;  %vm4333_vm6 = vmor %vm4331_vm5, %vm4332_vm4  ;;  %vm4341_vm1 = vweird.f32 %v4065_v3 }
 0x8d7   : > { %v4327_v43 = vmul.f32 %v7656_v23, %v4326_v14  ;;  %4683 = vst [vmem:[%s11286_s21 + $0x78] sm:$0xff] %v4618_v32  ;;  %v4324_v2 = vsel %vm4323_vm3, %v7654_v13, %v4320_v26  ;;  %v4851_v15 = vpop.f32.mrf.mxu2  ;;  %v5578_v32 = vld [vmem:[#allocation13 + $0x30] sm:$0xff] }
 0x8d8   : > { %4637 = vmatmul.f32.gmra.mxu0 %v4525_v8  ;;  %v4428_v12 = vmul.f32 %v4324_v2, %v11389_v17  ;;  %v11623_v37 = vsub.f32 %v11439_v47, %v4851_v15 }
 0x8d9   : > { %v4328_v19 = vmul.f32 0.5, %v4327_v43  ;;  %v4789_v0 = vpop.f32.mrf.mxu1  ;;  %5598 = vmatpush.msrb.mxu0 %v5578_v32 }
 0x8da   : > { %v4461_v35 = vmul.f32 %v10998_v48, %v4428_v12  ;;  %v4977_v18 = vmul.f32 %v11623_v37, %v11623_v37  ;;  %v11629_v46 = vadd.f32 %v4789_v0, %v11416_v45 }
 0x8db   : > { %v4329_v1 = vsub.f32 1.5, %v4328_v19 }
 0x8dc   : > { %v7658_v13 = vpop.eup %7657  ;;  %v4620_v20 = vpop.f32.mrf.mxu0  ;;  %v4494_v17 = vadd.f32 %v11006_v21, %v4461_v35  ;;  %4901 = vmatmul.f32.gmra.mxu2 %v11629_v46  ;;  %5027 = vmatmul.f32.gmra.mxu3 %v4977_v18 }
 0x8dd   : > { %v4330_v11 = vmul.f32 %v7656_v23, %v4329_v1  ;;  %v4336_v47 = vmul.f32 %v7658_v13, %v4065_v3  ;;  %v4621_v40 = vadd.f32 %v11616_v53, %v4620_v20  ;;  %vm4342_vm7 = vweird.f32 %v7658_v13 }
 0x8de   : > { %v4526_v62 = vmax.f32 %v4494_v17, 0.0  ;;  %vm4343_vm8 = vmor %vm4341_vm1, %vm4342_vm7 }
 0x8df   : > { %v4337_v30 = vmul.f32 %v7658_v13, %v4336_v47  ;;  %4684 = vst [vmem:[%s11286_s21 + $0x80] sm:$0xff] %v4621_v40  ;;  %v4334_v58 = vsel %vm4333_vm6, %v7656_v23, %v4330_v11  ;;  %v4854_v42 = vpop.f32.mrf.mxu2  ;;  %v5577_v47 = vld [vmem:[#allocation13 + $0x28] sm:$0xff] }
 0x8e0   : > { %4640 = vmatmul.f32.gmra.mxu0 %v4526_v62  ;;  %v4429_v10 = vmul.f32 %v4334_v58, %v11407_v51  ;;  %v11638_v9 = vsub.f32 %v11450_v63, %v4854_v42 }
 0x8e1   : > { %v4338_v25 = vmul.f32 0.5, %v4337_v30  ;;  %v4792_v27 = vpop.f32.mrf.mxu1  ;;  %5599 = vmatpush.msrb.mxu0 %v5577_v47 }
 0x8e2   : > { %v4462_v4 = vmul.f32 %v10998_v48, %v4429_v10  ;;  %v4978_v41 = vmul.f32 %v11638_v9, %v11638_v9  ;;  %v11644_v26 = vadd.f32 %v4792_v27, %v11416_v45 }
 0x8e3   : > { %v4339_v50 = vsub.f32 1.5, %v4338_v25 }
 0x8e4   : > { %v4623_v23 = vpop.f32.mrf.mxu0  ;;  %v4495_v14 = vadd.f32 %v11006_v21, %v4462_v4  ;;  %4904 = vmatmul.f32.gmra.mxu2 %v11644_v26  ;;  %5030 = vmatmul.f32.gmra.mxu3 %v4978_v41  ;;  %v5576_v4 = vld [vmem:[#allocation13 + $0x20] sm:$0xff] }
 0x8e5   : > { %v4340_v51 = vmul.f32 %v7658_v13, %v4339_v50  ;;  %v4624_v63 = vadd.f32 %v11616_v53, %v4623_v23  ;;  %5600 = vmatpush.msrb.mxu0 %v5576_v4 }
 0x8e6   : > { %v4527_v57 = vmax.f32 %v4495_v14, 0.0 }
 0x8e7   : > { %4685 = vst [vmem:[%s11286_s21 + $0x88] sm:$0xff] %v4624_v63  ;;  %v4344_v8 = vsel %vm4343_vm8, %v7658_v13, %v4340_v51  ;;  %v4857_v43 = vpop.f32.mrf.mxu2 }
 0x8e8   : > { %4643 = vmatmul.f32.gmra.mxu0 %v4527_v57  ;;  %v4430_v2 = vmul.f32 %v4344_v8, %v11426_v5  ;;  %v11652_v15 = vsub.f32 %v11461_v38, %v4857_v43 }
 0x8e9   : > { %v4795_v3 = vpop.f32.mrf.mxu1 }
 0x8ea   : > { %v4463_v12 = vmul.f32 %v10998_v48, %v4430_v2  ;;  %v4979_v19 = vmul.f32 %v11652_v15, %v11652_v15  ;;  %v11658_v0 = vadd.f32 %v4795_v3, %v11416_v45 }
 0x8ec   : > { %v4626_v35 = vpop.f32.mrf.mxu0  ;;  %v4496_v1 = vadd.f32 %v11006_v21, %v4463_v12  ;;  %4907 = vmatmul.f32.gmra.mxu2 %v11658_v0  ;;  %5033 = vmatmul.f32.gmra.mxu3 %v4979_v19  ;;  %v5575_v12 = vld [vmem:[#allocation13 + $0x18] sm:$0xff] }
 0x8ed   : > { %v4627_v5 = vadd.f32 %v11616_v53, %v4626_v35  ;;  %5601 = vmatpush.msrb.mxu0 %v5575_v12 }
 0x8ee   : > { %v4528_v18 = vmax.f32 %v4496_v1, 0.0 }
 0x8ef   : > { %4686 = vst [vmem:[%s11286_s21 + $0x90] sm:$0xff] %v4627_v5  ;;  %v4860_v38 = vpop.f32.mrf.mxu2 }
 0x8f0   : > { %4646 = vmatmul.f32.gmra.mxu0 %v4528_v18  ;;  %v11665_v13 = vsub.f32 %v11472_v29, %v4860_v38 }
 0x8f1   : > { %v4798_v20 = vpop.f32.mrf.mxu1 }
 0x8f2   : > { %v4980_v17 = vmul.f32 %v11665_v13, %v11665_v13  ;;  %v11670_v11 = vadd.f32 %v4798_v20, %v11416_v45 }
 0x8f4   : > { %4910 = vmatmul.f32.gmra.mxu2 %v11670_v11  ;;  %5036 = vmatmul.f32.gmra.mxu3 %v4980_v17 }
 0x8f7   : > { %v4863_v40 = vpop.f32.mrf.mxu2 }
 0x8f8   : > { %v11674_v62 = vsub.f32 %v11480_v54, %v4863_v40 }
 0x8f9   : > { %v4801_v30 = vpop.f32.mrf.mxu1 }
 0x8fa   : > { %v4981_v29 = vmul.f32 %v11674_v62, %v11674_v62  ;;  %v11679_v58 = vadd.f32 %v4801_v30, %v11416_v45 }
 0x8fc   : > { %4913 = vmatmul.f32.gmra.mxu2 %v11679_v58  ;;  %5039 = vmatmul.f32.gmra.mxu3 %v4981_v29 }
 0x8ff   : > { %v4866_v42 = vpop.f32.mrf.mxu2 }
 0x900   : > { %v11683_v10 = vsub.f32 %v11486_v28, %v4866_v42 }
 0x901   : > { %v4804_v25 = vpop.f32.mrf.mxu1 }
 0x902   : > { %v4982_v27 = vmul.f32 %v11683_v10, %v11683_v10  ;;  %v11688_v54 = vadd.f32 %v4804_v25, %v11416_v45 }
 0x904   : > { %4916 = vmatmul.f32.gmra.mxu2 %v11688_v54  ;;  %5042 = vmatmul.f32.gmra.mxu3 %v4982_v27 }
 0x907   : > { %v4869_v50 = vpop.f32.mrf.mxu2 }
 0x908   : > { %v11692_v41 = vsub.f32 %v11492_v7, %v4869_v50 }
 0x909   : > { %v4807_v23 = vpop.f32.mrf.mxu1 }
 0x90a   : > { %v4983_v28 = vmul.f32 %v11692_v41, %v11692_v41  ;;  %v11697_v14 = vadd.f32 %v4807_v23, %v11416_v45 }
 0x90c   : > { %4919 = vmatmul.f32.gmra.mxu2 %v11697_v14  ;;  %5045 = vmatmul.f32.gmra.mxu3 %v4983_v28  ;;  %v5574_v28 = vld [vmem:[#allocation13 + $0x10] sm:$0xff] }
 0x90d   : > { %5602 = vmatpush.msrb.mxu0 %v5574_v28 }
 0x90f   : > { %v4872_v51 = vpop.f32.mrf.mxu2 }
 0x910   : > { %v11701_v63 = vsub.f32 %v11498_v52, %v4872_v51 }
 0x911   : > { %v4810_v32 = vpop.f32.mrf.mxu1 }
 0x912   : > { %v4984_v57 = vmul.f32 %v11701_v63, %v11701_v63  ;;  %v11706_v7 = vadd.f32 %v4810_v32, %v11416_v45 }
 0x914   : > { %4922 = vmatmul.f32.gmra.mxu2 %v11706_v7  ;;  %5048 = vmatmul.f32.gmra.mxu3 %v4984_v57 }
 0x917   : > { %v4875_v8 = vpop.f32.mrf.mxu2 }
 0x918   : > { %v11710_v43 = vsub.f32 %v11504_v22, %v4875_v8 }
 0x919   : > { %v4813_v2 = vpop.f32.mrf.mxu1 }
 0x91a   : > { %v4985_v3 = vmul.f32 %v11710_v43, %v11710_v43  ;;  %v11715_v52 = vadd.f32 %v4813_v2, %v11416_v45 }
 0x91c   : > { %4925 = vmatmul.f32.gmra.mxu2 %v11715_v52  ;;  %5051 = vmatmul.f32.gmra.mxu3 %v4985_v3 }
 0x91f   : > { %v4878_v19 = vpop.f32.mrf.mxu2 }
 0x920   : > { %v11719_v35 = vsub.f32 %v11513_v61, %v4878_v19 }
 0x921   : > { %v4816_v5 = vpop.f32.mrf.mxu1 }
 0x922   : > { %v4986_v18 = vmul.f32 %v11719_v35, %v11719_v35  ;;  %v11724_v38 = vadd.f32 %v4816_v5, %v11416_v45 }
 0x923   : > { %v4067_v1 = vpop.f32.mrf.mxu3 }
 0x924   : > { %v4068_v22 = vadd.f32 1e-05, %v4067_v1  ;;  %4928 = vmatmul.f32.gmra.mxu2 %v11724_v38  ;;  %5054 = vmatmul.f32.gmra.mxu3 %v4986_v18 }
 0x926   : > { %7659 = vrsqrt.f32 %v4068_v22  ;;  %vm4351_vm10 = vweird.f32 %v4068_v22 }
 0x927   : > { %v4881_v20 = vpop.f32.mrf.mxu2 }
 0x928   : > { %v11728_v17 = vsub.f32 %v11521_v49, %v4881_v20 }
 0x929   : > { %v4819_v61 = vpop.f32.mrf.mxu1 }
 0x92a   : > { %v4987_v29 = vmul.f32 %v11728_v17, %v11728_v17  ;;  %v11733_v42 = vadd.f32 %v4819_v61, %v11416_v45 }
 0x92c   : > { %v7660_v47 = vpop.eup %7659  ;;  %v4070_v40 = vpop.f32.mrf.mxu3  ;;  %4931 = vmatmul.f32.gmra.mxu2 %v11733_v42  ;;  %5057 = vmatmul.f32.gmra.mxu3 %v4987_v29 }
 0x92d   : > { %v4346_v30 = vmul.f32 %v7660_v47, %v4068_v22  ;;  %v4071_v25 = vadd.f32 1e-05, %v4070_v40  ;;  %vm4352_vm9 = vweird.f32 %v7660_v47 }
 0x92e   : > { %vm4353_vm11 = vmor %vm4351_vm10, %vm4352_vm9 }
 0x92f   : > { %v4347_v27 = vmul.f32 %v7660_v47, %v4346_v30  ;;  %7661 = vrsqrt.f32 %v4071_v25  ;;  %v4884_v50 = vpop.f32.mrf.mxu2  ;;  %vm4361_vm0 = vweird.f32 %v4071_v25 }
 0x930   : > { %v11737_v23 = vsub.f32 %v11532_v34, %v4884_v50 }
 0x931   : > { %v4348_v4 = vmul.f32 0.5, %v4347_v27  ;;  %v4822_v51 = vpop.f32.mrf.mxu1 }
 0x932   : > { %v4988_v57 = vmul.f32 %v11737_v23, %v11737_v23  ;;  %v11742_v8 = vadd.f32 %v4822_v51, %v11416_v45 }
 0x933   : > { %v4349_v49 = vsub.f32 1.5, %v4348_v4 }
 0x934   : > { %4934 = vmatmul.f32.gmra.mxu2 %v11742_v8  ;;  %5060 = vmatmul.f32.gmra.mxu3 %v4988_v57 }
 0x935   : > { %v4350_v32 = vmul.f32 %v7660_v47, %v4349_v49  ;;  %v7662_v2 = vpop.eup %7661  ;;  %v4073_v1 = vpop.f32.mrf.mxu3 }
 0x936   : > { %v4356_v3 = vmul.f32 %v7662_v2, %v4071_v25  ;;  %v4074_v5 = vadd.f32 1e-05, %v4073_v1  ;;  %vm4362_vm12 = vweird.f32 %v7662_v2  ;;  %v5573_v1 = vld [vmem:[#allocation13 + $0x8] sm:$0xff] }
 0x937   : > { %v4354_v12 = vsel %vm4353_vm11, %v7660_v47, %v4350_v32  ;;  %v4887_v22 = vpop.f32.mrf.mxu2  ;;  %vm4363_vm13 = vmor %vm4361_vm0, %vm4362_vm12  ;;  %5603 = vmatpush.msrb.mxu0 %v5573_v1 }
 0x938   : > { %v4431_v34 = vmul.f32 %v4354_v12, %v11510_v55  ;;  %v4357_v19 = vmul.f32 %v7662_v2, %v4356_v3  ;;  %v11748_v61 = vsub.f32 %v11543_v33, %v4887_v22  ;;  %7663 = vrsqrt.f32 %v4074_v5 }
 0x939   : > { %v4825_v30 = vpop.f32.mrf.mxu1  ;;  %vm4371_vm15 = vweird.f32 %v4074_v5 }
 0x93a   : > { %v4464_v18 = vmul.f32 %v10998_v48, %v4431_v34  ;;  %v4358_v20 = vmul.f32 0.5, %v4357_v19  ;;  %v4989_v55 = vmul.f32 %v11748_v61, %v11748_v61  ;;  %v11755_v4 = vadd.f32 %v4825_v30, %v11416_v45 }
 0x93b   : > { %v4629_v40 = vpop.f32.mrf.mxu0 }
 0x93c   : > { %v4630_v29 = vadd.f32 %v11616_v53, %v4629_v40  ;;  %v4497_v47 = vadd.f32 %v11006_v21, %v4464_v18  ;;  %v4359_v27 = vsub.f32 1.5, %v4358_v20  ;;  %4937 = vmatmul.f32.gmra.mxu2 %v11755_v4  ;;  %5063 = vmatmul.f32.gmra.mxu3 %v4989_v55 }
 0x93e   : > { %4687 = vst [vmem:[%s11286_s21 + $0x98] sm:$0xff] %v4630_v29  ;;  %v4529_v50 = vmax.f32 %v4497_v47, 0.0  ;;  %v4360_v49 = vmul.f32 %v7662_v2, %v4359_v27  ;;  %v4076_v33 = vpop.f32.mrf.mxu3  ;;  %v7664_v51 = vpop.eup %7663 }
 0x93f   : > { %v4077_v32 = vadd.f32 1e-05, %v4076_v33  ;;  %v4890_v57 = vpop.f32.mrf.mxu2  ;;  %v4366_v12 = vmul.f32 %v7664_v51, %v4074_v5  ;;  %vm4372_vm14 = vweird.f32 %v7664_v51 }
 0x940   : > { %4649 = vmatmul.f32.gmra.mxu0 %v4529_v50  ;;  %v4364_v28 = vsel %vm4363_vm13, %v7662_v2, %v4360_v49  ;;  %v11761_v34 = vsub.f32 %v11559_v36, %v4890_v57  ;;  %vm4373_vm2 = vmor %vm4371_vm15, %vm4372_vm14 }
 0x941   : > { %v4432_v3 = vmul.f32 %v4364_v28, %v11524_v16  ;;  %7665 = vrsqrt.f32 %v4077_v32  ;;  %v4828_v19 = vpop.f32.mrf.mxu1  ;;  %v4367_v22 = vmul.f32 %v7664_v51, %v4366_v12  ;;  %vm4381_vm4 = vweird.f32 %v4077_v32 }
 0x942   : > { %v4990_v18 = vmul.f32 %v11761_v34, %v11761_v34  ;;  %v11767_v2 = vadd.f32 %v4828_v19, %v11416_v45 }
 0x943   : > { %v4465_v25 = vmul.f32 %v10998_v48, %v4432_v3  ;;  %v4368_v36 = vmul.f32 0.5, %v4367_v22 }
 0x944   : > { %4940 = vmatmul.f32.gmra.mxu2 %v11767_v2  ;;  %5066 = vmatmul.f32.gmra.mxu3 %v4990_v18 }
 0x945   : > { %v4632_v20 = vpop.f32.mrf.mxu0  ;;  %v4498_v40 = vadd.f32 %v11006_v21, %v4465_v25  ;;  %v4369_v29 = vsub.f32 1.5, %v4368_v36 }
 0x946   : > { %v4633_v16 = vadd.f32 %v11616_v53, %v4632_v20  ;;  %v4079_v47 = vpop.f32.mrf.mxu3 }
 0x947   : > { %v4530_v30 = vmax.f32 %v4498_v40, 0.0  ;;  %v7666_v27 = vpop.eup %7665  ;;  %v4080_v55 = vadd.f32 1e-05, %v4079_v47  ;;  %v4893_v50 = vpop.f32.mrf.mxu2  ;;  %v4370_v45 = vmul.f32 %v7664_v51, %v4369_v29  ;;  %v5572_v29 = vld [vmem:[#allocation13] sm:$0xff] }
 0x948   : > { %4688 = vst [vmem:[%s11286_s21 + $0xa0] sm:$0xff] %v4633_v16  ;;  %v4376_v49 = vmul.f32 %v7666_v27, %v4077_v32  ;;  %v11774_v33 = vsub.f32 %v11573_v59, %v4893_v50  ;;  %vm4382_vm3 = vweird.f32 %v7666_v27  ;;  %5604 = vmatpush.msrb.mxu0 %v5572_v29 }
 0x949   : > { %4652 = vmatmul.f32.gmra.mxu0 %v4530_v30  ;;  %7667 = vrsqrt.f32 %v4080_v55  ;;  %v4374_v3 = vsel %vm4373_vm2, %v7664_v51, %v4370_v45  ;;  %vm4383_vm5 = vmor %vm4381_vm4, %vm4382_vm3  ;;  %vm4391_vm7 = vweird.f32 %v4080_v55 }
 0x94a   : > { %v4377_v28 = vmul.f32 %v7666_v27, %v4376_v49  ;;  %v4991_v57 = vmul.f32 %v11774_v33, %v11774_v33  ;;  %v4433_v12 = vmul.f32 %v4374_v3, %v11538_v39 }
 0x94c   : > { %v4378_v19 = vmul.f32 0.5, %v4377_v28  ;;  %5069 = vmatmul.f32.gmra.mxu3 %v4991_v57  ;;  %v4466_v5 = vmul.f32 %v10998_v48, %v4433_v12  ;;  %v7963_v12 = vld [vmem:[%s12970_s5 + $0x70] sm:$0xff] }
 0x94d   : > { %v4635_v25 = vpop.f32.mrf.mxu0 }
 0x94e   : > { %v4636_v1 = vadd.f32 %v11616_v53, %v4635_v25  ;;  %v4379_v22 = vsub.f32 1.5, %v4378_v19  ;;  %v4499_v16 = vadd.f32 %v11006_v21, %v4466_v5 }
 0x94f   : > { %v7668_v59 = vpop.eup %7667  ;;  %v4082_v18 = vpop.f32.mrf.mxu3 }
 0x950   : > { %4689 = vst [vmem:[%s11286_s21 + $0xa8] sm:$0xff] %v4636_v1  ;;  %v4896_v20 = vpop.f32.mrf.mxu2  ;;  %v4380_v40 = vmul.f32 %v7666_v27, %v4379_v22  ;;  %v4386_v51 = vmul.f32 %v7668_v59, %v4080_v55  ;;  %v11783_v36 = vadd.f32 1e-05, %v4082_v18  ;;  %v4531_v30 = vmax.f32 %v4499_v16, 0.0 }
 0x951   : > { %v11786_v39 = vsub.f32 %v11592_v56, %v4896_v20  ;;  %v7962_v56 = vld [vmem:[%s12970_s5 + $0x78] sm:$0xff]  ;;  %vm4392_vm6 = vweird.f32 %v7668_v59  ;;  %v7964_v20 = vld [vmem:[%s12970_s5 + $0x68] sm:$0xff] }
 0x952   : > { %v4387_v47 = vmul.f32 %v7668_v59, %v4386_v51  ;;  %7669 = vrsqrt.f32 %v11783_v36  ;;  %v4384_v50 = vsel %vm4383_vm5, %v7666_v27, %v4380_v40  ;;  %4655 = vmatmul.f32.gmra.mxu0 %v4531_v30  ;;  %vm4393_vm1 = vmor %vm4391_vm7, %vm4392_vm6  ;;  %vm4401_vm9 = vweird.f32 %v11783_v36 }
 0x953   : > { %v4992_v45 = vmul.f32 %v11786_v39, %v11786_v39  ;;  %v4434_v32 = vmul.f32 %v4384_v50, %v11551_v6  ;;  %5879 = vmatpush.msra.mxu0 %v7962_v56  ;;  %v7966_v50 = vld [vmem:[%s12970_s5 + $0x58] sm:$0xff] }
 0x954   : > { %v4388_v49 = vmul.f32 0.5, %v4387_v47 }
 0x955   : > { %v4638_v28 = vpop.f32.mrf.mxu0  ;;  %5072 = vmatmul.f32.gmra.mxu3 %v4992_v45  ;;  %v4467_v27 = vmul.f32 %v10998_v48, %v4434_v32  ;;  %5880 = vmatpush.msra.mxu0 %v7963_v12 }
 0x956   : > { %v4639_v57 = vadd.f32 %v11616_v53, %v4638_v28  ;;  %v4389_v3 = vsub.f32 1.5, %v4388_v49  ;;  %v7967_v49 = vld [vmem:[%s12970_s5 + $0x50] sm:$0xff] }
 0x957   : > { %v5025_v19 = vpop.f32.mrf.mxu3  ;;  %v4500_v25 = vadd.f32 %v11006_v21, %v4467_v27  ;;  %5881 = vmatpush.msra.mxu0 %v7964_v20 }
 0x958   : > { %4690 = vst [vmem:[%s11286_s21 + $0xb0] sm:$0xff] %v4639_v57  ;;  %v4899_v6 = vpop.f32.mrf.mxu2  ;;  %v7670_v1 = vpop.eup %7669  ;;  %v4390_v5 = vmul.f32 %v7668_v59, %v4389_v3  ;;  %v11805_v18 = vadd.f32 1e-05, %v5025_v19 }
 0x959   : > { %v11803_v22 = vsub.f32 %v11610_v60, %v4899_v6  ;;  %v4396_v16 = vmul.f32 %v7670_v1, %v11783_v36  ;;  %v4532_v40 = vmax.f32 %v4500_v25, 0.0  ;;  %v7965_v60 = vld [vmem:[%s12970_s5 + $0x60] sm:$0xff]  ;;  %vm4402_vm8 = vweird.f32 %v7670_v1  ;;  %v7968_v6 = vld [vmem:[%s12970_s5 + $0x48] sm:$0xff] }
 0x95a   : > { %7671 = vrsqrt.f32 %v11805_v18  ;;  %v4394_v55 = vsel %vm4393_vm1, %v7668_v59, %v4390_v5  ;;  %5882 = vmatpush.msra.mxu0 %v7965_v60  ;;  %vm4403_vm10 = vmor %vm4401_vm9, %vm4402_vm8  ;;  %vm5127_vm12 = vweird.f32 %v11805_v18 }
 0x95b   : > { %v4993_v51 = vmul.f32 %v11803_v22, %v11803_v22  ;;  %v4397_v30 = vmul.f32 %v7670_v1, %v4396_v16  ;;  %4658 = vmatmul.f32.gmra.mxu0 %v4532_v40  ;;  %v4435_v29 = vmul.f32 %v4394_v55, %v11566_v24  ;;  %v7970_v55 = vld [vmem:[%s12970_s5 + $0x38] sm:$0xff] }
 0x95c   : > { %5883 = vmatpush.msra.mxu0 %v7966_v50 }
 0x95d   : > { %v4641_v47 = vpop.f32.mrf.mxu0  ;;  %v4398_v45 = vmul.f32 0.5, %v4397_v30  ;;  %5075 = vmatmul.f32.gmra.mxu3 %v4993_v51  ;;  %v4468_v32 = vmul.f32 %v10998_v48, %v4435_v29 }
 0x95e   : > { %v4642_v59 = vadd.f32 %v11616_v53, %v4641_v47  ;;  %5884 = vmatpush.msra.mxu0 %v7967_v49  ;;  %v7971_v47 = vld [vmem:[%s12970_s5 + $0x30] sm:$0xff] }
 0x95f   : > { %v4399_v28 = vsub.f32 1.5, %v4398_v45  ;;  %v5028_v56 = vpop.f32.mrf.mxu3  ;;  %v4501_v57 = vadd.f32 %v11006_v21, %v4468_v32 }
 0x960   : > { %4691 = vst [vmem:[%s11286_s21 + $0xb8] sm:$0xff] %v4642_v59  ;;  %v4902_v24 = vpop.f32.mrf.mxu2  ;;  %v7672_v27 = vpop.eup %7671  ;;  %v11831_v12 = vadd.f32 1e-05, %v5028_v56  ;;  %5885 = vmatpush.msra.mxu0 %v7968_v6  ;;  %v7973_v56 = vld [vmem:[#allocation11] sm:$0x7]  ;;  %v7974_v6 = vld [vmem:[%s12970_s5 + $0x20] sm:$0xff] }
 0x961   : > { %v11829_v3 = vsub.f32 %v11629_v46, %v4902_v24  ;;  %v4400_v19 = vmul.f32 %v7670_v1, %v4399_v28  ;;  %v5122_v25 = vmul.f32 %v7672_v27, %v11805_v18  ;;  %v4533_v5 = vmax.f32 %v4501_v57, 0.0  ;;  %v7969_v46 = vld [vmem:[%s12970_s5 + $0x40] sm:$0xff] }
 0x962   : > { %7673 = vrsqrt.f32 %v11831_v12  ;;  %5886 = vmatpush.msra.mxu0 %v7969_v46  ;;  %vm5128_vm11 = vweird.f32 %v7672_v27  ;;  %v11865_v57 = vperm.slane %v7973_v56, 1  ;;  %vm5137_vm14 = vweird.f32 %v11831_v12 }
 0x963   : > { %v4994_v20 = vmul.f32 %v11829_v3, %v11829_v3  ;;  %v5123_v16 = vmul.f32 %v7672_v27, %v5122_v25  ;;  %4661 = vmatmul.f32.gmra.mxu0 %v4533_v5  ;;  %v4404_v40 = vsel %vm4403_vm10, %v7670_v1, %v4400_v19  ;;  %vm5129_vm0 = vmor %vm5127_vm12, %vm5128_vm11 }
 0x964   : > { %v4436_v36 = vmul.f32 %v4404_v40, %v11586_v44  ;;  %5887 = vmatpush.msra.mxu0 %v7970_v55  ;;  %v7975_v40 = vld [vmem:[%s12970_s5 + $0x18] sm:$0xff]  ;;  %v7976_v55 = vld [vmem:[%s12970_s5 + $0x10] sm:$0xff] }
 0x965   : > { %v4644_v51 = vpop.f32.mrf.mxu0  ;;  %v5124_v60 = vmul.f32 0.5, %v5123_v16  ;;  %5078 = vmatmul.f32.gmra.mxu3 %v4994_v20  ;;  %v11874_v20 = vperm.slane %v7973_v56, 2 }
 0x966   : > { %v4645_v30 = vadd.f32 %v11616_v53, %v4644_v51  ;;  %v4469_v29 = vmul.f32 %v10998_v48, %v4436_v36  ;;  %5888 = vmatpush.msra.mxu0 %v7971_v47  ;;  %v7972_v48 = vld [vmem:[%s12970_s5 + $0x28] sm:$0xff] }
 0x967   : > { %v5125_v1 = vsub.f32 1.5, %v5124_v60  ;;  %v5031_v50 = vpop.f32.mrf.mxu3 }
 0x968   : > { %4692 = vst [vmem:[%s11286_s21 + $0xc0] sm:$0xff] %v4645_v30  ;;  %v4905_v44 = vpop.f32.mrf.mxu2  ;;  %v7674_v45 = vpop.eup %7673  ;;  %v11857_v32 = vadd.f32 1e-05, %v5031_v50  ;;  %v4502_v49 = vadd.f32 %v11006_v21, %v4469_v29  ;;  %5889 = vmatpush.msra.mxu0 %v7972_v48 }
 0x969   : > { %v11855_v59 = vsub.f32 %v11644_v26, %v4905_v44  ;;  %v5126_v28 = vmul.f32 %v7672_v27, %v5125_v1  ;;  %v5132_v24 = vmul.f32 %v7674_v45, %v11831_v12  ;;  %vm5138_vm13 = vweird.f32 %v7674_v45  ;;  %v7977_v44 = vld [vmem:[%s12970_s5 + $0x8] sm:$0xff]  ;;  %v7978_v12 = vld [vmem:[%s12970_s5] sm:$0xff] }
 0x96a   : > { %7675 = vrsqrt.f32 %v11857_v32  ;;  %v4534_v21 = vmax.f32 %v4502_v49, 0.0  ;;  %5890 = vmatpush.msra.mxu0 %v7974_v6  ;;  %vm5139_vm15 = vmor %vm5137_vm14, %vm5138_vm13  ;;  %vm5147_vm3 = vweird.f32 %v11857_v32 }
 0x96b   : > { %v4995_v26 = vmul.f32 %v11855_v59, %v11855_v59  ;;  %v5130_v19 = vsel %vm5129_vm0, %v7672_v27, %v5126_v28  ;;  %v5133_v18 = vmul.f32 %v7674_v45, %v5132_v24 }
 0x96c   : > { %v5441_v25 = vmul.f32 %v5130_v19, %v11604_v31  ;;  %4664 = vmatmul.f32.gmra.mxu0 %v4534_v21 }
 0x96d   : > { %v4647_v5 = vpop.f32.mrf.mxu0  ;;  %v5134_v46 = vmul.f32 0.5, %v5133_v18  ;;  %5081 = vmatmul.f32.gmra.mxu3 %v4995_v26  ;;  %5891 = vmatpush.msra.mxu0 %v7975_v40 }
 0x96e   : > { %v4648_v16 = vadd.f32 %v11616_v53, %v4647_v5  ;;  %v5474_v51 = vmul.f32 %v11865_v57, %v5441_v25 }
 0x96f   : > { %v5135_v36 = vsub.f32 1.5, %v5134_v46  ;;  %v5034_v31 = vpop.f32.mrf.mxu3  ;;  %5892 = vmatpush.msra.mxu0 %v7976_v55 }
 0x970   : > { %4693 = vst [vmem:[%s11286_s21 + $0xc8] sm:$0xff] %v4648_v16  ;;  %v4908_v27 = vpop.f32.mrf.mxu2  ;;  %v7676_v60 = vpop.eup %7675  ;;  %v5035_v30 = vadd.f32 1e-05, %v5034_v31  ;;  %v5507_v29 = vadd.f32 %v11874_v20, %v5474_v51 }
 0x971   : > { %v11886_v53 = vsub.f32 %v11658_v0, %v4908_v27  ;;  %v5136_v47 = vmul.f32 %v7674_v45, %v5135_v36  ;;  %v5142_v1 = vmul.f32 %v7676_v60, %v11857_v32  ;;  %5893 = vmatpush.msra.mxu0 %v7977_v44  ;;  %vm5148_vm2 = vweird.f32 %v7676_v60 }
 0x972   : > { %7677 = vrsqrt.f32 %v5035_v30  ;;  %v5539_v0 = vmax.f32 %v5507_v29, 0.0  ;;  %vm5149_vm4 = vmor %vm5147_vm3, %vm5148_vm2  ;;  %vm5157_vm6 = vweird.f32 %v5035_v30 }
 0x973   : > { %v4996_v50 = vmul.f32 %v11886_v53, %v11886_v53  ;;  %v5143_v49 = vmul.f32 %v7676_v60, %v5142_v1  ;;  %v5140_v48 = vsel %vm5139_vm15, %v7674_v45, %v5136_v47  ;;  %5894 = vmatpush.msra.mxu0 %v7978_v12 }
 0x974   : > { %5605 = vmatmul.f32.vlgmr.msrb.gmra.mxu0 %v5539_v0  ;;  %v5442_v28 = vmul.f32 %v5140_v48, %v11623_v37 }
 0x975   : > { %v5144_v24 = vmul.f32 0.5, %v5143_v49  ;;  %5084 = vmatmul.f32.gmra.mxu3 %v4996_v50 }
 0x976   : > { %v5475_v56 = vmul.f32 %v11865_v57, %v5442_v28 }
 0x977   : > { %v5145_v26 = vsub.f32 1.5, %v5144_v24  ;;  %v5037_v6 = vpop.f32.mrf.mxu3 }
 0x978   : > { %v4911_v21 = vpop.f32.mrf.mxu2  ;;  %v7678_v19 = vpop.eup %7677  ;;  %v5038_v45 = vadd.f32 1e-05, %v5037_v6  ;;  %v5508_v25 = vadd.f32 %v11874_v20, %v5475_v56 }
 0x979   : > { %v11903_v18 = vsub.f32 %v11670_v11, %v4911_v21  ;;  %v5146_v5 = vmul.f32 %v7676_v60, %v5145_v26  ;;  %v5152_v46 = vmul.f32 %v7678_v19, %v5035_v30  ;;  %vm5158_vm5 = vweird.f32 %v7678_v19 }
 0x97a   : > { %7679 = vrsqrt.f32 %v5038_v45  ;;  %v5540_v16 = vmax.f32 %v5508_v25, 0.0  ;;  %vm5159_vm7 = vmor %vm5157_vm6, %vm5158_vm5  ;;  %vm5167_vm8 = vweird.f32 %v5038_v45 }
 0x97b   : > { %v4997_v37 = vmul.f32 %v11903_v18, %v11903_v18  ;;  %v5153_v40 = vmul.f32 %v7678_v19, %v5152_v46  ;;  %v5150_v51 = vsel %vm5149_vm4, %v7676_v60, %v5146_v5 }
 0x97c   : > { %5608 = vmatmul.f32.gmra.mxu0 %v5540_v16  ;;  %v5443_v36 = vmul.f32 %v5150_v51, %v11638_v9 }
 0x97d   : > { %v5154_v11 = vmul.f32 0.5, %v5153_v40  ;;  %5087 = vmatmul.f32.gmra.mxu3 %v4997_v37 }
 0x97e   : > { %v5476_v27 = vmul.f32 %v11865_v57, %v5443_v36 }
 0x97f   : > { %v5155_v31 = vsub.f32 1.5, %v5154_v11  ;;  %v5040_v32 = vpop.f32.mrf.mxu3 }
 0x980   : > { %v4914_v55 = vpop.f32.mrf.mxu2  ;;  %v7680_v29 = vpop.eup %7679  ;;  %v5041_v1 = vadd.f32 1e-05, %v5040_v32  ;;  %v5509_v44 = vadd.f32 %v11874_v20, %v5476_v27 }
 0x981   : > { %v11912_v47 = vsub.f32 %v11679_v58, %v4914_v55  ;;  %v5156_v50 = vmul.f32 %v7678_v19, %v5155_v31  ;;  %v5162_v60 = vmul.f32 %v7680_v29, %v5038_v45  ;;  %vm5168_vm1 = vweird.f32 %v7680_v29 }
 0x982   : > { %7681 = vrsqrt.f32 %v5041_v1  ;;  %v5541_v0 = vmax.f32 %v5509_v44, 0.0  ;;  %vm5169_vm9 = vmor %vm5167_vm8, %vm5168_vm1  ;;  %vm5177_vm11 = vweird.f32 %v5041_v1 }
 0x983   : > { %v4998_v9 = vmul.f32 %v11912_v47, %v11912_v47  ;;  %v5163_v49 = vmul.f32 %v7680_v29, %v5162_v60  ;;  %v5160_v48 = vsel %vm5159_vm7, %v7678_v19, %v5156_v50 }
 0x984   : > { %5611 = vmatmul.f32.gmra.mxu0 %v5541_v0  ;;  %v5444_v12 = vmul.f32 %v5160_v48, %v11652_v15 }
 0x985   : > { %v5164_v28 = vmul.f32 0.5, %v5163_v49  ;;  %5090 = vmatmul.f32.gmra.mxu3 %v4998_v9 }
 0x986   : > { %v5477_v58 = vmul.f32 %v11865_v57, %v5444_v12 }
 0x987   : > { %v5165_v24 = vsub.f32 1.5, %v5164_v28  ;;  %v5043_v30 = vpop.f32.mrf.mxu3 }
 0x988   : > { %v4917_v56 = vpop.f32.mrf.mxu2  ;;  %v7682_v26 = vpop.eup %7681  ;;  %v5044_v6 = vadd.f32 1e-05, %v5043_v30  ;;  %v5510_v25 = vadd.f32 %v11874_v20, %v5477_v58 }
 0x989   : > { %v11920_v21 = vsub.f32 %v11688_v54, %v4917_v56  ;;  %v5166_v5 = vmul.f32 %v7680_v29, %v5165_v24  ;;  %v5172_v19 = vmul.f32 %v7682_v26, %v5041_v1  ;;  %vm5178_vm10 = vweird.f32 %v7682_v26 }
 0x98a   : > { %7683 = vrsqrt.f32 %v5044_v6  ;;  %v5542_v46 = vmax.f32 %v5510_v25, 0.0  ;;  %vm5179_vm12 = vmor %vm5177_vm11, %vm5178_vm10  ;;  %vm5187_vm13 = vweird.f32 %v5044_v6 }
 0x98b   : > { %v4999_v15 = vmul.f32 %v11920_v21, %v11920_v21  ;;  %v5173_v37 = vmul.f32 %v7682_v26, %v5172_v19  ;;  %v5170_v16 = vsel %vm5169_vm9, %v7680_v29, %v5166_v5 }
 0x98c   : > { %5614 = vmatmul.f32.gmra.mxu0 %v5542_v46  ;;  %v5445_v40 = vmul.f32 %v5170_v16, %v11665_v13 }
 0x98d   : > { %v5174_v51 = vmul.f32 0.5, %v5173_v37  ;;  %5093 = vmatmul.f32.gmra.mxu3 %v4999_v15 }
 0x98e   : > { %v5478_v54 = vmul.f32 %v11865_v57, %v5445_v40 }
 0x98f   : > { %v5175_v36 = vsub.f32 1.5, %v5174_v51  ;;  %v5046_v45 = vpop.f32.mrf.mxu3 }
 0x990   : > { %v4920_v11 = vpop.f32.mrf.mxu2  ;;  %v7684_v27 = vpop.eup %7683  ;;  %v5047_v55 = vadd.f32 1e-05, %v5046_v45  ;;  %v5511_v32 = vadd.f32 %v11874_v20, %v5478_v54 }
 0x991   : > { %v11928_v31 = vsub.f32 %v11697_v14, %v4920_v11  ;;  %v5176_v44 = vmul.f32 %v7682_v26, %v5175_v36  ;;  %v5182_v29 = vmul.f32 %v7684_v27, %v5044_v6  ;;  %vm5188_vm0 = vweird.f32 %v7684_v27 }
 0x992   : > { %7685 = vrsqrt.f32 %v5047_v55  ;;  %v5543_v50 = vmax.f32 %v5511_v32, 0.0  ;;  %vm5189_vm14 = vmor %vm5187_vm13, %vm5188_vm0  ;;  %vm5197_vm2 = vweird.f32 %v5047_v55 }
 0x993   : > { %v5000_v13 = vmul.f32 %v11928_v31, %v11928_v31  ;;  %v5183_v60 = vmul.f32 %v7684_v27, %v5182_v29  ;;  %v5180_v9 = vsel %vm5179_vm12, %v7682_v26, %v5176_v44 }
 0x994   : > { %5617 = vmatmul.f32.gmra.mxu0 %v5543_v50  ;;  %v5446_v0 = vmul.f32 %v5180_v9, %v11674_v62 }
 0x995   : > { %v5184_v49 = vmul.f32 0.5, %v5183_v60  ;;  %5096 = vmatmul.f32.gmra.mxu3 %v5000_v13 }
 0x996   : > { %v5479_v14 = vmul.f32 %v11865_v57, %v5446_v0 }
 0x997   : > { %v5185_v48 = vsub.f32 1.5, %v5184_v49  ;;  %v5049_v1 = vpop.f32.mrf.mxu3 }
 0x998   : > { %v4923_v12 = vpop.f32.mrf.mxu2  ;;  %v7686_v28 = vpop.eup %7685  ;;  %v5050_v24 = vadd.f32 1e-05, %v5049_v1  ;;  %v5512_v56 = vadd.f32 %v11874_v20, %v5479_v14 }
 0x999   : > { %v11936_v58 = vsub.f32 %v11706_v7, %v4923_v12  ;;  %v5186_v30 = vmul.f32 %v7684_v27, %v5185_v48  ;;  %v5192_v26 = vmul.f32 %v7686_v28, %v5047_v55  ;;  %vm5198_vm15 = vweird.f32 %v7686_v28 }
 0x99a   : > { %7687 = vrsqrt.f32 %v5050_v24  ;;  %v5544_v25 = vmax.f32 %v5512_v56, 0.0  ;;  %vm5199_vm3 = vmor %vm5197_vm2, %vm5198_vm15  ;;  %vm5207_vm5 = vweird.f32 %v5050_v24 }
 0x99b   : > { %v5001_v62 = vmul.f32 %v11936_v58, %v11936_v58  ;;  %v5193_v5 = vmul.f32 %v7686_v28, %v5192_v26  ;;  %v5190_v19 = vsel %vm5189_vm14, %v7684_v27, %v5186_v30 }
 0x99c   : > { %5620 = vmatmul.f32.gmra.mxu0 %v5544_v25  ;;  %v5447_v15 = vmul.f32 %v5190_v19, %v11683_v10 }
 0x99d   : > { %v5194_v46 = vmul.f32 0.5, %v5193_v5  ;;  %5099 = vmatmul.f32.gmra.mxu3 %v5001_v62 }
 0x99e   : > { %v5480_v7 = vmul.f32 %v11865_v57, %v5447_v15 }
 0x99f   : > { %v5195_v37 = vsub.f32 1.5, %v5194_v46  ;;  %v5052_v6 = vpop.f32.mrf.mxu3 }
 0x9a0   : > { %v4926_v16 = vpop.f32.mrf.mxu2  ;;  %v7688_v40 = vpop.eup %7687  ;;  %v5053_v54 = vadd.f32 1e-05, %v5052_v6  ;;  %v5513_v36 = vadd.f32 %v11874_v20, %v5480_v7 }
 0x9a1   : > { %v11944_v51 = vsub.f32 %v11715_v52, %v4926_v16  ;;  %v5196_v11 = vmul.f32 %v7686_v28, %v5195_v37  ;;  %v5202_v45 = vmul.f32 %v7688_v40, %v5050_v24  ;;  %vm5208_vm4 = vweird.f32 %v7688_v40 }
 0x9a2   : > { %7689 = vrsqrt.f32 %v5053_v54  ;;  %v5545_v27 = vmax.f32 %v5513_v36, 0.0  ;;  %vm5209_vm6 = vmor %vm5207_vm5, %vm5208_vm4  ;;  %vm5217_vm1 = vweird.f32 %v5053_v54 }
 0x9a3   : > { %v5002_v10 = vmul.f32 %v11944_v51, %v11944_v51  ;;  %v5203_v32 = vmul.f32 %v7688_v40, %v5202_v45  ;;  %v5200_v44 = vsel %vm5199_vm3, %v7686_v28, %v5196_v11 }
 0x9a4   : > { %5623 = vmatmul.f32.gmra.mxu0 %v5545_v27  ;;  %v5448_v29 = vmul.f32 %v5200_v44, %v11692_v41 }
 0x9a5   : > { %v5204_v13 = vmul.f32 0.5, %v5203_v32  ;;  %5102 = vmatmul.f32.gmra.mxu3 %v5002_v10 }
 0x9a6   : > { %v5481_v52 = vmul.f32 %v11865_v57, %v5448_v29 }
 0x9a7   : > { %v5205_v50 = vsub.f32 1.5, %v5204_v13  ;;  %v5055_v55 = vpop.f32.mrf.mxu3 }
 0x9a8   : > { %v4929_v60 = vpop.f32.mrf.mxu2  ;;  %v7690_v9 = vpop.eup %7689  ;;  %v5056_v49 = vadd.f32 1e-05, %v5055_v55  ;;  %v5514_v14 = vadd.f32 %v11874_v20, %v5481_v52 }
 0x9a9   : > { %v11952_v0 = vsub.f32 %v11724_v38, %v4929_v60  ;;  %v5206_v48 = vmul.f32 %v7688_v40, %v5205_v50  ;;  %v5212_v12 = vmul.f32 %v7690_v9, %v5053_v54  ;;  %vm5218_vm7 = vweird.f32 %v7690_v9 }
 0x9aa   : > { %7691 = vrsqrt.f32 %v5056_v49  ;;  %v5546_v1 = vmax.f32 %v5514_v14, 0.0  ;;  %vm5219_vm8 = vmor %vm5217_vm1, %vm5218_vm7  ;;  %vm5227_vm10 = vweird.f32 %v5056_v49 }
 0x9ab   : > { %v5003_v41 = vmul.f32 %v11952_v0, %v11952_v0  ;;  %v5213_v28 = vmul.f32 %v7690_v9, %v5212_v12  ;;  %v5210_v56 = vsel %vm5209_vm6, %v7688_v40, %v5206_v48 }
 0x9ac   : > { %5626 = vmatmul.f32.gmra.mxu0 %v5546_v1  ;;  %v5449_v30 = vmul.f32 %v5210_v56, %v11701_v63 }
 0x9ad   : > { %v5214_v26 = vmul.f32 0.5, %v5213_v28  ;;  %5105 = vmatmul.f32.gmra.mxu3 %v5003_v41 }
 0x9ae   : > { %v5482_v38 = vmul.f32 %v11865_v57, %v5449_v30 }
 0x9af   : > { %v5215_v62 = vsub.f32 1.5, %v5214_v26  ;;  %v5058_v24 = vpop.f32.mrf.mxu3 }
 0x9b0   : > { %v4932_v25 = vpop.f32.mrf.mxu2  ;;  %v7692_v5 = vpop.eup %7691  ;;  %v5059_v15 = vadd.f32 1e-05, %v5058_v24  ;;  %v5515_v46 = vadd.f32 %v11874_v20, %v5482_v38 }
 0x9b1   : > { %v11960_v19 = vsub.f32 %v11733_v42, %v4932_v25  ;;  %v5216_v7 = vmul.f32 %v7690_v9, %v5215_v62  ;;  %v5222_v37 = vmul.f32 %v7692_v5, %v5056_v49  ;;  %vm5228_vm9 = vweird.f32 %v7692_v5 }
 0x9b2   : > { %7693 = vrsqrt.f32 %v5059_v15  ;;  %v5547_v16 = vmax.f32 %v5515_v46, 0.0  ;;  %vm5229_vm11 = vmor %vm5227_vm10, %vm5228_vm9  ;;  %vm5237_vm0 = vweird.f32 %v5059_v15 }
 0x9b3   : > { %v5004_v63 = vmul.f32 %v11960_v19, %v11960_v19  ;;  %v5223_v6 = vmul.f32 %v7692_v5, %v5222_v37  ;;  %v5220_v40 = vsel %vm5219_vm8, %v7690_v9, %v5216_v7  ;;  %v11973_v9 = vld [vmem:[#allocation10] ss:$0 sm:$0xff] }
 0x9b4   : > { %5629 = vmatmul.f32.gmra.mxu0 %v5547_v16  ;;  %v5450_v36 = vmul.f32 %v5220_v40, %v11710_v43 }
 0x9b5   : > { %v5224_v11 = vmul.f32 0.5, %v5223_v6  ;;  %5108 = vmatmul.f32.gmra.mxu3 %v5004_v63 }
 0x9b6   : > { %v5483_v42 = vmul.f32 %v11865_v57, %v5450_v36 }
 0x9b7   : > { %v5225_v45 = vsub.f32 1.5, %v5224_v11  ;;  %v5061_v54 = vpop.f32.mrf.mxu3 }
 0x9b8   : > { %v4935_v10 = vpop.f32.mrf.mxu2  ;;  %v7694_v27 = vpop.eup %7693  ;;  %v5062_v44 = vadd.f32 1e-05, %v5061_v54  ;;  %v5516_v29 = vadd.f32 %v11874_v20, %v5483_v42 }
 0x9b9   : > { %v11968_v32 = vsub.f32 %v11742_v8, %v4935_v10  ;;  %v5226_v13 = vmul.f32 %v7692_v5, %v5225_v45  ;;  %v5232_v52 = vmul.f32 %v7694_v27, %v5059_v15  ;;  %vm5238_vm12 = vweird.f32 %v7694_v27 }
 0x9ba   : > { %7695 = vrsqrt.f32 %v5062_v44  ;;  %v5548_v50 = vmax.f32 %v5516_v29, 0.0  ;;  %vm5239_vm13 = vmor %vm5237_vm0, %vm5238_vm12  ;;  %vm5247_vm15 = vweird.f32 %v5062_v44 }
 0x9bb   : > { %v5005_v43 = vmul.f32 %v11968_v32, %v11968_v32  ;;  %v5233_v55 = vmul.f32 %v7694_v27, %v5232_v52  ;;  %v5230_v14 = vsel %vm5229_vm11, %v7692_v5, %v5226_v13 }
 0x9bc   : > { %5632 = vmatmul.f32.gmra.mxu0 %v5548_v50  ;;  %v5451_v48 = vmul.f32 %v5230_v14, %v11719_v35 }
 0x9bd   : > { %v4650_v60 = vpop.f32.mrf.mxu0  ;;  %v5234_v12 = vmul.f32 0.5, %v5233_v55  ;;  %5111 = vmatmul.f32.gmra.mxu3 %v5005_v43 }
 0x9be   : > { %v4651_v8 = vadd.f32 %v11973_v9, %v4650_v60  ;;  %v5484_v49 = vmul.f32 %v11865_v57, %v5451_v48 }
 0x9bf   : > { %v5235_v41 = vsub.f32 1.5, %v5234_v12  ;;  %v5064_v28 = vpop.f32.mrf.mxu3 }
 0x9c0   : > { %4694 = vst [vmem:[%s11286_s21 + $0xd0] sm:$0xff] %v4651_v8  ;;  %v4938_v1 = vpop.f32.mrf.mxu2  ;;  %v7696_v56 = vpop.eup %7695  ;;  %v5065_v26 = vadd.f32 1e-05, %v5064_v28  ;;  %v5517_v38 = vadd.f32 %v11874_v20, %v5484_v49 }
 0x9c1   : > { %v11980_v30 = vsub.f32 %v11755_v4, %v4938_v1  ;;  %v5236_v62 = vmul.f32 %v7694_v27, %v5235_v41  ;;  %v5242_v25 = vmul.f32 %v7696_v56, %v5062_v44  ;;  %vm5248_vm14 = vweird.f32 %v7696_v56 }
 0x9c2   : > { %7697 = vrsqrt.f32 %v5065_v26  ;;  %v5549_v24 = vmax.f32 %v5517_v38, 0.0  ;;  %vm5249_vm2 = vmor %vm5247_vm15, %vm5248_vm14  ;;  %vm5257_vm4 = vweird.f32 %v5065_v26 }
 0x9c3   : > { %v5006_v35 = vmul.f32 %v11980_v30, %v11980_v30  ;;  %v5243_v5 = vmul.f32 %v7696_v56, %v5242_v25  ;;  %v5240_v46 = vsel %vm5239_vm13, %v7694_v27, %v5236_v62 }
 0x9c4   : > { %5635 = vmatmul.f32.gmra.mxu0 %v5549_v24  ;;  %v5452_v4 = vmul.f32 %v5240_v46, %v11728_v17 }
 0x9c5   : > { %v5244_v37 = vmul.f32 0.5, %v5243_v5  ;;  %5114 = vmatmul.f32.gmra.mxu3 %v5006_v35 }
 0x9c6   : > { %v4653_v7 = vpop.f32.mrf.mxu0  ;;  %v5485_v15 = vmul.f32 %v11865_v57, %v5452_v4 }
 0x9c7   : > { %v4654_v63 = vadd.f32 %v11973_v9, %v4653_v7  ;;  %v5245_v16 = vsub.f32 1.5, %v5244_v37  ;;  %v5067_v40 = vpop.f32.mrf.mxu3 }
 0x9c8   : > { %v4941_v6 = vpop.f32.mrf.mxu2  ;;  %v7698_v36 = vpop.eup %7697  ;;  %v5068_v42 = vadd.f32 1e-05, %v5067_v40  ;;  %v5518_v45 = vadd.f32 %v11874_v20, %v5485_v15 }
 0x9c9   : > { %4695 = vst [vmem:[%s11286_s21 + $0xd8] sm:$0xff] %v4654_v63  ;;  %v11990_v11 = vsub.f32 %v11767_v2, %v4941_v6  ;;  %v5246_v10 = vmul.f32 %v7696_v56, %v5245_v16  ;;  %v5252_v17 = vmul.f32 %v7698_v36, %v5065_v26  ;;  %vm5258_vm3 = vweird.f32 %v7698_v36 }
 0x9ca   : > { %7699 = vrsqrt.f32 %v5068_v42  ;;  %v5550_v27 = vmax.f32 %v5518_v45, 0.0  ;;  %vm5259_vm5 = vmor %vm5257_vm4, %vm5258_vm3  ;;  %vm5267_vm7 = vweird.f32 %v5068_v42 }
 0x9cb   : > { %v5007_v54 = vmul.f32 %v11990_v11, %v11990_v11  ;;  %v5253_v29 = vmul.f32 %v7698_v36, %v5252_v17  ;;  %v5250_v13 = vsel %vm5249_vm2, %v7696_v56, %v5246_v10 }
 0x9cc   : > { %5638 = vmatmul.f32.gmra.mxu0 %v5550_v27  ;;  %v5453_v52 = vmul.f32 %v5250_v13, %v11737_v23 }
 0x9cd   : > { %v5254_v43 = vmul.f32 0.5, %v5253_v29  ;;  %5117 = vmatmul.f32.gmra.mxu3 %v5007_v54 }
 0x9ce   : > { %v5486_v2 = vmul.f32 %v11865_v57, %v5453_v52 }
 0x9cf   : > { %v5255_v50 = vsub.f32 1.5, %v5254_v43  ;;  %v5070_v44 = vpop.f32.mrf.mxu3  ;;  %v4656_v8 = vpop.f32.mrf.mxu0 }
 0x9d0   : > { %v7700_v60 = vpop.eup %7699  ;;  %v5071_v55 = vadd.f32 1e-05, %v5070_v44  ;;  %v5519_v14 = vadd.f32 %v11874_v20, %v5486_v2  ;;  %v4657_v49 = vadd.f32 %v11973_v9, %v4656_v8 }
 0x9d1   : > { %v5256_v48 = vmul.f32 %v7698_v36, %v5255_v50  ;;  %v5262_v12 = vmul.f32 %v7700_v60, %v5068_v42  ;;  %vm5268_vm6 = vweird.f32 %v7700_v60 }
 0x9d2   : > { %7701 = vrsqrt.f32 %v5071_v55  ;;  %v5551_v23 = vmax.f32 %v5519_v14, 0.0  ;;  %4696 = vst [vmem:[%s11286_s21 + $0xe0] sm:$0xff] %v4657_v49  ;;  %vm5269_vm1 = vmor %vm5267_vm7, %vm5268_vm6  ;;  %vm5277_vm9 = vweird.f32 %v5071_v55 }
 0x9d3   : > { %v5263_v41 = vmul.f32 %v7700_v60, %v5262_v12  ;;  %v5260_v1 = vsel %vm5259_vm5, %v7698_v36, %v5256_v48 }
 0x9d4   : > { %5641 = vmatmul.f32.gmra.mxu0 %v5551_v23  ;;  %v5454_v28 = vmul.f32 %v5260_v1, %v11748_v61 }
 0x9d5   : > { %v5264_v56 = vmul.f32 0.5, %v5263_v41  ;;  %v12014_v41 = vld [vmem:[#allocation14] sm:$0x7] }
 0x9d6   : > { %v5487_v38 = vmul.f32 %v11865_v57, %v5454_v28 }
 0x9d7   : > { %v5265_v62 = vsub.f32 1.5, %v5264_v56 }
 0x9d8   : > { %v7702_v25 = vpop.eup %7701  ;;  %v5073_v26 = vpop.f32.mrf.mxu3  ;;  %v5520_v24 = vadd.f32 %v11874_v20, %v5487_v38 }
 0x9d9   : > { %v4659_v35 = vpop.f32.mrf.mxu0  ;;  %v5266_v5 = vmul.f32 %v7700_v60, %v5265_v62  ;;  %v5272_v46 = vmul.f32 %v7702_v25, %v5071_v55  ;;  %v5074_v7 = vadd.f32 1e-05, %v5073_v26  ;;  %vm5278_vm8 = vweird.f32 %v7702_v25 }
 0x9da   : > { %v4660_v4 = vadd.f32 %v11973_v9, %v4659_v35  ;;  %v5552_v37 = vmax.f32 %v5520_v24, 0.0  ;;  %vm5279_vm10 = vmor %vm5277_vm9, %vm5278_vm8  ;;  %v12019_v62 = vperm.slane %v12014_v41, 0 }
 0x9db   : > { %v5273_v61 = vmul.f32 %v7702_v25, %v5272_v46  ;;  %7703 = vrsqrt.f32 %v5074_v7  ;;  %v5270_v63 = vsel %vm5269_vm1, %v7700_v60, %v5266_v5  ;;  %vm5287_vm12 = vweird.f32 %v5074_v7 }
 0x9dc   : > { %4697 = vst [vmem:[%s11286_s21 + $0xe8] sm:$0xff] %v4660_v4  ;;  %5644 = vmatmul.f32.gmra.mxu0 %v5552_v37  ;;  %v5455_v15 = vmul.f32 %v5270_v63, %v11761_v34 }
 0x9dd   : > { %v5274_v16 = vmul.f32 0.5, %v5273_v61 }
 0x9de   : > { %v5488_v6 = vmul.f32 %v11865_v57, %v5455_v15 }
 0x9df   : > { %v5275_v40 = vsub.f32 1.5, %v5274_v16 }
 0x9e0   : > { %v5076_v36 = vpop.f32.mrf.mxu3  ;;  %v5521_v45 = vadd.f32 %v11874_v20, %v5488_v6 }
 0x9e1   : > { %v4662_v42 = vpop.f32.mrf.mxu0  ;;  %v7704_v10 = vpop.eup %7703  ;;  %v5276_v17 = vmul.f32 %v7702_v25, %v5275_v40  ;;  %v5077_v54 = vadd.f32 1e-05, %v5076_v36 }
 0x9e2   : > { %v4663_v27 = vadd.f32 %v11973_v9, %v4662_v42  ;;  %v5282_v29 = vmul.f32 %v7704_v10, %v5074_v7  ;;  %v5553_v13 = vmax.f32 %v5521_v45, 0.0  ;;  %vm5288_vm11 = vweird.f32 %v7704_v10 }
 0x9e3   : > { %7705 = vrsqrt.f32 %v5077_v54  ;;  %v5280_v34 = vsel %vm5279_vm10, %v7702_v25, %v5276_v17  ;;  %vm5289_vm0 = vmor %vm5287_vm12, %vm5288_vm11  ;;  %vm5297_vm14 = vweird.f32 %v5077_v54 }
 0x9e4   : > { %4698 = vst [vmem:[%s11286_s21 + $0xf0] sm:$0xff] %v4663_v27  ;;  %v5283_v52 = vmul.f32 %v7704_v10, %v5282_v29  ;;  %5647 = vmatmul.f32.gmra.mxu0 %v5553_v13  ;;  %v5456_v43 = vmul.f32 %v5280_v34, %v11774_v33 }
 0x9e6   : > { %v5284_v2 = vmul.f32 0.5, %v5283_v52  ;;  %v5489_v50 = vmul.f32 %v11865_v57, %v5456_v43 }
 0x9e8   : > { %v5285_v44 = vsub.f32 1.5, %v5284_v2  ;;  %v5079_v60 = vpop.f32.mrf.mxu3  ;;  %v5522_v55 = vadd.f32 %v11874_v20, %v5489_v50 }
 0x9e9   : > { %v7706_v8 = vpop.eup %7705  ;;  %v5080_v14 = vadd.f32 1e-05, %v5079_v60  ;;  %v4665_v48 = vpop.f32.mrf.mxu0 }
 0x9ea   : > { %v5286_v12 = vmul.f32 %v7704_v10, %v5285_v44  ;;  %v5292_v49 = vmul.f32 %v7706_v8, %v5077_v54  ;;  %v4666_v23 = vadd.f32 %v11973_v9, %v4665_v48  ;;  %v5554_v33 = vmax.f32 %v5522_v55, 0.0 }
 0x9eb   : > { %7707 = vrsqrt.f32 %v5080_v14  ;;  %vm5298_vm13 = vweird.f32 %v7706_v8  ;;  %vm5307_vm3 = vweird.f32 %v5080_v14 }
 0x9ec   : > { %v5293_v1 = vmul.f32 %v7706_v8, %v5292_v49  ;;  %4699 = vst [vmem:[%s11286_s21 + $0xf8] sm:$0xff] %v4666_v23  ;;  %v5290_v28 = vsel %vm5289_vm0, %v7704_v10, %v5286_v12  ;;  %5650 = vmatmul.f32.gmra.mxu0 %v5554_v33  ;;  %vm5299_vm15 = vmor %vm5297_vm14, %vm5298_vm13 }
 0x9ed   : > { %v5457_v56 = vmul.f32 %v5290_v28, %v11786_v39 }
 0x9ee   : > { %v5294_v38 = vmul.f32 0.5, %v5293_v1 }
 0x9ef   : > { %v5490_v25 = vmul.f32 %v11865_v57, %v5457_v56 }
 0x9f0   : > { %v5295_v26 = vsub.f32 1.5, %v5294_v38  ;;  %v5082_v9 = vpop.f32.mrf.mxu3 }
 0x9f1   : > { %v7708_v35 = vpop.eup %7707  ;;  %v5083_v24 = vadd.f32 1e-05, %v5082_v9  ;;  %v5606_v5 = vpop.f32.mrf.mxu0  ;;  %v5523_v46 = vadd.f32 %v11874_v20, %v5490_v25 }
 0x9f2   : > { %v5296_v7 = vmul.f32 %v7706_v8, %v5295_v26  ;;  %v5302_v4 = vmul.f32 %v7708_v35, %v5080_v14  ;;  %v12024_v37 = vadd.f32 %v5606_v5, %v12019_v62  ;;  %vm5308_vm2 = vweird.f32 %v7708_v35 }
 0x9f3   : > { %7709 = vrsqrt.f32 %v5083_v24  ;;  %v5555_v39 = vmax.f32 %v5523_v46, 0.0  ;;  %vm5309_vm4 = vmor %vm5307_vm3, %vm5308_vm2  ;;  %vm5317_vm6 = vweird.f32 %v5083_v24 }
 0x9f4   : > { %v5303_v61 = vmul.f32 %v7708_v35, %v5302_v4  ;;  %5718 = vmatmul.f32.vlgmr.msrb.gmra.mxu1 %v12024_v37  ;;  %v5300_v63 = vsel %vm5299_vm15, %v7706_v8, %v5296_v7 }
 0x9f5   : > { %5653 = vmatmul.f32.gmra.mxu0 %v5555_v39  ;;  %v5458_v15 = vmul.f32 %v5300_v63, %v11803_v22 }
 0x9f6   : > { %v5304_v16 = vmul.f32 0.5, %v5303_v61 }
 0x9f7   : > { %v5491_v6 = vmul.f32 %v11865_v57, %v5458_v15 }
 0x9f8   : > { %v5305_v40 = vsub.f32 1.5, %v5304_v16  ;;  %v5085_v36 = vpop.f32.mrf.mxu3 }
 0x9f9   : > { %v7710_v42 = vpop.eup %7709  ;;  %v5086_v45 = vadd.f32 1e-05, %v5085_v36  ;;  %v5609_v10 = vpop.f32.mrf.mxu0  ;;  %v5524_v17 = vadd.f32 %v11874_v20, %v5491_v6 }
 0x9fa   : > { %v5306_v54 = vmul.f32 %v7708_v35, %v5305_v40  ;;  %v5312_v27 = vmul.f32 %v7710_v42, %v5083_v24  ;;  %v12031_v29 = vadd.f32 %v5609_v10, %v12019_v62  ;;  %vm5318_vm5 = vweird.f32 %v7710_v42 }
 0x9fb   : > { %7711 = vrsqrt.f32 %v5086_v45  ;;  %v5556_v22 = vmax.f32 %v5524_v17, 0.0  ;;  %vm5319_vm7 = vmor %vm5317_vm6, %vm5318_vm5  ;;  %vm5327_vm8 = vweird.f32 %v5086_v45 }
 0x9fc   : > { %v5313_v13 = vmul.f32 %v7710_v42, %v5312_v27  ;;  %5721 = vmatmul.f32.gmra.mxu1 %v12031_v29  ;;  %v5310_v34 = vsel %vm5309_vm4, %v7708_v35, %v5306_v54 }
 0x9fd   : > { %5656 = vmatmul.f32.gmra.mxu0 %v5556_v22  ;;  %v5459_v52 = vmul.f32 %v5310_v34, %v11829_v3  ;;  %v6457_v3 = vld [vmem:[%s13140_s18 + $0x78] sm:$0xff] }
 0x9fe   : > { %v5314_v43 = vmul.f32 0.5, %v5313_v13  ;;  %6462 = vmatpush.msrb.mxu3 %v6457_v3 }
 0x9ff   : > { %v5492_v2 = vmul.f32 %v11865_v57, %v5459_v52 }
 0xa00   : > { %v5315_v50 = vsub.f32 1.5, %v5314_v43  ;;  %v5088_v44 = vpop.f32.mrf.mxu3 }
 0xa01   : > { %v7712_v60 = vpop.eup %7711  ;;  %v5089_v55 = vadd.f32 1e-05, %v5088_v44  ;;  %v5612_v8 = vpop.f32.mrf.mxu0  ;;  %v5525_v14 = vadd.f32 %v11874_v20, %v5492_v2 }
 0xa02   : > { %v5316_v48 = vmul.f32 %v7710_v42, %v5315_v50  ;;  %v5322_v12 = vmul.f32 %v7712_v60, %v5086_v45  ;;  %v12038_v49 = vadd.f32 %v5612_v8, %v12019_v62  ;;  %vm5328_vm1 = vweird.f32 %v7712_v60 }
 0xa03   : > { %7713 = vrsqrt.f32 %v5089_v55  ;;  %v5557_v23 = vmax.f32 %v5525_v14, 0.0  ;;  %vm5329_vm9 = vmor %vm5327_vm8, %vm5328_vm1  ;;  %vm5337_vm11 = vweird.f32 %v5089_v55 }
 0xa04   : > { %v5323_v33 = vmul.f32 %v7712_v60, %v5322_v12  ;;  %5724 = vmatmul.f32.gmra.mxu1 %v12038_v49  ;;  %v5320_v1 = vsel %vm5319_vm7, %v7710_v42, %v5316_v48 }
 0xa05   : > { %5659 = vmatmul.f32.gmra.mxu0 %v5557_v23  ;;  %v5460_v28 = vmul.f32 %v5320_v1, %v11855_v59 }
 0xa06   : > { %v5324_v56 = vmul.f32 0.5, %v5323_v33 }
 0xa07   : > { %v5493_v38 = vmul.f32 %v11865_v57, %v5460_v28 }
 0xa08   : > { %v5325_v25 = vsub.f32 1.5, %v5324_v56  ;;  %v5091_v26 = vpop.f32.mrf.mxu3 }
 0xa09   : > { %v7714_v9 = vpop.eup %7713  ;;  %v5092_v35 = vadd.f32 1e-05, %v5091_v26  ;;  %v5615_v24 = vpop.f32.mrf.mxu0  ;;  %v5526_v5 = vadd.f32 %v11874_v20, %v5493_v38 }
 0xa0a   : > { %v5326_v46 = vmul.f32 %v7712_v60, %v5325_v25  ;;  %v5332_v7 = vmul.f32 %v7714_v9, %v5089_v55  ;;  %v12048_v4 = vadd.f32 %v5615_v24, %v12019_v62  ;;  %vm5338_vm10 = vweird.f32 %v7714_v9 }
 0xa0b   : > { %7715 = vrsqrt.f32 %v5092_v35  ;;  %v5558_v59 = vmax.f32 %v5526_v5, 0.0  ;;  %vm5339_vm12 = vmor %vm5337_vm11, %vm5338_vm10  ;;  %vm5347_vm13 = vweird.f32 %v5092_v35 }
 0xa0c   : > { %v5333_v39 = vmul.f32 %v7714_v9, %v5332_v7  ;;  %5727 = vmatmul.f32.gmra.mxu1 %v12048_v4  ;;  %v5330_v61 = vsel %vm5329_vm9, %v7712_v60, %v5326_v46 }
 0xa0d   : > { %5662 = vmatmul.f32.gmra.mxu0 %v5558_v59  ;;  %v5461_v63 = vmul.f32 %v5330_v61, %v11886_v53  ;;  %v6456_v53 = vld [vmem:[%s13140_s18 + $0x70] sm:$0xff] }
 0xa0e   : > { %v5334_v15 = vmul.f32 0.5, %v5333_v39  ;;  %6463 = vmatpush.msrb.mxu3 %v6456_v53 }
 0xa0f   : > { %v5494_v16 = vmul.f32 %v11865_v57, %v5461_v63 }
 0xa10   : > { %v5335_v6 = vsub.f32 1.5, %v5334_v15  ;;  %v5094_v40 = vpop.f32.mrf.mxu3 }
 0xa11   : > { %v7716_v36 = vpop.eup %7715  ;;  %v5095_v42 = vadd.f32 1e-05, %v5094_v40  ;;  %v5618_v45 = vpop.f32.mrf.mxu0  ;;  %v5527_v10 = vadd.f32 %v11874_v20, %v5494_v16 }
 0xa12   : > { %v5336_v17 = vmul.f32 %v7714_v9, %v5335_v6  ;;  %v5342_v54 = vmul.f32 %v7716_v36, %v5092_v35  ;;  %v12055_v27 = vadd.f32 %v5618_v45, %v12019_v62  ;;  %vm5348_vm0 = vweird.f32 %v7716_v36 }
 0xa13   : > { %7717 = vrsqrt.f32 %v5095_v42  ;;  %v5559_v22 = vmax.f32 %v5527_v10, 0.0  ;;  %vm5349_vm14 = vmor %vm5347_vm13, %vm5348_vm0  ;;  %vm5357_vm2 = vweird.f32 %v5095_v42 }
 0xa14   : > { %v5343_v13 = vmul.f32 %v7716_v36, %v5342_v54  ;;  %5730 = vmatmul.f32.gmra.mxu1 %v12055_v27  ;;  %v5340_v34 = vsel %vm5339_vm12, %v7714_v9, %v5336_v17 }
 0xa15   : > { %5665 = vmatmul.f32.gmra.mxu0 %v5559_v22  ;;  %v5462_v52 = vmul.f32 %v5340_v34, %v11903_v18 }
 0xa16   : > { %v5344_v43 = vmul.f32 0.5, %v5343_v13 }
 0xa17   : > { %v5495_v2 = vmul.f32 %v11865_v57, %v5462_v52 }
 0xa18   : > { %v5345_v50 = vsub.f32 1.5, %v5344_v43  ;;  %v5097_v44 = vpop.f32.mrf.mxu3 }
 0xa19   : > { %v7718_v60 = vpop.eup %7717  ;;  %v5098_v55 = vadd.f32 1e-05, %v5097_v44  ;;  %v5621_v8 = vpop.f32.mrf.mxu0  ;;  %v5528_v14 = vadd.f32 %v11874_v20, %v5495_v2 }
 0xa1a   : > { %v5346_v48 = vmul.f32 %v7716_v36, %v5345_v50  ;;  %v5352_v12 = vmul.f32 %v7718_v60, %v5095_v42  ;;  %v12065_v3 = vadd.f32 %v5621_v8, %v12019_v62  ;;  %vm5358_vm15 = vweird.f32 %v7718_v60 }
 0xa1b   : > { %7719 = vrsqrt.f32 %v5098_v55  ;;  %v5560_v18 = vmax.f32 %v5528_v14, 0.0  ;;  %vm5359_vm3 = vmor %vm5357_vm2, %vm5358_vm15  ;;  %vm5367_vm5 = vweird.f32 %v5098_v55 }
 0xa1c   : > { %v5353_v23 = vmul.f32 %v7718_v60, %v5352_v12  ;;  %5733 = vmatmul.f32.gmra.mxu1 %v12065_v3  ;;  %v5350_v33 = vsel %vm5349_vm14, %v7716_v36, %v5346_v48 }
 0xa1d   : > { %5668 = vmatmul.f32.gmra.mxu0 %v5560_v18  ;;  %v5463_v1 = vmul.f32 %v5350_v33, %v11912_v47  ;;  %v6455_v47 = vld [vmem:[%s13140_s18 + $0x68] sm:$0xff] }
 0xa1e   : > { %v5354_v28 = vmul.f32 0.5, %v5353_v23  ;;  %6464 = vmatpush.msrb.mxu3 %v6455_v47 }
 0xa1f   : > { %v5496_v56 = vmul.f32 %v11865_v57, %v5463_v1 }
 0xa20   : > { %v5355_v38 = vsub.f32 1.5, %v5354_v28  ;;  %v5100_v25 = vpop.f32.mrf.mxu3 }
 0xa21   : > { %v7720_v26 = vpop.eup %7719  ;;  %v5101_v9 = vadd.f32 1e-05, %v5100_v25  ;;  %v5624_v35 = vpop.f32.mrf.mxu0  ;;  %v5529_v24 = vadd.f32 %v11874_v20, %v5496_v56 }
 0xa22   : > { %v5356_v5 = vmul.f32 %v7718_v60, %v5355_v38  ;;  %v5362_v46 = vmul.f32 %v7720_v26, %v5098_v55  ;;  %v12072_v7 = vadd.f32 %v5624_v35, %v12019_v62  ;;  %vm5368_vm4 = vweird.f32 %v7720_v26 }
 0xa23   : > { %7721 = vrsqrt.f32 %v5101_v9  ;;  %v5561_v59 = vmax.f32 %v5529_v24, 0.0  ;;  %vm5369_vm6 = vmor %vm5367_vm5, %vm5368_vm4  ;;  %vm5377_vm1 = vweird.f32 %v5101_v9 }
 0xa24   : > { %v5363_v39 = vmul.f32 %v7720_v26, %v5362_v46  ;;  %5736 = vmatmul.f32.gmra.mxu1 %v12072_v7  ;;  %v5360_v61 = vsel %vm5359_vm3, %v7718_v60, %v5356_v5 }
 0xa25   : > { %5671 = vmatmul.f32.gmra.mxu0 %v5561_v59  ;;  %v5464_v63 = vmul.f32 %v5360_v61, %v11920_v21 }
 0xa26   : > { %v5364_v15 = vmul.f32 0.5, %v5363_v39 }
 0xa27   : > { %v5497_v16 = vmul.f32 %v11865_v57, %v5464_v63 }
 0xa28   : > { %v5365_v6 = vsub.f32 1.5, %v5364_v15  ;;  %v5103_v40 = vpop.f32.mrf.mxu3 }
 0xa29   : > { %v7722_v36 = vpop.eup %7721  ;;  %v5104_v42 = vadd.f32 1e-05, %v5103_v40  ;;  %v5627_v45 = vpop.f32.mrf.mxu0  ;;  %v5530_v10 = vadd.f32 %v11874_v20, %v5497_v16 }
 0xa2a   : > { %v5366_v17 = vmul.f32 %v7720_v26, %v5365_v6  ;;  %v5372_v54 = vmul.f32 %v7722_v36, %v5101_v9  ;;  %v12082_v53 = vadd.f32 %v5627_v45, %v12019_v62  ;;  %vm5378_vm7 = vweird.f32 %v7722_v36 }
 0xa2b   : > { %7723 = vrsqrt.f32 %v5104_v42  ;;  %v5562_v21 = vmax.f32 %v5530_v10, 0.0  ;;  %vm5379_vm8 = vmor %vm5377_vm1, %vm5378_vm7  ;;  %vm5387_vm10 = vweird.f32 %v5104_v42 }
 0xa2c   : > { %v5373_v22 = vmul.f32 %v7722_v36, %v5372_v54  ;;  %5739 = vmatmul.f32.gmra.mxu1 %v12082_v53  ;;  %v5370_v13 = vsel %vm5369_vm6, %v7720_v26, %v5366_v17 }
 0xa2d   : > { %5674 = vmatmul.f32.gmra.mxu0 %v5562_v21  ;;  %v5465_v34 = vmul.f32 %v5370_v13, %v11928_v31  ;;  %v6454_v31 = vld [vmem:[%s13140_s18 + $0x60] sm:$0xff] }
 0xa2e   : > { %v5374_v52 = vmul.f32 0.5, %v5373_v22  ;;  %6465 = vmatpush.msrb.mxu3 %v6454_v31 }
 0xa2f   : > { %v5498_v43 = vmul.f32 %v11865_v57, %v5465_v34 }
 0xa30   : > { %v5375_v2 = vsub.f32 1.5, %v5374_v52  ;;  %v5106_v50 = vpop.f32.mrf.mxu3  ;;  %v6452_v52 = vld [vmem:[%s13140_s18 + $0x50] sm:$0xff] }
 0xa31   : > { %v7724_v44 = vpop.eup %7723  ;;  %v5107_v60 = vadd.f32 1e-05, %v5106_v50  ;;  %v5630_v55 = vpop.f32.mrf.mxu0  ;;  %v5531_v8 = vadd.f32 %v11874_v20, %v5498_v43 }
 0xa32   : > { %v5376_v14 = vmul.f32 %v7722_v36, %v5375_v2  ;;  %v5382_v48 = vmul.f32 %v7724_v44, %v5104_v42  ;;  %v12089_v12 = vadd.f32 %v5630_v55, %v12019_v62  ;;  %vm5388_vm9 = vweird.f32 %v7724_v44 }
 0xa33   : > { %7725 = vrsqrt.f32 %v5107_v60  ;;  %v5563_v18 = vmax.f32 %v5531_v8, 0.0  ;;  %vm5389_vm11 = vmor %vm5387_vm10, %vm5388_vm9  ;;  %vm5397_vm0 = vweird.f32 %v5107_v60 }
 0xa34   : > { %v5383_v23 = vmul.f32 %v7724_v44, %v5382_v48  ;;  %5742 = vmatmul.f32.gmra.mxu1 %v12089_v12  ;;  %v5380_v33 = vsel %vm5379_vm8, %v7722_v36, %v5376_v14 }
 0xa35   : > { %5677 = vmatmul.f32.gmra.mxu0 %v5563_v18  ;;  %v5466_v1 = vmul.f32 %v5380_v33, %v11936_v58 }
 0xa36   : > { %v5384_v28 = vmul.f32 0.5, %v5383_v23 }
 0xa37   : > { %v5499_v56 = vmul.f32 %v11865_v57, %v5466_v1 }
 0xa38   : > { %v5385_v38 = vsub.f32 1.5, %v5384_v28  ;;  %v5109_v25 = vpop.f32.mrf.mxu3 }
 0xa39   : > { %v7726_v26 = vpop.eup %7725  ;;  %v5110_v9 = vadd.f32 1e-05, %v5109_v25  ;;  %v5633_v35 = vpop.f32.mrf.mxu0  ;;  %v5532_v24 = vadd.f32 %v11874_v20, %v5499_v56 }
 0xa3a   : > { %v5386_v5 = vmul.f32 %v7724_v44, %v5385_v38  ;;  %v5392_v46 = vmul.f32 %v7726_v26, %v5107_v60  ;;  %v12099_v47 = vadd.f32 %v5633_v35, %v12019_v62  ;;  %vm5398_vm12 = vweird.f32 %v7726_v26 }
 0xa3b   : > { %7727 = vrsqrt.f32 %v5110_v9  ;;  %v5564_v58 = vmax.f32 %v5532_v24, 0.0  ;;  %vm5399_vm13 = vmor %vm5397_vm0, %vm5398_vm12  ;;  %vm5407_vm15 = vweird.f32 %v5110_v9 }
 0xa3c   : > { %v5393_v59 = vmul.f32 %v7726_v26, %v5392_v46  ;;  %5745 = vmatmul.f32.gmra.mxu1 %v12099_v47  ;;  %v5390_v39 = vsel %vm5389_vm11, %v7724_v44, %v5386_v5 }
 0xa3d   : > { %5680 = vmatmul.f32.gmra.mxu0 %v5564_v58  ;;  %v5467_v61 = vmul.f32 %v5390_v39, %v11944_v51  ;;  %v6453_v51 = vld [vmem:[%s13140_s18 + $0x58] sm:$0xff] }
 0xa3e   : > { %v5394_v63 = vmul.f32 0.5, %v5393_v59  ;;  %6466 = vmatpush.msrb.mxu3 %v6453_v51 }
 0xa3f   : > { %v5500_v15 = vmul.f32 %v11865_v57, %v5467_v61 }
 0xa40   : > { %v5395_v16 = vsub.f32 1.5, %v5394_v63  ;;  %v5112_v6 = vpop.f32.mrf.mxu3  ;;  %6467 = vmatpush.msrb.mxu3 %v6452_v52 }
 0xa41   : > { %v7728_v40 = vpop.eup %7727  ;;  %v5113_v36 = vadd.f32 1e-05, %v5112_v6  ;;  %v5636_v42 = vpop.f32.mrf.mxu0  ;;  %v5533_v45 = vadd.f32 %v11874_v20, %v5500_v15  ;;  %v6451_v15 = vld [vmem:[%s13140_s18 + $0x48] sm:$0xff] }
 0xa42   : > { %v5396_v10 = vmul.f32 %v7726_v26, %v5395_v16  ;;  %v5402_v17 = vmul.f32 %v7728_v40, %v5110_v9  ;;  %v12106_v54 = vadd.f32 %v5636_v42, %v12019_v62  ;;  %vm5408_vm14 = vweird.f32 %v7728_v40  ;;  %6468 = vmatpush.msrb.mxu3 %v6451_v15 }
 0xa43   : > { %7729 = vrsqrt.f32 %v5113_v36  ;;  %v5565_v21 = vmax.f32 %v5533_v45, 0.0  ;;  %vm5409_vm2 = vmor %vm5407_vm15, %vm5408_vm14  ;;  %vm5417_vm4 = vweird.f32 %v5113_v36 }
 0xa44   : > { %v5403_v22 = vmul.f32 %v7728_v40, %v5402_v17  ;;  %5748 = vmatmul.f32.gmra.mxu1 %v12106_v54  ;;  %v5400_v13 = vsel %vm5399_vm13, %v7726_v26, %v5396_v10 }
 0xa45   : > { %5683 = vmatmul.f32.gmra.mxu0 %v5565_v21  ;;  %v5468_v34 = vmul.f32 %v5400_v13, %v11952_v0 }
 0xa46   : > { %v5404_v43 = vmul.f32 0.5, %v5403_v22 }
 0xa47   : > { %v5501_v2 = vmul.f32 %v11865_v57, %v5468_v34 }
 0xa48   : > { %v5405_v50 = vsub.f32 1.5, %v5404_v43  ;;  %v5115_v44 = vpop.f32.mrf.mxu3 }
 0xa49   : > { %v7730_v60 = vpop.eup %7729  ;;  %v5116_v55 = vadd.f32 1e-05, %v5115_v44  ;;  %v5639_v8 = vpop.f32.mrf.mxu0  ;;  %v5534_v14 = vadd.f32 %v11874_v20, %v5501_v2 }
 0xa4a   : > { %v5406_v48 = vmul.f32 %v7728_v40, %v5405_v50  ;;  %v5412_v31 = vmul.f32 %v7730_v60, %v5113_v36  ;;  %v12119_v0 = vadd.f32 %v5639_v8, %v12019_v62  ;;  %vm5418_vm3 = vweird.f32 %v7730_v60  ;;  %v6450_v8 = vld [vmem:[%s13140_s18 + $0x40] sm:$0xff] }
 0xa4b   : > { %7731 = vrsqrt.f32 %v5116_v55  ;;  %v5566_v18 = vmax.f32 %v5534_v14, 0.0  ;;  %vm5419_vm5 = vmor %vm5417_vm4, %vm5418_vm3  ;;  %vm5427_vm7 = vweird.f32 %v5116_v55  ;;  %6469 = vmatpush.msrb.mxu3 %v6450_v8  ;;  %v6445_v8 = vld [vmem:[%s13140_s18 + $0x18] sm:$0xff] }
 0xa4c   : > { %v5413_v23 = vmul.f32 %v7730_v60, %v5412_v31  ;;  %5751 = vmatmul.f32.gmra.mxu1 %v12119_v0  ;;  %v5410_v33 = vsel %vm5409_vm2, %v7728_v40, %v5406_v48 }
 0xa4d   : > { %5686 = vmatmul.f32.gmra.mxu0 %v5566_v18  ;;  %v5469_v1 = vmul.f32 %v5410_v33, %v11960_v19 }
 0xa4e   : > { %v5414_v28 = vmul.f32 0.5, %v5413_v23 }
 0xa4f   : > { %v5502_v56 = vmul.f32 %v11865_v57, %v5469_v1 }
 0xa50   : > { %v5415_v38 = vsub.f32 1.5, %v5414_v28  ;;  %v5118_v25 = vpop.f32.mrf.mxu3 }
 0xa51   : > { %v7732_v26 = vpop.eup %7731  ;;  %v5119_v9 = vadd.f32 1e-05, %v5118_v25  ;;  %v5642_v35 = vpop.f32.mrf.mxu0  ;;  %v5535_v24 = vadd.f32 %v11874_v20, %v5502_v56 }
 0xa52   : > { %v5416_v5 = vmul.f32 %v7730_v60, %v5415_v38  ;;  %v5422_v46 = vmul.f32 %v7732_v26, %v5116_v55  ;;  %v12126_v58 = vadd.f32 %v5642_v35, %v12019_v62  ;;  %vm5428_vm6 = vweird.f32 %v7732_v26 }
 0xa53   : > { %7733 = vrsqrt.f32 %v5119_v9  ;;  %v5567_v19 = vmax.f32 %v5535_v24, 0.0  ;;  %vm5429_vm1 = vmor %vm5427_vm7, %vm5428_vm6  ;;  %vm5437_vm9 = vweird.f32 %v5119_v9 }
 0xa54   : > { %v5423_v59 = vmul.f32 %v7732_v26, %v5422_v46  ;;  %5754 = vmatmul.f32.gmra.mxu1 %v12126_v58  ;;  %v5420_v39 = vsel %vm5419_vm5, %v7730_v60, %v5416_v5  ;;  %v6448_v46 = vld [vmem:[%s13140_s18 + $0x30] sm:$0xff] }
 0xa55   : > { %5689 = vmatmul.f32.gmra.mxu0 %v5567_v19  ;;  %v5470_v61 = vmul.f32 %v5420_v39, %v11968_v32 }
 0xa56   : > { %v5424_v63 = vmul.f32 0.5, %v5423_v59 }
 0xa57   : > { %v5503_v16 = vmul.f32 %v11865_v57, %v5470_v61 }
 0xa58   : > { %v5425_v6 = vsub.f32 1.5, %v5424_v63 }
 0xa59   : > { %v7734_v40 = vpop.eup %7733  ;;  %v5645_v36 = vpop.f32.mrf.mxu0  ;;  %v5536_v42 = vadd.f32 %v11874_v20, %v5503_v16 }
 0xa5a   : > { %v5426_v45 = vmul.f32 %v7732_v26, %v5425_v6  ;;  %v5432_v10 = vmul.f32 %v7734_v40, %v5119_v9  ;;  %v12136_v17 = vadd.f32 %v5645_v36, %v12019_v62  ;;  %vm5438_vm8 = vweird.f32 %v7734_v40 }
 0xa5b   : > { %v5568_v32 = vmax.f32 %v5536_v42, 0.0  ;;  %vm5439_vm10 = vmor %vm5437_vm9, %vm5438_vm8 }
 0xa5c   : > { %v5433_v51 = vmul.f32 %v7734_v40, %v5432_v10  ;;  %5757 = vmatmul.f32.gmra.mxu1 %v12136_v17  ;;  %v5430_v21 = vsel %vm5429_vm1, %v7732_v26, %v5426_v45 }
 0xa5d   : > { %5692 = vmatmul.f32.gmra.mxu0 %v5568_v32  ;;  %v5471_v22 = vmul.f32 %v5430_v21, %v11980_v30 }
 0xa5e   : > { %v5434_v13 = vmul.f32 0.5, %v5433_v51 }
 0xa5f   : > { %v5504_v34 = vmul.f32 %v11865_v57, %v5471_v22 }
 0xa60   : > { %v5435_v52 = vsub.f32 1.5, %v5434_v13  ;;  %v6446_v13 = vld [vmem:[%s13140_s18 + $0x20] sm:$0xff] }
 0xa61   : > { %v5648_v43 = vpop.f32.mrf.mxu0  ;;  %v5537_v2 = vadd.f32 %v11874_v20, %v5504_v34 }
 0xa62   : > { %v5436_v50 = vmul.f32 %v7734_v40, %v5435_v52  ;;  %v12143_v44 = vadd.f32 %v5648_v43, %v12019_v62 }
 0xa63   : > { %v5569_v60 = vmax.f32 %v5537_v2, 0.0 }
 0xa64   : > { %5760 = vmatmul.f32.gmra.mxu1 %v12143_v44  ;;  %v5440_v55 = vsel %vm5439_vm10, %v7734_v40, %v5436_v50  ;;  %v6447_v40 = vld [vmem:[%s13140_s18 + $0x28] sm:$0xff] }
 0xa65   : > { %5695 = vmatmul.f32.gmra.mxu0 %v5569_v60  ;;  %v5472_v30 = vmul.f32 %v5440_v55, %v11990_v11 }
 0xa67   : > { %v5505_v14 = vmul.f32 %v11865_v57, %v5472_v30 }
 0xa69   : > { %v5538_v48 = vadd.f32 %v11874_v20, %v5505_v14  ;;  %v5651_v31 = vpop.f32.mrf.mxu0  ;;  %v6449_v20 = vld [vmem:[%s13140_s18 + $0x38] sm:$0xff] }
 0xa6a   : > { %v12153_v18 = vadd.f32 %v5651_v31, %v12019_v62  ;;  %6470 = vmatpush.msrb.mxu3 %v6449_v20 }
 0xa6b   : > { %v5570_v23 = vmax.f32 %v5538_v48, 0.0 }
 0xa6c   : > { %5763 = vmatmul.f32.gmra.mxu1 %v12153_v18  ;;  %6471 = vmatpush.msrb.mxu3 %v6448_v46 }
 0xa6d   : > { %5698 = vmatmul.f32.gmra.mxu0 %v5570_v23 }
 0xa6e   : > { %6472 = vmatpush.msrb.mxu3 %v6447_v40 }
 0xa70   : > { %6473 = vmatpush.msrb.mxu3 %v6446_v13 }
 0xa71   : > { %v5719_v33 = vpop.f32.mrf.mxu1 }
 0xa72   : > { %v5654_v1 = vpop.f32.mrf.mxu0  ;;  %v12157_v11 = vsub.f32 %v12024_v37, %v5719_v33  ;;  %6474 = vmatpush.msrb.mxu3 %v6445_v8 }
 0xa73   : > { %v12160_v28 = vadd.f32 %v5654_v1, %v12019_v62 }
 0xa74   : > { %v5847_v57 = vmul.f32 %v12157_v11, %v12157_v11 }
 0xa75   : > { %5766 = vmatmul.f32.gmra.mxu1 %v12160_v28 }
 0xa76   : > { %5895 = vmatmul.f32.vlgmr.msra.gmra.mxu0 %v5847_v57 }
 0xa79   : > { %v5722_v56 = vpop.f32.mrf.mxu1 }
 0xa7a   : > { %v5657_v38 = vpop.f32.mrf.mxu0  ;;  %v12169_v25 = vsub.f32 %v12031_v29, %v5722_v56  ;;  %v6444_v56 = vld [vmem:[%s13140_s18 + $0x10] sm:$0xff] }
 0xa7b   : > { %v12172_v37 = vadd.f32 %v5657_v38, %v12019_v62  ;;  %6475 = vmatpush.msrb.mxu3 %v6444_v56 }
 0xa7c   : > { %v5848_v26 = vmul.f32 %v12169_v25, %v12169_v25 }
 0xa7d   : > { %5769 = vmatmul.f32.gmra.mxu1 %v12172_v37 }
 0xa7e   : > { %5898 = vmatmul.f32.vlgmr.msrb.gmra.mxu2 %v5848_v26 }
 0xa81   : > { %v5725_v9 = vpop.f32.mrf.mxu1 }
 0xa82   : > { %v5660_v35 = vpop.f32.mrf.mxu0  ;;  %v12178_v24 = vsub.f32 %v12038_v49, %v5725_v9 }
 0xa83   : > { %v12181_v5 = vadd.f32 %v5660_v35, %v12019_v62 }
 0xa84   : > { %v5849_v29 = vmul.f32 %v12178_v24, %v12178_v24 }
 0xa85   : > { %5772 = vmatmul.f32.gmra.mxu1 %v12181_v5 }
 0xa86   : > { %5901 = vmatmul.f32.gmra.mxu2 %v5849_v29 }
 0xa89   : > { %v5728_v19 = vpop.f32.mrf.mxu1 }
 0xa8a   : > { %v5663_v59 = vpop.f32.mrf.mxu0  ;;  %v12190_v39 = vsub.f32 %v12048_v4, %v5728_v19 }
 0xa8b   : > { %v12193_v49 = vadd.f32 %v5663_v59, %v12019_v62 }
 0xa8c   : > { %v5850_v61 = vmul.f32 %v12190_v39, %v12190_v39 }
 0xa8d   : > { %5775 = vmatmul.f32.gmra.mxu1 %v12193_v49 }
 0xa8e   : > { %5904 = vmatmul.f32.gmra.mxu2 %v5850_v61 }
 0xa91   : > { %v5731_v63 = vpop.f32.mrf.mxu1 }
 0xa92   : > { %v5666_v15 = vpop.f32.mrf.mxu0  ;;  %v12199_v16 = vsub.f32 %v12055_v27, %v5731_v63 }
 0xa93   : > { %v12202_v6 = vadd.f32 %v5666_v15, %v12019_v62 }
 0xa94   : > { %v5851_v4 = vmul.f32 %v12199_v16, %v12199_v16 }
 0xa95   : > { %5778 = vmatmul.f32.gmra.mxu1 %v12202_v6 }
 0xa96   : > { %5907 = vmatmul.f32.gmra.mxu2 %v5851_v4 }
 0xa99   : > { %v5734_v36 = vpop.f32.mrf.mxu1 }
 0xa9a   : > { %v5669_v42 = vpop.f32.mrf.mxu0  ;;  %v12211_v45 = vsub.f32 %v12065_v3, %v5734_v36 }
 0xa9b   : > { %v12214_v27 = vadd.f32 %v5669_v42, %v12019_v62 }
 0xa9c   : > { %v5852_v10 = vmul.f32 %v12211_v45, %v12211_v45 }
 0xa9d   : > { %5781 = vmatmul.f32.gmra.mxu1 %v12214_v27 }
 0xa9e   : > { %5910 = vmatmul.f32.gmra.mxu2 %v5852_v10 }
 0xaa1   : > { %v5737_v32 = vpop.f32.mrf.mxu1 }
 0xaa2   : > { %v5672_v51 = vpop.f32.mrf.mxu0  ;;  %v12220_v21 = vsub.f32 %v12072_v7, %v5737_v32 }
 0xaa3   : > { %v12223_v22 = vadd.f32 %v5672_v51, %v12019_v62 }
 0xaa4   : > { %v5853_v3 = vmul.f32 %v12220_v21, %v12220_v21 }
 0xaa5   : > { %5784 = vmatmul.f32.gmra.mxu1 %v12223_v22 }
 0xaa6   : > { %5913 = vmatmul.f32.gmra.mxu2 %v5853_v3  ;;  %v6443_v3 = vld [vmem:[%s13140_s18 + $0x8] sm:$0xff] }
 0xaa7   : > { %6476 = vmatpush.msrb.mxu3 %v6443_v3 }
 0xaa9   : > { %v5740_v34 = vpop.f32.mrf.mxu1 }
 0xaaa   : > { %v5675_v52 = vpop.f32.mrf.mxu0  ;;  %v12232_v43 = vsub.f32 %v12082_v53, %v5740_v34 }
 0xaab   : > { %v12235_v7 = vadd.f32 %v5675_v52, %v12019_v62  ;;  %v6442_v52 = vld [vmem:[%s13140_s18] sm:$0xff] }
 0xaac   : > { %v5854_v2 = vmul.f32 %v12232_v43, %v12232_v43  ;;  %6477 = vmatpush.msrb.mxu3 %v6442_v52 }
 0xaad   : > { %5787 = vmatmul.f32.gmra.mxu1 %v12235_v7 }
 0xaae   : > { %5916 = vmatmul.f32.gmra.mxu2 %v5854_v2 }
 0xab1   : > { %v5743_v50 = vpop.f32.mrf.mxu1 }
 0xab2   : > { %v5678_v60 = vpop.f32.mrf.mxu0  ;;  %v12241_v55 = vsub.f32 %v12089_v12, %v5743_v50 }
 0xab3   : > { %v12244_v30 = vadd.f32 %v5678_v60, %v12019_v62 }
 0xab4   : > { %v5855_v53 = vmul.f32 %v12241_v55, %v12241_v55 }
 0xab5   : > { %5790 = vmatmul.f32.gmra.mxu1 %v12244_v30 }
 0xab6   : > { %5919 = vmatmul.f32.gmra.mxu2 %v5855_v53 }
 0xab9   : > { %v5746_v14 = vpop.f32.mrf.mxu1 }
 0xaba   : > { %v5681_v48 = vpop.f32.mrf.mxu0  ;;  %v12253_v31 = vsub.f32 %v12099_v47, %v5746_v14 }
 0xabb   : > { %v12256_v12 = vadd.f32 %v5681_v48, %v12019_v62 }
 0xabc   : > { %v5856_v23 = vmul.f32 %v12253_v31, %v12253_v31 }
 0xabd   : > { %5793 = vmatmul.f32.gmra.mxu1 %v12256_v12 }
 0xabe   : > { %5922 = vmatmul.f32.gmra.mxu2 %v5856_v23 }
 0xac1   : > { %v5749_v33 = vpop.f32.mrf.mxu1 }
 0xac2   : > { %v5684_v1 = vpop.f32.mrf.mxu0  ;;  %v12262_v57 = vsub.f32 %v12106_v54, %v5749_v33 }
 0xac3   : > { %v12265_v20 = vadd.f32 %v5684_v1, %v12019_v62 }
 0xac4   : > { %v5857_v47 = vmul.f32 %v12262_v57, %v12262_v57 }
 0xac5   : > { %5796 = vmatmul.f32.gmra.mxu1 %v12265_v20 }
 0xac6   : > { %5925 = vmatmul.f32.gmra.mxu2 %v5857_v47 }
 0xac9   : > { %v5752_v38 = vpop.f32.mrf.mxu1 }
 0xaca   : > { %v5687_v26 = vpop.f32.mrf.mxu0  ;;  %v12274_v9 = vsub.f32 %v12119_v0, %v5752_v38 }
 0xacb   : > { %v12277_v54 = vadd.f32 %v5687_v26, %v12019_v62 }
 0xacc   : > { %v5858_v35 = vmul.f32 %v12274_v9, %v12274_v9 }
 0xacd   : > { %5799 = vmatmul.f32.gmra.mxu1 %v12277_v54 }
 0xace   : > { %5928 = vmatmul.f32.gmra.mxu2 %v5858_v35 }
 0xad1   : > { %v5755_v29 = vpop.f32.mrf.mxu1 }
 0xad2   : > { %v5690_v46 = vpop.f32.mrf.mxu0  ;;  %v12283_v19 = vsub.f32 %v12126_v58, %v5755_v29  ;;  %v12340_v29 = vperm.slane %v12014_v41, 1 }
 0xad3   : > { %v12286_v59 = vadd.f32 %v5690_v46, %v12019_v62 }
 0xad4   : > { %v5859_v0 = vmul.f32 %v12283_v19, %v12283_v19 }
 0xad5   : > { %5802 = vmatmul.f32.gmra.mxu1 %v12286_v59 }
 0xad6   : > { %5931 = vmatmul.f32.gmra.mxu2 %v5859_v0 }
 0xad9   : > { %v5758_v61 = vpop.f32.mrf.mxu1 }
 0xada   : > { %v5693_v63 = vpop.f32.mrf.mxu0  ;;  %v12292_v15 = vsub.f32 %v12136_v17, %v5758_v61  ;;  %v12344_v61 = vperm.slane %v12014_v41, 2 }
 0xadb   : > { %v12295_v4 = vadd.f32 %v5693_v63, %v12019_v62 }
 0xadc   : > { %v5860_v58 = vmul.f32 %v12292_v15, %v12292_v15 }
 0xadd   : > { %5805 = vmatmul.f32.gmra.mxu1 %v12295_v4 }
 0xade   : > { %5934 = vmatmul.f32.gmra.mxu2 %v5860_v58 }
 0xae1   : > { %v5761_v40 = vpop.f32.mrf.mxu1 }
 0xae2   : > { %v5696_v36 = vpop.f32.mrf.mxu0  ;;  %v12301_v42 = vsub.f32 %v12143_v44, %v5761_v40 }
 0xae3   : > { %v12304_v10 = vadd.f32 %v5696_v36, %v12019_v62 }
 0xae4   : > { %v5861_v17 = vmul.f32 %v12301_v42, %v12301_v42 }
 0xae5   : > { %5808 = vmatmul.f32.gmra.mxu1 %v12304_v10 }
 0xae6   : > { %5937 = vmatmul.f32.gmra.mxu2 %v5861_v17 }
 0xae9   : > { %v5764_v51 = vpop.f32.mrf.mxu1 }
 0xaea   : > { %v5699_v32 = vpop.f32.mrf.mxu0  ;;  %v12316_v44 = vsub.f32 %v12153_v18, %v5764_v51 }
 0xaeb   : > { %v12313_v13 = vadd.f32 %v5699_v32, %v12019_v62 }
 0xaec   : > { %v5862_v34 = vmul.f32 %v12316_v44, %v12316_v44 }
 0xaed   : > { %5811 = vmatmul.f32.gmra.mxu1 %v12313_v13 }
 0xaee   : > { %5940 = vmatmul.f32.gmra.mxu2 %v5862_v34 }
 0xaf2   : > { %v5767_v2 = vpop.f32.mrf.mxu1 }
 0xaf3   : > { %v12325_v50 = vsub.f32 %v12160_v28, %v5767_v2  ;;  %v5896_v62 = vpop.f32.mrf.mxu0 }
 0xaf4   : > { %v5897_v60 = vadd.f32 1e-05, %v5896_v62 }
 0xaf5   : > { %v5863_v18 = vmul.f32 %v12325_v50, %v12325_v50 }
 0xaf6   : > { %7735 = vrsqrt.f32 %v5897_v60  ;;  %vm5998_vm12 = vweird.f32 %v5897_v60 }
 0xaf7   : > { %5943 = vmatmul.f32.gmra.mxu2 %v5863_v18 }
 0xafa   : > { %v5770_v53 = vpop.f32.mrf.mxu1 }
 0xafb   : > { %v12330_v8 = vsub.f32 %v12172_v37, %v5770_v53 }
 0xafc   : > { %v7736_v14 = vpop.eup %7735 }
 0xafd   : > { %v5993_v48 = vmul.f32 %v7736_v14, %v5897_v60  ;;  %v5864_v23 = vmul.f32 %v12330_v8, %v12330_v8  ;;  %vm5999_vm11 = vweird.f32 %v7736_v14 }
 0xafe   : > { %vm6000_vm0 = vmor %vm5998_vm12, %vm5999_vm11 }
 0xaff   : > { %v5994_v33 = vmul.f32 %v7736_v14, %v5993_v48  ;;  %5946 = vmatmul.f32.gmra.mxu2 %v5864_v23 }
 0xb01   : > { %v5995_v28 = vmul.f32 0.5, %v5994_v33  ;;  %v5899_v1 = vpop.f32.mrf.mxu2 }
 0xb02   : > { %v5773_v47 = vpop.f32.mrf.mxu1  ;;  %v5900_v56 = vadd.f32 1e-05, %v5899_v1 }
 0xb03   : > { %v5996_v38 = vsub.f32 1.5, %v5995_v28  ;;  %v12335_v26 = vsub.f32 %v12181_v5, %v5773_v47 }
 0xb04   : > { %7737 = vrsqrt.f32 %v5900_v56  ;;  %vm6008_vm14 = vweird.f32 %v5900_v56 }
 0xb05   : > { %v5997_v35 = vmul.f32 %v7736_v14, %v5996_v38  ;;  %v5865_v37 = vmul.f32 %v12335_v26, %v12335_v26 }
 0xb07   : > { %v6001_v46 = vsel %vm6000_vm0, %v7736_v14, %v5997_v35  ;;  %5949 = vmatmul.f32.gmra.mxu2 %v5865_v37 }
 0xb08   : > { %v6312_v0 = vmul.f32 %v6001_v46, %v12157_v11 }
 0xb09   : > { %v5902_v63 = vpop.f32.mrf.mxu2 }
 0xb0a   : > { %v7738_v5 = vpop.eup %7737  ;;  %v6345_v58 = vmul.f32 %v12340_v29, %v6312_v0  ;;  %v5776_v40 = vpop.f32.mrf.mxu1  ;;  %v5903_v36 = vadd.f32 1e-05, %v5902_v63 }
 0xb0b   : > { %v6003_v17 = vmul.f32 %v7738_v5, %v5900_v56  ;;  %v12348_v32 = vsub.f32 %v12193_v49, %v5776_v40  ;;  %vm6009_vm13 = vweird.f32 %v7738_v5 }
 0xb0c   : > { %7739 = vrsqrt.f32 %v5903_v36  ;;  %v6378_v51 = vadd.f32 %v12344_v61, %v6345_v58  ;;  %vm6010_vm15 = vmor %vm6008_vm14, %vm6009_vm13  ;;  %vm6018_vm3 = vweird.f32 %v5903_v36 }
 0xb0d   : > { %v6004_v3 = vmul.f32 %v7738_v5, %v6003_v17  ;;  %v5866_v11 = vmul.f32 %v12348_v32, %v12348_v32 }
 0xb0e   : > { %v6410_v34 = vmax.f32 %v6378_v51, 0.0 }
 0xb0f   : > { %v6005_v41 = vmul.f32 0.5, %v6004_v3  ;;  %5952 = vmatmul.f32.gmra.mxu2 %v5866_v11 }
 0xb10   : > { %6478 = vmatmul.f32.vlgmr.msrb.gmra.mxu3 %v6410_v34 }
 0xb11   : > { %v6006_v52 = vsub.f32 1.5, %v6005_v41  ;;  %v5905_v2 = vpop.f32.mrf.mxu2 }
 0xb12   : > { %v7740_v62 = vpop.eup %7739  ;;  %v5779_v60 = vpop.f32.mrf.mxu1  ;;  %v5906_v18 = vadd.f32 1e-05, %v5905_v2 }
 0xb13   : > { %v6007_v53 = vmul.f32 %v7738_v5, %v6006_v52  ;;  %v6013_v49 = vmul.f32 %v7740_v62, %v5903_v36  ;;  %v12354_v14 = vsub.f32 %v12202_v6, %v5779_v60  ;;  %vm6019_vm2 = vweird.f32 %v7740_v62 }
 0xb14   : > { %7741 = vrsqrt.f32 %v5906_v18  ;;  %vm6020_vm4 = vmor %vm6018_vm3, %vm6019_vm2  ;;  %vm6028_vm6 = vweird.f32 %v5906_v18 }
 0xb15   : > { %v6014_v48 = vmul.f32 %v7740_v62, %v6013_v49  ;;  %v5867_v23 = vmul.f32 %v12354_v14, %v12354_v14  ;;  %v6011_v33 = vsel %vm6010_vm15, %v7738_v5, %v6007_v53 }
 0xb16   : > { %v6313_v28 = vmul.f32 %v6011_v33, %v12169_v25 }
 0xb17   : > { %v6015_v1 = vmul.f32 0.5, %v6014_v48  ;;  %5955 = vmatmul.f32.gmra.mxu2 %v5867_v23 }
 0xb18   : > { %v6346_v47 = vmul.f32 %v12340_v29, %v6313_v28 }
 0xb19   : > { %v6016_v38 = vsub.f32 1.5, %v6015_v1  ;;  %v5908_v56 = vpop.f32.mrf.mxu2 }
 0xb1a   : > { %v7742_v35 = vpop.eup %7741  ;;  %v5782_v37 = vpop.f32.mrf.mxu1  ;;  %v5909_v6 = vadd.f32 1e-05, %v5908_v56  ;;  %v6379_v46 = vadd.f32 %v12344_v61, %v6346_v47 }
 0xb1b   : > { %v6017_v0 = vmul.f32 %v7740_v62, %v6016_v38  ;;  %v6023_v63 = vmul.f32 %v7742_v35, %v5906_v18  ;;  %v12362_v58 = vsub.f32 %v12214_v27, %v5782_v37  ;;  %vm6029_vm5 = vweird.f32 %v7742_v35 }
 0xb1c   : > { %7743 = vrsqrt.f32 %v5909_v6  ;;  %v6411_v25 = vmax.f32 %v6379_v46, 0.0  ;;  %vm6030_vm7 = vmor %vm6028_vm6, %vm6029_vm5  ;;  %vm6038_vm8 = vweird.f32 %v5909_v6 }
 0xb1d   : > { %v6024_v5 = vmul.f32 %v7742_v35, %v6023_v63  ;;  %v5868_v40 = vmul.f32 %v12362_v58, %v12362_v58  ;;  %v6021_v17 = vsel %vm6020_vm4, %v7740_v62, %v6017_v0 }
 0xb1e   : > { %6481 = vmatmul.f32.gmra.mxu3 %v6411_v25  ;;  %v6314_v51 = vmul.f32 %v6021_v17, %v12178_v24 }
 0xb1f   : > { %v6025_v3 = vmul.f32 0.5, %v6024_v5  ;;  %5958 = vmatmul.f32.gmra.mxu2 %v5868_v40 }
 0xb20   : > { %v6347_v11 = vmul.f32 %v12340_v29, %v6314_v51 }
 0xb21   : > { %v6026_v36 = vsub.f32 1.5, %v6025_v3  ;;  %v5911_v34 = vpop.f32.mrf.mxu2 }
 0xb22   : > { %v7744_v27 = vpop.eup %7743  ;;  %v5785_v41 = vpop.f32.mrf.mxu1  ;;  %v5912_v52 = vadd.f32 1e-05, %v5911_v34  ;;  %v6380_v2 = vadd.f32 %v12344_v61, %v6347_v11 }
 0xb23   : > { %v6027_v60 = vmul.f32 %v7742_v35, %v6026_v36  ;;  %v6033_v53 = vmul.f32 %v7744_v27, %v5909_v6  ;;  %v12370_v62 = vsub.f32 %v12223_v22, %v5785_v41  ;;  %vm6039_vm1 = vweird.f32 %v7744_v27 }
 0xb24   : > { %7745 = vrsqrt.f32 %v5912_v52  ;;  %v6412_v24 = vmax.f32 %v6380_v2, 0.0  ;;  %vm6040_vm9 = vmor %vm6038_vm8, %vm6039_vm1  ;;  %vm6048_vm11 = vweird.f32 %v5912_v52 }
 0xb25   : > { %v6034_v49 = vmul.f32 %v7744_v27, %v6033_v53  ;;  %v5869_v48 = vmul.f32 %v12370_v62, %v12370_v62  ;;  %v6031_v23 = vsel %vm6030_vm7, %v7742_v35, %v6027_v60 }
 0xb26   : > { %6484 = vmatmul.f32.gmra.mxu3 %v6412_v24  ;;  %v6315_v33 = vmul.f32 %v6031_v23, %v12190_v39 }
 0xb27   : > { %v6035_v28 = vmul.f32 0.5, %v6034_v49  ;;  %5961 = vmatmul.f32.gmra.mxu2 %v5869_v48 }
 0xb28   : > { %v6348_v1 = vmul.f32 %v12340_v29, %v6315_v33 }
 0xb29   : > { %v6036_v18 = vsub.f32 1.5, %v6035_v28  ;;  %v5914_v47 = vpop.f32.mrf.mxu2 }
 0xb2a   : > { %v7746_v22 = vpop.eup %7745  ;;  %v5788_v38 = vpop.f32.mrf.mxu1  ;;  %v5915_v56 = vadd.f32 1e-05, %v5914_v47  ;;  %v6381_v37 = vadd.f32 %v12344_v61, %v6348_v1 }
 0xb2b   : > { %v6037_v46 = vmul.f32 %v7744_v27, %v6036_v18  ;;  %v6043_v0 = vmul.f32 %v7746_v22, %v5912_v52  ;;  %v12378_v35 = vsub.f32 %v12235_v7, %v5788_v38  ;;  %vm6049_vm10 = vweird.f32 %v7746_v22 }
 0xb2c   : > { %7747 = vrsqrt.f32 %v5915_v56  ;;  %v6413_v39 = vmax.f32 %v6381_v37, 0.0  ;;  %vm6050_vm12 = vmor %vm6048_vm11, %vm6049_vm10  ;;  %vm6058_vm13 = vweird.f32 %v5915_v56 }
 0xb2d   : > { %v6044_v63 = vmul.f32 %v7746_v22, %v6043_v0  ;;  %v5870_v25 = vmul.f32 %v12378_v35, %v12378_v35  ;;  %v6041_v5 = vsel %vm6040_vm9, %v7744_v27, %v6037_v46 }
 0xb2e   : > { %6487 = vmatmul.f32.gmra.mxu3 %v6413_v39  ;;  %v6316_v40 = vmul.f32 %v6041_v5, %v12199_v16 }
 0xb2f   : > { %v6045_v17 = vmul.f32 0.5, %v6044_v63  ;;  %5964 = vmatmul.f32.gmra.mxu2 %v5870_v25 }
 0xb30   : > { %v6349_v51 = vmul.f32 %v12340_v29, %v6316_v40 }
 0xb31   : > { %v6046_v6 = vsub.f32 1.5, %v6045_v17  ;;  %v5917_v3 = vpop.f32.mrf.mxu2 }
 0xb32   : > { %v7748_v7 = vpop.eup %7747  ;;  %v5791_v11 = vpop.f32.mrf.mxu1  ;;  %v5918_v36 = vadd.f32 1e-05, %v5917_v3  ;;  %v6382_v34 = vadd.f32 %v12344_v61, %v6349_v51 }
 0xb33   : > { %v6047_v41 = vmul.f32 %v7746_v22, %v6046_v6  ;;  %v6053_v2 = vmul.f32 %v7748_v7, %v5915_v56  ;;  %v12386_v27 = vsub.f32 %v12244_v30, %v5791_v11  ;;  %vm6059_vm0 = vweird.f32 %v7748_v7 }
 0xb34   : > { %7749 = vrsqrt.f32 %v5918_v36  ;;  %v6414_v16 = vmax.f32 %v6382_v34, 0.0  ;;  %vm6060_vm14 = vmor %vm6058_vm13, %vm6059_vm0  ;;  %vm6068_vm2 = vweird.f32 %v5918_v36 }
 0xb35   : > { %v6054_v60 = vmul.f32 %v7748_v7, %v6053_v2  ;;  %v5871_v53 = vmul.f32 %v12386_v27, %v12386_v27  ;;  %v6051_v24 = vsel %vm6050_vm12, %v7746_v22, %v6047_v41 }
 0xb36   : > { %6490 = vmatmul.f32.gmra.mxu3 %v6414_v16  ;;  %v6317_v49 = vmul.f32 %v6051_v24, %v12211_v45 }
 0xb37   : > { %v6055_v48 = vmul.f32 0.5, %v6054_v60  ;;  %5967 = vmatmul.f32.gmra.mxu2 %v5871_v53 }
 0xb38   : > { %v6350_v23 = vmul.f32 %v12340_v29, %v6317_v49 }
 0xb39   : > { %v6056_v52 = vsub.f32 1.5, %v6055_v48  ;;  %v5920_v33 = vpop.f32.mrf.mxu2 }
 0xb3a   : > { %v7750_v30 = vpop.eup %7749  ;;  %v5794_v28 = vpop.f32.mrf.mxu1  ;;  %v5921_v1 = vadd.f32 1e-05, %v5920_v33  ;;  %v6383_v18 = vadd.f32 %v12344_v61, %v6350_v23 }
 0xb3b   : > { %v6057_v47 = vmul.f32 %v7748_v7, %v6056_v52  ;;  %v6063_v38 = vmul.f32 %v7750_v30, %v5918_v36  ;;  %v12394_v22 = vsub.f32 %v12256_v12, %v5794_v28  ;;  %vm6069_vm15 = vweird.f32 %v7750_v30 }
 0xb3c   : > { %7751 = vrsqrt.f32 %v5921_v1  ;;  %v6415_v45 = vmax.f32 %v6383_v18, 0.0  ;;  %vm6070_vm3 = vmor %vm6068_vm2, %vm6069_vm15  ;;  %vm6078_vm5 = vweird.f32 %v5921_v1 }
 0xb3d   : > { %v6064_v37 = vmul.f32 %v7750_v30, %v6063_v38  ;;  %v5872_v46 = vmul.f32 %v12394_v22, %v12394_v22  ;;  %v6061_v0 = vsel %vm6060_vm14, %v7748_v7, %v6057_v47 }
 0xb3e   : > { %6493 = vmatmul.f32.gmra.mxu3 %v6415_v45  ;;  %v6318_v39 = vmul.f32 %v6061_v0, %v12220_v21 }
 0xb3f   : > { %v6065_v63 = vmul.f32 0.5, %v6064_v37  ;;  %5970 = vmatmul.f32.gmra.mxu2 %v5872_v46 }
 0xb40   : > { %v6351_v25 = vmul.f32 %v12340_v29, %v6318_v39 }
 0xb41   : > { %v6066_v56 = vsub.f32 1.5, %v6065_v63  ;;  %v5923_v5 = vpop.f32.mrf.mxu2 }
 0xb42   : > { %v7752_v12 = vpop.eup %7751  ;;  %v5797_v40 = vpop.f32.mrf.mxu1  ;;  %v5924_v17 = vadd.f32 1e-05, %v5923_v5  ;;  %v6384_v51 = vadd.f32 %v12344_v61, %v6351_v25 }
 0xb43   : > { %v6067_v6 = vmul.f32 %v7750_v30, %v6066_v56  ;;  %v6073_v3 = vmul.f32 %v7752_v12, %v5921_v1  ;;  %v12402_v7 = vsub.f32 %v12265_v20, %v5797_v40  ;;  %vm6079_vm4 = vweird.f32 %v7752_v12 }
 0xb44   : > { %7753 = vrsqrt.f32 %v5924_v17  ;;  %v6416_v21 = vmax.f32 %v6384_v51, 0.0  ;;  %vm6080_vm6 = vmor %vm6078_vm5, %vm6079_vm4  ;;  %vm6088_vm1 = vweird.f32 %v5924_v17 }
 0xb45   : > { %v6074_v11 = vmul.f32 %v7752_v12, %v6073_v3  ;;  %v5873_v34 = vmul.f32 %v12402_v7, %v12402_v7  ;;  %v6071_v41 = vsel %vm6070_vm3, %v7750_v30, %v6067_v6 }
 0xb46   : > { %6496 = vmatmul.f32.gmra.mxu3 %v6416_v21  ;;  %v6319_v2 = vmul.f32 %v6071_v41, %v12232_v43 }
 0xb47   : > { %v6075_v16 = vmul.f32 0.5, %v6074_v11  ;;  %5973 = vmatmul.f32.gmra.mxu2 %v5873_v34 }
 0xb48   : > { %v6352_v60 = vmul.f32 %v12340_v29, %v6319_v2 }
 0xb49   : > { %v6076_v36 = vsub.f32 1.5, %v6075_v16  ;;  %v5926_v53 = vpop.f32.mrf.mxu2 }
 0xb4a   : > { %v7754_v20 = vpop.eup %7753  ;;  %v5800_v24 = vpop.f32.mrf.mxu1  ;;  %v5927_v49 = vadd.f32 1e-05, %v5926_v53  ;;  %v6385_v48 = vadd.f32 %v12344_v61, %v6352_v60 }
 0xb4b   : > { %v6077_v23 = vmul.f32 %v7752_v12, %v6076_v36  ;;  %v6083_v52 = vmul.f32 %v7754_v20, %v5924_v17  ;;  %v12410_v33 = vsub.f32 %v12277_v54, %v5800_v24  ;;  %vm6089_vm7 = vweird.f32 %v7754_v20 }
 0xb4c   : > { %7755 = vrsqrt.f32 %v5927_v49  ;;  %v6417_v43 = vmax.f32 %v6385_v48, 0.0  ;;  %vm6090_vm8 = vmor %vm6088_vm1, %vm6089_vm7  ;;  %vm6098_vm10 = vweird.f32 %v5927_v49 }
 0xb4d   : > { %v6081_v30 = vsel %vm6080_vm6, %v7752_v12, %v6077_v23  ;;  %v6084_v28 = vmul.f32 %v7754_v20, %v6083_v52  ;;  %v5874_v18 = vmul.f32 %v12410_v33, %v12410_v33 }
 0xb4e   : > { %6499 = vmatmul.f32.gmra.mxu3 %v6417_v43  ;;  %v6320_v47 = vmul.f32 %v6081_v30, %v12241_v55 }
 0xb4f   : > { %v6085_v38 = vmul.f32 0.5, %v6084_v28  ;;  %5976 = vmatmul.f32.gmra.mxu2 %v5874_v18 }
 0xb50   : > { %v6353_v45 = vmul.f32 %v12340_v29, %v6320_v47 }
 0xb51   : > { %v6086_v1 = vsub.f32 1.5, %v6085_v38  ;;  %v5929_v37 = vpop.f32.mrf.mxu2 }
 0xb52   : > { %v7756_v54 = vpop.eup %7755  ;;  %v5803_v46 = vpop.f32.mrf.mxu1  ;;  %v5930_v0 = vadd.f32 1e-05, %v5929_v37  ;;  %v6386_v39 = vadd.f32 %v12344_v61, %v6353_v45 }
 0xb53   : > { %v6087_v63 = vmul.f32 %v7754_v20, %v6086_v1  ;;  %v6093_v25 = vmul.f32 %v7756_v54, %v5927_v49  ;;  %v12418_v56 = vsub.f32 %v12286_v59, %v5803_v46  ;;  %vm6099_vm9 = vweird.f32 %v7756_v54 }
 0xb54   : > { %7757 = vrsqrt.f32 %v5930_v0  ;;  %v6418_v55 = vmax.f32 %v6386_v39, 0.0  ;;  %vm6100_vm11 = vmor %vm6098_vm10, %vm6099_vm9  ;;  %vm6108_vm0 = vweird.f32 %v5930_v0 }
 0xb55   : > { %v6091_v5 = vsel %vm6090_vm8, %v7754_v20, %v6087_v63  ;;  %v6094_v12 = vmul.f32 %v7756_v54, %v6093_v25  ;;  %v5875_v40 = vmul.f32 %v12418_v56, %v12418_v56 }
 0xb56   : > { %6502 = vmatmul.f32.gmra.mxu3 %v6418_v55  ;;  %v6321_v51 = vmul.f32 %v6091_v5, %v12253_v31 }
 0xb57   : > { %v6095_v6 = vmul.f32 0.5, %v6094_v12  ;;  %5979 = vmatmul.f32.gmra.mxu2 %v5875_v40 }
 0xb58   : > { %v6354_v3 = vmul.f32 %v12340_v29, %v6321_v51 }
 0xb59   : > { %v6096_v17 = vsub.f32 1.5, %v6095_v6  ;;  %v5932_v21 = vpop.f32.mrf.mxu2 }
 0xb5a   : > { %v7758_v59 = vpop.eup %7757  ;;  %v5806_v11 = vpop.f32.mrf.mxu1  ;;  %v5933_v34 = vadd.f32 1e-05, %v5932_v21  ;;  %v6387_v41 = vadd.f32 %v12344_v61, %v6354_v3 }
 0xb5b   : > { %v6097_v2 = vmul.f32 %v7756_v54, %v6096_v17  ;;  %v6103_v16 = vmul.f32 %v7758_v59, %v5930_v0  ;;  %v12426_v60 = vsub.f32 %v12295_v4, %v5806_v11  ;;  %vm6109_vm12 = vweird.f32 %v7758_v59 }
 0xb5c   : > { %7759 = vrsqrt.f32 %v5933_v34  ;;  %v6419_v31 = vmax.f32 %v6387_v41, 0.0  ;;  %vm6110_vm13 = vmor %vm6108_vm0, %vm6109_vm12  ;;  %vm6118_vm15 = vweird.f32 %v5933_v34 }
 0xb5d   : > { %v6101_v36 = vsel %vm6100_vm11, %v7756_v54, %v6097_v2  ;;  %v6104_v53 = vmul.f32 %v7758_v59, %v6103_v16  ;;  %v5876_v20 = vmul.f32 %v12426_v60, %v12426_v60 }
 0xb5e   : > { %6505 = vmatmul.f32.gmra.mxu3 %v6419_v31  ;;  %v6322_v24 = vmul.f32 %v6101_v36, %v12262_v57 }
 0xb5f   : > { %v6105_v48 = vmul.f32 0.5, %v6104_v53  ;;  %5982 = vmatmul.f32.gmra.mxu2 %v5876_v20 }
 0xb60   : > { %v6355_v23 = vmul.f32 %v12340_v29, %v6322_v24 }
 0xb61   : > { %v6106_v49 = vsub.f32 1.5, %v6105_v48  ;;  %v5935_v52 = vpop.f32.mrf.mxu2 }
 0xb62   : > { %v7760_v4 = vpop.eup %7759  ;;  %v5809_v43 = vpop.f32.mrf.mxu1  ;;  %v5936_v30 = vadd.f32 1e-05, %v5935_v52  ;;  %v6388_v28 = vadd.f32 %v12344_v61, %v6355_v23 }
 0xb63   : > { %v6107_v18 = vmul.f32 %v7758_v59, %v6106_v49  ;;  %v6113_v47 = vmul.f32 %v7760_v4, %v5933_v34  ;;  %v12434_v38 = vsub.f32 %v12304_v10, %v5809_v43  ;;  %vm6119_vm14 = vweird.f32 %v7760_v4 }
 0xb64   : > { %7761 = vrsqrt.f32 %v5936_v30  ;;  %v6420_v57 = vmax.f32 %v6388_v28, 0.0  ;;  %vm6120_vm2 = vmor %vm6118_vm15, %vm6119_vm14  ;;  %vm6128_vm4 = vweird.f32 %v5936_v30  ;;  %vm6575_vm14 = vcmask 31744  }
 0xb65   : > { %v6111_v45 = vsel %vm6110_vm13, %v7758_v59, %v6107_v18  ;;  %v6114_v1 = vmul.f32 %v7760_v4, %v6113_v47  ;;  %v5877_v37 = vmul.f32 %v12434_v38, %v12434_v38 }
 0xb66   : > { %6508 = vmatmul.f32.gmra.mxu3 %v6420_v57  ;;  %v6323_v54 = vmul.f32 %v6111_v45, %v12274_v9 }
 0xb67   : > { %v6115_v46 = vmul.f32 0.5, %v6114_v1  ;;  %5985 = vmatmul.f32.gmra.mxu2 %v5877_v37 }
 0xb68   : > { %v6356_v39 = vmul.f32 %v12340_v29, %v6323_v54 }
 0xb69   : > { %v6116_v0 = vsub.f32 1.5, %v6115_v46  ;;  %v5938_v63 = vpop.f32.mrf.mxu2 }
 0xb6a   : > { %v7762_v10 = vpop.eup %7761  ;;  %v5812_v25 = vpop.f32.mrf.mxu1  ;;  %v5939_v55 = vadd.f32 1e-05, %v5938_v63  ;;  %v6389_v5 = vadd.f32 %v12344_v61, %v6356_v39 }
 0xb6b   : > { %v6117_v12 = vmul.f32 %v7760_v4, %v6116_v0  ;;  %v6123_v40 = vmul.f32 %v7762_v10, %v5936_v30  ;;  %v12442_v51 = vsub.f32 %v12313_v13, %v5812_v25  ;;  %vm6129_vm3 = vweird.f32 %v7762_v10 }
 0xb6c   : > { %7763 = vrsqrt.f32 %v5939_v55  ;;  %v6421_v9 = vmax.f32 %v6389_v5, 0.0  ;;  %vm6130_vm5 = vmor %vm6128_vm4, %vm6129_vm3  ;;  %vm6138_vm7 = vweird.f32 %v5939_v55 }
 0xb6d   : > { %v6121_v6 = vsel %vm6120_vm2, %v7760_v4, %v6117_v12  ;;  %v6124_v3 = vmul.f32 %v7762_v10, %v6123_v40  ;;  %v5878_v17 = vmul.f32 %v12442_v51, %v12442_v51 }
 0xb6e   : > { %6511 = vmatmul.f32.gmra.mxu3 %v6421_v9  ;;  %v6324_v21 = vmul.f32 %v6121_v6, %v12283_v19 }
 0xb6f   : > { %v6125_v59 = vmul.f32 0.5, %v6124_v3  ;;  %5988 = vmatmul.f32.gmra.mxu2 %v5878_v17 }
 0xb70   : > { %v6357_v11 = vmul.f32 %v12340_v29, %v6324_v21 }
 0xb71   : > { %v6126_v34 = vsub.f32 1.5, %v6125_v59  ;;  %v5941_v13 = vpop.f32.mrf.mxu2 }
 0xb72   : > { %v7764_v41 = vpop.eup %7763  ;;  %v6390_v2 = vadd.f32 %v12344_v61, %v6357_v11  ;;  %v5942_v36 = vadd.f32 1e-05, %v5941_v13 }
 0xb73   : > { %v6127_v16 = vmul.f32 %v7762_v10, %v6126_v34  ;;  %v6133_v31 = vmul.f32 %v7764_v41, %v5939_v55  ;;  %vm6139_vm6 = vweird.f32 %v7764_v41 }
 0xb74   : > { %v6422_v53 = vmax.f32 %v6390_v2, 0.0  ;;  %7765 = vrsqrt.f32 %v5942_v36  ;;  %vm6140_vm1 = vmor %vm6138_vm7, %vm6139_vm6  ;;  %vm6148_vm9 = vweird.f32 %v5942_v36 }
 0xb75   : > { %v6131_v20 = vsel %vm6130_vm5, %v7762_v10, %v6127_v16  ;;  %v6134_v24 = vmul.f32 %v7764_v41, %v6133_v31  ;;  %v12459_v31 = vld [vmem:[#allocation16] ss:$0 sm:$0xff] }
 0xb76   : > { %6514 = vmatmul.f32.gmra.mxu3 %v6422_v53  ;;  %v6325_v19 = vmul.f32 %v6131_v20, %v12292_v15 }
 0xb77   : > { %v6135_v48 = vmul.f32 0.5, %v6134_v24 }
 0xb78   : > { %v6358_v23 = vmul.f32 %v12340_v29, %v6325_v19 }
 0xb79   : > { %v6136_v49 = vsub.f32 1.5, %v6135_v48 }
 0xb7a   : > { %v5944_v52 = vpop.f32.mrf.mxu2  ;;  %v6391_v4 = vadd.f32 %v12344_v61, %v6358_v23  ;;  %v7766_v43 = vpop.eup %7765 }
 0xb7b   : > { %v6137_v30 = vmul.f32 %v7764_v41, %v6136_v49  ;;  %v5945_v28 = vadd.f32 1e-05, %v5944_v52  ;;  %v6143_v18 = vmul.f32 %v7766_v43, %v5942_v36  ;;  %vm6149_vm8 = vweird.f32 %v7766_v43 }
 0xb7c   : > { %v6423_v47 = vmax.f32 %v6391_v4, 0.0  ;;  %vm6150_vm10 = vmor %vm6148_vm9, %vm6149_vm8 }
 0xb7d   : > { %v6141_v57 = vsel %vm6140_vm1, %v7764_v41, %v6137_v30  ;;  %7767 = vrsqrt.f32 %v5945_v28  ;;  %v6144_v45 = vmul.f32 %v7766_v43, %v6143_v18  ;;  %vm6158_vm12 = vweird.f32 %v5945_v28 }
 0xb7e   : > { %6517 = vmatmul.f32.gmra.mxu3 %v6423_v47  ;;  %v6326_v15 = vmul.f32 %v6141_v57, %v12301_v42 }
 0xb7f   : > { %v6145_v1 = vmul.f32 0.5, %v6144_v45 }
 0xb80   : > { %v6359_v37 = vmul.f32 %v12340_v29, %v6326_v15 }
 0xb81   : > { %v6146_v54 = vsub.f32 1.5, %v6145_v1 }
 0xb82   : > { %v5947_v46 = vpop.f32.mrf.mxu2  ;;  %v6392_v39 = vadd.f32 %v12344_v61, %v6359_v37 }
 0xb83   : > { %v7768_v0 = vpop.eup %7767  ;;  %v5948_v63 = vadd.f32 1e-05, %v5947_v46  ;;  %v6147_v10 = vmul.f32 %v7766_v43, %v6146_v54 }
 0xb84   : > { %v6153_v25 = vmul.f32 %v7768_v0, %v5945_v28  ;;  %v6424_v55 = vmax.f32 %v6392_v39, 0.0  ;;  %vm6159_vm11 = vweird.f32 %v7768_v0 }
 0xb85   : > { %7769 = vrsqrt.f32 %v5948_v63  ;;  %v6151_v5 = vsel %vm6150_vm10, %v7766_v43, %v6147_v10  ;;  %vm6160_vm0 = vmor %vm6158_vm12, %vm6159_vm11  ;;  %vm6168_vm15 = vweird.f32 %v5948_v63 }
 0xb86   : > { %v6154_v12 = vmul.f32 %v7768_v0, %v6153_v25  ;;  %6520 = vmatmul.f32.gmra.mxu3 %v6424_v55  ;;  %v6327_v42 = vmul.f32 %v6151_v5, %v12316_v44 }
 0xb88   : > { %v6155_v40 = vmul.f32 0.5, %v6154_v12  ;;  %v6360_v9 = vmul.f32 %v12340_v29, %v6327_v42 }
 0xb8a   : > { %v6156_v6 = vsub.f32 1.5, %v6155_v40  ;;  %v5950_v3 = vpop.f32.mrf.mxu2  ;;  %v6393_v59 = vadd.f32 %v12344_v61, %v6360_v9 }
 0xb8b   : > { %v7770_v17 = vpop.eup %7769  ;;  %v5951_v21 = vadd.f32 1e-05, %v5950_v3 }
 0xb8c   : > { %v6157_v11 = vmul.f32 %v7768_v0, %v6156_v6  ;;  %v6163_v34 = vmul.f32 %v7770_v17, %v5948_v63  ;;  %v6425_v41 = vmax.f32 %v6393_v59, 0.0  ;;  %vm6169_vm13 = vweird.f32 %v7770_v17 }
 0xb8d   : > { %7771 = vrsqrt.f32 %v5951_v21  ;;  %vm6170_vm2 = vmor %vm6168_vm15, %vm6169_vm13  ;;  %vm6178_vm4 = vweird.f32 %v5951_v21 }
 0xb8e   : > { %v6161_v13 = vsel %vm6160_vm0, %v7768_v0, %v6157_v11  ;;  %v6164_v2 = vmul.f32 %v7770_v17, %v6163_v34  ;;  %6523 = vmatmul.f32.gmra.mxu3 %v6425_v41 }
 0xb8f   : > { %v6328_v44 = vmul.f32 %v6161_v13, %v12325_v50 }
 0xb90   : > { %v6165_v16 = vmul.f32 0.5, %v6164_v2 }
 0xb91   : > { %v6361_v36 = vmul.f32 %v12340_v29, %v6328_v44 }
 0xb92   : > { %v6166_v53 = vsub.f32 1.5, %v6165_v16  ;;  %v5953_v20 = vpop.f32.mrf.mxu2 }
 0xb93   : > { %v7772_v24 = vpop.eup %7771  ;;  %v5954_v19 = vadd.f32 1e-05, %v5953_v20  ;;  %v6479_v48 = vpop.f32.mrf.mxu3  ;;  %v6394_v23 = vadd.f32 %v12344_v61, %v6361_v36 }
 0xb94   : > { %v6167_v49 = vmul.f32 %v7770_v17, %v6166_v53  ;;  %v6173_v52 = vmul.f32 %v7772_v24, %v5951_v21  ;;  %v12464_v4 = vadd.f32 %v12459_v31, %v6479_v48  ;;  %vm6179_vm3 = vweird.f32 %v7772_v24 }
 0xb95   : > { %7773 = vrsqrt.f32 %v5954_v19  ;;  %v6426_v50 = vmax.f32 %v6394_v23, 0.0  ;;  %vm6180_vm5 = vmor %vm6178_vm4, %vm6179_vm3  ;;  %vm6188_vm7 = vweird.f32 %v5954_v19 }
 0xb96   : > { %v6171_v43 = vsel %vm6170_vm2, %v7770_v17, %v6167_v49  ;;  %v6174_v30 = vmul.f32 %v7772_v24, %v6173_v52  ;;  %v6576_v28 = vsel %vm6575_vm14, %v12464_v4, -inf }
 0xb97   : > { %6526 = vmatmul.f32.gmra.mxu3 %v6426_v50  ;;  %6577 = vmax.xlane.f32.xlu2 %v6576_v28  ;;  %v6329_v18 = vmul.f32 %v6171_v43, %v12330_v8 }
 0xb98   : > { %v6175_v47 = vmul.f32 0.5, %v6174_v30 }
 0xb99   : > { %v6362_v57 = vmul.f32 %v12340_v29, %v6329_v18 }
 0xb9a   : > { %v6176_v45 = vsub.f32 1.5, %v6175_v47  ;;  %v5956_v15 = vpop.f32.mrf.mxu2 }
 0xb9b   : > { %v7774_v1 = vpop.eup %7773  ;;  %v5957_v37 = vadd.f32 1e-05, %v5956_v15  ;;  %v6395_v54 = vadd.f32 %v12344_v61, %v6362_v57 }
 0xb9c   : > { %v6177_v46 = vmul.f32 %v7772_v24, %v6176_v45  ;;  %v6183_v39 = vmul.f32 %v7774_v1, %v5954_v19  ;;  %vm6189_vm6 = vweird.f32 %v7774_v1 }
 0xb9d   : > { %7775 = vrsqrt.f32 %v5957_v37  ;;  %v6427_v0 = vmax.f32 %v6395_v54, 0.0  ;;  %vm6190_vm1 = vmor %vm6188_vm7, %vm6189_vm6  ;;  %vm6198_vm9 = vweird.f32 %v5957_v37 }
 0xb9e   : > { %v6181_v63 = vsel %vm6180_vm5, %v7772_v24, %v6177_v46  ;;  %v6184_v10 = vmul.f32 %v7774_v1, %v6183_v39 }
 0xb9f   : > { %6529 = vmatmul.f32.gmra.mxu3 %v6427_v0  ;;  %v6330_v8 = vmul.f32 %v6181_v63, %v12335_v26 }
 0xba0   : > { %v6185_v25 = vmul.f32 0.5, %v6184_v10 }
 0xba1   : > { %v6482_v55 = vpop.f32.mrf.mxu3  ;;  %v6363_v5 = vmul.f32 %v12340_v29, %v6330_v8 }
 0xba2   : > { %v6186_v12 = vsub.f32 1.5, %v6185_v25  ;;  %v5959_v42 = vpop.f32.mrf.mxu2  ;;  %v12474_v40 = vadd.f32 %v12459_v31, %v6482_v55 }
 0xba3   : > { %v7776_v9 = vpop.eup %7775  ;;  %v5960_v6 = vadd.f32 1e-05, %v5959_v42  ;;  %v6396_v3 = vadd.f32 %v12344_v61, %v6363_v5 }
 0xba4   : > { %v6187_v17 = vmul.f32 %v7774_v1, %v6186_v12  ;;  %v6193_v21 = vmul.f32 %v7776_v9, %v5957_v37  ;;  %v6579_v26 = vsel %vm6575_vm14, %v12474_v40, -inf  ;;  %vm6199_vm8 = vweird.f32 %v7776_v9 }
 0xba5   : > { %7777 = vrsqrt.f32 %v5960_v6  ;;  %6580 = vmax.xlane.f32.xlu0 %v6579_v26  ;;  %v6428_v59 = vmax.f32 %v6396_v3, 0.0  ;;  %vm6200_vm10 = vmor %vm6198_vm9, %vm6199_vm8  ;;  %vm6208_vm12 = vweird.f32 %v5960_v6 }
 0xba6   : > { %v6191_v11 = vsel %vm6190_vm1, %v7774_v1, %v6187_v17  ;;  %v6194_v34 = vmul.f32 %v7776_v9, %v6193_v21 }
 0xba7   : > { %6532 = vmatmul.f32.gmra.mxu3 %v6428_v59  ;;  %v6331_v41 = vmul.f32 %v6191_v11, %v12348_v32 }
 0xba8   : > { %v6195_v13 = vmul.f32 0.5, %v6194_v34 }
 0xba9   : > { %v6485_v2 = vpop.f32.mrf.mxu3  ;;  %v6364_v44 = vmul.f32 %v12340_v29, %v6331_v41 }
 0xbaa   : > { %v6196_v16 = vsub.f32 1.5, %v6195_v13  ;;  %v5962_v36 = vpop.f32.mrf.mxu2  ;;  %v12482_v53 = vadd.f32 %v12459_v31, %v6485_v2 }
 0xbab   : > { %v7778_v20 = vpop.eup %7777  ;;  %v5963_v24 = vadd.f32 1e-05, %v5962_v36  ;;  %v6397_v19 = vadd.f32 %v12344_v61, %v6364_v44 }
 0xbac   : > { %v6197_v48 = vmul.f32 %v7776_v9, %v6196_v16  ;;  %v6203_v23 = vmul.f32 %v7778_v20, %v5960_v6  ;;  %v6582_v32 = vsel %vm6575_vm14, %v12482_v53, -inf  ;;  %vm6209_vm11 = vweird.f32 %v7778_v20 }
 0xbad   : > { %7779 = vrsqrt.f32 %v5963_v24  ;;  %6583 = vmax.xlane.f32.xlu1 %v6582_v32  ;;  %v6429_v49 = vmax.f32 %v6397_v19, 0.0  ;;  %vm6210_vm0 = vmor %vm6208_vm12, %vm6209_vm11  ;;  %vm6218_vm15 = vweird.f32 %v5963_v24 }
 0xbae   : > { %v6201_v52 = vsel %vm6200_vm10, %v7776_v9, %v6197_v48  ;;  %v6204_v50 = vmul.f32 %v7778_v20, %v6203_v23 }
 0xbaf   : > { %6535 = vmatmul.f32.gmra.mxu3 %v6429_v49  ;;  %v6332_v43 = vmul.f32 %v6201_v52, %v12354_v14 }
 0xbb0   : > { %v6205_v30 = vmul.f32 0.5, %v6204_v50 }
 0xbb1   : > { %v6488_v28 = vpop.f32.mrf.mxu3  ;;  %v6365_v18 = vmul.f32 %v12340_v29, %v6332_v43 }
 0xbb2   : > { %v6206_v47 = vsub.f32 1.5, %v6205_v30  ;;  %v5965_v57 = vpop.f32.mrf.mxu2  ;;  %v12490_v45 = vadd.f32 %v12459_v31, %v6488_v28 }
 0xbb3   : > { %v7780_v15 = vpop.eup %7779  ;;  %v5966_v1 = vadd.f32 1e-05, %v5965_v57  ;;  %v6398_v37 = vadd.f32 %v12344_v61, %v6365_v18 }
 0xbb4   : > { %v6207_v54 = vmul.f32 %v7778_v20, %v6206_v47  ;;  %v6213_v46 = vmul.f32 %v7780_v15, %v5963_v24  ;;  %v6585_v14 = vsel %vm6575_vm14, %v12490_v45, -inf  ;;  %vm6219_vm13 = vweird.f32 %v7780_v15 }
 0xbb5   : > { %7781 = vrsqrt.f32 %v5966_v1  ;;  %6586 = vmax.xlane.f32.xlu2 %v6585_v14  ;;  %v6430_v39 = vmax.f32 %v6398_v37, 0.0  ;;  %vm6220_vm2 = vmor %vm6218_vm15, %vm6219_vm13  ;;  %vm6228_vm4 = vweird.f32 %v5966_v1 }
 0xbb6   : > { %v6211_v0 = vsel %vm6210_vm0, %v7778_v20, %v6207_v54  ;;  %v6214_v63 = vmul.f32 %v7780_v15, %v6213_v46 }
 0xbb7   : > { %6538 = vmatmul.f32.gmra.mxu3 %v6430_v39  ;;  %v6333_v10 = vmul.f32 %v6211_v0, %v12362_v58 }
 0xbb8   : > { %v6215_v8 = vmul.f32 0.5, %v6214_v63 }
 0xbb9   : > { %v6491_v25 = vpop.f32.mrf.mxu3  ;;  %v6366_v55 = vmul.f32 %v12340_v29, %v6333_v10 }
 0xbba   : > { %v6216_v5 = vsub.f32 1.5, %v6215_v8  ;;  %v5968_v12 = vpop.f32.mrf.mxu2  ;;  %v12498_v42 = vadd.f32 %v12459_v31, %v6491_v25 }
 0xbbb   : > { %v7782_v9 = vpop.eup %7781  ;;  %v5969_v6 = vadd.f32 1e-05, %v5968_v12  ;;  %v6399_v3 = vadd.f32 %v12344_v61, %v6366_v55 }
 0xbbc   : > { %v6217_v17 = vmul.f32 %v7780_v15, %v6216_v5  ;;  %v6223_v21 = vmul.f32 %v7782_v9, %v5966_v1  ;;  %v6588_v58 = vsel %vm6575_vm14, %v12498_v42, -inf  ;;  %vm6229_vm3 = vweird.f32 %v7782_v9 }
 0xbbd   : > { %7783 = vrsqrt.f32 %v5969_v6  ;;  %6589 = vmax.xlane.f32.xlu0 %v6588_v58  ;;  %v6431_v26 = vmax.f32 %v6399_v3, 0.0  ;;  %vm6230_vm5 = vmor %vm6228_vm4, %vm6229_vm3  ;;  %vm6238_vm7 = vweird.f32 %v5969_v6 }
 0xbbe   : > { %v6221_v59 = vsel %vm6220_vm2, %v7780_v15, %v6217_v17  ;;  %v6224_v11 = vmul.f32 %v7782_v9, %v6223_v21 }
 0xbbf   : > { %6541 = vmatmul.f32.gmra.mxu3 %v6431_v26  ;;  %v6334_v34 = vmul.f32 %v6221_v59, %v12370_v62 }
 0xbc0   : > { %v6225_v41 = vmul.f32 0.5, %v6224_v11 }
 0xbc1   : > { %v6494_v13 = vpop.f32.mrf.mxu3  ;;  %v6367_v2 = vmul.f32 %v12340_v29, %v6334_v34 }
 0xbc2   : > { %v6226_v44 = vsub.f32 1.5, %v6225_v41  ;;  %v5971_v16 = vpop.f32.mrf.mxu2  ;;  %v12506_v36 = vadd.f32 %v12459_v31, %v6494_v13 }
 0xbc3   : > { %v7784_v20 = vpop.eup %7783  ;;  %v5972_v24 = vadd.f32 1e-05, %v5971_v16  ;;  %v6400_v19 = vadd.f32 %v12344_v61, %v6367_v2 }
 0xbc4   : > { %v6227_v48 = vmul.f32 %v7782_v9, %v6226_v44  ;;  %v6233_v23 = vmul.f32 %v7784_v20, %v5969_v6  ;;  %v6591_v62 = vsel %vm6575_vm14, %v12506_v36, -inf  ;;  %vm6239_vm6 = vweird.f32 %v7784_v20 }
 0xbc5   : > { %7785 = vrsqrt.f32 %v5972_v24  ;;  %6592 = vmax.xlane.f32.xlu1 %v6591_v62  ;;  %v6432_v32 = vmax.f32 %v6400_v19, 0.0  ;;  %vm6240_vm1 = vmor %vm6238_vm7, %vm6239_vm6  ;;  %vm6248_vm9 = vweird.f32 %v5972_v24 }
 0xbc6   : > { %v6231_v49 = vsel %vm6230_vm5, %v7782_v9, %v6227_v48  ;;  %v6234_v52 = vmul.f32 %v7784_v20, %v6233_v23 }
 0xbc7   : > { %6544 = vmatmul.f32.gmra.mxu3 %v6432_v32  ;;  %v6335_v50 = vmul.f32 %v6231_v49, %v12378_v35 }
 0xbc8   : > { %v6235_v43 = vmul.f32 0.5, %v6234_v52 }
 0xbc9   : > { %v6497_v30 = vpop.f32.mrf.mxu3  ;;  %v6368_v28 = vmul.f32 %v12340_v29, %v6335_v50 }
 0xbca   : > { %v6236_v18 = vsub.f32 1.5, %v6235_v43  ;;  %v5974_v47 = vpop.f32.mrf.mxu2  ;;  %v12514_v57 = vadd.f32 %v12459_v31, %v6497_v30 }
 0xbcb   : > { %v7786_v15 = vpop.eup %7785  ;;  %v5975_v1 = vadd.f32 1e-05, %v5974_v47  ;;  %v6401_v37 = vadd.f32 %v12344_v61, %v6368_v28 }
 0xbcc   : > { %v6237_v54 = vmul.f32 %v7784_v20, %v6236_v18  ;;  %v6243_v46 = vmul.f32 %v7786_v15, %v5972_v24  ;;  %v6594_v35 = vsel %vm6575_vm14, %v12514_v57, -inf  ;;  %vm6249_vm8 = vweird.f32 %v7786_v15 }
 0xbcd   : > { %7787 = vrsqrt.f32 %v5975_v1  ;;  %6595 = vmax.xlane.f32.xlu2 %v6594_v35  ;;  %v6433_v14 = vmax.f32 %v6401_v37, 0.0  ;;  %vm6250_vm10 = vmor %vm6248_vm9, %vm6249_vm8  ;;  %vm6258_vm12 = vweird.f32 %v5975_v1 }
 0xbce   : > { %v6241_v39 = vsel %vm6240_vm1, %v7784_v20, %v6237_v54  ;;  %v6244_v0 = vmul.f32 %v7786_v15, %v6243_v46 }
 0xbcf   : > { %6547 = vmatmul.f32.gmra.mxu3 %v6433_v14  ;;  %v6336_v63 = vmul.f32 %v6241_v39, %v12386_v27 }
 0xbd0   : > { %v6245_v10 = vmul.f32 0.5, %v6244_v0 }
 0xbd1   : > { %v6500_v8 = vpop.f32.mrf.mxu3  ;;  %v6369_v25 = vmul.f32 %v12340_v29, %v6336_v63 }
 0xbd2   : > { %v6246_v55 = vsub.f32 1.5, %v6245_v10  ;;  %v5977_v5 = vpop.f32.mrf.mxu2  ;;  %v12522_v12 = vadd.f32 %v12459_v31, %v6500_v8 }
 0xbd3   : > { %v7788_v9 = vpop.eup %7787  ;;  %v5978_v6 = vadd.f32 1e-05, %v5977_v5  ;;  %v6402_v3 = vadd.f32 %v12344_v61, %v6369_v25 }
 0xbd4   : > { %v6247_v17 = vmul.f32 %v7786_v15, %v6246_v55  ;;  %v6253_v21 = vmul.f32 %v7788_v9, %v5975_v1  ;;  %v6597_v27 = vsel %vm6575_vm14, %v12522_v12, -inf  ;;  %vm6259_vm11 = vweird.f32 %v7788_v9 }
 0xbd5   : > { %7789 = vrsqrt.f32 %v5978_v6  ;;  %6598 = vmax.xlane.f32.xlu0 %v6597_v27  ;;  %v6434_v58 = vmax.f32 %v6402_v3, 0.0  ;;  %vm6260_vm0 = vmor %vm6258_vm12, %vm6259_vm11  ;;  %vm6268_vm15 = vweird.f32 %v5978_v6 }
 0xbd6   : > { %v6251_v26 = vsel %vm6250_vm10, %v7786_v15, %v6247_v17  ;;  %v6254_v59 = vmul.f32 %v7788_v9, %v6253_v21 }
 0xbd7   : > { %6550 = vmatmul.f32.gmra.mxu3 %v6434_v58  ;;  %v6337_v11 = vmul.f32 %v6251_v26, %v12394_v22 }
 0xbd8   : > { %v6255_v34 = vmul.f32 0.5, %v6254_v59 }
 0xbd9   : > { %v6503_v41 = vpop.f32.mrf.mxu3  ;;  %v6370_v13 = vmul.f32 %v12340_v29, %v6337_v11 }
 0xbda   : > { %v6256_v2 = vsub.f32 1.5, %v6255_v34  ;;  %v5980_v44 = vpop.f32.mrf.mxu2  ;;  %v12530_v16 = vadd.f32 %v12459_v31, %v6503_v41 }
 0xbdb   : > { %v7790_v20 = vpop.eup %7789  ;;  %v5981_v24 = vadd.f32 1e-05, %v5980_v44  ;;  %v6403_v19 = vadd.f32 %v12344_v61, %v6370_v13 }
 0xbdc   : > { %v6257_v48 = vmul.f32 %v7788_v9, %v6256_v2  ;;  %v6263_v23 = vmul.f32 %v7790_v20, %v5978_v6  ;;  %v6600_v22 = vsel %vm6575_vm14, %v12530_v16, -inf  ;;  %vm6269_vm13 = vweird.f32 %v7790_v20 }
 0xbdd   : > { %7791 = vrsqrt.f32 %v5981_v24  ;;  %6601 = vmax.xlane.f32.xlu1 %v6600_v22  ;;  %v6435_v62 = vmax.f32 %v6403_v19, 0.0  ;;  %vm6270_vm2 = vmor %vm6268_vm15, %vm6269_vm13  ;;  %vm6278_vm4 = vweird.f32 %v5981_v24 }
 0xbde   : > { %v6261_v32 = vsel %vm6260_vm0, %v7788_v9, %v6257_v48  ;;  %v6264_v49 = vmul.f32 %v7790_v20, %v6263_v23 }
 0xbdf   : > { %6553 = vmatmul.f32.gmra.mxu3 %v6435_v62  ;;  %v6338_v52 = vmul.f32 %v6261_v32, %v12402_v7 }
 0xbe0   : > { %v6265_v50 = vmul.f32 0.5, %v6264_v49 }
 0xbe1   : > { %v6506_v43 = vpop.f32.mrf.mxu3  ;;  %v6371_v30 = vmul.f32 %v12340_v29, %v6338_v52 }
 0xbe2   : > { %v6266_v28 = vsub.f32 1.5, %v6265_v50  ;;  %v5983_v18 = vpop.f32.mrf.mxu2  ;;  %v12538_v47 = vadd.f32 %v12459_v31, %v6506_v43 }
 0xbe3   : > { %v7792_v15 = vpop.eup %7791  ;;  %v5984_v1 = vadd.f32 1e-05, %v5983_v18  ;;  %v6404_v37 = vadd.f32 %v12344_v61, %v6371_v30 }
 0xbe4   : > { %v6267_v54 = vmul.f32 %v7790_v20, %v6266_v28  ;;  %v6273_v46 = vmul.f32 %v7792_v15, %v5981_v24  ;;  %v6603_v7 = vsel %vm6575_vm14, %v12538_v47, -inf  ;;  %vm6279_vm3 = vweird.f32 %v7792_v15 }
 0xbe5   : > { %7793 = vrsqrt.f32 %v5984_v1  ;;  %6604 = vmax.xlane.f32.xlu2 %v6603_v7  ;;  %v6436_v35 = vmax.f32 %v6404_v37, 0.0  ;;  %vm6280_vm5 = vmor %vm6278_vm4, %vm6279_vm3  ;;  %vm6288_vm7 = vweird.f32 %v5984_v1 }
 0xbe6   : > { %v6271_v14 = vsel %vm6270_vm2, %v7790_v20, %v6267_v54  ;;  %v6274_v39 = vmul.f32 %v7792_v15, %v6273_v46 }
 0xbe7   : > { %6556 = vmatmul.f32.gmra.mxu3 %v6436_v35  ;;  %v6339_v0 = vmul.f32 %v6271_v14, %v12410_v33 }
 0xbe8   : > { %v6275_v63 = vmul.f32 0.5, %v6274_v39 }
 0xbe9   : > { %v6509_v10 = vpop.f32.mrf.mxu3  ;;  %v6372_v8 = vmul.f32 %v12340_v29, %v6339_v0 }
 0xbea   : > { %v6276_v25 = vsub.f32 1.5, %v6275_v63  ;;  %v5986_v55 = vpop.f32.mrf.mxu2  ;;  %v12546_v5 = vadd.f32 %v12459_v31, %v6509_v10 }
 0xbeb   : > { %v7794_v9 = vpop.eup %7793  ;;  %v5987_v6 = vadd.f32 1e-05, %v5986_v55  ;;  %v6405_v3 = vadd.f32 %v12344_v61, %v6372_v8 }
 0xbec   : > { %v6277_v17 = vmul.f32 %v7792_v15, %v6276_v25  ;;  %v6283_v21 = vmul.f32 %v7794_v9, %v5984_v1  ;;  %v6606_v33 = vsel %vm6575_vm14, %v12546_v5, -inf  ;;  %vm6289_vm6 = vweird.f32 %v7794_v9 }
 0xbed   : > { %7795 = vrsqrt.f32 %v5987_v6  ;;  %6607 = vmax.xlane.f32.xlu0 %v6606_v33  ;;  %v6437_v27 = vmax.f32 %v6405_v3, 0.0  ;;  %vm6290_vm1 = vmor %vm6288_vm7, %vm6289_vm6  ;;  %vm6298_vm9 = vweird.f32 %v5987_v6 }
 0xbee   : > { %v6281_v58 = vsel %vm6280_vm5, %v7792_v15, %v6277_v17  ;;  %v6284_v26 = vmul.f32 %v7794_v9, %v6283_v21 }
 0xbef   : > { %6559 = vmatmul.f32.gmra.mxu3 %v6437_v27  ;;  %v6340_v59 = vmul.f32 %v6281_v58, %v12418_v56 }
 0xbf0   : > { %v6285_v11 = vmul.f32 0.5, %v6284_v26 }
 0xbf1   : > { %v6512_v34 = vpop.f32.mrf.mxu3  ;;  %v6373_v41 = vmul.f32 %v12340_v29, %v6340_v59 }
 0xbf2   : > { %v6286_v13 = vsub.f32 1.5, %v6285_v11  ;;  %v5989_v2 = vpop.f32.mrf.mxu2  ;;  %v12554_v44 = vadd.f32 %v12459_v31, %v6512_v34 }
 0xbf3   : > { %v7796_v20 = vpop.eup %7795  ;;  %v5990_v24 = vadd.f32 1e-05, %v5989_v2  ;;  %v6406_v19 = vadd.f32 %v12344_v61, %v6373_v41 }
 0xbf4   : > { %v6287_v48 = vmul.f32 %v7794_v9, %v6286_v13  ;;  %v6293_v23 = vmul.f32 %v7796_v20, %v5987_v6  ;;  %v6609_v56 = vsel %vm6575_vm14, %v12554_v44, -inf  ;;  %vm6299_vm8 = vweird.f32 %v7796_v20 }
 0xbf5   : > { %7797 = vrsqrt.f32 %v5990_v24  ;;  %6610 = vmax.xlane.f32.xlu1 %v6609_v56  ;;  %v6438_v22 = vmax.f32 %v6406_v19, 0.0  ;;  %vm6300_vm10 = vmor %vm6298_vm9, %vm6299_vm8  ;;  %vm6308_vm12 = vweird.f32 %v5990_v24 }
 0xbf6   : > { %v6291_v62 = vsel %vm6290_vm1, %v7794_v9, %v6287_v48  ;;  %v6294_v32 = vmul.f32 %v7796_v20, %v6293_v23 }
 0xbf7   : > { %6562 = vmatmul.f32.gmra.mxu3 %v6438_v22  ;;  %v6341_v49 = vmul.f32 %v6291_v62, %v12426_v60 }
 0xbf8   : > { %v6295_v52 = vmul.f32 0.5, %v6294_v32 }
 0xbf9   : > { %v6515_v50 = vpop.f32.mrf.mxu3  ;;  %v6374_v43 = vmul.f32 %v12340_v29, %v6341_v49 }
 0xbfa   : > { %v6296_v30 = vsub.f32 1.5, %v6295_v52  ;;  %v12562_v28 = vadd.f32 %v12459_v31, %v6515_v50 }
 0xbfb   : > { %v7798_v18 = vpop.eup %7797  ;;  %v6407_v15 = vadd.f32 %v12344_v61, %v6374_v43 }
 0xbfc   : > { %v6297_v1 = vmul.f32 %v7796_v20, %v6296_v30  ;;  %v6303_v37 = vmul.f32 %v7798_v18, %v5990_v24  ;;  %v6612_v54 = vsel %vm6575_vm14, %v12562_v28, -inf  ;;  %vm6309_vm11 = vweird.f32 %v7798_v18 }
 0xbfd   : > { %6613 = vmax.xlane.f32.xlu2 %v6612_v54  ;;  %v6439_v60 = vmax.f32 %v6407_v15, 0.0  ;;  %vm6310_vm0 = vmor %vm6308_vm12, %vm6309_vm11 }
 0xbfe   : > { %v6301_v46 = vsel %vm6300_vm10, %v7796_v20, %v6297_v1  ;;  %v6304_v7 = vmul.f32 %v7798_v18, %v6303_v37 }
 0xbff   : > { %6565 = vmatmul.f32.gmra.mxu3 %v6439_v60  ;;  %v6342_v35 = vmul.f32 %v6301_v46, %v12434_v38 }
 0xc00   : > { %v6305_v14 = vmul.f32 0.5, %v6304_v7 }
 0xc01   : > { %v6518_v39 = vpop.f32.mrf.mxu3  ;;  %v6375_v0 = vmul.f32 %v12340_v29, %v6342_v35 }
 0xc02   : > { %v6306_v63 = vsub.f32 1.5, %v6305_v14  ;;  %v12570_v10 = vadd.f32 %v12459_v31, %v6518_v39 }
 0xc03   : > { %v6408_v8 = vadd.f32 %v12344_v61, %v6375_v0 }
 0xc04   : > { %v6307_v25 = vmul.f32 %v7798_v18, %v6306_v63  ;;  %v6615_v55 = vsel %vm6575_vm14, %v12570_v10, -inf }
 0xc05   : > { %6616 = vmax.xlane.f32.xlu0 %v6615_v55  ;;  %v6440_v9 = vmax.f32 %v6408_v8, 0.0 }
 0xc06   : > { %v6311_v38 = vsel %vm6310_vm0, %v7798_v18, %v6307_v25 }
 0xc07   : > { %6568 = vmatmul.f32.gmra.mxu3 %v6440_v9  ;;  %v6343_v6 = vmul.f32 %v6311_v38, %v12442_v51 }
 0xc09   : > { %v6521_v3 = vpop.f32.mrf.mxu3  ;;  %v6376_v17 = vmul.f32 %v12340_v29, %v6343_v6 }
 0xc0a   : > { %v12578_v21 = vadd.f32 %v12459_v31, %v6521_v3  ;;  %v6578_v33 = vpop.xlane.xlu2 %6577 }
 0xc0b   : > { %v6672_v27 = vsub.f32 %v12464_v4, %v6578_v33  ;;  %v6409_v58 = vadd.f32 %v12344_v61, %v6376_v17 }
 0xc0c   : > { %v6618_v26 = vsel %vm6575_vm14, %v12578_v21, -inf }
 0xc0d   : > { %v6704_v59 = vmul.f32 1.442695, %v6672_v27  ;;  %6619 = vmax.xlane.f32.xlu1 %v6618_v26  ;;  %v6441_v11 = vmax.f32 %v6409_v58, 0.0 }
 0xc0f   : > { %7799 = vpow2.f32 %v6704_v59  ;;  %6571 = vmatmul.f32.gmra.mxu3 %v6441_v11 }
 0xc11   : > { %v6524_v51 = vpop.f32.mrf.mxu3 }
 0xc12   : > { %v12585_v34 = vadd.f32 %v12459_v31, %v6524_v51 }
 0xc14   : > { %v6621_v41 = vsel %vm6575_vm14, %v12585_v34, -inf }
 0xc15   : > { %v12587_v29 = vpop.eup %7799  ;;  %6622 = vmax.xlane.f32.xlu2 %v6621_v41 }
 0xc16   : > { %v6768_v61 = vsel %vm6575_vm14, %v12587_v29, 0.0 }
 0xc17   : > { %6769 = vadd.xlane.f32.xlu1 %v6768_v61 }
 0xc18   : > { %v6581_v4 = vpop.xlane.xlu0 %6580 }
 0xc19   : > { %v6673_v13 = vsub.f32 %v12474_v40, %v6581_v4 }
 0xc1a   : > { %v6527_v2 = vpop.f32.mrf.mxu3 }
 0xc1b   : > { %v6706_v20 = vmul.f32 1.442695, %v6673_v13  ;;  %v12595_v24 = vadd.f32 %v12459_v31, %v6527_v2 }
 0xc1d   : > { %7801 = vpow2.f32 %v6706_v20  ;;  %v6624_v19 = vsel %vm6575_vm14, %v12595_v24, -inf }
 0xc1e   : > { %6625 = vmax.xlane.f32.xlu0 %v6624_v19 }
 0xc20   : > { %v6584_v48 = vpop.xlane.xlu1 %6583 }
 0xc21   : > { %v6674_v23 = vsub.f32 %v12482_v53, %v6584_v48 }
 0xc22   : > { %v6530_v56 = vpop.f32.mrf.mxu3 }
 0xc23   : > { %v12600_v22 = vpop.eup %7801  ;;  %v6708_v62 = vmul.f32 1.442695, %v6674_v23  ;;  %v12603_v32 = vadd.f32 %v12459_v31, %v6530_v56 }
 0xc24   : > { %v6771_v40 = vsel %vm6575_vm14, %v12600_v22, 0.0 }
 0xc25   : > { %7803 = vpow2.f32 %v6708_v62  ;;  %6772 = vadd.xlane.f32.xlu2 %v6771_v40  ;;  %v6627_v49 = vsel %vm6575_vm14, %v12603_v32, -inf }
 0xc26   : > { %6628 = vmax.xlane.f32.xlu1 %v6627_v49 }
 0xc28   : > { %v6587_v52 = vpop.xlane.xlu2 %6586 }
 0xc29   : > { %v6675_v50 = vsub.f32 %v12490_v45, %v6587_v52 }
 0xc2a   : > { %v6533_v53 = vpop.f32.mrf.mxu3 }
 0xc2b   : > { %v12610_v43 = vpop.eup %7803  ;;  %v6710_v30 = vmul.f32 1.442695, %v6675_v50  ;;  %v12613_v18 = vadd.f32 %v12459_v31, %v6533_v53 }
 0xc2c   : > { %v6774_v15 = vsel %vm6575_vm14, %v12610_v43, 0.0 }
 0xc2d   : > { %7805 = vpow2.f32 %v6710_v30  ;;  %6775 = vadd.xlane.f32.xlu0 %v6774_v15  ;;  %v6630_v1 = vsel %vm6575_vm14, %v12613_v18, -inf }
 0xc2e   : > { %6631 = vmax.xlane.f32.xlu2 %v6630_v1 }
 0xc30   : > { %v6590_v37 = vpop.xlane.xlu0 %6589 }
 0xc31   : > { %v6676_v54 = vsub.f32 %v12498_v42, %v6590_v37 }
 0xc32   : > { %v6536_v45 = vpop.f32.mrf.mxu3 }
 0xc33   : > { %v12620_v60 = vpop.eup %7805  ;;  %v6712_v46 = vmul.f32 1.442695, %v6676_v54  ;;  %v12623_v7 = vadd.f32 %v12459_v31, %v6536_v45 }
 0xc34   : > { %v6777_v35 = vsel %vm6575_vm14, %v12620_v60, 0.0 }
 0xc35   : > { %7807 = vpow2.f32 %v6712_v46  ;;  %6778 = vadd.xlane.f32.xlu1 %v6777_v35  ;;  %v6633_v14 = vsel %vm6575_vm14, %v12623_v7, -inf }
 0xc36   : > { %6634 = vmax.xlane.f32.xlu0 %v6633_v14 }
 0xc38   : > { %v6593_v39 = vpop.xlane.xlu1 %6592 }
 0xc39   : > { %v6677_v0 = vsub.f32 %v12506_v36, %v6593_v39 }
 0xc3a   : > { %v6539_v42 = vpop.f32.mrf.mxu3 }
 0xc3b   : > { %v12630_v63 = vpop.eup %7807  ;;  %v6714_v8 = vmul.f32 1.442695, %v6677_v0  ;;  %v12633_v25 = vadd.f32 %v12459_v31, %v6539_v42 }
 0xc3c   : > { %v6780_v55 = vsel %vm6575_vm14, %v12630_v63, 0.0 }
 0xc3d   : > { %7809 = vpow2.f32 %v6714_v8  ;;  %6781 = vadd.xlane.f32.xlu2 %v6780_v55  ;;  %v6636_v9 = vsel %vm6575_vm14, %v12633_v25, -inf }
 0xc3e   : > { %6637 = vmax.xlane.f32.xlu1 %v6636_v9 }
 0xc40   : > { %v6596_v38 = vpop.xlane.xlu2 %6595 }
 0xc41   : > { %v6678_v6 = vsub.f32 %v12514_v57, %v6596_v38 }
 0xc42   : > { %v6542_v36 = vpop.f32.mrf.mxu3 }
 0xc43   : > { %v12640_v3 = vpop.eup %7809  ;;  %v6716_v17 = vmul.f32 1.442695, %v6678_v6  ;;  %v12643_v33 = vadd.f32 %v12459_v31, %v6542_v36 }
 0xc44   : > { %v6783_v27 = vsel %vm6575_vm14, %v12640_v3, 0.0 }
 0xc45   : > { %7811 = vpow2.f32 %v6716_v17  ;;  %6784 = vadd.xlane.f32.xlu0 %v6783_v27  ;;  %v6639_v58 = vsel %vm6575_vm14, %v12643_v33, -inf }
 0xc46   : > { %6640 = vmax.xlane.f32.xlu2 %v6639_v58 }
 0xc48   : > { %v6599_v26 = vpop.xlane.xlu0 %6598 }
 0xc49   : > { %v6679_v59 = vsub.f32 %v12522_v12, %v6599_v26 }
 0xc4a   : > { %v6545_v57 = vpop.f32.mrf.mxu3 }
 0xc4b   : > { %v12650_v11 = vpop.eup %7811  ;;  %v6718_v51 = vmul.f32 1.442695, %v6679_v59  ;;  %v12653_v41 = vadd.f32 %v12459_v31, %v6545_v57 }
 0xc4c   : > { %v6786_v61 = vsel %vm6575_vm14, %v12650_v11, 0.0 }
 0xc4d   : > { %7813 = vpow2.f32 %v6718_v51  ;;  %6787 = vadd.xlane.f32.xlu1 %v6786_v61  ;;  %v6642_v4 = vsel %vm6575_vm14, %v12653_v41, -inf }
 0xc4e   : > { %6643 = vmax.xlane.f32.xlu0 %v6642_v4 }
 0xc50   : > { %v6602_v13 = vpop.xlane.xlu1 %6601 }
 0xc51   : > { %v6680_v2 = vsub.f32 %v12530_v16, %v6602_v13 }
 0xc52   : > { %v6548_v12 = vpop.f32.mrf.mxu3 }
 0xc53   : > { %v12660_v20 = vpop.eup %7813  ;;  %v6720_v19 = vmul.f32 1.442695, %v6680_v2  ;;  %v12663_v48 = vadd.f32 %v12459_v31, %v6548_v12 }
 0xc54   : > { %v6789_v23 = vsel %vm6575_vm14, %v12660_v20, 0.0 }
 0xc55   : > { %7815 = vpow2.f32 %v6720_v19  ;;  %6790 = vadd.xlane.f32.xlu2 %v6789_v23  ;;  %v6645_v56 = vsel %vm6575_vm14, %v12663_v48, -inf }
 0xc56   : > { %6646 = vmax.xlane.f32.xlu1 %v6645_v56 }
 0xc58   : > { %v6605_v62 = vpop.xlane.xlu2 %6604 }
 0xc59   : > { %v6681_v40 = vsub.f32 %v12538_v47, %v6605_v62 }
 0xc5a   : > { %v6551_v16 = vpop.f32.mrf.mxu3 }
 0xc5b   : > { %v12670_v49 = vpop.eup %7815  ;;  %v6722_v52 = vmul.f32 1.442695, %v6681_v40  ;;  %v12673_v50 = vadd.f32 %v12459_v31, %v6551_v16 }
 0xc5c   : > { %v6792_v53 = vsel %vm6575_vm14, %v12670_v49, 0.0 }
 0xc5d   : > { %7817 = vpow2.f32 %v6722_v52  ;;  %6793 = vadd.xlane.f32.xlu0 %v6792_v53  ;;  %v6648_v30 = vsel %vm6575_vm14, %v12673_v50, -inf }
 0xc5e   : > { %6649 = vmax.xlane.f32.xlu2 %v6648_v30 }
 0xc60   : > { %v6608_v15 = vpop.xlane.xlu0 %6607 }
 0xc61   : > { %v6682_v1 = vsub.f32 %v12546_v5, %v6608_v15 }
 0xc62   : > { %v6554_v47 = vpop.f32.mrf.mxu3 }
 0xc63   : > { %v12680_v37 = vpop.eup %7817  ;;  %v6724_v54 = vmul.f32 1.442695, %v6682_v1  ;;  %v12683_v45 = vadd.f32 %v12459_v31, %v6554_v47 }
 0xc64   : > { %v6795_v46 = vsel %vm6575_vm14, %v12680_v37, 0.0 }
 0xc65   : > { %7819 = vpow2.f32 %v6724_v54  ;;  %6796 = vadd.xlane.f32.xlu1 %v6795_v46  ;;  %v6651_v35 = vsel %vm6575_vm14, %v12683_v45, -inf }
 0xc66   : > { %6652 = vmax.xlane.f32.xlu0 %v6651_v35 }
 0xc68   : > { %v6611_v6 = vpop.xlane.xlu1 %6610 }
 0xc69   : > { %v6683_v40 = vsub.f32 %v12554_v44, %v6611_v6 }
 0xc6a   : > { %v6557_v14 = vpop.f32.mrf.mxu3 }
 0xc6b   : > { %v12689_v39 = vpop.eup %7819  ;;  %v12692_v5 = vadd.f32 %v12459_v31, %v6557_v14 }
 0xc6c   : > { %v6798_v0 = vsel %vm6575_vm14, %v12689_v39, 0.0 }
 0xc6d   : > { %6799 = vadd.xlane.f32.xlu2 %v6798_v0  ;;  %v6654_v42 = vsel %vm6575_vm14, %v12692_v5, -inf }
 0xc6e   : > { %6655 = vmax.xlane.f32.xlu1 %v6654_v42 }
 0xc70   : > { %v6614_v38 = vpop.xlane.xlu2 %6613 }
 0xc71   : > { %v6684_v27 = vsub.f32 %v12562_v28, %v6614_v38 }
 0xc72   : > { %v6560_v8 = vpop.f32.mrf.mxu3 }
 0xc73   : > { %v12699_v55 = vadd.f32 %v12459_v31, %v6560_v8  ;;  %v6728_v26 = vmul.f32 1.442695, %v6684_v27 }
 0xc75   : > { %v6657_v9 = vsel %vm6575_vm14, %v12699_v55, -inf  ;;  %7821 = vpow2.f32 %v6728_v26 }
 0xc76   : > { %6658 = vmax.xlane.f32.xlu2 %v6657_v9 }
 0xc78   : > { %v6617_v59 = vpop.xlane.xlu0 %6616 }
 0xc79   : > { %v6685_v4 = vsub.f32 %v12570_v10, %v6617_v59 }
 0xc7a   : > { %v6563_v36 = vpop.f32.mrf.mxu3 }
 0xc7b   : > { %v12704_v17 = vadd.f32 %v12459_v31, %v6563_v36  ;;  %v6730_v2 = vmul.f32 1.442695, %v6685_v4  ;;  %v12715_v12 = vpop.eup %7821 }
 0xc7c   : > { %v6804_v16 = vsel %vm6575_vm14, %v12715_v12, 0.0 }
 0xc7d   : > { %v6660_v58 = vsel %vm6575_vm14, %v12704_v17, -inf }
 0xc7e   : > { %6661 = vmax.xlane.f32.xlu0 %v6660_v58 }
 0xc80   : > { %v6620_v57 = vpop.xlane.xlu1 %6619 }
 0xc81   : > { %v6686_v14 = vsub.f32 %v12578_v21, %v6620_v57 }
 0xc82   : > { %v6566_v51 = vpop.f32.mrf.mxu3 }
 0xc83   : > { %v12710_v61 = vadd.f32 %v12459_v31, %v6566_v51  ;;  %v6732_v42 = vmul.f32 1.442695, %v6686_v14 }
 0xc85   : > { %v6663_v13 = vsel %vm6575_vm14, %v12710_v61, -inf }
 0xc86   : > { %6664 = vmax.xlane.f32.xlu1 %v6663_v13 }
 0xc88   : > { %v6623_v28 = vpop.xlane.xlu2 %6622 }
 0xc89   : > { %v6687_v19 = vsub.f32 %v12585_v34, %v6623_v28  ;;  %v6726_v34 = vmul.f32 1.442695, %v6683_v40 }
 0xc8a   : > { %v6569_v23 = vpop.f32.mrf.mxu3  ;;  %v6770_v56 = vpop.xlane.xlu1 %6769 }
 0xc8b   : > { %v12719_v62 = vadd.f32 %v12459_v31, %v6569_v23  ;;  %7823 = vrcp.f32 %v6770_v56  ;;  %v6734_v10 = vmul.f32 1.442695, %v6687_v19 }
 0xc8c   : > { %7825 = vpow2.f32 %v6730_v2 }
 0xc8d   : > { %v6666_v52 = vsel %vm6575_vm14, %v12719_v62, -inf  ;;  %7827 = vpow2.f32 %v6734_v10 }
 0xc8e   : > { %6805 = vadd.xlane.f32.xlu1 %v6804_v16  ;;  %6667 = vmax.xlane.f32.xlu2 %v6666_v52  ;;  %7829 = vpow2.f32 %v6726_v34 }
 0xc91   : > { %v7824_v53 = vpop.eup %7823  ;;  %v6626_v44 = vpop.xlane.xlu0 %6625 }
 0xc92   : > { %v12733_v30 = vpop.eup %7825  ;;  %v6896_v15 = vmul.f32 %v7824_v53, %v12587_v29  ;;  %v6688_v1 = vsub.f32 %v12595_v24, %v6626_v44  ;;  %v6572_v47 = vpop.f32.mrf.mxu3 }
 0xc93   : > { %v12738_v54 = vadd.f32 %v12459_v31, %v6572_v47  ;;  %v12740_v46 = vpop.eup %7827  ;;  %v6807_v29 = vsel %vm6575_vm14, %v12733_v30, 0.0 }
 0xc94   : > { %6928 = vst.msk [vmem:[%s12731_s24] sm:$0xff] %vm6575_vm14, %v6896_v15  ;;  %v6736_v35 = vmul.f32 1.442695, %v6688_v1  ;;  %v6813_v0 = vsel %vm6575_vm14, %v12740_v46, 0.0  ;;  %v12751_v8 = vpop.eup %7829 }
 0xc95   : > { %v6669_v24 = vsel %vm6575_vm14, %v12738_v54, -inf  ;;  %v6801_v36 = vsel %vm6575_vm14, %v12751_v8, 0.0 }
 0xc96   : > { %7831 = vpow2.f32 %v6736_v35  ;;  %6814 = vadd.xlane.f32.xlu1 %v6813_v0  ;;  %6808 = vadd.xlane.f32.xlu2 %v6807_v29 }
 0xc97   : > { %6670 = vmax.xlane.f32.xlu0 %v6669_v24 }
 0xc98   : > { %v6773_v31 = vpop.xlane.xlu2 %6772 }
 0xc99   : > { %7833 = vrcp.f32 %v6773_v31  ;;  %v6629_v21 = vpop.xlane.xlu1 %6628 }
 0xc9a   : > { %7835 = vpow2.f32 %v6732_v42  ;;  %v6689_v38 = vsub.f32 %v12603_v32, %v6629_v21 }
 0xc9c   : > { %v12753_v9 = vpop.eup %7831  ;;  %v6738_v59 = vmul.f32 1.442695, %v6689_v38 }
 0xc9d   : > { %v6816_v6 = vsel %vm6575_vm14, %v12753_v9, 0.0 }
 0xc9e   : > { %6817 = vadd.xlane.f32.xlu2 %v6816_v6 }
 0xc9f   : > { %v7834_v27 = vpop.eup %7833  ;;  %6802 = vadd.xlane.f32.xlu0 %v6801_v36 }
 0xca0   : > { %v6897_v58 = vmul.f32 %v7834_v27, %v12600_v22  ;;  %v6776_v26 = vpop.xlane.xlu0 %6775  ;;  %v12764_v51 = vpop.eup %7835 }
 0xca1   : > { %7837 = vrcp.f32 %v6776_v26  ;;  %v6632_v57 = vpop.xlane.xlu2 %6631  ;;  %v6810_v13 = vsel %vm6575_vm14, %v12764_v51, 0.0 }
 0xca2   : > { %6929 = vst.msk [vmem:[%s12731_s24 + $0x8] sm:$0xff] %vm6575_vm14, %v6897_v58  ;;  %v6690_v32 = vsub.f32 %v12613_v18, %v6632_v57  ;;  %7839 = vpow2.f32 %v6738_v59 }
 0xca4   : > { %v6740_v4 = vmul.f32 1.442695, %v6690_v32 }
 0xca6   : > { %7841 = vpow2.f32 %v6740_v4 }
 0xca7   : > { %v7838_v2 = vpop.eup %7837  ;;  %6811 = vadd.xlane.f32.xlu0 %v6810_v13 }
 0xca8   : > { %v6898_v22 = vmul.f32 %v7838_v2, %v12610_v43  ;;  %v6779_v28 = vpop.xlane.xlu1 %6778  ;;  %v12772_v23 = vpop.eup %7839 }
 0xca9   : > { %7843 = vrcp.f32 %v6779_v28  ;;  %v6635_v19 = vpop.xlane.xlu0 %6634  ;;  %v6819_v43 = vsel %vm6575_vm14, %v12772_v23, 0.0 }
 0xcaa   : > { %6930 = vst.msk [vmem:[%s12731_s24 + $0x10] sm:$0xff] %vm6575_vm14, %v6898_v22  ;;  %v6691_v18 = vsub.f32 %v12623_v7, %v6635_v19 }
 0xcac   : > { %v12774_v56 = vpop.eup %7841  ;;  %v6742_v40 = vmul.f32 1.442695, %v6691_v18 }
 0xcad   : > { %v6822_v10 = vsel %vm6575_vm14, %v12774_v56, 0.0 }
 0xcae   : > { %7845 = vpow2.f32 %v6742_v40  ;;  %6823 = vadd.xlane.f32.xlu1 %v6822_v10 }
 0xcaf   : > { %v7844_v16 = vpop.eup %7843  ;;  %6820 = vadd.xlane.f32.xlu0 %v6819_v43 }
 0xcb0   : > { %v6899_v52 = vmul.f32 %v7844_v16, %v12620_v60  ;;  %v6782_v34 = vpop.xlane.xlu2 %6781 }
 0xcb1   : > { %7847 = vrcp.f32 %v6782_v34  ;;  %v6638_v7 = vpop.xlane.xlu1 %6637 }
 0xcb2   : > { %6931 = vst.msk [vmem:[%s12731_s24 + $0x18] sm:$0xff] %vm6575_vm14, %v6899_v52  ;;  %v6692_v53 = vsub.f32 %v12633_v25, %v6638_v7 }
 0xcb4   : > { %v12784_v44 = vpop.eup %7845  ;;  %v6744_v15 = vmul.f32 1.442695, %v6692_v53 }
 0xcb5   : > { %v6825_v1 = vsel %vm6575_vm14, %v12784_v44, 0.0 }
 0xcb6   : > { %7849 = vpow2.f32 %v6744_v15  ;;  %6826 = vadd.xlane.f32.xlu2 %v6825_v1 }
 0xcb7   : > { %v7848_v47 = vpop.eup %7847 }
 0xcb8   : > { %v6900_v35 = vmul.f32 %v7848_v47, %v12630_v63  ;;  %v6785_v60 = vpop.xlane.xlu0 %6784 }
 0xcb9   : > { %7851 = vrcp.f32 %v6785_v60  ;;  %v6641_v14 = vpop.xlane.xlu2 %6640 }
 0xcba   : > { %6932 = vst.msk [vmem:[%s12731_s24 + $0x20] sm:$0xff] %vm6575_vm14, %v6900_v35  ;;  %v6693_v0 = vsub.f32 %v12643_v33, %v6641_v14 }
 0xcbc   : > { %v12792_v25 = vpop.eup %7849  ;;  %v6746_v29 = vmul.f32 1.442695, %v6693_v0 }
 0xcbd   : > { %v6828_v24 = vsel %vm6575_vm14, %v12792_v25, 0.0 }
 0xcbe   : > { %7853 = vpow2.f32 %v6746_v29  ;;  %6829 = vadd.xlane.f32.xlu0 %v6828_v24 }
 0xcbf   : > { %v7852_v31 = vpop.eup %7851 }
 0xcc0   : > { %v6901_v42 = vmul.f32 %v7852_v31, %v12640_v3  ;;  %v6788_v63 = vpop.xlane.xlu1 %6787 }
 0xcc1   : > { %7855 = vrcp.f32 %v6788_v63  ;;  %v6644_v21 = vpop.xlane.xlu0 %6643 }
 0xcc2   : > { %6933 = vst.msk [vmem:[%s12731_s24 + $0x28] sm:$0xff] %vm6575_vm14, %v6901_v42  ;;  %v6694_v38 = vsub.f32 %v12653_v41, %v6644_v21 }
 0xcc4   : > { %v12800_v33 = vpop.eup %7853  ;;  %v6748_v6 = vmul.f32 1.442695, %v6694_v38 }
 0xcc5   : > { %v6831_v36 = vsel %vm6575_vm14, %v12800_v33, 0.0 }
 0xcc6   : > { %7857 = vpow2.f32 %v6748_v6  ;;  %6832 = vadd.xlane.f32.xlu1 %v6831_v36 }
 0xcc7   : > { %v7856_v27 = vpop.eup %7855 }
 0xcc8   : > { %v6902_v58 = vmul.f32 %v7856_v27, %v12650_v11  ;;  %v6791_v3 = vpop.xlane.xlu2 %6790 }
 0xcc9   : > { %7859 = vrcp.f32 %v6791_v3  ;;  %v6647_v26 = vpop.xlane.xlu1 %6646 }
 0xcca   : > { %6934 = vst.msk [vmem:[%s12731_s24 + $0x30] sm:$0xff] %vm6575_vm14, %v6902_v58  ;;  %v6695_v59 = vsub.f32 %v12663_v48, %v6647_v26 }
 0xccc   : > { %v12808_v41 = vpop.eup %7857  ;;  %v6750_v57 = vmul.f32 1.442695, %v6695_v59 }
 0xccd   : > { %v6834_v32 = vsel %vm6575_vm14, %v12808_v41, 0.0 }
 0xcce   : > { %7861 = vpow2.f32 %v6750_v57  ;;  %6835 = vadd.xlane.f32.xlu2 %v6834_v32 }
 0xccf   : > { %v7860_v4 = vpop.eup %7859 }
 0xcd0   : > { %v6903_v13 = vmul.f32 %v7860_v4, %v12660_v20  ;;  %v6794_v11 = vpop.xlane.xlu0 %6793 }
 0xcd1   : > { %7863 = vrcp.f32 %v6794_v11  ;;  %v6650_v2 = vpop.xlane.xlu2 %6649 }
 0xcd2   : > { %6935 = vst.msk [vmem:[%s12731_s24 + $0x38] sm:$0xff] %vm6575_vm14, %v6903_v13  ;;  %v6696_v22 = vsub.f32 %v12673_v50, %v6650_v2 }
 0xcd4   : > { %v12816_v48 = vpop.eup %7861  ;;  %v6752_v28 = vmul.f32 1.442695, %v6696_v22 }
 0xcd5   : > { %v6837_v19 = vsel %vm6575_vm14, %v12816_v48, 0.0 }
 0xcd6   : > { %7865 = vpow2.f32 %v6752_v28  ;;  %6838 = vadd.xlane.f32.xlu0 %v6837_v19 }
 0xcd7   : > { %v7864_v18 = vpop.eup %7863 }
 0xcd8   : > { %v6904_v40 = vmul.f32 %v7864_v18, %v12670_v49  ;;  %v6797_v20 = vpop.xlane.xlu1 %6796 }
 0xcd9   : > { %7867 = vrcp.f32 %v6797_v20  ;;  %v6653_v10 = vpop.xlane.xlu0 %6652 }
 0xcda   : > { %6936 = vst.msk [vmem:[%s12731_s24 + $0x40] sm:$0xff] %vm6575_vm14, %v6904_v40  ;;  %v6697_v43 = vsub.f32 %v12683_v45, %v6653_v10 }
 0xcdc   : > { %v12824_v50 = vpop.eup %7865  ;;  %v6754_v16 = vmul.f32 1.442695, %v6697_v43 }
 0xcdd   : > { %v6840_v52 = vsel %vm6575_vm14, %v12824_v50, 0.0 }
 0xcde   : > { %7869 = vpow2.f32 %v6754_v16  ;;  %6841 = vadd.xlane.f32.xlu1 %v6840_v52 }
 0xcdf   : > { %v7868_v34 = vpop.eup %7867 }
 0xce0   : > { %v6905_v49 = vmul.f32 %v7868_v34, %v12680_v37  ;;  %v6800_v7 = vpop.xlane.xlu2 %6799 }
 0xce1   : > { %7871 = vrcp.f32 %v6800_v7  ;;  %v6656_v53 = vpop.xlane.xlu1 %6655 }
 0xce2   : > { %6937 = vst.msk [vmem:[%s12731_s24 + $0x48] sm:$0xff] %vm6575_vm14, %v6905_v49  ;;  %v6698_v15 = vsub.f32 %v12692_v5, %v6656_v53 }
 0xce4   : > { %v12832_v45 = vpop.eup %7869  ;;  %v6756_v1 = vmul.f32 1.442695, %v6698_v15 }
 0xce5   : > { %v6843_v47 = vsel %vm6575_vm14, %v12832_v45, 0.0 }
 0xce6   : > { %7873 = vpow2.f32 %v6756_v1  ;;  %6844 = vadd.xlane.f32.xlu2 %v6843_v47 }
 0xce7   : > { %v7872_v35 = vpop.eup %7871 }
 0xce8   : > { %v6906_v60 = vmul.f32 %v7872_v35, %v12689_v39 }
 0xce9   : > { %v6659_v14 = vpop.xlane.xlu2 %6658 }
 0xcea   : > { %6938 = vst.msk [vmem:[%s12731_s24 + $0x50] sm:$0xff] %vm6575_vm14, %v6906_v60  ;;  %v6699_v37 = vsub.f32 %v12699_v55, %v6659_v14 }
 0xcec   : > { %v12840_v0 = vpop.eup %7873  ;;  %v6758_v29 = vmul.f32 1.442695, %v6699_v37 }
 0xced   : > { %v6846_v5 = vsel %vm6575_vm14, %v12840_v0, 0.0 }
 0xcee   : > { %7875 = vpow2.f32 %v6758_v29  ;;  %6847 = vadd.xlane.f32.xlu0 %v6846_v5 }
 0xcf1   : > { %v6662_v24 = vpop.xlane.xlu0 %6661 }
 0xcf2   : > { %v6700_v31 = vsub.f32 %v12704_v17, %v6662_v24 }
 0xcf4   : > { %v12845_v42 = vpop.eup %7875  ;;  %v6760_v63 = vmul.f32 1.442695, %v6700_v31 }
 0xcf5   : > { %v6849_v39 = vsel %vm6575_vm14, %v12845_v42, 0.0 }
 0xcf6   : > { %7877 = vpow2.f32 %v6760_v63  ;;  %6850 = vadd.xlane.f32.xlu1 %v6849_v39 }
 0xcf9   : > { %v6665_v55 = vpop.xlane.xlu1 %6664 }
 0xcfa   : > { %v6701_v21 = vsub.f32 %v12710_v61, %v6665_v55 }
 0xcfc   : > { %v12850_v38 = vpop.eup %7877  ;;  %v6762_v6 = vmul.f32 1.442695, %v6701_v21 }
 0xcfd   : > { %v6852_v36 = vsel %vm6575_vm14, %v12850_v38, 0.0 }
 0xcfe   : > { %7879 = vpow2.f32 %v6762_v6  ;;  %6853 = vadd.xlane.f32.xlu2 %v6852_v36 }
 0xd01   : > { %v6806_v17 = vpop.xlane.xlu1 %6805  ;;  %v6668_v27 = vpop.xlane.xlu2 %6667 }
 0xd02   : > { %7881 = vrcp.f32 %v6806_v17  ;;  %v6702_v58 = vsub.f32 %v12719_v62, %v6668_v27 }
 0xd04   : > { %v12855_v3 = vpop.eup %7879  ;;  %v6764_v26 = vmul.f32 1.442695, %v6702_v58 }
 0xd05   : > { %v6855_v61 = vsel %vm6575_vm14, %v12855_v3, 0.0 }
 0xd06   : > { %7883 = vpow2.f32 %v6764_v26  ;;  %6856 = vadd.xlane.f32.xlu0 %v6855_v61 }
 0xd08   : > { %v7882_v59 = vpop.eup %7881 }
 0xd09   : > { %v6908_v57 = vmul.f32 %v7882_v59, %v12715_v12  ;;  %v6815_v32 = vpop.xlane.xlu1 %6814  ;;  %v6809_v4 = vpop.xlane.xlu2 %6808 }
 0xd0a   : > { %7885 = vrcp.f32 %v6815_v32  ;;  %v6671_v13 = vpop.xlane.xlu0 %6670 }
 0xd0b   : > { %6940 = vst.msk [vmem:[%s12731_s24 + $0x60] sm:$0xff] %vm6575_vm14, %v6908_v57  ;;  %7887 = vrcp.f32 %v6809_v4  ;;  %v6703_v62 = vsub.f32 %v12738_v54, %v6671_v13 }
 0xd0c   : > { %v12863_v11 = vpop.eup %7883 }
 0xd0d   : > { %v6766_v2 = vmul.f32 1.442695, %v6703_v62  ;;  %v6858_v22 = vsel %vm6575_vm14, %v12863_v11, 0.0 }
 0xd0e   : > { %6859 = vadd.xlane.f32.xlu1 %v6858_v22 }
 0xd0f   : > { %7889 = vpow2.f32 %v6766_v2 }
 0xd10   : > { %v7886_v12 = vpop.eup %7885 }
 0xd11   : > { %v7888_v28 = vpop.eup %7887  ;;  %v6911_v19 = vmul.f32 %v7886_v12, %v12740_v46  ;;  %v6818_v18 = vpop.xlane.xlu2 %6817 }
 0xd12   : > { %v6909_v54 = vmul.f32 %v7888_v28, %v12733_v30  ;;  %7891 = vrcp.f32 %v6818_v18  ;;  %v6803_v40 = vpop.xlane.xlu0 %6802 }
 0xd13   : > { %6943 = vst.msk [vmem:[%s12731_s24 + $0x78] sm:$0xff] %vm6575_vm14, %v6911_v19  ;;  %7893 = vrcp.f32 %v6803_v40 }
 0xd14   : > { %6941 = vst.msk [vmem:[%s12731_s24 + $0x68] sm:$0xff] %vm6575_vm14, %v6909_v54 }
 0xd15   : > { %v12878_v46 = vpop.eup %7889 }
 0xd16   : > { %v6861_v20 = vsel %vm6575_vm14, %v12878_v46, 0.0 }
 0xd17   : > { %8277 = shalt.err (!%p8274_p8)
}
 0xd18   : > { %s8347_s29 = smov 128   ;;  %s8348_s27 = smov 8   ;;  %6862 = vadd.xlane.f32.xlu2 %v6861_v20  ;;  %v7892_v30 = vpop.eup %7891 }
 0xd19   : > { %7309 = dma.vmem_to_hbm [thread:$0]  (%p8487_p5), %s6983_s7, 4096, %s6985_s25, %s6966_s1, %s8347_s29, %s8347_s29, %s8348_s27   ;;  %v7894_v10 = vpop.eup %7893  ;;  %v6912_v43 = vmul.f32 %v7892_v30, %v12753_v9 }
 0xd1a   : > { %v6907_v16 = vmul.f32 %v7894_v10, %v12751_v8  ;;  %v6812_v52 = vpop.xlane.xlu0 %6811 }
 0xd1b   : > { %6944 = vst.msk [vmem:[%s12731_s24 + $0x80] sm:$0xff] %vm6575_vm14, %v6912_v43  ;;  %7895 = vrcp.f32 %v6812_v52 }
 0xd1c   : > { %6939 = vst.msk [vmem:[%s12731_s24 + $0x58] sm:$0xff] %vm6575_vm14, %v6907_v16 }
 0xd21   : > { %v7896_v34 = vpop.eup %7895  ;;  %v6824_v49 = vpop.xlane.xlu1 %6823 }
 0xd22   : > { %v6910_v7 = vmul.f32 %v7896_v34, %v12764_v51  ;;  %7897 = vrcp.f32 %v6824_v49  ;;  %v6821_v53 = vpop.xlane.xlu0 %6820 }
 0xd23   : > { %7899 = vrcp.f32 %v6821_v53 }
 0xd24   : > { %6942 = vst.msk [vmem:[%s12731_s24 + $0x70] sm:$0xff] %vm6575_vm14, %v6910_v7 }
 0xd28   : > { %v7898_v9 = vpop.eup %7897 }
 0xd29   : > { %v7900_v8 = vpop.eup %7899  ;;  %v6914_v15 = vmul.f32 %v7898_v9, %v12774_v56  ;;  %v6827_v1 = vpop.xlane.xlu2 %6826 }
 0xd2a   : > { %v6913_v47 = vmul.f32 %v7900_v8, %v12772_v23  ;;  %7901 = vrcp.f32 %v6827_v1 }
 0xd2b   : > { %6946 = vst.msk [vmem:[%s12731_s24 + $0x90] sm:$0xff] %vm6575_vm14, %v6914_v15 }
 0xd2c   : > { %6945 = vst.msk [vmem:[%s12731_s24 + $0x88] sm:$0xff] %vm6575_vm14, %v6913_v47 }
 0xd30   : > { %v7902_v51 = vpop.eup %7901 }
 0xd31   : > { %v6915_v35 = vmul.f32 %v7902_v51, %v12784_v44  ;;  %v6830_v60 = vpop.xlane.xlu0 %6829 }
 0xd32   : > { %7903 = vrcp.f32 %v6830_v60 }
 0xd33   : > { %6947 = vst.msk [vmem:[%s12731_s24 + $0x98] sm:$0xff] %vm6575_vm14, %v6915_v35 }
 0xd38   : > { %v7904_v14 = vpop.eup %7903 }
 0xd39   : > { %v6916_v56 = vmul.f32 %v7904_v14, %v12792_v25  ;;  %v6833_v37 = vpop.xlane.xlu1 %6832 }
 0xd3a   : > { %7905 = vrcp.f32 %v6833_v37 }
 0xd3b   : > { %6948 = vst.msk [vmem:[%s12731_s24 + $0xa0] sm:$0xff] %vm6575_vm14, %v6916_v56 }
 0xd40   : > { %v7906_v23 = vpop.eup %7905 }
 0xd41   : > { %v6917_v29 = vmul.f32 %v7906_v23, %v12800_v33  ;;  %v6836_v5 = vpop.xlane.xlu2 %6835 }
 0xd42   : > { %7907 = vrcp.f32 %v6836_v5 }
 0xd43   : > { %6949 = vst.msk [vmem:[%s12731_s24 + $0xa8] sm:$0xff] %vm6575_vm14, %v6917_v29 }
 0xd48   : > { %v7908_v44 = vpop.eup %7907 }
 0xd49   : > { %v6918_v24 = vmul.f32 %v7908_v44, %v12808_v41  ;;  %v6839_v31 = vpop.xlane.xlu0 %6838 }
 0xd4a   : > { %7909 = vrcp.f32 %v6839_v31 }
 0xd4b   : > { %6950 = vst.msk [vmem:[%s12731_s24 + $0xb0] sm:$0xff] %vm6575_vm14, %v6918_v24 }
 0xd50   : > { %v7910_v25 = vpop.eup %7909 }
 0xd51   : > { %v6919_v63 = vmul.f32 %v7910_v25, %v12816_v48  ;;  %v6842_v39 = vpop.xlane.xlu1 %6841 }
 0xd52   : > { %7911 = vrcp.f32 %v6842_v39 }
 0xd53   : > { %6951 = vst.msk [vmem:[%s12731_s24 + $0xb8] sm:$0xff] %vm6575_vm14, %v6919_v63 }
 0xd58   : > { %v7912_v33 = vpop.eup %7911 }
 0xd59   : > { %v6920_v55 = vmul.f32 %v7912_v33, %v12824_v50  ;;  %v6845_v21 = vpop.xlane.xlu2 %6844 }
 0xd5a   : > { %7913 = vrcp.f32 %v6845_v21 }
 0xd5b   : > { %6952 = vst.msk [vmem:[%s12731_s24 + $0xc0] sm:$0xff] %vm6575_vm14, %v6920_v55 }
 0xd60   : > { %v7914_v41 = vpop.eup %7913 }
 0xd61   : > { %v6921_v6 = vmul.f32 %v7914_v41, %v12832_v45  ;;  %v6848_v36 = vpop.xlane.xlu0 %6847 }
 0xd62   : > { %7915 = vrcp.f32 %v6848_v36 }
 0xd63   : > { %6953 = vst.msk [vmem:[%s12731_s24 + $0xc8] sm:$0xff] %vm6575_vm14, %v6921_v6 }
 0xd68   : > { %v7916_v48 = vpop.eup %7915 }
 0xd69   : > { %v6922_v17 = vmul.f32 %v7916_v48, %v12840_v0  ;;  %v6851_v27 = vpop.xlane.xlu1 %6850 }
 0xd6a   : > { %7917 = vrcp.f32 %v6851_v27 }
 0xd6b   : > { %6954 = vst.msk [vmem:[%s12731_s24 + $0xd0] sm:$0xff] %vm6575_vm14, %v6922_v17 }
 0xd70   : > { %v7918_v50 = vpop.eup %7917 }
 0xd71   : > { %v6923_v58 = vmul.f32 %v7918_v50, %v12845_v42  ;;  %v6854_v26 = vpop.xlane.xlu2 %6853 }
 0xd72   : > { %7919 = vrcp.f32 %v6854_v26 }
 0xd73   : > { %6955 = vst.msk [vmem:[%s12731_s24 + $0xd8] sm:$0xff] %vm6575_vm14, %v6923_v58 }
 0xd78   : > { %v7920_v45 = vpop.eup %7919 }
 0xd79   : > { %v6924_v61 = vmul.f32 %v7920_v45, %v12850_v38  ;;  %v6857_v59 = vpop.xlane.xlu0 %6856 }
 0xd7a   : > { %7921 = vrcp.f32 %v6857_v59 }
 0xd7b   : > { %6956 = vst.msk [vmem:[%s12731_s24 + $0xe0] sm:$0xff] %vm6575_vm14, %v6924_v61 }
 0xd80   : > { %v7922_v0 = vpop.eup %7921 }
 0xd81   : > { %v6925_v57 = vmul.f32 %v7922_v0, %v12855_v3  ;;  %v6860_v32 = vpop.xlane.xlu1 %6859 }
 0xd82   : > { %7923 = vrcp.f32 %v6860_v32 }
 0xd83   : > { %6957 = vst.msk [vmem:[%s12731_s24 + $0xe8] sm:$0xff] %vm6575_vm14, %v6925_v57 }
 0xd88   : > { %v7924_v42 = vpop.eup %7923 }
 0xd89   : > { %v6926_v4 = vmul.f32 %v7924_v42, %v12863_v11 }
 0xd8b   : > { %v6863_v13 = vpop.xlane.xlu2 %6862  ;;  %6958 = vst.msk [vmem:[%s12731_s24 + $0xf0] sm:$0xff] %vm6575_vm14, %v6926_v4 }
 0xd8c   : > { %7925 = vrcp.f32 %v6863_v13 }
 0xd92   : > { %v7926_v38 = vpop.eup %7925 }
 0xd93   : > { %v6927_v62 = vmul.f32 %v7926_v38, %v12878_v46 }
 0xd95   : > { %6959 = vst.msk [vmem:[%s12731_s24 + $0xf8] sm:$0xff] %vm6575_vm14, %v6927_v62 }
 0xd96 PF: > { %s13144_s20 = sld [smem:[#allocation26_spill]] }
 0xd97   : > { %s13145_s28 = sld [smem:[#allocation24_spill]] }
 0xd9c   : > { %p7361_p5 = scmp.ge.s32.totalorder %s13144_s20, 2 }
 0xd9d   : > { %s7007_s7 = sand.u32 1, %s13145_s28  }
 0xd9e   : > { %p7340_p9 = pnand %p7361_p5, %p8491_p6  ;;  %s7008_s25 = scalar_lea.sflag [#allocation4], %s7007_s7 }
 0xda0   : > { %p7341_p10 = pneg %p7340_p9 }
 0xda2   : > { %8315 = dma.done.wait (%p7341_p10), %s7008_s25, 4096  }
 0xda3   : > { %8317 = vsyncadd (%p7341_p10), %s7008_s25, 4294963200  ;;  %s13147_s21 = sld [smem:[#allocation27_spill]]  ;;  %s13150_s0 = smov %s8324_s30 }
 0xda4   : > { %s13148_s1 = sld [smem:[#allocation25_spill]] }
 0xda5   : > { %s13149_s20 = sld [smem:[#allocation28_spill]] }
 0xda9   : > { %p35_p11 = scmp.ge.s32.totalorder %s13147_s21, 4  }
 0xdaa   : > { %s13151_s30 = smov %s13148_s1 }
 0xdab   :  { %37 = sbr.rel (!%p35_p11) target bundleno = 17 (0x11), region = 176 }
 0xdb0   :  { %7014 = vsyncpa [#allocation3], 1 }
 0xdb1   :  { %7016 = vsyncpa [#allocation3 + $0x1], 1 }
 0xdb2   :  { %7017 = vsyncpa [#allocation6], 1 }
 0xdb3   :  { %7018 = vsyncpa [#allocation9], 1 }
 0xdb4   :  { %7019 = vsyncpa [#allocation12], 1 }
 0xdb5   :  { %7020 = vsyncpa [#allocation15], 1 }
 0xdb6   :  { %7021 = vsyncpa [#allocation4], 1 }
 0xdb7   :  { %7023 = vsyncpa [#allocation4 + $0x1], 1 }

</bundles_post_ra>
